<compile_context>
chip_gen: v7x
topology: tpu7x:2x2x1
jax: 0.10.0
libtpu: 0.0.40
codegen_flags: <defaults>
</compile_context>

<pallas_src>
import jax
import jax.numpy as jnp
from jax.experimental import pallas as pl
from jax.experimental.pallas import tpu as pltpu

_K = 4.0  # `k` in kernel(pred, target, k=4)


def _box_points_loss_kernel(bpts_ref, tgt_ref, loss_ref):
    # bpts_ref: (16, BR, L), tgt_ref: (8, BR, L), loss_ref: (BR, L)
    # Target corner points, each a (BR, L) dense tile.
    tx = [tgt_ref[2 * i] for i in range(4)]
    ty = [tgt_ref[2 * i + 1] for i in range(4)]

    def tri_area(i1, i2, qx, qy):
        # triangle_area(target_corner[i1], target_corner[i2], q)
        part = (qx * (ty[i2] - ty[i1]) + qy * (tx[i1] - tx[i2]) +
                (tx[i2] * ty[i1] - ty[i2] * tx[i1]))
        return jnp.abs(part * 0.5)

    # poly_area(bbox_target)  (computed once per tile)
    target_area = tri_area(0, 1, tx[2], ty[2]) + tri_area(1, 3, tx[2], ty[2])
    inv_ta = pl.reciprocal(target_area, approx=True)

    # rectangle_area(target, q) = sum of 4 triangles with target-corner pairs
    # (t1,t0), (t0,t2), (t2,t3), (t3,t1).  Hoist the target-only coefficients
    # (with the 1/2 folded in) so the inner loop is just 2 mul + 2 add + abs
    # per triangle.
    pairs = ((1, 0), (0, 2), (2, 3), (3, 1))
    A = [(ty[p2] - ty[p1]) * 0.5 for (p1, p2) in pairs]
    B = [(tx[p1] - tx[p2]) * 0.5 for (p1, p2) in pairs]
    C = [(tx[p2] * ty[p1] - ty[p2] * tx[p1]) * 0.5 for (p1, p2) in pairs]

    half_k = _K * 0.5  # 2/(1+exp(k*x)) == 1 - tanh(k*x/2), exact identity
    inter = jnp.zeros_like(target_area)
    for j in range(8):  # 8 predicted box points (static unroll)
        qx = bpts_ref[2 * j]
        qy = bpts_ref[2 * j + 1]
        rect = (jnp.abs(qx * A[0] + qy * B[0] + C[0]) +
                jnp.abs(qx * A[1] + qy * B[1] + C[1]) +
                jnp.abs(qx * A[2] + qy * B[2] + C[2]) +
                jnp.abs(qx * A[3] + qy * B[3] + C[3]))
        # kernel(rect, target_area, k=4) = 2 / (1 + exp(k*|rect/ta - 1|))
        #                               = 1 - tanh(k/2 * |rect/ta - 1|)
        x = jnp.abs(rect * inv_ta - 1.0)
        inter = inter + (1.0 - jnp.tanh(half_k * x))

    ious = jnp.abs(inter * 0.125)
    loss_ref[...] = 1.0 - ious


def box_points_loss_pallas(bpts, target, block_rows=16, block_lanes=512):
    """Per-box loss. bpts: [N,16], target: [N,8] -> [N] float32."""
    assert bpts.shape[0] == target.shape[0]
    assert bpts.shape[1] == 16 and target.shape[1] == 8
    n = bpts.shape[0]
    boxes_per_tile = block_rows * block_lanes
    n_pad = pl.cdiv(n, boxes_per_tile) * boxes_per_tile
    rows = n_pad // block_lanes  # total sublane-rows across the whole problem
    pad = n_pad - n

    # Coordinate-major transpose + pad + reshape (plain XLA glue).
    bpts_t = jnp.pad(bpts.astype(jnp.float32).T, ((0, 0), (0, pad)))
    bpts3 = bpts_t.reshape(16, rows, block_lanes)

    # Pad target columns with a unit-square quad (area 1) so padded lanes stay
    # finite inside the kernel (no NaN/Inf anywhere, even in discarded lanes).
    pad_quad = jnp.array([0., 0., 1., 0., 0., 1., 1., 1.], jnp.float32)[:, None]
    tgt_t = jnp.concatenate(
        [target.astype(jnp.float32).T, jnp.broadcast_to(pad_quad, (8, pad))],
        axis=1)
    tgt3 = tgt_t.reshape(8, rows, block_lanes)

    grid = (rows // block_rows,)
    # NOTE: for large N the grid has >= 2 steps (>= 16384 boxes), so the
    # "parallel" axis shards across v7x's two TensorCores automatically.
    loss = pl.pallas_call(
        _box_points_loss_kernel,
        out_shape=jax.ShapeDtypeStruct((rows, block_lanes), jnp.float32),
        grid_spec=pltpu.PrefetchScalarGridSpec(
            num_scalar_prefetch=0,
            grid=grid,
            in_specs=[
                pl.BlockSpec((16, block_rows, block_lanes),
                             lambda i: (0, i, 0)),
                pl.BlockSpec((8, block_rows, block_lanes),
                             lambda i: (0, i, 0)),
            ],
            out_specs=pl.BlockSpec((block_rows, block_lanes),
                                   lambda i: (i, 0)),
        ),
        compiler_params=pltpu.CompilerParams(
            dimension_semantics=("parallel",)),
    )(bpts3, tgt3)
    return loss.reshape(n_pad)[:n]


def _weight_reduce_loss(loss, weight=None, reduction='mean', avg_factor=None):
    if weight is not None:
        loss = loss * weight
    if avg_factor is None:
        if reduction == 'mean':
            return loss.mean()
        if reduction == 'sum':
            return loss.sum()
        return loss
    else:
        if reduction == 'mean':
            return loss.sum() / avg_factor
        elif reduction == 'none':
            return loss
        raise ValueError('avg_factor can not be used with reduction="sum"')


class BoxPointsLoss:
    """JAX/Pallas port of mmdet BoxPointsLoss (no learnable parameters)."""

    def __init__(self, eps=1e-06, reduction='mean', loss_weight=1.0):
        self.eps = eps  # kept for API parity; the reference math never uses it
        self.reduction = reduction
        self.loss_weight = loss_weight

    def __call__(self, bpts, target, weight=None, avg_factor=None,
                 reduction_override=None):
        assert reduction_override in (None, 'none', 'mean', 'sum')
        reduction = reduction_override if reduction_override else self.reduction
        if (weight is not None and not bool(jnp.any(weight > 0))
                and reduction != 'none'):
            # TODO(synk): data-dependent short-circuit; only valid for concrete
            # (non-traced) weights, mirrors the PyTorch early-return branch.
            return (bpts * weight).sum()
        if weight is not None and weight.ndim > 1:
            assert weight.shape[0] == bpts.shape[0]
            weight = weight.mean(-1)
        loss = box_points_loss_pallas(bpts, target)
        return self.loss_weight * _weight_reduce_loss(
            loss, weight, reduction, avg_factor)


# ---------------- pure-JAX reference (mirrors the PyTorch code) ----------------
def _ref_tri_area(p1, p2, q):
    part1 = p1[:, 0] * q[:, 1] + q[:, 0] * p2[:, 1] + p2[:, 0] * p1[:, 1]
    part2 = p1[:, 1] * q[:, 0] + q[:, 1] * p2[:, 0] + p2[:, 1] * p1[:, 0]
    return jnp.abs((part1 - part2) / 2)


def _ref_poly_area(poly):
    return (_ref_tri_area(poly[:, 0:2], poly[:, 2:4], poly[:, 4:6]) +
            _ref_tri_area(poly[:, 2:4], poly[:, 6:8], poly[:, 4:6]))


def _ref_rect_area(bbox, bpts):
    return (_ref_tri_area(bbox[:, 2:4], bbox[:, 0:2], bpts) +
            _ref_tri_area(bbox[:, 0:2], bbox[:, 4:6], bpts) +
            _ref_tri_area(bbox[:, 4:6], bbox[:, 6:8], bpts) +
            _ref_tri_area(bbox[:, 6:8], bbox[:, 2:4], bpts))


def _ref_kernel(pred, target, k=4.0):
    x = jnp.abs((pred - target) / target)
    return 2.0 / (1.0 + jnp.exp(k * x))


def _reference_per_box(bpts, target):
    ta = _ref_poly_area(target)
    inter = 0.0
    for j in range(8):
        inter = inter + _ref_kernel(
            _ref_rect_area(target, bpts[:, 2 * j:2 * j + 2]), ta)
    return 1.0 - jnp.abs(inter / 8.0)


if __name__ == "__main__":
    key = jax.random.PRNGKey(0)
    k1, k2 = jax.random.split(key)
    N = 16
    # synthetic (non-degenerate) target quads and predicted box points
    target = jax.random.uniform(k1, (N, 8), jnp.float32, minval=1.0, maxval=10.0)
    bpts = jax.random.uniform(k2, (N, 16), jnp.float32, minval=1.0, maxval=10.0)

    loss_fn = BoxPointsLoss(eps=1e-6, reduction='mean', loss_weight=1.0)
    out = jax.block_until_ready(loss_fn(bpts, target))

    # per-box check (reduction='none') + reduced check, vs pure-JAX reference.
    per_box = jax.block_until_ready(box_points_loss_pallas(bpts, target))
    ref_per_box = _reference_per_box(bpts, target)
    ref_mean = ref_per_box.mean()

    assert bool(jnp.all(jnp.isfinite(per_box))), per_box
    assert bool(jnp.isfinite(out)), out
    # approx reciprocal (EUP) for 1/target_area introduces small relative error
    assert jnp.allclose(per_box, ref_per_box, rtol=5e-3, atol=1e-3), \
        (per_box, ref_per_box)
    assert jnp.allclose(out, ref_mean, rtol=5e-3, atol=1e-3), (out, ref_mean)
    print("KERNEL_OK")
</pallas_src>

<mosaic_0001>
module attributes {stable_mosaic.version = 11 : i64} {
  func.func @_box_points_loss_kernel(%arg0: i32, %arg1: memref<16x16x512xf32, #tpu.memory_space<vmem>>, %arg2: memref<8x16x512xf32, #tpu.memory_space<vmem>>, %arg3: memref<16x512xf32, #tpu.memory_space<vmem>>) attributes {dimension_semantics = [#tpu.dimension_semantics<parallel>], iteration_bounds = array<i64: 1>, scalar_prefetch = 0 : i64, scratch_operands = 0 : i64, tpu.core_type = #tpu.core_type<tc>, window_params = [{transform_indices = @transform_0, window_bounds = array<i64: 16, 16, 512>}, {transform_indices = @transform_1, window_bounds = array<i64: 8, 16, 512>}, {transform_indices = @transform_2, window_bounds = array<i64: 16, 512>}]} {
    %c0 = arith.constant 0 : index
    %c0_0 = arith.constant 0 : index
    %c0_1 = arith.constant 0 : index
    %0 = vector.load %arg2[%c0, %c0_0, %c0_1] : memref<8x16x512xf32, #tpu.memory_space<vmem>>, vector<1x16x512xf32>
    %1 = vector.shape_cast %0 : vector<1x16x512xf32> to vector<16x512xf32>
    %c2 = arith.constant 2 : index
    %c0_2 = arith.constant 0 : index
    %c0_3 = arith.constant 0 : index
    %2 = vector.load %arg2[%c2, %c0_2, %c0_3] : memref<8x16x512xf32, #tpu.memory_space<vmem>>, vector<1x16x512xf32>
    %3 = vector.shape_cast %2 : vector<1x16x512xf32> to vector<16x512xf32>
    %c4 = arith.constant 4 : index
    %c0_4 = arith.constant 0 : index
    %c0_5 = arith.constant 0 : index
    %4 = vector.load %arg2[%c4, %c0_4, %c0_5] : memref<8x16x512xf32, #tpu.memory_space<vmem>>, vector<1x16x512xf32>
    %5 = vector.shape_cast %4 : vector<1x16x512xf32> to vector<16x512xf32>
    %c6 = arith.constant 6 : index
    %c0_6 = arith.constant 0 : index
    %c0_7 = arith.constant 0 : index
    %6 = vector.load %arg2[%c6, %c0_6, %c0_7] : memref<8x16x512xf32, #tpu.memory_space<vmem>>, vector<1x16x512xf32>
    %7 = vector.shape_cast %6 : vector<1x16x512xf32> to vector<16x512xf32>
    %c1 = arith.constant 1 : index
    %c0_8 = arith.constant 0 : index
    %c0_9 = arith.constant 0 : index
    %8 = vector.load %arg2[%c1, %c0_8, %c0_9] : memref<8x16x512xf32, #tpu.memory_space<vmem>>, vector<1x16x512xf32>
    %9 = vector.shape_cast %8 : vector<1x16x512xf32> to vector<16x512xf32>
    %c3 = arith.constant 3 : index
    %c0_10 = arith.constant 0 : index
    %c0_11 = arith.constant 0 : index
    %10 = vector.load %arg2[%c3, %c0_10, %c0_11] : memref<8x16x512xf32, #tpu.memory_space<vmem>>, vector<1x16x512xf32>
    %11 = vector.shape_cast %10 : vector<1x16x512xf32> to vector<16x512xf32>
    %c5 = arith.constant 5 : index
    %c0_12 = arith.constant 0 : index
    %c0_13 = arith.constant 0 : index
    %12 = vector.load %arg2[%c5, %c0_12, %c0_13] : memref<8x16x512xf32, #tpu.memory_space<vmem>>, vector<1x16x512xf32>
    %13 = vector.shape_cast %12 : vector<1x16x512xf32> to vector<16x512xf32>
    %c7 = arith.constant 7 : index
    %c0_14 = arith.constant 0 : index
    %c0_15 = arith.constant 0 : index
    %14 = vector.load %arg2[%c7, %c0_14, %c0_15] : memref<8x16x512xf32, #tpu.memory_space<vmem>>, vector<1x16x512xf32>
    %15 = vector.shape_cast %14 : vector<1x16x512xf32> to vector<16x512xf32>
    %16 = arith.subf %11, %9 : vector<16x512xf32>
    %17 = arith.mulf %5, %16 : vector<16x512xf32>
    %18 = arith.subf %1, %3 : vector<16x512xf32>
    %19 = arith.mulf %13, %18 : vector<16x512xf32>
    %20 = arith.addf %17, %19 : vector<16x512xf32>
    %21 = arith.mulf %3, %9 : vector<16x512xf32>
    %22 = arith.mulf %11, %1 : vector<16x512xf32>
    %23 = arith.subf %21, %22 : vector<16x512xf32>
    %24 = arith.addf %20, %23 : vector<16x512xf32>
    %cst = arith.constant 5.000000e-01 : f32
    %25 = vector.broadcast %cst : f32 to vector<16x512xf32>
    %26 = arith.mulf %24, %25 : vector<16x512xf32>
    %27 = math.absf %26 : vector<16x512xf32>
    %28 = arith.subf %15, %11 : vector<16x512xf32>
    %29 = arith.mulf %5, %28 : vector<16x512xf32>
    %30 = arith.subf %3, %7 : vector<16x512xf32>
    %31 = arith.mulf %13, %30 : vector<16x512xf32>
    %32 = arith.addf %29, %31 : vector<16x512xf32>
    %33 = arith.mulf %7, %11 : vector<16x512xf32>
    %34 = arith.mulf %15, %3 : vector<16x512xf32>
    %35 = arith.subf %33, %34 : vector<16x512xf32>
    %36 = arith.addf %32, %35 : vector<16x512xf32>
    %cst_16 = arith.constant 5.000000e-01 : f32
    %37 = vector.broadcast %cst_16 : f32 to vector<16x512xf32>
    %38 = arith.mulf %36, %37 : vector<16x512xf32>
    %39 = math.absf %38 : vector<16x512xf32>
    %40 = arith.addf %27, %39 : vector<16x512xf32>
    %41 = tpu.reciprocal %40 {approx = true} : vector<16x512xf32> -> vector<16x512xf32>
    %42 = arith.subf %9, %11 : vector<16x512xf32>
    %cst_17 = arith.constant 5.000000e-01 : f32
    %43 = vector.broadcast %cst_17 : f32 to vector<16x512xf32>
    %44 = arith.mulf %42, %43 : vector<16x512xf32>
    %45 = arith.subf %13, %9 : vector<16x512xf32>
    %cst_18 = arith.constant 5.000000e-01 : f32
    %46 = vector.broadcast %cst_18 : f32 to vector<16x512xf32>
    %47 = arith.mulf %45, %46 : vector<16x512xf32>
    %48 = arith.subf %15, %13 : vector<16x512xf32>
    %cst_19 = arith.constant 5.000000e-01 : f32
    %49 = vector.broadcast %cst_19 : f32 to vector<16x512xf32>
    %50 = arith.mulf %48, %49 : vector<16x512xf32>
    %51 = arith.subf %11, %15 : vector<16x512xf32>
    %cst_20 = arith.constant 5.000000e-01 : f32
    %52 = vector.broadcast %cst_20 : f32 to vector<16x512xf32>
    %53 = arith.mulf %51, %52 : vector<16x512xf32>
    %54 = arith.subf %3, %1 : vector<16x512xf32>
    %cst_21 = arith.constant 5.000000e-01 : f32
    %55 = vector.broadcast %cst_21 : f32 to vector<16x512xf32>
    %56 = arith.mulf %54, %55 : vector<16x512xf32>
    %57 = arith.subf %1, %5 : vector<16x512xf32>
    %cst_22 = arith.constant 5.000000e-01 : f32
    %58 = vector.broadcast %cst_22 : f32 to vector<16x512xf32>
    %59 = arith.mulf %57, %58 : vector<16x512xf32>
    %60 = arith.subf %5, %7 : vector<16x512xf32>
    %cst_23 = arith.constant 5.000000e-01 : f32
    %61 = vector.broadcast %cst_23 : f32 to vector<16x512xf32>
    %62 = arith.mulf %60, %61 : vector<16x512xf32>
    %63 = arith.subf %7, %3 : vector<16x512xf32>
    %cst_24 = arith.constant 5.000000e-01 : f32
    %64 = vector.broadcast %cst_24 : f32 to vector<16x512xf32>
    %65 = arith.mulf %63, %64 : vector<16x512xf32>
    %66 = arith.mulf %1, %11 : vector<16x512xf32>
    %67 = arith.mulf %9, %3 : vector<16x512xf32>
    %68 = arith.subf %66, %67 : vector<16x512xf32>
    %cst_25 = arith.constant 5.000000e-01 : f32
    %69 = vector.broadcast %cst_25 : f32 to vector<16x512xf32>
    %70 = arith.mulf %68, %69 : vector<16x512xf32>
    %71 = arith.mulf %5, %9 : vector<16x512xf32>
    %72 = arith.mulf %13, %1 : vector<16x512xf32>
    %73 = arith.subf %71, %72 : vector<16x512xf32>
    %cst_26 = arith.constant 5.000000e-01 : f32
    %74 = vector.broadcast %cst_26 : f32 to vector<16x512xf32>
    %75 = arith.mulf %73, %74 : vector<16x512xf32>
    %76 = arith.mulf %7, %13 : vector<16x512xf32>
    %77 = arith.mulf %15, %5 : vector<16x512xf32>
    %78 = arith.subf %76, %77 : vector<16x512xf32>
    %cst_27 = arith.constant 5.000000e-01 : f32
    %79 = vector.broadcast %cst_27 : f32 to vector<16x512xf32>
    %80 = arith.mulf %78, %79 : vector<16x512xf32>
    %81 = arith.mulf %3, %15 : vector<16x512xf32>
    %82 = arith.mulf %11, %7 : vector<16x512xf32>
    %83 = arith.subf %81, %82 : vector<16x512xf32>
    %cst_28 = arith.constant 5.000000e-01 : f32
    %84 = vector.broadcast %cst_28 : f32 to vector<16x512xf32>
    %85 = arith.mulf %83, %84 : vector<16x512xf32>
    %cst_29 = arith.constant 0.000000e+00 : f32
    %86 = vector.broadcast %cst_29 : f32 to vector<16x512xf32>
    %c0_30 = arith.constant 0 : index
    %c0_31 = arith.constant 0 : index
    %c0_32 = arith.constant 0 : index
    %87 = vector.load %arg1[%c0_30, %c0_31, %c0_32] : memref<16x16x512xf32, #tpu.memory_space<vmem>>, vector<1x16x512xf32>
    %88 = vector.shape_cast %87 : vector<1x16x512xf32> to vector<16x512xf32>
    %c1_33 = arith.constant 1 : index
    %c0_34 = arith.constant 0 : index
    %c0_35 = arith.constant 0 : index
    %89 = vector.load %arg1[%c1_33, %c0_34, %c0_35] : memref<16x16x512xf32, #tpu.memory_space<vmem>>, vector<1x16x512xf32>
    %90 = vector.shape_cast %89 : vector<1x16x512xf32> to vector<16x512xf32>
    %91 = arith.mulf %88, %44 : vector<16x512xf32>
    %92 = arith.mulf %90, %56 : vector<16x512xf32>
    %93 = arith.addf %91, %92 : vector<16x512xf32>
    %94 = arith.addf %93, %70 : vector<16x512xf32>
    %95 = math.absf %94 : vector<16x512xf32>
    %96 = arith.mulf %88, %47 : vector<16x512xf32>
    %97 = arith.mulf %90, %59 : vector<16x512xf32>
    %98 = arith.addf %96, %97 : vector<16x512xf32>
    %99 = arith.addf %98, %75 : vector<16x512xf32>
    %100 = math.absf %99 : vector<16x512xf32>
    %101 = arith.addf %95, %100 : vector<16x512xf32>
    %102 = arith.mulf %88, %50 : vector<16x512xf32>
    %103 = arith.mulf %90, %62 : vector<16x512xf32>
    %104 = arith.addf %102, %103 : vector<16x512xf32>
    %105 = arith.addf %104, %80 : vector<16x512xf32>
    %106 = math.absf %105 : vector<16x512xf32>
    %107 = arith.addf %101, %106 : vector<16x512xf32>
    %108 = arith.mulf %88, %53 : vector<16x512xf32>
    %109 = arith.mulf %90, %65 : vector<16x512xf32>
    %110 = arith.addf %108, %109 : vector<16x512xf32>
    %111 = arith.addf %110, %85 : vector<16x512xf32>
    %112 = math.absf %111 : vector<16x512xf32>
    %113 = arith.addf %107, %112 : vector<16x512xf32>
    %114 = arith.mulf %113, %41 : vector<16x512xf32>
    %cst_36 = arith.constant 1.000000e+00 : f32
    %115 = vector.broadcast %cst_36 : f32 to vector<16x512xf32>
    %116 = arith.subf %114, %115 : vector<16x512xf32>
    %117 = math.absf %116 : vector<16x512xf32>
    %cst_37 = arith.constant 2.000000e+00 : f32
    %118 = vector.broadcast %cst_37 : f32 to vector<16x512xf32>
    %119 = arith.mulf %118, %117 : vector<16x512xf32>
    %120 = math.tanh %119 : vector<16x512xf32>
    %cst_38 = arith.constant 1.000000e+00 : f32
    %121 = vector.broadcast %cst_38 : f32 to vector<16x512xf32>
    %122 = arith.subf %121, %120 : vector<16x512xf32>
    %123 = arith.addf %86, %122 : vector<16x512xf32>
    %c2_39 = arith.constant 2 : index
    %c0_40 = arith.constant 0 : index
    %c0_41 = arith.constant 0 : index
    %124 = vector.load %arg1[%c2_39, %c0_40, %c0_41] : memref<16x16x512xf32, #tpu.memory_space<vmem>>, vector<1x16x512xf32>
    %125 = vector.shape_cast %124 : vector<1x16x512xf32> to vector<16x512xf32>
    %c3_42 = arith.constant 3 : index
    %c0_43 = arith.constant 0 : index
    %c0_44 = arith.constant 0 : index
    %126 = vector.load %arg1[%c3_42, %c0_43, %c0_44] : memref<16x16x512xf32, #tpu.memory_space<vmem>>, vector<1x16x512xf32>
    %127 = vector.shape_cast %126 : vector<1x16x512xf32> to vector<16x512xf32>
    %128 = arith.mulf %125, %44 : vector<16x512xf32>
    %129 = arith.mulf %127, %56 : vector<16x512xf32>
    %130 = arith.addf %128, %129 : vector<16x512xf32>
    %131 = arith.addf %130, %70 : vector<16x512xf32>
    %132 = math.absf %131 : vector<16x512xf32>
    %133 = arith.mulf %125, %47 : vector<16x512xf32>
    %134 = arith.mulf %127, %59 : vector<16x512xf32>
    %135 = arith.addf %133, %134 : vector<16x512xf32>
    %136 = arith.addf %135, %75 : vector<16x512xf32>
    %137 = math.absf %136 : vector<16x512xf32>
    %138 = arith.addf %132, %137 : vector<16x512xf32>
    %139 = arith.mulf %125, %50 : vector<16x512xf32>
    %140 = arith.mulf %127, %62 : vector<16x512xf32>
    %141 = arith.addf %139, %140 : vector<16x512xf32>
    %142 = arith.addf %141, %80 : vector<16x512xf32>
    %143 = math.absf %142 : vector<16x512xf32>
    %144 = arith.addf %138, %143 : vector<16x512xf32>
    %145 = arith.mulf %125, %53 : vector<16x512xf32>
    %146 = arith.mulf %127, %65 : vector<16x512xf32>
    %147 = arith.addf %145, %146 : vector<16x512xf32>
    %148 = arith.addf %147, %85 : vector<16x512xf32>
    %149 = math.absf %148 : vector<16x512xf32>
    %150 = arith.addf %144, %149 : vector<16x512xf32>
    %151 = arith.mulf %150, %41 : vector<16x512xf32>
    %cst_45 = arith.constant 1.000000e+00 : f32
    %152 = vector.broadcast %cst_45 : f32 to vector<16x512xf32>
    %153 = arith.subf %151, %152 : vector<16x512xf32>
    %154 = math.absf %153 : vector<16x512xf32>
    %cst_46 = arith.constant 2.000000e+00 : f32
    %155 = vector.broadcast %cst_46 : f32 to vector<16x512xf32>
    %156 = arith.mulf %155, %154 : vector<16x512xf32>
    %157 = math.tanh %156 : vector<16x512xf32>
    %cst_47 = arith.constant 1.000000e+00 : f32
    %158 = vector.broadcast %cst_47 : f32 to vector<16x512xf32>
    %159 = arith.subf %158, %157 : vector<16x512xf32>
    %160 = arith.addf %123, %159 : vector<16x512xf32>
    %c4_48 = arith.constant 4 : index
    %c0_49 = arith.constant 0 : index
    %c0_50 = arith.constant 0 : index
    %161 = vector.load %arg1[%c4_48, %c0_49, %c0_50] : memref<16x16x512xf32, #tpu.memory_space<vmem>>, vector<1x16x512xf32>
    %162 = vector.shape_cast %161 : vector<1x16x512xf32> to vector<16x512xf32>
    %c5_51 = arith.constant 5 : index
    %c0_52 = arith.constant 0 : index
    %c0_53 = arith.constant 0 : index
    %163 = vector.load %arg1[%c5_51, %c0_52, %c0_53] : memref<16x16x512xf32, #tpu.memory_space<vmem>>, vector<1x16x512xf32>
    %164 = vector.shape_cast %163 : vector<1x16x512xf32> to vector<16x512xf32>
    %165 = arith.mulf %162, %44 : vector<16x512xf32>
    %166 = arith.mulf %164, %56 : vector<16x512xf32>
    %167 = arith.addf %165, %166 : vector<16x512xf32>
    %168 = arith.addf %167, %70 : vector<16x512xf32>
    %169 = math.absf %168 : vector<16x512xf32>
    %170 = arith.mulf %162, %47 : vector<16x512xf32>
    %171 = arith.mulf %164, %59 : vector<16x512xf32>
    %172 = arith.addf %170, %171 : vector<16x512xf32>
    %173 = arith.addf %172, %75 : vector<16x512xf32>
    %174 = math.absf %173 : vector<16x512xf32>
    %175 = arith.addf %169, %174 : vector<16x512xf32>
    %176 = arith.mulf %162, %50 : vector<16x512xf32>
    %177 = arith.mulf %164, %62 : vector<16x512xf32>
    %178 = arith.addf %176, %177 : vector<16x512xf32>
    %179 = arith.addf %178, %80 : vector<16x512xf32>
    %180 = math.absf %179 : vector<16x512xf32>
    %181 = arith.addf %175, %180 : vector<16x512xf32>
    %182 = arith.mulf %162, %53 : vector<16x512xf32>
    %183 = arith.mulf %164, %65 : vector<16x512xf32>
    %184 = arith.addf %182, %183 : vector<16x512xf32>
    %185 = arith.addf %184, %85 : vector<16x512xf32>
    %186 = math.absf %185 : vector<16x512xf32>
    %187 = arith.addf %181, %186 : vector<16x512xf32>
    %188 = arith.mulf %187, %41 : vector<16x512xf32>
    %cst_54 = arith.constant 1.000000e+00 : f32
    %189 = vector.broadcast %cst_54 : f32 to vector<16x512xf32>
    %190 = arith.subf %188, %189 : vector<16x512xf32>
    %191 = math.absf %190 : vector<16x512xf32>
    %cst_55 = arith.constant 2.000000e+00 : f32
    %192 = vector.broadcast %cst_55 : f32 to vector<16x512xf32>
    %193 = arith.mulf %192, %191 : vector<16x512xf32>
    %194 = math.tanh %193 : vector<16x512xf32>
    %cst_56 = arith.constant 1.000000e+00 : f32
    %195 = vector.broadcast %cst_56 : f32 to vector<16x512xf32>
    %196 = arith.subf %195, %194 : vector<16x512xf32>
    %197 = arith.addf %160, %196 : vector<16x512xf32>
    %c6_57 = arith.constant 6 : index
    %c0_58 = arith.constant 0 : index
    %c0_59 = arith.constant 0 : index
    %198 = vector.load %arg1[%c6_57, %c0_58, %c0_59] : memref<16x16x512xf32, #tpu.memory_space<vmem>>, vector<1x16x512xf32>
    %199 = vector.shape_cast %198 : vector<1x16x512xf32> to vector<16x512xf32>
    %c7_60 = arith.constant 7 : index
    %c0_61 = arith.constant 0 : index
    %c0_62 = arith.constant 0 : index
    %200 = vector.load %arg1[%c7_60, %c0_61, %c0_62] : memref<16x16x512xf32, #tpu.memory_space<vmem>>, vector<1x16x512xf32>
    %201 = vector.shape_cast %200 : vector<1x16x512xf32> to vector<16x512xf32>
    %202 = arith.mulf %199, %44 : vector<16x512xf32>
    %203 = arith.mulf %201, %56 : vector<16x512xf32>
    %204 = arith.addf %202, %203 : vector<16x512xf32>
    %205 = arith.addf %204, %70 : vector<16x512xf32>
    %206 = math.absf %205 : vector<16x512xf32>
    %207 = arith.mulf %199, %47 : vector<16x512xf32>
    %208 = arith.mulf %201, %59 : vector<16x512xf32>
    %209 = arith.addf %207, %208 : vector<16x512xf32>
    %210 = arith.addf %209, %75 : vector<16x512xf32>
    %211 = math.absf %210 : vector<16x512xf32>
    %212 = arith.addf %206, %211 : vector<16x512xf32>
    %213 = arith.mulf %199, %50 : vector<16x512xf32>
    %214 = arith.mulf %201, %62 : vector<16x512xf32>
    %215 = arith.addf %213, %214 : vector<16x512xf32>
    %216 = arith.addf %215, %80 : vector<16x512xf32>
    %217 = math.absf %216 : vector<16x512xf32>
    %218 = arith.addf %212, %217 : vector<16x512xf32>
    %219 = arith.mulf %199, %53 : vector<16x512xf32>
    %220 = arith.mulf %201, %65 : vector<16x512xf32>
    %221 = arith.addf %219, %220 : vector<16x512xf32>
    %222 = arith.addf %221, %85 : vector<16x512xf32>
    %223 = math.absf %222 : vector<16x512xf32>
    %224 = arith.addf %218, %223 : vector<16x512xf32>
    %225 = arith.mulf %224, %41 : vector<16x512xf32>
    %cst_63 = arith.constant 1.000000e+00 : f32
    %226 = vector.broadcast %cst_63 : f32 to vector<16x512xf32>
    %227 = arith.subf %225, %226 : vector<16x512xf32>
    %228 = math.absf %227 : vector<16x512xf32>
    %cst_64 = arith.constant 2.000000e+00 : f32
    %229 = vector.broadcast %cst_64 : f32 to vector<16x512xf32>
    %230 = arith.mulf %229, %228 : vector<16x512xf32>
    %231 = math.tanh %230 : vector<16x512xf32>
    %cst_65 = arith.constant 1.000000e+00 : f32
    %232 = vector.broadcast %cst_65 : f32 to vector<16x512xf32>
    %233 = arith.subf %232, %231 : vector<16x512xf32>
    %234 = arith.addf %197, %233 : vector<16x512xf32>
    %c8 = arith.constant 8 : index
    %c0_66 = arith.constant 0 : index
    %c0_67 = arith.constant 0 : index
    %235 = vector.load %arg1[%c8, %c0_66, %c0_67] : memref<16x16x512xf32, #tpu.memory_space<vmem>>, vector<1x16x512xf32>
    %236 = vector.shape_cast %235 : vector<1x16x512xf32> to vector<16x512xf32>
    %c9 = arith.constant 9 : index
    %c0_68 = arith.constant 0 : index
    %c0_69 = arith.constant 0 : index
    %237 = vector.load %arg1[%c9, %c0_68, %c0_69] : memref<16x16x512xf32, #tpu.memory_space<vmem>>, vector<1x16x512xf32>
    %238 = vector.shape_cast %237 : vector<1x16x512xf32> to vector<16x512xf32>
    %239 = arith.mulf %236, %44 : vector<16x512xf32>
    %240 = arith.mulf %238, %56 : vector<16x512xf32>
    %241 = arith.addf %239, %240 : vector<16x512xf32>
    %242 = arith.addf %241, %70 : vector<16x512xf32>
    %243 = math.absf %242 : vector<16x512xf32>
    %244 = arith.mulf %236, %47 : vector<16x512xf32>
    %245 = arith.mulf %238, %59 : vector<16x512xf32>
    %246 = arith.addf %244, %245 : vector<16x512xf32>
    %247 = arith.addf %246, %75 : vector<16x512xf32>
    %248 = math.absf %247 : vector<16x512xf32>
    %249 = arith.addf %243, %248 : vector<16x512xf32>
    %250 = arith.mulf %236, %50 : vector<16x512xf32>
    %251 = arith.mulf %238, %62 : vector<16x512xf32>
    %252 = arith.addf %250, %251 : vector<16x512xf32>
    %253 = arith.addf %252, %80 : vector<16x512xf32>
    %254 = math.absf %253 : vector<16x512xf32>
    %255 = arith.addf %249, %254 : vector<16x512xf32>
    %256 = arith.mulf %236, %53 : vector<16x512xf32>
    %257 = arith.mulf %238, %65 : vector<16x512xf32>
    %258 = arith.addf %256, %257 : vector<16x512xf32>
    %259 = arith.addf %258, %85 : vector<16x512xf32>
    %260 = math.absf %259 : vector<16x512xf32>
    %261 = arith.addf %255, %260 : vector<16x512xf32>
    %262 = arith.mulf %261, %41 : vector<16x512xf32>
    %cst_70 = arith.constant 1.000000e+00 : f32
    %263 = vector.broadcast %cst_70 : f32 to vector<16x512xf32>
    %264 = arith.subf %262, %263 : vector<16x512xf32>
    %265 = math.absf %264 : vector<16x512xf32>
    %cst_71 = arith.constant 2.000000e+00 : f32
    %266 = vector.broadcast %cst_71 : f32 to vector<16x512xf32>
    %267 = arith.mulf %266, %265 : vector<16x512xf32>
    %268 = math.tanh %267 : vector<16x512xf32>
    %cst_72 = arith.constant 1.000000e+00 : f32
    %269 = vector.broadcast %cst_72 : f32 to vector<16x512xf32>
    %270 = arith.subf %269, %268 : vector<16x512xf32>
    %271 = arith.addf %234, %270 : vector<16x512xf32>
    %c10 = arith.constant 10 : index
    %c0_73 = arith.constant 0 : index
    %c0_74 = arith.constant 0 : index
    %272 = vector.load %arg1[%c10, %c0_73, %c0_74] : memref<16x16x512xf32, #tpu.memory_space<vmem>>, vector<1x16x512xf32>
    %273 = vector.shape_cast %272 : vector<1x16x512xf32> to vector<16x512xf32>
    %c11 = arith.constant 11 : index
    %c0_75 = arith.constant 0 : index
    %c0_76 = arith.constant 0 : index
    %274 = vector.load %arg1[%c11, %c0_75, %c0_76] : memref<16x16x512xf32, #tpu.memory_space<vmem>>, vector<1x16x512xf32>
    %275 = vector.shape_cast %274 : vector<1x16x512xf32> to vector<16x512xf32>
    %276 = arith.mulf %273, %44 : vector<16x512xf32>
    %277 = arith.mulf %275, %56 : vector<16x512xf32>
    %278 = arith.addf %276, %277 : vector<16x512xf32>
    %279 = arith.addf %278, %70 : vector<16x512xf32>
    %280 = math.absf %279 : vector<16x512xf32>
    %281 = arith.mulf %273, %47 : vector<16x512xf32>
    %282 = arith.mulf %275, %59 : vector<16x512xf32>
    %283 = arith.addf %281, %282 : vector<16x512xf32>
    %284 = arith.addf %283, %75 : vector<16x512xf32>
    %285 = math.absf %284 : vector<16x512xf32>
    %286 = arith.addf %280, %285 : vector<16x512xf32>
    %287 = arith.mulf %273, %50 : vector<16x512xf32>
    %288 = arith.mulf %275, %62 : vector<16x512xf32>
    %289 = arith.addf %287, %288 : vector<16x512xf32>
    %290 = arith.addf %289, %80 : vector<16x512xf32>
    %291 = math.absf %290 : vector<16x512xf32>
    %292 = arith.addf %286, %291 : vector<16x512xf32>
    %293 = arith.mulf %273, %53 : vector<16x512xf32>
    %294 = arith.mulf %275, %65 : vector<16x512xf32>
    %295 = arith.addf %293, %294 : vector<16x512xf32>
    %296 = arith.addf %295, %85 : vector<16x512xf32>
    %297 = math.absf %296 : vector<16x512xf32>
    %298 = arith.addf %292, %297 : vector<16x512xf32>
    %299 = arith.mulf %298, %41 : vector<16x512xf32>
    %cst_77 = arith.constant 1.000000e+00 : f32
    %300 = vector.broadcast %cst_77 : f32 to vector<16x512xf32>
    %301 = arith.subf %299, %300 : vector<16x512xf32>
    %302 = math.absf %301 : vector<16x512xf32>
    %cst_78 = arith.constant 2.000000e+00 : f32
    %303 = vector.broadcast %cst_78 : f32 to vector<16x512xf32>
    %304 = arith.mulf %303, %302 : vector<16x512xf32>
    %305 = math.tanh %304 : vector<16x512xf32>
    %cst_79 = arith.constant 1.000000e+00 : f32
    %306 = vector.broadcast %cst_79 : f32 to vector<16x512xf32>
    %307 = arith.subf %306, %305 : vector<16x512xf32>
    %308 = arith.addf %271, %307 : vector<16x512xf32>
    %c12 = arith.constant 12 : index
    %c0_80 = arith.constant 0 : index
    %c0_81 = arith.constant 0 : index
    %309 = vector.load %arg1[%c12, %c0_80, %c0_81] : memref<16x16x512xf32, #tpu.memory_space<vmem>>, vector<1x16x512xf32>
    %310 = vector.shape_cast %309 : vector<1x16x512xf32> to vector<16x512xf32>
    %c13 = arith.constant 13 : index
    %c0_82 = arith.constant 0 : index
    %c0_83 = arith.constant 0 : index
    %311 = vector.load %arg1[%c13, %c0_82, %c0_83] : memref<16x16x512xf32, #tpu.memory_space<vmem>>, vector<1x16x512xf32>
    %312 = vector.shape_cast %311 : vector<1x16x512xf32> to vector<16x512xf32>
    %313 = arith.mulf %310, %44 : vector<16x512xf32>
    %314 = arith.mulf %312, %56 : vector<16x512xf32>
    %315 = arith.addf %313, %314 : vector<16x512xf32>
    %316 = arith.addf %315, %70 : vector<16x512xf32>
    %317 = math.absf %316 : vector<16x512xf32>
    %318 = arith.mulf %310, %47 : vector<16x512xf32>
    %319 = arith.mulf %312, %59 : vector<16x512xf32>
    %320 = arith.addf %318, %319 : vector<16x512xf32>
    %321 = arith.addf %320, %75 : vector<16x512xf32>
    %322 = math.absf %321 : vector<16x512xf32>
    %323 = arith.addf %317, %322 : vector<16x512xf32>
    %324 = arith.mulf %310, %50 : vector<16x512xf32>
    %325 = arith.mulf %312, %62 : vector<16x512xf32>
    %326 = arith.addf %324, %325 : vector<16x512xf32>
    %327 = arith.addf %326, %80 : vector<16x512xf32>
    %328 = math.absf %327 : vector<16x512xf32>
    %329 = arith.addf %323, %328 : vector<16x512xf32>
    %330 = arith.mulf %310, %53 : vector<16x512xf32>
    %331 = arith.mulf %312, %65 : vector<16x512xf32>
    %332 = arith.addf %330, %331 : vector<16x512xf32>
    %333 = arith.addf %332, %85 : vector<16x512xf32>
    %334 = math.absf %333 : vector<16x512xf32>
    %335 = arith.addf %329, %334 : vector<16x512xf32>
    %336 = arith.mulf %335, %41 : vector<16x512xf32>
    %cst_84 = arith.constant 1.000000e+00 : f32
    %337 = vector.broadcast %cst_84 : f32 to vector<16x512xf32>
    %338 = arith.subf %336, %337 : vector<16x512xf32>
    %339 = math.absf %338 : vector<16x512xf32>
    %cst_85 = arith.constant 2.000000e+00 : f32
    %340 = vector.broadcast %cst_85 : f32 to vector<16x512xf32>
    %341 = arith.mulf %340, %339 : vector<16x512xf32>
    %342 = math.tanh %341 : vector<16x512xf32>
    %cst_86 = arith.constant 1.000000e+00 : f32
    %343 = vector.broadcast %cst_86 : f32 to vector<16x512xf32>
    %344 = arith.subf %343, %342 : vector<16x512xf32>
    %345 = arith.addf %308, %344 : vector<16x512xf32>
    %c14 = arith.constant 14 : index
    %c0_87 = arith.constant 0 : index
    %c0_88 = arith.constant 0 : index
    %346 = vector.load %arg1[%c14, %c0_87, %c0_88] : memref<16x16x512xf32, #tpu.memory_space<vmem>>, vector<1x16x512xf32>
    %347 = vector.shape_cast %346 : vector<1x16x512xf32> to vector<16x512xf32>
    %c15 = arith.constant 15 : index
    %c0_89 = arith.constant 0 : index
    %c0_90 = arith.constant 0 : index
    %348 = vector.load %arg1[%c15, %c0_89, %c0_90] : memref<16x16x512xf32, #tpu.memory_space<vmem>>, vector<1x16x512xf32>
    %349 = vector.shape_cast %348 : vector<1x16x512xf32> to vector<16x512xf32>
    %350 = arith.mulf %347, %44 : vector<16x512xf32>
    %351 = arith.mulf %349, %56 : vector<16x512xf32>
    %352 = arith.addf %350, %351 : vector<16x512xf32>
    %353 = arith.addf %352, %70 : vector<16x512xf32>
    %354 = math.absf %353 : vector<16x512xf32>
    %355 = arith.mulf %347, %47 : vector<16x512xf32>
    %356 = arith.mulf %349, %59 : vector<16x512xf32>
    %357 = arith.addf %355, %356 : vector<16x512xf32>
    %358 = arith.addf %357, %75 : vector<16x512xf32>
    %359 = math.absf %358 : vector<16x512xf32>
    %360 = arith.addf %354, %359 : vector<16x512xf32>
    %361 = arith.mulf %347, %50 : vector<16x512xf32>
    %362 = arith.mulf %349, %62 : vector<16x512xf32>
    %363 = arith.addf %361, %362 : vector<16x512xf32>
    %364 = arith.addf %363, %80 : vector<16x512xf32>
    %365 = math.absf %364 : vector<16x512xf32>
    %366 = arith.addf %360, %365 : vector<16x512xf32>
    %367 = arith.mulf %347, %53 : vector<16x512xf32>
    %368 = arith.mulf %349, %65 : vector<16x512xf32>
    %369 = arith.addf %367, %368 : vector<16x512xf32>
    %370 = arith.addf %369, %85 : vector<16x512xf32>
    %371 = math.absf %370 : vector<16x512xf32>
    %372 = arith.addf %366, %371 : vector<16x512xf32>
    %373 = arith.mulf %372, %41 : vector<16x512xf32>
    %cst_91 = arith.constant 1.000000e+00 : f32
    %374 = vector.broadcast %cst_91 : f32 to vector<16x512xf32>
    %375 = arith.subf %373, %374 : vector<16x512xf32>
    %376 = math.absf %375 : vector<16x512xf32>
    %cst_92 = arith.constant 2.000000e+00 : f32
    %377 = vector.broadcast %cst_92 : f32 to vector<16x512xf32>
    %378 = arith.mulf %377, %376 : vector<16x512xf32>
    %379 = math.tanh %378 : vector<16x512xf32>
    %cst_93 = arith.constant 1.000000e+00 : f32
    %380 = vector.broadcast %cst_93 : f32 to vector<16x512xf32>
    %381 = arith.subf %380, %379 : vector<16x512xf32>
    %382 = arith.addf %345, %381 : vector<16x512xf32>
    %cst_94 = arith.constant 1.250000e-01 : f32
    %383 = vector.broadcast %cst_94 : f32 to vector<16x512xf32>
    %384 = arith.mulf %382, %383 : vector<16x512xf32>
    %385 = math.absf %384 : vector<16x512xf32>
    %cst_95 = arith.constant 1.000000e+00 : f32
    %386 = vector.broadcast %cst_95 : f32 to vector<16x512xf32>
    %387 = arith.subf %386, %385 : vector<16x512xf32>
    %c0_96 = arith.constant 0 : index
    %c0_97 = arith.constant 0 : index
    %388 = vector.load %arg3[%c0_96, %c0_97] : memref<16x512xf32, #tpu.memory_space<vmem>>, vector<16x512xf32>
    tpu.vector_store %arg3[%c0_96, %c0_97], %387 {strides = array<i32>} : memref<16x512xf32, #tpu.memory_space<vmem>>, vector<16x512xf32>,
    return
  }
  func.func @transform_0(%arg0: i32) -> (i32, i32, i32) {
    %c0_i32 = arith.constant 0 : i32
    %c0_i32_0 = arith.constant 0 : i32
    %c0_i32_1 = arith.constant 0 : i32
    return %c0_i32, %arg0, %c0_i32_0 : i32, i32, i32
  }
  func.func @transform_1(%arg0: i32) -> (i32, i32, i32) {
    %c0_i32 = arith.constant 0 : i32
    %c0_i32_0 = arith.constant 0 : i32
    %c0_i32_1 = arith.constant 0 : i32
    return %c0_i32, %arg0, %c0_i32_0 : i32, i32, i32
  }
  func.func @transform_2(%arg0: i32) -> (i32, i32) {
    %c0_i32 = arith.constant 0 : i32
    %c0_i32_0 = arith.constant 0 : i32
    return %arg0, %c0_i32 : i32, i32
  }
}

</mosaic_0001>

<bundles_post_ra>
// kernel: tpu_custom_call.1
= control target key start
LH: loop header
LB: loop body
LE: loop exit
PB: predicated region body
PF: predicated region fallthrough
CT: control target
= control target key end

     0   :  { %7 = vsyncpa [#allocation3], 0  ;;  %s6151_s0 = inlined_call_operand.hbm [shape: f32[16,16,512], index: 0, kind: input, shape index: {}]   ;;  %s6152_s1 = inlined_call_operand.hbm [shape: f32[8,16,512], index: 1, kind: input, shape index: {}]   ;;  %s6153_s2 = inlined_call_operand.hbm [shape: f32[16,512], index: 2, kind: output, shape index: {}]  }
   0x1   :  { %8 = vsyncpa [#allocation6], 0 }
   0x2   :  { %9 = vsyncpa [#allocation4], 0  ;;  %s2925_s9 = smov [#allocation2]   ;;  %s2853_s13 = scalar_lea.hbm %s6151_s0, 16384 }
   0x3   :  { %s15_s10 = sshll.u32 %s2925_s9, 4  ;;  %p2854_p0 = scmp.ne.s32.totalorder %s6151_s0, %s2853_s13  ;;  %s16_s10 = int_to_ptr.vmem [resolvable:$true] %s15_s10 }
   0x4   :  { %p2857_p1 = scmp.lt.u32.totalorder %s2853_s13, %s6151_s0 }
   0x6   :  { %p2859_p2 = pnand %p2857_p1, %p2854_p0 }
   0x8   :  { %2862 = shalt.err (!%p2859_p2)
}
   0x9   :  { %s2863_s18 = scalar_lea.vmem %s16_s10, 16384  ;;  %p2868_p4 = scmp.lt.s32.totalorder %s16_s10, %s16_s10 }
   0xa   :  { %p2864_p3 = scmp.ne.s32.totalorder %s16_s10, %s2863_s18  ;;  %p2869_p5 = scmp.lt.s32.totalorder %s2863_s18, %s2863_s18 }
   0xc   :  { %p2870_p6 = por %p2869_p5, %p2868_p4 }
   0xe   :  { %p2871_p7 = pnand %p2870_p6, %p2864_p3 }
  0x10   :  { %2874 = shalt.err (!%p2871_p7)
}
  0x11   :  { %s2926_s19 = smov 512   ;;  %s2927_s20 = smov 32  }
  0x12   :  { %21 = dma.hbm_to_vmem [thread:$0]  %s6151_s0, 16384, %s16_s10, [#allocation3], %s2926_s19, %s2926_s19, %s2927_s20  }
  0x13   :  { %s2928_s23 = smov [#allocation5]   ;;  %s2875_s27 = scalar_lea.hbm %s6152_s1, 8192 }
  0x14   :  { %s27_s24 = sshll.u32 %s2928_s23, 4  ;;  %p2876_p8 = scmp.ne.s32.totalorder %s6152_s1, %s2875_s27  ;;  %s28_s24 = int_to_ptr.vmem [resolvable:$true] %s27_s24 }
  0x15   :  { %p2879_p9 = scmp.lt.u32.totalorder %s2875_s27, %s6152_s1 }
  0x17   :  { %p2881_p10 = pnand %p2879_p9, %p2876_p8 }
  0x19   :  { %2884 = shalt.err (!%p2881_p10)
}
  0x1a   :  { %s2885_s4 = scalar_lea.vmem %s28_s24, 8192  ;;  %p2890_p12 = scmp.lt.s32.totalorder %s28_s24, %s28_s24 }
  0x1b   :  { %p2886_p11 = scmp.ne.s32.totalorder %s28_s24, %s2885_s4  ;;  %p2891_p13 = scmp.lt.s32.totalorder %s2885_s4, %s2885_s4 }
  0x1d   :  { %p2892_p0 = por %p2891_p13, %p2890_p12 }
  0x1f   :  { %p2893_p1 = pnand %p2892_p0, %p2886_p11 }
  0x21   :  { %2896 = shalt.err (!%p2893_p1)
}
  0x22   :  { %33 = dma.hbm_to_vmem [thread:$0]  %s6152_s1, 8192, %s28_s24, [#allocation6], %s2926_s19, %s2926_s19, %s2927_s20  }
  0x23   :  { %2919 = dma.done.wait [#allocation3], 16384  }
  0x24   :  { %2920 = vsyncadd [#allocation3], 4294950912 }
  0x25   :  { %2921 = dma.done.wait [#allocation6], 8192  }
  0x26   :  { %2922 = vsyncadd [#allocation6], 4294959104  ;;  %v2975_v0 = vld [vmem:[#allocation5] sm:$0xff]  ;;  %v2977_v1 = vld [vmem:[#allocation5 + $0x8] sm:$0xff]  ;;  %s2929_s1 = smov [#allocation7]  }
  0x27   :  { %6510 = vst [vmem:[#allocation11_spill] sm:$0xff] %v2975_v0  ;;  %6511 = vst [vmem:[#allocation12_spill] sm:$0xff] %v2977_v1  ;;  %v2979_v2 = vld [vmem:[#allocation5 + $0x10] sm:$0xff]  ;;  %v2981_v3 = vld [vmem:[#allocation5 + $0x18] sm:$0xff]  ;;  %s2627_s6 = sshll.u32 %s2929_s1, 4  ;;  %s2628_s6 = int_to_ptr.vmem [resolvable:$true] %s2627_s6 }
  0x28   :  { %6512 = vst [vmem:[#allocation13_spill] sm:$0xff] %v2979_v2  ;;  %6513 = vst [vmem:[#allocation14_spill] sm:$0xff] %v2981_v3  ;;  %v2983_v4 = vld [vmem:[#allocation5 + $0x20] sm:$0xff]  ;;  %v2985_v5 = vld [vmem:[#allocation5 + $0x28] sm:$0xff]  ;;  %s2897_s7 = scalar_lea.vmem %s2628_s6, 1024  ;;  %p2902_p3 = scmp.lt.s32.totalorder %s2628_s6, %s2628_s6 }
  0x29   :  { %6514 = vst [vmem:[#allocation15_spill] sm:$0xff] %v2983_v4  ;;  %6515 = vst [vmem:[#allocation16_spill] sm:$0xff] %v2985_v5  ;;  %v2987_v6 = vld [vmem:[#allocation5 + $0x30] sm:$0xff]  ;;  %v2989_v7 = vld [vmem:[#allocation5 + $0x38] sm:$0xff]  ;;  %p2898_p2 = scmp.ne.s32.totalorder %s2628_s6, %s2897_s7  ;;  %p2903_p4 = scmp.lt.s32.totalorder %s2897_s7, %s2897_s7 }
  0x2a   :  { %6516 = vst [vmem:[#allocation17_spill] sm:$0xff] %v2987_v6  ;;  %6517 = vst [vmem:[#allocation18_spill] sm:$0xff] %v2989_v7  ;;  %v2991_v8 = vld [vmem:[#allocation5 + $0x80] sm:$0xff]  ;;  %v2993_v9 = vld [vmem:[#allocation5 + $0x88] sm:$0xff] }
  0x2b   :  { %6518 = vst [vmem:[#allocation19_spill] sm:$0xff] %v2991_v8  ;;  %6519 = vst [vmem:[#allocation20_spill] sm:$0xff] %v2993_v9  ;;  %v2995_v10 = vld [vmem:[#allocation5 + $0x90] sm:$0xff]  ;;  %v2997_v11 = vld [vmem:[#allocation5 + $0x98] sm:$0xff]  ;;  %v367_v16 = vsub.f32 %v2991_v8, %v2975_v0  ;;  %v368_v17 = vsub.f32 %v2993_v9, %v2977_v1  ;;  %p2904_p5 = por %p2903_p4, %p2902_p3 }
  0x2c   :  { %6520 = vst [vmem:[#allocation21_spill] sm:$0xff] %v2995_v10  ;;  %6521 = vst [vmem:[#allocation22_spill] sm:$0xff] %v2997_v11  ;;  %v2999_v12 = vld [vmem:[#allocation5 + $0xa0] sm:$0xff]  ;;  %v3001_v13 = vld [vmem:[#allocation5 + $0xa8] sm:$0xff]  ;;  %v369_v18 = vsub.f32 %v2995_v10, %v2979_v2  ;;  %v370_v24 = vsub.f32 %v2997_v11, %v2981_v3 }
  0x2d   :  { %6522 = vst [vmem:[#allocation23_spill] sm:$0xff] %v2999_v12  ;;  %6523 = vst [vmem:[#allocation24_spill] sm:$0xff] %v3001_v13  ;;  %v3003_v14 = vld [vmem:[#allocation5 + $0xb0] sm:$0xff]  ;;  %v3005_v15 = vld [vmem:[#allocation5 + $0xb8] sm:$0xff]  ;;  %v371_v25 = vsub.f32 %v2999_v12, %v2983_v4  ;;  %v372_v33 = vsub.f32 %v3001_v13, %v2985_v5  ;;  %v3065_v45 = vmul.f32 0.5, %v367_v16  ;;  %v3067_v46 = vmul.f32 0.5, %v368_v17  ;;  %p2905_p6 = pnand %p2904_p5, %p2898_p2 }
  0x2e   :  { %6524 = vst [vmem:[#allocation25_spill] sm:$0xff] %v3003_v14  ;;  %6525 = vst [vmem:[#allocation26_spill] sm:$0xff] %v3005_v15  ;;  %v3013_v19 = vld [vmem:[#allocation5 + $0x180] sm:$0xff]  ;;  %v3015_v20 = vld [vmem:[#allocation5 + $0x188] sm:$0xff]  ;;  %v3069_v47 = vmul.f32 0.5, %v369_v18  ;;  %v3079_v52 = vmul.f32 0.5, %v370_v24 }
  0x2f   :  { %6526 = vst [vmem:[#allocation27_spill] sm:$0xff] %v3013_v19  ;;  %6527 = vst [vmem:[#allocation28_spill] sm:$0xff] %v3015_v20  ;;  %v3017_v21 = vld [vmem:[#allocation5 + $0x190] sm:$0xff]  ;;  %v3027_v26 = vld [vmem:[#allocation5 + $0x100] sm:$0xff]  ;;  %v3081_v53 = vmul.f32 0.5, %v371_v25  ;;  %v3097_v61 = vmul.f32 0.5, %v372_v33  ;;  %v6571_v19 = vsub.f32 %v2977_v1, %v2993_v9 }
  0x30   :  { %6528 = vst [vmem:[#allocation29_spill] sm:$0xff] %v3017_v21  ;;  %6529 = vst [vmem:[#allocation30_spill] sm:$0xff] %v3027_v26  ;;  %v3029_v27 = vld [vmem:[#allocation5 + $0x198] sm:$0xff]  ;;  %v3031_v28 = vld [vmem:[#allocation5 + $0x1a0] sm:$0xff] }
  0x31   :  { %6530 = vst [vmem:[#allocation31_spill] sm:$0xff] %v3029_v27  ;;  %6531 = vst [vmem:[#allocation32_spill] sm:$0xff] %v3031_v28  ;;  %v3033_v29 = vld [vmem:[#allocation5 + $0x1a8] sm:$0xff]  ;;  %v3043_v34 = vld [vmem:[#allocation5 + $0x1b0] sm:$0xff] }
  0x32   :  { %6532 = vst [vmem:[#allocation33_spill] sm:$0xff] %v3033_v29  ;;  %6533 = vst [vmem:[#allocation34_spill] sm:$0xff] %v3043_v34  ;;  %v3045_v35 = vld [vmem:[#allocation5 + $0x1b8] sm:$0xff]  ;;  %v3047_v36 = vld [vmem:[#allocation5 + $0x40] sm:$0xff] }
  0x33   :  { %6534 = vst [vmem:[#allocation35_spill] sm:$0xff] %v3045_v35  ;;  %6535 = vst [vmem:[#allocation36_spill] sm:$0xff] %v3047_v36  ;;  %v3057_v41 = vld [vmem:[#allocation5 + $0x48] sm:$0xff]  ;;  %v3059_v42 = vld [vmem:[#allocation5 + $0x50] sm:$0xff]  ;;  %v3111_v24 = vmul.f32 %v3047_v36, %v2991_v8 }
  0x34   :  { %6536 = vst [vmem:[#allocation37_spill] sm:$0xff] %v3057_v41  ;;  %6537 = vst [vmem:[#allocation38_spill] sm:$0xff] %v3059_v42  ;;  %v3061_v43 = vld [vmem:[#allocation5 + $0x58] sm:$0xff]  ;;  %v3071_v48 = vld [vmem:[#allocation5 + $0xc0] sm:$0xff]  ;;  %v3147_v31 = vmul.f32 %v3057_v41, %v2993_v9  ;;  %v3151_v30 = vmul.f32 %v3059_v42, %v2995_v10 }
  0x35   :  { %6538 = vst [vmem:[#allocation39_spill] sm:$0xff] %v3061_v43  ;;  %6539 = vst [vmem:[#allocation40_spill] sm:$0xff] %v3065_v45  ;;  %v3073_v49 = vld [vmem:[#allocation5 + $0xc8] sm:$0xff]  ;;  %v3075_v50 = vld [vmem:[#allocation5 + $0xd0] sm:$0xff]  ;;  %v111_v58 = vsub.f32 %v3071_v48, %v3047_v36 }
  0x36   :  { %6540 = vst [vmem:[#allocation41_spill] sm:$0xff] %v3067_v46  ;;  %6541 = vst [vmem:[#allocation42_spill] sm:$0xff] %v3069_v47  ;;  %v3085_v55 = vld [vmem:[#allocation5 + $0x60] sm:$0xff]  ;;  %v3087_v56 = vld [vmem:[#allocation5 + $0xd8] sm:$0xff]  ;;  %v112_v25 = vsub.f32 %v3073_v49, %v3057_v41  ;;  %v113_v33 = vsub.f32 %v3075_v50, %v3059_v42 }
  0x37   :  { %6542 = vst [vmem:[#allocation43_spill] sm:$0xff] %v3079_v52  ;;  %6543 = vst [vmem:[#allocation44_spill] sm:$0xff] %v3081_v53  ;;  %v3089_v57 = vld [vmem:[#allocation5 + $0xe0] sm:$0xff]  ;;  %v3099_v62 = vld [vmem:[#allocation5 + $0x108] sm:$0xff]  ;;  %v114_v37 = vsub.f32 %v3087_v56, %v3061_v43  ;;  %v3163_v53 = vmul.f32 %v3061_v43, %v2997_v11  ;;  %v3167_v52 = vmul.f32 %v3085_v55, %v2999_v12 }
  0x38   :  { %6544 = vst [vmem:[#allocation45_spill] sm:$0xff] %v3085_v55  ;;  %6545 = vst [vmem:[#allocation46_spill] sm:$0xff] %v3097_v61  ;;  %v3101_v63 = vld [vmem:[#allocation5 + $0x110] sm:$0xff]  ;;  %v3103_v16 = vld [vmem:[#allocation5 + $0x68] sm:$0xff]  ;;  %v115_v32 = vsub.f32 %v3089_v57, %v3085_v55  ;;  %v119_v29 = vmul.f32 %v111_v58, %v3027_v26  ;;  %v120_v28 = vmul.f32 %v112_v25, %v3099_v62 }
  0x39   :  { %6546 = vst [vmem:[#allocation47_spill] sm:$0xff] %v3099_v62  ;;  %6547 = vst [vmem:[#allocation48_spill] sm:$0xff] %v3101_v63  ;;  %v3105_v17 = vld [vmem:[#allocation5 + $0x70] sm:$0xff]  ;;  %v3107_v18 = vld [vmem:[#allocation5 + $0xe8] sm:$0xff]  ;;  %v3171_v47 = vmul.f32 %v3103_v16, %v3001_v13  ;;  %v121_v27 = vmul.f32 %v113_v33, %v3101_v63  ;;  %v6572_v58 = vsub.f32 %v2979_v2, %v2995_v10 }
  0x3a   :  { %6548 = vst [vmem:[#allocation49_spill] sm:$0xff] %v3103_v16  ;;  %6549 = vst [vmem:[#allocation50_spill] sm:$0xff] %v3105_v17  ;;  %v3119_v44 = vld [vmem:[#allocation5 + $0x118] sm:$0xff]  ;;  %v3123_v60 = vld [vmem:[#allocation5 + $0xf0] sm:$0xff]  ;;  %v116_v61 = vsub.f32 %v3107_v18, %v3103_v16  ;;  %v3185_v55 = vmul.f32 %v3105_v17, %v3003_v14 }
  0x3b   :  { %6550 = vst [vmem:[#allocation51_spill] sm:$0xff] %v3111_v24  ;;  %6551 = vst [vmem:[#allocation52_spill] sm:$0xff] %v3119_v44  ;;  %v3121_v40 = vld [vmem:[#allocation5 + $0x78] sm:$0xff]  ;;  %v3135_v51 = vld [vmem:[#allocation5 + $0x120] sm:$0xff]  ;;  %v117_v41 = vsub.f32 %v3123_v60, %v3105_v17  ;;  %v6570_v17 = vsub.f32 %v2975_v0, %v2991_v8 }
  0x3c   :  { %6552 = vst [vmem:[#allocation53_spill] sm:$0xff] %v3121_v40  ;;  %v3125_v59 = vld [vmem:[#allocation5 + $0xf8] sm:$0xff]  ;;  %6553 = vst [vmem:[#allocation54_spill] sm:$0xff] %v3135_v51  ;;  %v3137_v39 = vld [vmem:[#allocation5 + $0x128] sm:$0xff]  ;;  %v3189_v16 = vmul.f32 %v3121_v40, %v3005_v15  ;;  %v123_v20 = vmul.f32 %v115_v32, %v3135_v51  ;;  %v6574_v32 = vsub.f32 %v2983_v4, %v2999_v12 }
  0x3d   :  { %6554 = vst [vmem:[#allocation55_spill] sm:$0xff] %v3137_v39  ;;  %v3139_v38 = vld [vmem:[#allocation5 + $0x140] sm:$0xff]  ;;  %6556 = vst [vmem:[#allocation57_spill] sm:$0xff] %v3147_v31  ;;  %v3153_v54 = vld [vmem:[#allocation5 + $0x130] sm:$0xff]  ;;  %v118_v43 = vsub.f32 %v3125_v59, %v3121_v40  ;;  %v122_v40 = vmul.f32 %v114_v37, %v3119_v44  ;;  %v124_v33 = vmul.f32 %v116_v61, %v3137_v39 }
  0x3e   :  { %6555 = vst [vmem:[#allocation56_spill] sm:$0xff] %v3139_v38  ;;  %6557 = vst [vmem:[#allocation58_spill] sm:$0xff] %v3151_v30  ;;  %v3155_v23 = vld [vmem:[#allocation5 + $0x148] sm:$0xff]  ;;  %v3157_v22 = vld [vmem:[#allocation5 + $0x150] sm:$0xff]  ;;  %v135_v21 = vmul.f32 %v6570_v17, %v3139_v38  ;;  %v6573_v17 = vsub.f32 %v2981_v3, %v2997_v11  ;;  %v125_v10 = vmul.f32 %v117_v41, %v3153_v54 }
  0x3f   :  { %6558 = vst [vmem:[#allocation59_spill] sm:$0xff] %v3153_v54  ;;  %6559 = vst [vmem:[#allocation60_spill] sm:$0xff] %v3155_v23  ;;  %v3173_v46 = vld [vmem:[#allocation5 + $0x158] sm:$0xff]  ;;  %v3175_v45 = vld [vmem:[#allocation5 + $0x160] sm:$0xff]  ;;  %v137_v25 = vmul.f32 %v6572_v58, %v3157_v22  ;;  %v6576_v61 = vsub.f32 %v2987_v6, %v3003_v14  ;;  %v3243_v41 = vmul.f32 %v3073_v49, %v2977_v1 }
  0x40   :  { %6560 = vst [vmem:[#allocation61_spill] sm:$0xff] %v3157_v22  ;;  %6561 = vst [vmem:[#allocation62_spill] sm:$0xff] %v3163_v53  ;;  %v3177_v42 = vld [vmem:[#allocation5 + $0x168] sm:$0xff]  ;;  %v3191_v36 = vld [vmem:[#allocation5 + $0x138] sm:$0xff]  ;;  %v138_v8 = vmul.f32 %v6573_v17, %v3173_v46  ;;  %v139_v37 = vmul.f32 %v6574_v32, %v3175_v45  ;;  %v6577_v17 = vsub.f32 %v2989_v7, %v3005_v15 }
  0x41   :  { %6562 = vst [vmem:[#allocation63_spill] sm:$0xff] %v3167_v52  ;;  %6563 = vst [vmem:[#allocation64_spill] sm:$0xff] %v3171_v47  ;;  %v3193_v35 = vld [vmem:[#allocation5 + $0x170] sm:$0xff]  ;;  %v3195_v34 = vld [vmem:[#allocation5 + $0x178] sm:$0xff]  ;;  %v126_v58 = vmul.f32 %v118_v43, %v3191_v36  ;;  %v143_v32 = vadd.f32 %v135_v21, %v119_v29  ;;  %v3247_v43 = vmul.f32 %v3075_v50, %v2979_v2 }
  0x42   :  { %6564 = vst [vmem:[#allocation65_spill] sm:$0xff] %v3173_v46  ;;  %6565 = vst [vmem:[#allocation66_spill] sm:$0xff] %v3175_v45  ;;  %v141_v11 = vmul.f32 %v6576_v61, %v3193_v35  ;;  %v142_v12 = vmul.f32 %v6577_v17, %v3195_v34  ;;  %v3239_v45 = vmul.f32 %v3071_v48, %v2975_v0  ;;  %v3259_v29 = vld [vmem:[#allocation5 + $0x1c8] sm:$0xff]  ;;  %v3261_v0 = vld [vmem:[#allocation5 + $0x1d0] sm:$0xff] }
  0x43   :  { %6566 = vst [vmem:[#allocation67_spill] sm:$0xff] %v3185_v55  ;;  %6567 = vst [vmem:[#allocation68_spill] sm:$0xff] %v3189_v16  ;;  %v136_v16 = vmul.f32 %v6571_v19, %v3155_v23  ;;  %v6575_v19 = vsub.f32 %v2985_v5, %v3001_v13  ;;  %v145_v14 = vadd.f32 %v137_v25, %v121_v27  ;;  %v3277_v25 = vld [vmem:[#allocation5 + $0x1e8] sm:$0xff] }
  0x44   :  { %6568 = vst [vmem:[#allocation69_spill] sm:$0xff] %v3191_v36  ;;  %6569 = vst [vmem:[#allocation70_spill] sm:$0xff] %v3193_v35  ;;  %v3253_v17 = vmul.f32 %v3087_v56, %v2981_v3  ;;  %v3257_v21 = vmul.f32 %v3089_v57, %v2983_v4  ;;  %v3263_v1 = vadd.f32 %v138_v8, %v122_v40  ;;  %v3291_v40 = vld [vmem:[#allocation5 + $0x1f0] sm:$0xff] }
  0x45   :  { %v140_v51 = vmul.f32 %v6575_v19, %v3177_v42  ;;  %6578 = vst [vmem:[#allocation71_spill] sm:$0xff] %v3239_v45  ;;  %6579 = vst [vmem:[#allocation72_spill] sm:$0xff] %v3243_v41  ;;  %v3249_v19 = vld [vmem:[#allocation5 + $0x1c0] sm:$0xff]  ;;  %v144_v61 = vadd.f32 %v136_v16, %v120_v28  ;;  %v3265_v2 = vadd.f32 %v139_v37, %v123_v20  ;;  %v3273_v28 = vld [vmem:[#allocation5 + $0x1d8] sm:$0xff] }
  0x46   :  { %6580 = vst [vmem:[#allocation73_spill] sm:$0xff] %v3247_v43  ;;  %6581 = vst [vmem:[#allocation74_spill] sm:$0xff] %v3249_v19  ;;  %v3271_v27 = vmul.f32 %v3107_v18, %v2985_v5  ;;  %v3275_v16 = vld [vmem:[#allocation5 + $0x1e0] sm:$0xff]  ;;  %v3279_v4 = vadd.f32 %v141_v11, %v125_v10  ;;  %v3281_v3 = vadd.f32 %v142_v12, %v126_v58 }
  0x47   :  { %6582 = vst [vmem:[#allocation75_spill] sm:$0xff] %v3253_v17  ;;  %6583 = vst [vmem:[#allocation76_spill] sm:$0xff] %v3257_v21  ;;  %v3267_v15 = vadd.f32 %v140_v51, %v124_v33  ;;  %v3285_v8 = vmul.f32 %v3123_v60, %v2987_v6  ;;  %v3289_v20 = vmul.f32 %v3125_v59, %v2989_v7  ;;  %v3293_v51 = vld [vmem:[#allocation5 + $0x1f8] sm:$0xff] }
  0x48   :  { %6584 = vst [vmem:[#allocation77_spill] sm:$0xff] %v3259_v29  ;;  %6585 = vst [vmem:[#allocation78_spill] sm:$0xff] %v3261_v0  ;;  %v167_v33 = vsub.f32 %v3111_v24, %v3239_v45  ;;  %v168_v10 = vsub.f32 %v3147_v31, %v3243_v41  ;;  %v169_v11 = vsub.f32 %v3151_v30, %v3247_v43 }
  0x49   :  { %6586 = vst [vmem:[#allocation79_spill] sm:$0xff] %v3265_v2  ;;  %6587 = vst [vmem:[#allocation80_spill] sm:$0xff] %v3267_v15  ;;  %v199_v12 = vsub.f32 %v3249_v19, %v3071_v48  ;;  %v200_v5 = vsub.f32 %v3259_v29, %v3073_v49  ;;  %v201_v45 = vsub.f32 %v3261_v0, %v3075_v50 }
  0x4a   :  { %6588 = vst [vmem:[#allocation81_spill] sm:$0xff] %v3271_v27  ;;  %6589 = vst [vmem:[#allocation82_spill] sm:$0xff] %v3273_v28  ;;  %v172_v41 = vsub.f32 %v3171_v47, %v3271_v27  ;;  %v202_v43 = vsub.f32 %v3273_v28, %v3087_v56  ;;  %v203_v30 = vsub.f32 %v3275_v16, %v3089_v57 }
  0x4b   :  { %6590 = vst [vmem:[#allocation83_spill] sm:$0xff] %v3275_v16  ;;  %6591 = vst [vmem:[#allocation84_spill] sm:$0xff] %v3277_v25  ;;  %v204_v37 = vsub.f32 %v3277_v25, %v3107_v18  ;;  %v173_v58 = vsub.f32 %v3185_v55, %v3285_v8  ;;  %v205_v7 = vsub.f32 %v3291_v40, %v3123_v60  ;;  %v6600_v55 = vld [vmem:[#allocation27_spill] sm:$0xff] }
  0x4c   :  { %6592 = vst [vmem:[#allocation85_spill] sm:$0xff] %v3279_v4  ;;  %6593 = vst [vmem:[#allocation86_spill] sm:$0xff] %v3281_v3  ;;  %v206_v27 = vsub.f32 %v3293_v51, %v3125_v59  ;;  %v175_v47 = vadd.f32 %v167_v33, %v143_v32  ;;  %v176_v6 = vadd.f32 %v168_v10, %v144_v61  ;;  %v6604_v61 = vld [vmem:[#allocation54_spill] sm:$0xff]  ;;  %v6606_v10 = vld [vmem:[#allocation29_spill] sm:$0xff] }
  0x4d   :  { %6594 = vst [vmem:[#allocation87_spill] sm:$0xff] %v3285_v8  ;;  %6595 = vst [vmem:[#allocation88_spill] sm:$0xff] %v3289_v20  ;;  %v177_v3 = vadd.f32 %v169_v11, %v145_v14  ;;  %v207_v4 = vmul.f32 %v199_v12, %v3027_v26  ;;  %v208_v15 = vmul.f32 %v200_v5, %v3099_v62  ;;  %v6599_v8 = vld [vmem:[#allocation19_spill] sm:$0xff]  ;;  %v6602_v20 = vld [vmem:[#allocation28_spill] sm:$0xff] }
  0x4e   :  { %6596 = vst [vmem:[#allocation89_spill] sm:$0xff] %v3291_v40  ;;  %6597 = vst [vmem:[#allocation90_spill] sm:$0xff] %v3293_v51  ;;  %v209_v21 = vmul.f32 %v201_v45, %v3101_v63  ;;  %v6601_v52 = vsub.f32 %v6599_v8, %v6600_v55  ;;  %v6603_v31 = vsub.f32 %v2993_v9, %v6602_v20  ;;  %v6605_v5 = vld [vmem:[#allocation21_spill] sm:$0xff]  ;;  %v6608_v26 = vld [vmem:[#allocation22_spill] sm:$0xff] }
  0x4f   :  { %v210_v32 = vmul.f32 %v202_v43, %v3119_v44  ;;  %v211_v14 = vmul.f32 %v203_v30, %v6604_v61  ;;  %v212_v33 = vmul.f32 %v204_v37, %v3137_v39  ;;  %v6607_v45 = vsub.f32 %v6605_v5, %v6606_v10  ;;  %v6612_v43 = vld [vmem:[#allocation23_spill] sm:$0xff]  ;;  %v6613_v44 = vld [vmem:[#allocation32_spill] sm:$0xff]  ;;  %v6615_v37 = vld [vmem:[#allocation33_spill] sm:$0xff] }
  0x50   :  { %v223_v24 = vmul.f32 %v6601_v52, %v3139_v38  ;;  %v224_v2 = vmul.f32 %v6603_v31, %v3155_v23  ;;  %v213_v12 = vmul.f32 %v205_v7, %v3153_v54  ;;  %v214_v52 = vmul.f32 %v206_v27, %v3191_v36  ;;  %v6609_v38 = vld [vmem:[#allocation31_spill] sm:$0xff]  ;;  %v6611_v23 = vld [vmem:[#allocation66_spill] sm:$0xff] }
  0x51   :  { %v225_v11 = vmul.f32 %v6607_v45, %v3157_v22  ;;  %v6610_v63 = vsub.f32 %v6608_v26, %v6609_v38  ;;  %v6614_v30 = vsub.f32 %v6612_v43, %v6613_v44  ;;  %v6616_v39 = vsub.f32 %v3001_v13, %v6615_v37  ;;  %v6617_v45 = vld [vmem:[#allocation25_spill] sm:$0xff]  ;;  %v6618_v7 = vld [vmem:[#allocation34_spill] sm:$0xff]  ;;  %v6621_v22 = vld [vmem:[#allocation35_spill] sm:$0xff] }
  0x52   :  { %v6619_v54 = vsub.f32 %v6617_v45, %v6618_v7  ;;  %v6620_v36 = vld [vmem:[#allocation26_spill] sm:$0xff]  ;;  %v232_v53 = vadd.f32 %v224_v2, %v208_v15  ;;  %v3385_v2 = vmul.f32 %v3089_v57, %v6613_v44  ;;  %v3393_v15 = vmul.f32 %v3123_v60, %v6618_v7 }
  0x53   :  { %v226_v31 = vmul.f32 %v6610_v63, %v3173_v46  ;;  %v227_v61 = vmul.f32 %v6614_v30, %v6611_v23  ;;  %v228_v62 = vmul.f32 %v6616_v39, %v3177_v42  ;;  %v6622_v17 = vsub.f32 %v6620_v36, %v6621_v22 }
  0x54   :  { %v229_v27 = vmul.f32 %v6619_v54, %v3193_v35  ;;  %v231_v46 = vadd.f32 %v223_v24, %v207_v4  ;;  %v3369_v30 = vmul.f32 %v3071_v48, %v6600_v55  ;;  %v3373_v23 = vmul.f32 %v3073_v49, %v6602_v20  ;;  %6627 = vst [vmem:[#allocation92_spill] sm:$0xff] %v3385_v2 }
  0x55   :  { %v230_v63 = vmul.f32 %v6622_v17, %v3195_v34  ;;  %v3377_v39 = vmul.f32 %v3075_v50, %v6606_v10  ;;  %v233_v54 = vadd.f32 %v225_v11, %v209_v21  ;;  %v3381_v35 = vmul.f32 %v3087_v56, %v6609_v38  ;;  %6629 = vst [vmem:[#allocation94_spill] sm:$0xff] %v3393_v15 }
  0x56   :  { %6623 = vst [vmem:[#allocation27_spill] sm:$0xff] %v3369_v30  ;;  %6624 = vst [vmem:[#allocation25_spill] sm:$0xff] %v3373_v23  ;;  %v3389_v4 = vmul.f32 %v3107_v18, %v6615_v37  ;;  %v3397_v24 = vmul.f32 %v3249_v19, %v6599_v8  ;;  %v3401_v17 = vmul.f32 %v3259_v29, %v2993_v9 }
  0x57   :  { %6625 = vst [vmem:[#allocation26_spill] sm:$0xff] %v3377_v39  ;;  %6626 = vst [vmem:[#allocation91_spill] sm:$0xff] %v3381_v35  ;;  %v3405_v21 = vmul.f32 %v3261_v0, %v6605_v5  ;;  %v3409_v11 = vmul.f32 %v3273_v28, %v6608_v26  ;;  %v3413_v7 = vmul.f32 %v3275_v16, %v6612_v43 }
  0x58   :  { %6628 = vst [vmem:[#allocation93_spill] sm:$0xff] %v3389_v4  ;;  %6630 = vst [vmem:[#allocation95_spill] sm:$0xff] %v3397_v24  ;;  %v3417_v8 = vmul.f32 %v3277_v25, %v3001_v13  ;;  %v3421_v9 = vmul.f32 %v3291_v40, %v6617_v45  ;;  %v234_v37 = vadd.f32 %v226_v31, %v210_v32 }
  0x59   :  { %6631 = vst [vmem:[#allocation96_spill] sm:$0xff] %v3401_v17  ;;  %6632 = vst [vmem:[#allocation97_spill] sm:$0xff] %v3405_v21  ;;  %v255_v5 = vsub.f32 %v3369_v30, %v3397_v24  ;;  %v256_v26 = vsub.f32 %v3373_v23, %v3401_v17  ;;  %v257_v44 = vsub.f32 %v3377_v39, %v3405_v21  ;;  %v183_v39 = vmul.f32 0.5, %v175_v47 }
  0x5a   :  { %6633 = vst [vmem:[#allocation98_spill] sm:$0xff] %v3409_v11  ;;  %6634 = vst [vmem:[#allocation99_spill] sm:$0xff] %v3413_v7  ;;  %v235_v43 = vadd.f32 %v227_v61, %v211_v14  ;;  %v236_v38 = vadd.f32 %v228_v62, %v212_v33  ;;  %v258_v13 = vsub.f32 %v3381_v35, %v3409_v11  ;;  %v6639_v33 = vld [vmem:[#allocation62_spill] sm:$0xff]  ;;  %v6647_v35 = vld [vmem:[#allocation85_spill] sm:$0xff] }
  0x5b   :  { %6635 = vst [vmem:[#allocation100_spill] sm:$0xff] %v3417_v8  ;;  %6636 = vst [vmem:[#allocation101_spill] sm:$0xff] %v3421_v9  ;;  %v259_v10 = vsub.f32 %v3385_v2, %v3413_v7  ;;  %v237_v20 = vadd.f32 %v229_v27, %v213_v12  ;;  %v260_v32 = vsub.f32 %v3389_v4, %v3417_v8  ;;  %v6640_v12 = vld [vmem:[#allocation75_spill] sm:$0xff]  ;;  %v6646_v4 = vld [vmem:[#allocation80_spill] sm:$0xff] }
  0x5c   :  { %v263_v31 = vadd.f32 %v255_v5, %v231_v46  ;;  %v264_v24 = vadd.f32 %v256_v26, %v232_v53  ;;  %v3437_v17 = vmul.f32 %v3125_v59, %v6621_v22  ;;  %v3441_v61 = vmul.f32 %v3293_v51, %v6620_v36  ;;  %v6642_v8 = vld [vmem:[#allocation79_spill] sm:$0xff]  ;;  %v6644_v26 = vld [vmem:[#allocation76_spill] sm:$0xff] }
  0x5d   :  { %v261_v62 = vsub.f32 %v3393_v15, %v3421_v9  ;;  %v265_v14 = vadd.f32 %v257_v44, %v233_v54  ;;  %v6641_v27 = vsub.f32 %v6639_v33, %v6640_v12  ;;  %v6643_v46 = vld [vmem:[#allocation63_spill] sm:$0xff]  ;;  %v180_v2 = vadd.f32 %v172_v41, %v6646_v4 }
  0x5e   :  { %6637 = vst [vmem:[#allocation102_spill] sm:$0xff] %v3437_v17  ;;  %6638 = vst [vmem:[#allocation103_spill] sm:$0xff] %v3441_v61  ;;  %v6645_v53 = vsub.f32 %v6643_v46, %v6644_v26  ;;  %v266_v11 = vadd.f32 %v258_v13, %v234_v37  ;;  %v181_v21 = vadd.f32 %v173_v58, %v6647_v35  ;;  %v271_v30 = vmul.f32 0.5, %v263_v31  ;;  %v6648_v26 = vld [vmem:[#allocation86_spill] sm:$0xff] }
  0x5f   :  { %v178_v7 = vadd.f32 %v6641_v27, %v3263_v1  ;;  %v267_v23 = vadd.f32 %v259_v10, %v235_v43  ;;  %v184_v9 = vmul.f32 0.5, %v176_v6  ;;  %v185_v44 = vmul.f32 0.5, %v177_v3 }
  0x60   :  { %v179_v5 = vadd.f32 %v6645_v53, %v6642_v8  ;;  %v268_v54 = vadd.f32 %v260_v32, %v236_v38  ;;  %v272_v15 = vmul.f32 0.5, %v264_v24  ;;  %v238_v22 = vadd.f32 %v230_v63, %v214_v52  ;;  %v6649_v8 = vld [vmem:[#allocation68_spill] sm:$0xff] }
  0x61   :  { %v262_v1 = vsub.f32 %v3437_v17, %v3441_v61  ;;  %v269_v27 = vadd.f32 %v261_v62, %v237_v20  ;;  %v273_v12 = vmul.f32 0.5, %v265_v14  ;;  %v6650_v53 = vld [vmem:[#allocation88_spill] sm:$0xff]  ;;  %v186_v37 = vmul.f32 0.5, %v178_v7  ;;  %v6652_v14 = vld [vmem:[#allocation17_spill] sm:$0xff] }
  0x62   :  { %v6651_v41 = vsub.f32 %v6649_v8, %v6650_v53  ;;  %v187_v35 = vmul.f32 0.5, %v179_v5  ;;  %v274_v47 = vmul.f32 0.5, %v266_v11  ;;  %v188_v58 = vmul.f32 0.5, %v180_v2  ;;  %v6655_v2 = vld [vmem:[#allocation18_spill] sm:$0xff]  ;;  %v6659_v11 = vld [vmem:[#allocation12_spill] sm:$0xff] }
  0x63   :  { %v191_v10 = vand.u32 2147483647, %v183_v39  ;;  %v275_v6 = vmul.f32 0.5, %v267_v23  ;;  %v279_v3 = vand.u32 2147483647, %v271_v30  ;;  %v189_v38 = vmul.f32 0.5, %v181_v21 }
  0x64   :  { %v182_v13 = vadd.f32 %v6651_v41, %v6648_v26  ;;  %v192_v43 = vand.u32 2147483647, %v184_v9  ;;  %v276_v52 = vmul.f32 0.5, %v268_v54  ;;  %v280_v63 = vand.u32 2147483647, %v272_v15  ;;  %v6658_v15 = vld [vmem:[#allocation47_spill] sm:$0xff] }
  0x65   :  { %v193_v4 = vand.u32 2147483647, %v185_v44  ;;  %v270_v24 = vadd.f32 %v262_v1, %v238_v22  ;;  %v277_v20 = vmul.f32 0.5, %v269_v27  ;;  %v281_v32 = vand.u32 2147483647, %v273_v12  ;;  %v6671_v22 = vld [vmem:[#allocation53_spill] sm:$0xff] }
  0x66   :  { %v194_v31 = vand.u32 2147483647, %v186_v37  ;;  %v282_v62 = vand.u32 2147483647, %v274_v47  ;;  %v6653_v26 = vsub.f32 %v6617_v45, %v6652_v14  ;;  %v6656_v39 = vsub.f32 %v6620_v36, %v6655_v2 }
  0x67   :  { %v195_v30 = vand.u32 2147483647, %v187_v35  ;;  %v283_v9 = vand.u32 2147483647, %v275_v6  ;;  %v287_v21 = vadd.f32 %v279_v3, %v191_v10  ;;  %v3473_v5 = vmul.f32 0.5, %v182_v13  ;;  %v6663_v35 = vld [vmem:[#allocation37_spill] sm:$0xff] }
  0x68   :  { %v3464_v7 = vmul.f32 0.5, %v6653_v26  ;;  %v3469_v23 = vmul.f32 0.5, %v6656_v39  ;;  %v196_v12 = vand.u32 2147483647, %v188_v58  ;;  %v284_v44 = vand.u32 2147483647, %v276_v52 }
  0x69   :  { %6660 = vst [vmem:[#allocation63_spill] sm:$0xff] %v3473_v5  ;;  %v288_v54 = vadd.f32 %v280_v63, %v192_v43  ;;  %v197_v1 = vand.u32 2147483647, %v189_v38  ;;  %v3475_v27 = vmul.f32 0.5, %v270_v24  ;;  %v285_v41 = vand.u32 2147483647, %v277_v20 }
  0x6a   :  { %6654 = vst [vmem:[#allocation62_spill] sm:$0xff] %v3464_v7  ;;  %6657 = vst [vmem:[#allocation79_spill] sm:$0xff] %v3469_v23  ;;  %v289_v37 = vadd.f32 %v281_v32, %v193_v4  ;;  %v290_v47 = vadd.f32 %v282_v62, %v194_v31  ;;  %v6662_v26 = vld [vmem:[#allocation36_spill] sm:$0xff]  ;;  %v304_v10 = vsub.f32 %v6663_v35, %v3073_v49  ;;  %v6665_v3 = vld [vmem:[#allocation13_spill] sm:$0xff]  ;;  %2709 = vrcp.f32 %v287_v21 }
  0x6b   :  { %6661 = vst [vmem:[#allocation80_spill] sm:$0xff] %v3475_v27  ;;  %v303_v39 = vsub.f32 %v6662_v26, %v3071_v48  ;;  %v6664_v6 = vld [vmem:[#allocation48_spill] sm:$0xff]  ;;  %v291_v13 = vadd.f32 %v283_v9, %v195_v30  ;;  %v6666_v58 = vld [vmem:[#allocation38_spill] sm:$0xff]  ;;  %v6667_v38 = vld [vmem:[#allocation39_spill] sm:$0xff]  ;;  %v292_v63 = vadd.f32 %v284_v44, %v196_v12  ;;  %2711 = vrcp.f32 %v288_v54 }
  0x6c   :  { %v305_v43 = vsub.f32 %v6666_v58, %v3075_v50  ;;  %v306_v52 = vsub.f32 %v6667_v38, %v3087_v56  ;;  %v6668_v4 = vld [vmem:[#allocation45_spill] sm:$0xff]  ;;  %v293_v30 = vadd.f32 %v285_v41, %v197_v1  ;;  %2713 = vrcp.f32 %v289_v37  ;;  %v6670_v9 = vld [vmem:[#allocation50_spill] sm:$0xff]  ;;  %v6678_v41 = vld [vmem:[#allocation56_spill] sm:$0xff] }
  0x6d   :  { %v307_v24 = vsub.f32 %v6668_v4, %v3089_v57  ;;  %v6669_v20 = vld [vmem:[#allocation49_spill] sm:$0xff]  ;;  %2715 = vrcp.f32 %v290_v47  ;;  %v309_v21 = vsub.f32 %v6670_v9, %v3123_v60  ;;  %v310_v12 = vsub.f32 %v6671_v22, %v3125_v59  ;;  %v6679_v47 = vld [vmem:[#allocation60_spill] sm:$0xff] }
  0x6e   :  { %v308_v32 = vsub.f32 %v6669_v20, %v3107_v18  ;;  %v3497_v44 = vmul.f32 0.5, %v303_v39  ;;  %2717 = vrcp.f32 %v291_v13  ;;  %v3499_v54 = vmul.f32 0.5, %v304_v10  ;;  %v6680_v39 = vld [vmem:[#allocation61_spill] sm:$0xff] }
  0x6f   :  { %v3501_v23 = vmul.f32 0.5, %v305_v43  ;;  %v3503_v7 = vmul.f32 0.5, %v306_v52  ;;  %2719 = vrcp.f32 %v292_v63  ;;  %v3505_v62 = vmul.f32 0.5, %v307_v24  ;;  %v6681_v10 = vld [vmem:[#allocation65_spill] sm:$0xff]  ;;  %v6682_v52 = vld [vmem:[#allocation66_spill] sm:$0xff] }
  0x70   :  { %6672 = vst [vmem:[#allocation85_spill] sm:$0xff] %v3497_v44  ;;  %6673 = vst [vmem:[#allocation86_spill] sm:$0xff] %v3499_v54  ;;  %v3507_v1 = vmul.f32 0.5, %v308_v32  ;;  %v319_v37 = vsub.f32 %v6678_v41, %v6662_v26  ;;  %v320_v31 = vsub.f32 %v6679_v47, %v6663_v35  ;;  %v321_v13 = vsub.f32 %v6680_v39, %v6666_v58  ;;  %v6684_v32 = vld [vmem:[#allocation70_spill] sm:$0xff] }
  0x71   :  { %6674 = vst [vmem:[#allocation68_spill] sm:$0xff] %v3501_v23  ;;  %6675 = vst [vmem:[#allocation88_spill] sm:$0xff] %v3503_v7  ;;  %v322_v43 = vsub.f32 %v6681_v10, %v6667_v38  ;;  %v323_v27 = vsub.f32 %v6682_v52, %v6668_v4  ;;  %v3519_v63 = vmul.f32 0.5, %v309_v21  ;;  %v324_v24 = vsub.f32 %v3177_v42, %v6669_v20 }
  0x72   :  { %6676 = vst [vmem:[#allocation17_spill] sm:$0xff] %v3505_v62  ;;  %6677 = vst [vmem:[#allocation18_spill] sm:$0xff] %v3507_v1  ;;  %v325_v5 = vsub.f32 %v6684_v32, %v6670_v9  ;;  %v326_v1 = vsub.f32 %v3195_v34, %v6671_v22  ;;  %2721 = vrcp.f32 %v293_v30  ;;  %v3527_v62 = vmul.f32 0.5, %v310_v12 }
  0x73   :  { %6683 = vst [vmem:[#allocation47_spill] sm:$0xff] %v3519_v63  ;;  %v335_v7 = vsub.f32 %v3249_v19, %v6678_v41  ;;  %v336_v23 = vsub.f32 %v3259_v29, %v6679_v47  ;;  %v3533_v21 = vmul.f32 0.5, %v319_v37  ;;  %v337_v63 = vsub.f32 %v3261_v0, %v6680_v39 }
  0x74   :  { %6685 = vst [vmem:[#allocation12_spill] sm:$0xff] %v3527_v62  ;;  %v338_v54 = vsub.f32 %v3273_v28, %v6681_v10  ;;  %v339_v44 = vsub.f32 %v3275_v16, %v6682_v52  ;;  %v3541_v30 = vpop.eup %2709  ;;  %v3543_v12 = vmul.f32 0.5, %v320_v31  ;;  %v3545_v62 = vmul.f32 0.5, %v321_v13 }
  0x75   :  { %6686 = vst [vmem:[#allocation36_spill] sm:$0xff] %v3533_v21  ;;  %6687 = vst [vmem:[#allocation37_spill] sm:$0xff] %v3541_v30  ;;  %v3547_v61 = vmul.f32 0.5, %v322_v43  ;;  %v3549_v17 = vmul.f32 0.5, %v323_v27  ;;  %v3551_v37 = vpop.eup %2711  ;;  %v3553_v21 = vmul.f32 0.5, %v324_v24  ;;  %v3555_v39 = vmul.f32 0.5, %v325_v5 }
  0x76   :  { %6688 = vst [vmem:[#allocation48_spill] sm:$0xff] %v3543_v12  ;;  %6689 = vst [vmem:[#allocation13_spill] sm:$0xff] %v3545_v62  ;;  %v3557_v10 = vmul.f32 0.5, %v326_v1  ;;  %v340_v52 = vsub.f32 %v3277_v25, %v3177_v42  ;;  %v3561_v30 = vpop.eup %2713  ;;  %v341_v31 = vsub.f32 %v3291_v40, %v6684_v32  ;;  %v342_v27 = vsub.f32 %v3293_v51, %v3195_v34  ;;  %v6725_v62 = vld [vmem:[#allocation11_spill] sm:$0xff]  ;;  %v6726_v12 = vld [vmem:[#allocation30_spill] sm:$0xff] }
  0x77   :  { %6690 = vst [vmem:[#allocation38_spill] sm:$0xff] %v3547_v61  ;;  %6691 = vst [vmem:[#allocation39_spill] sm:$0xff] %v3549_v17  ;;  %v3567_v13 = vmul.f32 0.5, %v335_v7  ;;  %v3569_v43 = vmul.f32 0.5, %v336_v23  ;;  %v3571_v24 = vpop.eup %2715  ;;  %v3573_v5 = vmul.f32 0.5, %v337_v63  ;;  %v3575_v1 = vmul.f32 0.5, %v338_v54 }
  0x78   :  { %6692 = vst [vmem:[#allocation45_spill] sm:$0xff] %v3551_v37  ;;  %6693 = vst [vmem:[#allocation49_spill] sm:$0xff] %v3553_v21  ;;  %v3577_v37 = vmul.f32 0.5, %v339_v44  ;;  %v353_v7 = vsub.f32 %v3075_v50, %v3261_v0  ;;  %v354_v23 = vsub.f32 %v3087_v56, %v3273_v28  ;;  %v355_v54 = vsub.f32 %v3089_v57, %v3275_v16  ;;  %v6708_v56 = vld [vmem:[#allocation52_spill] sm:$0xff]  ;;  %v6716_v21 = vld [vmem:[#allocation69_spill] sm:$0xff] }
  0x79   :  { %6694 = vst [vmem:[#allocation50_spill] sm:$0xff] %v3555_v39  ;;  %6695 = vst [vmem:[#allocation53_spill] sm:$0xff] %v3557_v10  ;;  %v3581_v10 = vpop.eup %2717  ;;  %v352_v39 = vsub.f32 %v3073_v49, %v3259_v29  ;;  %v3593_v44 = vmul.f32 0.5, %v340_v52  ;;  %v358_v49 = vsub.f32 %v3125_v59, %v3293_v51  ;;  %v3601_v50 = vmul.f32 0.5, %v341_v31  ;;  %v6749_v16 = vld [vmem:[#allocation23_spill] sm:$0xff]  ;;  %v6751_v29 = vld [vmem:[#allocation24_spill] sm:$0xff] }
  0x7a   :  { %6696 = vst [vmem:[#allocation56_spill] sm:$0xff] %v3561_v30  ;;  %6697 = vst [vmem:[#allocation60_spill] sm:$0xff] %v3567_v13  ;;  %v351_v30 = vsub.f32 %v3071_v48, %v3249_v19  ;;  %v3591_v63 = vpop.eup %2719  ;;  %v356_v48 = vsub.f32 %v3107_v18, %v3277_v25  ;;  %v6714_v18 = vld [vmem:[#allocation16_spill] sm:$0xff]  ;;  %v6715_v13 = vld [vmem:[#allocation59_spill] sm:$0xff]  ;;  %v390_v59 = vsub.f32 %v6655_v2, %v6716_v21  ;;  %v3625_v17 = vmul.f32 0.5, %v355_v54 }
  0x7b   :  { %6698 = vst [vmem:[#allocation70_spill] sm:$0xff] %v3569_v43  ;;  %6699 = vst [vmem:[#allocation104_spill] sm:$0xff] %v3571_v24  ;;  %v3603_v24 = vmul.f32 0.5, %v342_v27  ;;  %v3619_v27 = vmul.f32 0.5, %v352_v39  ;;  %v3631_v61 = vmul.f32 0.5, %v358_v49  ;;  %v6727_v51 = vsub.f32 %v6725_v62, %v6726_v12 }
  0x7c   :  { %6700 = vst [vmem:[#allocation105_spill] sm:$0xff] %v3573_v5  ;;  %6701 = vst [vmem:[#allocation106_spill] sm:$0xff] %v3575_v1  ;;  %v6710_v1 = vld [vmem:[#allocation54_spill] sm:$0xff]  ;;  %v6713_v5 = vld [vmem:[#allocation55_spill] sm:$0xff]  ;;  %v3617_v31 = vpop.eup %2721  ;;  %v6729_v39 = vsub.f32 %v6659_v11, %v6658_v15 }
  0x7d   :  { %6702 = vst [vmem:[#allocation107_spill] sm:$0xff] %v3577_v37  ;;  %6703 = vst [vmem:[#allocation108_spill] sm:$0xff] %v3581_v10  ;;  %v357_v10 = vsub.f32 %v3123_v60, %v3291_v40  ;;  %v6709_v37 = vld [vmem:[#allocation14_spill] sm:$0xff]  ;;  %v388_v43 = vsub.f32 %v6714_v18, %v6713_v5  ;;  %v389_v60 = vsub.f32 %v6652_v14, %v6715_v13  ;;  %v3636_v40 = vmul.f32 0.5, %v6727_v51 }
  0x7e   :  { %6704 = vst [vmem:[#allocation109_spill] sm:$0xff] %v3591_v63  ;;  %6705 = vst [vmem:[#allocation110_spill] sm:$0xff] %v3593_v44  ;;  %v386_v57 = vsub.f32 %v6709_v37, %v6708_v56  ;;  %v6711_v63 = vld [vmem:[#allocation15_spill] sm:$0xff]  ;;  %v3609_v44 = vmul.f32 0.5, %v351_v30  ;;  %v3627_v30 = vmul.f32 0.5, %v356_v48  ;;  %v3656_v51 = vmul.f32 0.5, %v390_v59 }
  0x7f   :  { %6706 = vst [vmem:[#allocation111_spill] sm:$0xff] %v3601_v50  ;;  %6707 = vst [vmem:[#allocation112_spill] sm:$0xff] %v3603_v24  ;;  %v387_v52 = vsub.f32 %v6711_v63, %v6710_v1  ;;  %v3621_v24 = vmul.f32 0.5, %v353_v7  ;;  %v3623_v50 = vmul.f32 0.5, %v354_v23  ;;  %v3641_v7 = vmul.f32 0.5, %v6729_v39  ;;  %v6738_v39 = vld [vmem:[#allocation28_spill] sm:$0xff] }
  0x80   :  { %6712 = vst [vmem:[#allocation52_spill] sm:$0xff] %v3609_v44  ;;  %6717 = vst [vmem:[#allocation14_spill] sm:$0xff] %v3617_v31  ;;  %v3629_v44 = vmul.f32 0.5, %v357_v10  ;;  %v6731_v23 = vsub.f32 %v6665_v3, %v6664_v6  ;;  %v3648_v48 = vmul.f32 0.5, %v386_v57  ;;  %v3652_v49 = vmul.f32 0.5, %v388_v43  ;;  %v6743_v59 = vld [vmem:[#allocation34_spill] sm:$0xff] }
  0x81   :  { %6718 = vst [vmem:[#allocation54_spill] sm:$0xff] %v3619_v27  ;;  %6719 = vst [vmem:[#allocation15_spill] sm:$0xff] %v3621_v24  ;;  %v3650_v10 = vmul.f32 0.5, %v387_v52  ;;  %v3654_v31 = vmul.f32 0.5, %v389_v60  ;;  %v6741_v52 = vld [vmem:[#allocation32_spill] sm:$0xff]  ;;  %v405_v24 = vsub.f32 %v6715_v13, %v6743_v59  ;;  %v6744_v27 = vld [vmem:[#allocation35_spill] sm:$0xff] }
  0x82   :  { %6720 = vst [vmem:[#allocation55_spill] sm:$0xff] %v3623_v50  ;;  %6721 = vst [vmem:[#allocation16_spill] sm:$0xff] %v3625_v17  ;;  %v3646_v54 = vmul.f32 0.5, %v6731_v23  ;;  %v6740_v17 = vld [vmem:[#allocation31_spill] sm:$0xff]  ;;  %v403_v43 = vsub.f32 %v6710_v1, %v6741_v52  ;;  %v6742_v50 = vld [vmem:[#allocation33_spill] sm:$0xff]  ;;  %v419_v28 = vsub.f32 %v6741_v52, %v6749_v16 }
  0x83   :  { %6722 = vst [vmem:[#allocation59_spill] sm:$0xff] %v3627_v30  ;;  %6723 = vst [vmem:[#allocation69_spill] sm:$0xff] %v3629_v44  ;;  %v400_v44 = vsub.f32 %v6658_v15, %v6738_v39  ;;  %v6739_v30 = vld [vmem:[#allocation29_spill] sm:$0xff]  ;;  %v402_v57 = vsub.f32 %v6708_v56, %v6740_v17  ;;  %v404_v60 = vsub.f32 %v6713_v5, %v6742_v50 }
  0x84   :  { %6724 = vst [vmem:[#allocation113_spill] sm:$0xff] %v3631_v61  ;;  %6728 = vst [vmem:[#allocation11_spill] sm:$0xff] %v3636_v40  ;;  %v399_v61 = vsub.f32 %v6726_v12, %v6600_v55  ;;  %v401_v23 = vsub.f32 %v6664_v6, %v6739_v30  ;;  %v6748_v40 = vld [vmem:[#allocation22_spill] sm:$0xff]  ;;  %v420_v19 = vsub.f32 %v6742_v50, %v6751_v29 }
  0x85   :  { %6730 = vst [vmem:[#allocation30_spill] sm:$0xff] %v3641_v7  ;;  %6732 = vst [vmem:[#allocation114_spill] sm:$0xff] %v3646_v54  ;;  %v6747_v54 = vld [vmem:[#allocation21_spill] sm:$0xff]  ;;  %v418_v25 = vsub.f32 %v6740_v17, %v6748_v40  ;;  %v3698_v40 = vmul.f32 0.5, %v403_v43  ;;  %v3700_v16 = vmul.f32 0.5, %v404_v60  ;;  %v6768_v60 = vld [vmem:[#allocation71_spill] sm:$0xff] }
  0x86   :  { %6733 = vst [vmem:[#allocation115_spill] sm:$0xff] %v3648_v48  ;;  %6734 = vst [vmem:[#allocation116_spill] sm:$0xff] %v3650_v10  ;;  %v6746_v10 = vld [vmem:[#allocation20_spill] sm:$0xff]  ;;  %v417_v7 = vsub.f32 %v6739_v30, %v6747_v54  ;;  %v3684_v0 = vmul.f32 0.5, %v399_v61  ;;  %v3694_v54 = vmul.f32 0.5, %v401_v23  ;;  %v3696_v30 = vmul.f32 0.5, %v402_v57 }
  0x87   :  { %6735 = vst [vmem:[#allocation117_spill] sm:$0xff] %v3652_v49  ;;  %6736 = vst [vmem:[#allocation118_spill] sm:$0xff] %v3654_v31  ;;  %v6745_v31 = vld [vmem:[#allocation19_spill] sm:$0xff]  ;;  %v416_v48 = vsub.f32 %v6738_v39, %v6746_v10  ;;  %v422_v10 = vsub.f32 %v6744_v27, %v6620_v36  ;;  %v3692_v39 = vmul.f32 0.5, %v400_v44  ;;  %v3702_v61 = vmul.f32 0.5, %v405_v24 }
  0x88   :  { %6737 = vst [vmem:[#allocation119_spill] sm:$0xff] %v3656_v51  ;;  %v406_v51 = vsub.f32 %v6716_v21, %v6744_v27  ;;  %v415_v49 = vsub.f32 %v6600_v55, %v6745_v31  ;;  %6750 = vst [vmem:[#allocation31_spill] sm:$0xff] %v3684_v0  ;;  %v421_v31 = vsub.f32 %v6743_v59, %v6617_v45  ;;  %v3710_v59 = vmul.f32 0.5, %v417_v7  ;;  %v6767_v24 = vld [vmem:[#allocation51_spill] sm:$0xff] }
  0x89   :  { %6752 = vst [vmem:[#allocation32_spill] sm:$0xff] %v3692_v39  ;;  %6753 = vst [vmem:[#allocation33_spill] sm:$0xff] %v3694_v54  ;;  %v3708_v45 = vmul.f32 0.5, %v416_v48  ;;  %v3712_v36 = vmul.f32 0.5, %v418_v25  ;;  %v3714_v44 = vmul.f32 0.5, %v419_v28  ;;  %v3716_v23 = vmul.f32 0.5, %v420_v19 }
  0x8a   :  { %6754 = vst [vmem:[#allocation35_spill] sm:$0xff] %v3696_v30  ;;  %6755 = vst [vmem:[#allocation19_spill] sm:$0xff] %v3698_v40  ;;  %v3704_v0 = vmul.f32 0.5, %v406_v51  ;;  %v3706_v29 = vmul.f32 0.5, %v415_v49  ;;  %v3718_v57 = vmul.f32 0.5, %v421_v31  ;;  %v3720_v43 = vmul.f32 0.5, %v422_v10 }
  0x8b   :  { %6756 = vst [vmem:[#allocation20_spill] sm:$0xff] %v3700_v16  ;;  %6757 = vst [vmem:[#allocation21_spill] sm:$0xff] %v3702_v61  ;;  %v431_v51 = vsub.f32 %v6768_v60, %v6767_v24  ;;  %v6770_v49 = vld [vmem:[#allocation72_spill] sm:$0xff]  ;;  %v6771_v48 = vld [vmem:[#allocation58_spill] sm:$0xff]  ;;  %v447_v24 = vmul.f32 %v6662_v26, %v6726_v12  ;;  %v452_v26 = vmul.f32 %v6669_v20, %v6713_v5 }
  0x8c   :  { %6758 = vst [vmem:[#allocation22_spill] sm:$0xff] %v3704_v0  ;;  %6759 = vst [vmem:[#allocation23_spill] sm:$0xff] %v3706_v29  ;;  %v6769_v0 = vld [vmem:[#allocation57_spill] sm:$0xff]  ;;  %v6773_v25 = vld [vmem:[#allocation75_spill] sm:$0xff]  ;;  %v460_v20 = vmul.f32 %v3177_v42, %v6714_v18 }
  0x8d   :  { %6760 = vst [vmem:[#allocation24_spill] sm:$0xff] %v3708_v45  ;;  %6761 = vst [vmem:[#allocation120_spill] sm:$0xff] %v3710_v59  ;;  %v432_v29 = vsub.f32 %v6770_v49, %v6769_v0  ;;  %v6772_v45 = vld [vmem:[#allocation73_spill] sm:$0xff]  ;;  %v6774_v28 = vld [vmem:[#allocation76_spill] sm:$0xff]  ;;  %v455_v0 = vmul.f32 %v6678_v41, %v6725_v62  ;;  %v453_v62 = vmul.f32 %v6670_v9, %v6715_v13 }
  0x8e   :  { %6762 = vst [vmem:[#allocation121_spill] sm:$0xff] %v3712_v36  ;;  %6763 = vst [vmem:[#allocation122_spill] sm:$0xff] %v3714_v44  ;;  %v433_v7 = vsub.f32 %v6772_v45, %v6771_v48  ;;  %v434_v36 = vsub.f32 %v6773_v25, %v6639_v33  ;;  %v435_v19 = vsub.f32 %v6774_v28, %v6643_v46  ;;  %v6776_v31 = vld [vmem:[#allocation81_spill] sm:$0xff]  ;;  %v6777_v10 = vld [vmem:[#allocation67_spill] sm:$0xff] }
  0x8f   :  { %6764 = vst [vmem:[#allocation123_spill] sm:$0xff] %v3716_v23  ;;  %6765 = vst [vmem:[#allocation124_spill] sm:$0xff] %v3718_v57  ;;  %v6775_v23 = vld [vmem:[#allocation64_spill] sm:$0xff]  ;;  %v438_v45 = vsub.f32 %v6650_v53, %v6649_v8  ;;  %v448_v33 = vmul.f32 %v6663_v35, %v6658_v15  ;;  %v449_v46 = vmul.f32 %v6666_v58, %v6664_v6  ;;  %v6779_v35 = vld [vmem:[#allocation61_spill] sm:$0xff]  ;;  %v3772_v25 = vmul.f32 0.5, %v432_v29 }
  0x90   :  { %6766 = vst [vmem:[#allocation125_spill] sm:$0xff] %v3720_v43  ;;  %v436_v57 = vsub.f32 %v6776_v31, %v6775_v23  ;;  %v6778_v43 = vld [vmem:[#allocation87_spill] sm:$0xff]  ;;  %v450_v23 = vmul.f32 %v6667_v38, %v6708_v56  ;;  %v454_v8 = vmul.f32 %v6671_v22, %v6716_v21  ;;  %v456_v53 = vmul.f32 %v6679_v47, %v6659_v11  ;;  %v6780_v38 = vld [vmem:[#allocation65_spill] sm:$0xff]  ;;  %v6866_v16 = vld [vmem:[#allocation48_spill] sm:$0xff] }
  0x91   :  { %v437_v44 = vsub.f32 %v6778_v43, %v6777_v10  ;;  %v451_v43 = vmul.f32 %v6668_v4, %v6710_v1  ;;  %v457_v58 = vmul.f32 %v6779_v35, %v6665_v3  ;;  %v458_v60 = vmul.f32 %v6780_v38, %v6709_v37  ;;  %v6781_v4 = vld [vmem:[#allocation66_spill] sm:$0xff]  ;;  %6783 = vst [vmem:[#allocation71_spill] sm:$0xff] %v3772_v25  ;;  %v6865_v61 = vld [vmem:[#allocation11_spill] sm:$0xff]  ;;  %v6867_v40 = vld [vmem:[#allocation13_spill] sm:$0xff] }
  0x92   :  { %v459_v49 = vmul.f32 %v6781_v4, %v6711_v63  ;;  %v461_v9 = vmul.f32 %v6684_v32, %v6652_v14  ;;  %v462_v22 = vmul.f32 %v3195_v34, %v6655_v2  ;;  %v463_v48 = vsub.f32 %v447_v24, %v455_v0  ;;  %v6868_v30 = vld [vmem:[#allocation38_spill] sm:$0xff] }
  0x93   :  { %v3770_v11 = vmul.f32 0.5, %v431_v51  ;;  %v3774_v3 = vmul.f32 0.5, %v433_v7  ;;  %v3776_v37 = vmul.f32 0.5, %v434_v36  ;;  %v3778_v28 = vmul.f32 0.5, %v435_v19  ;;  %v6791_v7 = vld [vmem:[#allocation28_spill] sm:$0xff]  ;;  %v6792_v19 = vld [vmem:[#allocation29_spill] sm:$0xff] }
  0x94   :  { %v3780_v63 = vmul.f32 0.5, %v436_v57  ;;  %v3782_v18 = vmul.f32 0.5, %v437_v44  ;;  %v3784_v31 = vmul.f32 0.5, %v438_v45  ;;  %v464_v14 = vsub.f32 %v448_v33, %v456_v53  ;;  %v6869_v54 = vld [vmem:[#allocation30_spill] sm:$0xff] }
  0x95   :  { %6782 = vst [vmem:[#allocation51_spill] sm:$0xff] %v3770_v11  ;;  %6784 = vst [vmem:[#allocation57_spill] sm:$0xff] %v3774_v3  ;;  %v465_v10 = vsub.f32 %v449_v46, %v457_v58  ;;  %v466_v2 = vsub.f32 %v450_v23, %v458_v60  ;;  %v467_v24 = vsub.f32 %v451_v43, %v459_v49  ;;  %v3786_v59 = vmul.f32 0.5, %v463_v48  ;;  %v6793_v23 = vld [vmem:[#allocation74_spill] sm:$0xff] }
  0x96   :  { %6785 = vst [vmem:[#allocation72_spill] sm:$0xff] %v3776_v37  ;;  %6786 = vst [vmem:[#allocation58_spill] sm:$0xff] %v3778_v28  ;;  %v468_v51 = vsub.f32 %v452_v26, %v460_v20  ;;  %v469_v0 = vsub.f32 %v453_v62, %v461_v9  ;;  %v470_v29 = vsub.f32 %v454_v8, %v462_v22  ;;  %v6796_v62 = vld [vmem:[#allocation82_spill] sm:$0xff]  ;;  %v3820_v60 = vmul.f32 0.5, %v464_v14  ;;  %v6809_v14 = vld [vmem:[#allocation27_spill] sm:$0xff] }
  0x97   :  { %6787 = vst [vmem:[#allocation73_spill] sm:$0xff] %v3780_v63  ;;  %6788 = vst [vmem:[#allocation75_spill] sm:$0xff] %v3782_v18  ;;  %v479_v36 = vmul.f32 %v6678_v41, %v6600_v55  ;;  %v480_v57 = vmul.f32 %v6679_v47, %v6791_v7  ;;  %v481_v44 = vmul.f32 %v6779_v35, %v6792_v19  ;;  %v6794_v55 = vld [vmem:[#allocation77_spill] sm:$0xff]  ;;  %v6795_v47 = vld [vmem:[#allocation78_spill] sm:$0xff] }
  0x98   :  { %6789 = vst [vmem:[#allocation76_spill] sm:$0xff] %v3784_v31  ;;  %6790 = vst [vmem:[#allocation64_spill] sm:$0xff] %v3786_v59  ;;  %v482_v45 = vmul.f32 %v6780_v38, %v6740_v17  ;;  %v483_v33 = vmul.f32 %v6781_v4, %v6741_v52  ;;  %v484_v46 = vmul.f32 %v3177_v42, %v6742_v50  ;;  %v6797_v17 = vld [vmem:[#allocation83_spill] sm:$0xff]  ;;  %v6798_v52 = vld [vmem:[#allocation84_spill] sm:$0xff]  ;;  %v3826_v4 = vmul.f32 0.5, %v467_v24 }
  0x99   :  { %v487_v43 = vmul.f32 %v6793_v23, %v6726_v12  ;;  %v488_v41 = vmul.f32 %v6794_v55, %v6658_v15  ;;  %v489_v26 = vmul.f32 %v6795_v47, %v6664_v6  ;;  %v490_v8 = vmul.f32 %v6796_v62, %v6708_v56  ;;  %v6799_v58 = vld [vmem:[#allocation34_spill] sm:$0xff]  ;;  %v6800_v15 = vld [vmem:[#allocation89_spill] sm:$0xff]  ;;  %6802 = vst [vmem:[#allocation81_spill] sm:$0xff] %v3820_v60  ;;  %v6812_v24 = vld [vmem:[#allocation96_spill] sm:$0xff] }
  0x9a   :  { %v491_v53 = vmul.f32 %v6797_v17, %v6710_v1  ;;  %v492_v35 = vmul.f32 %v6798_v52, %v6713_v5  ;;  %v485_v42 = vmul.f32 %v6684_v32, %v6799_v58  ;;  %v486_v12 = vmul.f32 %v3195_v34, %v6744_v27  ;;  %v6801_v6 = vld [vmem:[#allocation90_spill] sm:$0xff]  ;;  %6805 = vst [vmem:[#allocation61_spill] sm:$0xff] %v3826_v4  ;;  %v6811_v7 = vld [vmem:[#allocation25_spill] sm:$0xff]  ;;  %v6815_v55 = vld [vmem:[#allocation91_spill] sm:$0xff] }
  0x9b   :  { %v493_v50 = vmul.f32 %v6800_v15, %v6715_v13  ;;  %v494_v38 = vmul.f32 %v6801_v6, %v6716_v21  ;;  %v3822_v56 = vmul.f32 0.5, %v465_v10  ;;  %v3824_v1 = vmul.f32 0.5, %v466_v2  ;;  %v6810_v10 = vld [vmem:[#allocation95_spill] sm:$0xff]  ;;  %v6814_v23 = vld [vmem:[#allocation97_spill] sm:$0xff]  ;;  %v3866_v15 = vld [vmem:[#allocation2 + $0x18] sm:$0xff] }
  0x9c   :  { %v3828_v5 = vmul.f32 0.5, %v468_v51  ;;  %v3830_v32 = vmul.f32 0.5, %v469_v0  ;;  %v495_v49 = vsub.f32 %v479_v36, %v487_v43  ;;  %v496_v34 = vsub.f32 %v480_v57, %v488_v41  ;;  %v6813_v51 = vld [vmem:[#allocation26_spill] sm:$0xff]  ;;  %v6821_v43 = vld [vmem:[#allocation93_spill] sm:$0xff]  ;;  %v6822_v41 = vld [vmem:[#allocation100_spill] sm:$0xff]  ;;  %6830 = vst [vmem:[#allocation34_spill] sm:$0xff] %v3866_v15 }
  0x9d   :  { %6803 = vst [vmem:[#allocation67_spill] sm:$0xff] %v3822_v56  ;;  %6804 = vst [vmem:[#allocation87_spill] sm:$0xff] %v3824_v1  ;;  %v497_v27 = vsub.f32 %v481_v44, %v489_v26  ;;  %v498_v20 = vsub.f32 %v482_v45, %v490_v8  ;;  %v499_v13 = vsub.f32 %v483_v33, %v491_v53  ;;  %v3832_v22 = vmul.f32 0.5, %v470_v29  ;;  %v6816_v36 = vld [vmem:[#allocation98_spill] sm:$0xff]  ;;  %v6817_v44 = vld [vmem:[#allocation92_spill] sm:$0xff] }
  0x9e   :  { %6806 = vst [vmem:[#allocation65_spill] sm:$0xff] %v3828_v5  ;;  %6807 = vst [vmem:[#allocation66_spill] sm:$0xff] %v3830_v32  ;;  %v500_v9 = vsub.f32 %v484_v46, %v492_v35  ;;  %v501_v21 = vsub.f32 %v485_v42, %v493_v50  ;;  %v502_v48 = vsub.f32 %v486_v12, %v494_v38  ;;  %v6818_v45 = vld [vmem:[#allocation99_spill] sm:$0xff]  ;;  %v3844_v46 = vmul.f32 0.5, %v495_v49  ;;  %v6823_v26 = vld [vmem:[#allocation94_spill] sm:$0xff] }
  0x9f   :  { %6808 = vst [vmem:[#allocation28_spill] sm:$0xff] %v3832_v22  ;;  %v511_v2 = vsub.f32 %v6810_v10, %v6809_v14  ;;  %v512_v19 = vsub.f32 %v6812_v24, %v6811_v7  ;;  %v513_v0 = vsub.f32 %v6814_v23, %v6813_v51  ;;  %v514_v57 = vsub.f32 %v6816_v36, %v6815_v55  ;;  %v6824_v62 = vld [vmem:[#allocation101_spill] sm:$0xff]  ;;  %v3852_v17 = vld [vmem:[#allocation2] sm:$0xff]  ;;  %v3854_v53 = vld [vmem:[#allocation2 + $0x8] sm:$0xff] }
  0xa0   :  { %v515_v33 = vsub.f32 %v6818_v45, %v6817_v44  ;;  %6819 = vst [vmem:[#allocation29_spill] sm:$0xff] %v3844_v46  ;;  %v3846_v29 = vmul.f32 0.5, %v496_v34  ;;  %v516_v47 = vsub.f32 %v6822_v41, %v6821_v43  ;;  %v517_v8 = vsub.f32 %v6824_v62, %v6823_v26  ;;  %v3856_v52 = vld [vmem:[#allocation2 + $0x10] sm:$0xff]  ;;  %v3868_v50 = vld [vmem:[#allocation2 + $0x40] sm:$0xff]  ;;  %v6833_v49 = vld [vmem:[#allocation102_spill] sm:$0xff] }
  0xa1   :  { %6825 = vst [vmem:[#allocation77_spill] sm:$0xff] %v3856_v52  ;;  %v3858_v35 = vmul.f32 0.5, %v497_v27  ;;  %v3860_v58 = vmul.f32 0.5, %v498_v20  ;;  %v3862_v42 = vmul.f32 0.5, %v499_v13  ;;  %v3864_v12 = vmul.f32 0.5, %v500_v9  ;;  %v6834_v34 = vld [vmem:[#allocation103_spill] sm:$0xff] }
  0xa2   :  { %6820 = vst [vmem:[#allocation74_spill] sm:$0xff] %v3846_v29  ;;  %v3870_v6 = vmul.f32 0.5, %v501_v21  ;;  %v3872_v38 = vmul.f32 0.5, %v502_v48  ;;  %v518_v14 = vsub.f32 %v6834_v34, %v6833_v49  ;;  %v3876_v10 = vmul.f32 0.5, %v511_v2  ;;  %v3878_v27 = vld [vmem:[#allocation2 + $0x20] sm:$0xff]  ;;  %v3880_v20 = vld [vmem:[#allocation2 + $0x48] sm:$0xff] }
  0xa3   :  { %6826 = vst [vmem:[#allocation78_spill] sm:$0xff] %v3858_v35  ;;  %6827 = vst [vmem:[#allocation82_spill] sm:$0xff] %v3860_v58  ;;  %v3882_v13 = vld [vmem:[#allocation2 + $0x50] sm:$0xff]  ;;  %v3884_v9 = vmul.f32 0.5, %v512_v19  ;;  %v3886_v7 = vmul.f32 0.5, %v513_v0  ;;  %v3888_v24 = vmul.f32 0.5, %v514_v57 }
  0xa4   :  { %6828 = vst [vmem:[#allocation83_spill] sm:$0xff] %v3862_v42  ;;  %6829 = vst [vmem:[#allocation84_spill] sm:$0xff] %v3864_v12  ;;  %v3890_v21 = vmul.f32 0.5, %v515_v33  ;;  %v3892_v48 = vld [vmem:[#allocation2 + $0x28] sm:$0xff]  ;;  %v3894_v51 = vld [vmem:[#allocation2 + $0x30] sm:$0xff]  ;;  %v3896_v2 = vmul.f32 0.5, %v516_v47 }
  0xa5   :  { %6831 = vst [vmem:[#allocation89_spill] sm:$0xff] %v3870_v6  ;;  %6832 = vst [vmem:[#allocation90_spill] sm:$0xff] %v3872_v38  ;;  %v3898_v23 = vmul.f32 0.5, %v517_v8  ;;  %v3900_v55 = vld [vmem:[#allocation2 + $0x38] sm:$0xff]  ;;  %v3904_v19 = vld [vmem:[#allocation2 + $0x60] sm:$0xff] }
  0xa6   :  { %6835 = vst [vmem:[#allocation27_spill] sm:$0xff] %v3876_v10  ;;  %6836 = vst [vmem:[#allocation95_spill] sm:$0xff] %v3878_v27  ;;  %v3902_v36 = vld [vmem:[#allocation2 + $0x58] sm:$0xff]  ;;  %v6847_v0 = vld [vmem:[#allocation85_spill] sm:$0xff] }
  0xa7   :  { %6837 = vst [vmem:[#allocation25_spill] sm:$0xff] %v3880_v20  ;;  %6838 = vst [vmem:[#allocation96_spill] sm:$0xff] %v3882_v13  ;;  %v544_v57 = vmul.f32 %v3852_v17, %v6847_v0  ;;  %v6848_v44 = vld [vmem:[#allocation40_spill] sm:$0xff]  ;;  %v3912_v43 = vld [vmem:[#allocation2 + $0x70] sm:$0xff] }
  0xa8   :  { %6839 = vst [vmem:[#allocation26_spill] sm:$0xff] %v3884_v9  ;;  %6840 = vst [vmem:[#allocation97_spill] sm:$0xff] %v3886_v7  ;;  %v552_v45 = vmul.f32 %v3868_v50, %v6848_v44  ;;  %v3910_v33 = vld [vmem:[#allocation2 + $0x68] sm:$0xff]  ;;  %v3914_v41 = vld [vmem:[#allocation2 + $0x78] sm:$0xff] }
  0xa9   :  { %6841 = vst [vmem:[#allocation91_spill] sm:$0xff] %v3888_v24  ;;  %6842 = vst [vmem:[#allocation98_spill] sm:$0xff] %v3890_v21  ;;  %v6849_v47 = vld [vmem:[#allocation86_spill] sm:$0xff]  ;;  %v6850_v62 = vld [vmem:[#allocation68_spill] sm:$0xff] }
  0xaa   :  { %6843 = vst [vmem:[#allocation92_spill] sm:$0xff] %v3892_v48  ;;  %6844 = vst [vmem:[#allocation99_spill] sm:$0xff] %v3896_v2  ;;  %v545_v26 = vmul.f32 %v3854_v53, %v6849_v47  ;;  %v546_v8 = vmul.f32 %v3856_v52, %v6850_v62  ;;  %v6851_v49 = vld [vmem:[#allocation41_spill] sm:$0xff]  ;;  %v6852_v38 = vld [vmem:[#allocation42_spill] sm:$0xff]  ;;  %v560_v35 = vadd.f32 %v552_v45, %v544_v57 }
  0xab   :  { %6845 = vst [vmem:[#allocation93_spill] sm:$0xff] %v3898_v23  ;;  %6846 = vst [vmem:[#allocation100_spill] sm:$0xff] %v3902_v36  ;;  %v553_v34 = vmul.f32 %v3880_v20, %v6851_v49  ;;  %v554_v0 = vmul.f32 %v3882_v13, %v6852_v38  ;;  %v3924_v23 = vmul.f32 0.5, %v518_v14  ;;  %v6854_v44 = vld [vmem:[#allocation88_spill] sm:$0xff]  ;;  %v6855_v21 = vld [vmem:[#allocation17_spill] sm:$0xff]  ;;  %v593_v57 = vmul.f32 %v3880_v20, %v6869_v54 }
  0xac   :  { %v547_v2 = vmul.f32 %v3866_v15, %v6854_v44  ;;  %v548_v24 = vmul.f32 %v3878_v27, %v6855_v21  ;;  %v6856_v7 = vld [vmem:[#allocation18_spill] sm:$0xff]  ;;  %v6857_v6 = vld [vmem:[#allocation47_spill] sm:$0xff]  ;;  %v6858_v12 = vld [vmem:[#allocation12_spill] sm:$0xff] }
  0xad   :  { %6853 = vst [vmem:[#allocation94_spill] sm:$0xff] %v3924_v23  ;;  %v549_v47 = vmul.f32 %v3892_v48, %v6856_v7  ;;  %v550_v62 = vmul.f32 %v3894_v51, %v6857_v6  ;;  %v551_v49 = vmul.f32 %v3900_v55, %v6858_v12  ;;  %v6859_v9 = vld [vmem:[#allocation43_spill] sm:$0xff]  ;;  %v6860_v14 = vld [vmem:[#allocation44_spill] sm:$0xff]  ;;  %v6861_v10 = vld [vmem:[#allocation46_spill] sm:$0xff]  ;;  %v561_v6 = vadd.f32 %v553_v34, %v545_v26 }
  0xae   :  { %v555_v38 = vmul.f32 %v3902_v36, %v6859_v9  ;;  %v556_v23 = vmul.f32 %v3904_v19, %v6860_v14  ;;  %v557_v44 = vmul.f32 %v3910_v33, %v6861_v10  ;;  %v6862_v42 = vld [vmem:[#allocation62_spill] sm:$0xff]  ;;  %v6863_v58 = vld [vmem:[#allocation79_spill] sm:$0xff]  ;;  %v562_v29 = vadd.f32 %v554_v0, %v546_v8  ;;  %v6864_v46 = vld [vmem:[#allocation36_spill] sm:$0xff] }
  0xaf   :  { %v558_v21 = vmul.f32 %v3912_v43, %v6862_v42  ;;  %v559_v7 = vmul.f32 %v3914_v41, %v6863_v58  ;;  %v584_v12 = vmul.f32 %v3852_v17, %v6864_v46  ;;  %v592_v9 = vmul.f32 %v3868_v50, %v6865_v61  ;;  %v6870_v45 = vld [vmem:[#allocation39_spill] sm:$0xff]  ;;  %v6871_v26 = vld [vmem:[#allocation114_spill] sm:$0xff]  ;;  %v6873_v46 = vld [vmem:[#allocation116_spill] sm:$0xff] }
  0xb0   :  { %v585_v14 = vmul.f32 %v3854_v53, %v6866_v16  ;;  %v586_v10 = vmul.f32 %v3856_v52, %v6867_v40  ;;  %v587_v42 = vmul.f32 %v3866_v15, %v6868_v30  ;;  %v588_v0 = vmul.f32 %v3878_v27, %v6870_v45  ;;  %v6872_v34 = vld [vmem:[#allocation115_spill] sm:$0xff]  ;;  %v6874_v52 = vld [vmem:[#allocation49_spill] sm:$0xff]  ;;  %v6876_v39 = vld [vmem:[#allocation50_spill] sm:$0xff] }
  0xb1   :  { %v594_v8 = vmul.f32 %v3882_v13, %v6871_v26  ;;  %v595_v61 = vmul.f32 %v3902_v36, %v6872_v34  ;;  %v596_v16 = vmul.f32 %v3904_v19, %v6873_v46  ;;  %v563_v58 = vadd.f32 %v555_v38, %v547_v2  ;;  %v6875_v15 = vld [vmem:[#allocation117_spill] sm:$0xff]  ;;  %v6877_v27 = vld [vmem:[#allocation118_spill] sm:$0xff]  ;;  %v6879_v38 = vld [vmem:[#allocation119_spill] sm:$0xff] }
  0xb2   :  { %v564_v40 = vadd.f32 %v556_v23, %v548_v24  ;;  %v589_v30 = vmul.f32 %v3892_v48, %v6874_v52  ;;  %v597_v54 = vmul.f32 %v3910_v33, %v6875_v15  ;;  %v565_v20 = vadd.f32 %v557_v44, %v549_v47  ;;  %v6878_v36 = vld [vmem:[#allocation53_spill] sm:$0xff] }
  0xb3   :  { %v590_v45 = vmul.f32 %v3894_v51, %v6876_v39  ;;  %v598_v26 = vmul.f32 %v3912_v43, %v6877_v27  ;;  %v600_v13 = vadd.f32 %v592_v9, %v584_v12  ;;  %v566_v34 = vadd.f32 %v558_v21, %v550_v62 }
  0xb4   :  { %v591_v46 = vmul.f32 %v3900_v55, %v6878_v36  ;;  %v599_v24 = vmul.f32 %v3914_v41, %v6879_v38  ;;  %v601_v2 = vadd.f32 %v593_v57, %v585_v14  ;;  %v567_v23 = vadd.f32 %v559_v7, %v551_v49  ;;  %v6891_v57 = vld [vmem:[#allocation33_spill] sm:$0xff] }
  0xb5   :  { %v602_v52 = vadd.f32 %v594_v8, %v586_v10  ;;  %v603_v48 = vadd.f32 %v595_v61, %v587_v42  ;;  %v604_v15 = vadd.f32 %v596_v16, %v588_v0  ;;  %v568_v44 = vadd.f32 %v560_v35, %v3770_v11  ;;  %v6881_v8 = vld [vmem:[#allocation70_spill] sm:$0xff] }
  0xb6   :  { %v569_v47 = vadd.f32 %v561_v6, %v3772_v25  ;;  %v570_v39 = vadd.f32 %v562_v29, %v3774_v3  ;;  %v605_v27 = vadd.f32 %v597_v54, %v589_v30  ;;  %v571_v12 = vadd.f32 %v563_v58, %v3776_v37 }
  0xb7   :  { %v572_v9 = vadd.f32 %v564_v40, %v3778_v28  ;;  %v606_v21 = vadd.f32 %v598_v26, %v590_v45  ;;  %v608_v62 = vadd.f32 %v600_v13, %v3786_v59  ;;  %v573_v14 = vadd.f32 %v565_v20, %v3780_v63  ;;  %v6880_v26 = vld [vmem:[#allocation60_spill] sm:$0xff]  ;;  %v6902_v63 = vld [vmem:[#allocation22_spill] sm:$0xff] }
  0xb8   :  { %v3986_v10 = vadd.f32 %v566_v34, %v3782_v18  ;;  %v607_v16 = vadd.f32 %v599_v24, %v591_v46  ;;  %v609_v61 = vadd.f32 %v601_v2, %v3820_v60  ;;  %v3990_v35 = vadd.f32 %v567_v23, %v3784_v31  ;;  %v6882_v24 = vld [vmem:[#allocation31_spill] sm:$0xff]  ;;  %v6883_v23 = vld [vmem:[#allocation32_spill] sm:$0xff] }
  0xb9   :  { %v610_v30 = vadd.f32 %v602_v52, %v3822_v56  ;;  %v611_v54 = vadd.f32 %v603_v48, %v3824_v1  ;;  %v612_v40 = vadd.f32 %v604_v15, %v3826_v4  ;;  %v576_v29 = vand.u32 2147483647, %v568_v44  ;;  %v6884_v44 = vld [vmem:[#allocation25_spill] sm:$0xff]  ;;  %v6898_v4 = vld [vmem:[#allocation111_spill] sm:$0xff]  ;;  %v6899_v1 = vld [vmem:[#allocation20_spill] sm:$0xff] }
  0xba   :  { %v577_v58 = vand.u32 2147483647, %v569_v47  ;;  %v578_v42 = vand.u32 2147483647, %v570_v39  ;;  %v613_v6 = vadd.f32 %v605_v27, %v3828_v5  ;;  %v579_v20 = vand.u32 2147483647, %v571_v12 }
  0xbb   :  { %v580_v13 = vand.u32 2147483647, %v572_v9  ;;  %v3997_v46 = vadd.f32 %v606_v21, %v3830_v32  ;;  %v616_v7 = vand.u32 2147483647, %v608_v62  ;;  %v581_v49 = vand.u32 2147483647, %v573_v14 }
  0xbc   :  { %v4001_v52 = vadd.f32 %v607_v16, %v3832_v22  ;;  %v617_v48 = vand.u32 2147483647, %v609_v61  ;;  %v618_v45 = vand.u32 2147483647, %v610_v30  ;;  %v619_v15 = vand.u32 2147483647, %v611_v54 }
  0xbd   :  { %v620_v0 = vand.u32 2147483647, %v612_v40  ;;  %v632_v39 = vmul.f32 %v3852_v17, %v6880_v26  ;;  %v621_v27 = vand.u32 2147483647, %v613_v6  ;;  %v633_v34 = vmul.f32 %v3854_v53, %v6881_v8  ;;  %v6885_v21 = vld [vmem:[#allocation105_spill] sm:$0xff]  ;;  %v6887_v16 = vld [vmem:[#allocation106_spill] sm:$0xff] }
  0xbe   :  { %v640_v2 = vmul.f32 %v3868_v50, %v6882_v24  ;;  %v641_v47 = vmul.f32 %v6884_v44, %v6883_v23  ;;  %v622_v12 = vand.u32 2147483647, %v3997_v46  ;;  %v624_v9 = vadd.f32 %v616_v7, %v576_v29  ;;  %v6886_v62 = vld [vmem:[#allocation77_spill] sm:$0xff]  ;;  %v6888_v61 = vld [vmem:[#allocation34_spill] sm:$0xff]  ;;  %v6889_v54 = vld [vmem:[#allocation107_spill] sm:$0xff] }
  0xbf   :  { %v634_v14 = vmul.f32 %v6886_v62, %v6885_v21  ;;  %v635_v30 = vmul.f32 %v6888_v61, %v6887_v16  ;;  %v6890_v40 = vld [vmem:[#allocation95_spill] sm:$0xff]  ;;  %v6892_v8 = vld [vmem:[#allocation96_spill] sm:$0xff]  ;;  %v6896_v46 = vld [vmem:[#allocation110_spill] sm:$0xff]  ;;  %v638_v21 = vmul.f32 %v3894_v51, %v6898_v4  ;;  %v645_v16 = vmul.f32 %v3910_v33, %v6899_v1 }
  0xc0   :  { %v636_v6 = vmul.f32 %v6890_v40, %v6889_v54  ;;  %v642_v26 = vmul.f32 %v6892_v8, %v6891_v57  ;;  %v6893_v22 = vld [vmem:[#allocation35_spill] sm:$0xff]  ;;  %v6894_v24 = vld [vmem:[#allocation100_spill] sm:$0xff]  ;;  %v6900_v56 = vld [vmem:[#allocation21_spill] sm:$0xff]  ;;  %v625_v60 = vadd.f32 %v617_v48, %v577_v58  ;;  %v4032_v57 = vadd.f32 %v618_v45, %v578_v42 }
  0xc1   :  { %v643_v32 = vmul.f32 %v6894_v24, %v6893_v22  ;;  %v6895_v5 = vld [vmem:[#allocation19_spill] sm:$0xff]  ;;  %v6897_v29 = vld [vmem:[#allocation92_spill] sm:$0xff]  ;;  %v646_v54 = vmul.f32 %v3912_v43, %v6900_v56  ;;  %v648_v59 = vadd.f32 %v640_v2, %v632_v39  ;;  %v649_v22 = vadd.f32 %v641_v47, %v633_v34 }
  0xc2   :  { %v644_v23 = vmul.f32 %v3904_v19, %v6895_v5  ;;  %v637_v7 = vmul.f32 %v6897_v29, %v6896_v46  ;;  %v4034_v31 = vadd.f32 %v619_v15, %v579_v20  ;;  %v4036_v5 = vadd.f32 %v620_v0, %v580_v13  ;;  %v6901_v46 = vld [vmem:[#allocation112_spill] sm:$0xff]  ;;  %v6904_v20 = vld [vmem:[#allocation54_spill] sm:$0xff]  ;;  %v6905_v15 = vld [vmem:[#allocation29_spill] sm:$0xff] }
  0xc3   :  { %v4038_v18 = vadd.f32 %v621_v27, %v581_v49  ;;  %v639_v4 = vmul.f32 %v3900_v55, %v6901_v46  ;;  %v647_v1 = vmul.f32 %v3914_v41, %v6902_v63  ;;  %v650_v28 = vadd.f32 %v642_v26, %v634_v14  ;;  %v6903_v48 = vld [vmem:[#allocation52_spill] sm:$0xff]  ;;  %v6906_v0 = vld [vmem:[#allocation74_spill] sm:$0xff]  ;;  %v6907_v27 = vld [vmem:[#allocation15_spill] sm:$0xff] }
  0xc4   :  { %v651_v37 = vadd.f32 %v643_v32, %v635_v30  ;;  %v652_v56 = vadd.f32 %v644_v23, %v636_v6  ;;  %v653_v58 = vadd.f32 %v645_v16, %v637_v7  ;;  %v654_v42 = vadd.f32 %v646_v54, %v638_v21  ;;  %v6908_v2 = vld [vmem:[#allocation55_spill] sm:$0xff]  ;;  %v6909_v32 = vld [vmem:[#allocation16_spill] sm:$0xff]  ;;  %v6913_v16 = vld [vmem:[#allocation69_spill] sm:$0xff] }
  0xc5   :  { %v680_v45 = vmul.f32 %v3852_v17, %v6903_v48  ;;  %v681_v13 = vmul.f32 %v3854_v53, %v6904_v20  ;;  %v656_v49 = vadd.f32 %v648_v59, %v6905_v15  ;;  %v657_v39 = vadd.f32 %v649_v22, %v6906_v0  ;;  %v6910_v47 = vld [vmem:[#allocation59_spill] sm:$0xff]  ;;  %v6912_v53 = vld [vmem:[#allocation24_spill] sm:$0xff]  ;;  %v6915_v54 = vld [vmem:[#allocation121_spill] sm:$0xff] }
  0xc6   :  { %v682_v34 = vmul.f32 %v6886_v62, %v6907_v27  ;;  %v683_v26 = vmul.f32 %v6888_v61, %v6908_v2  ;;  %v684_v23 = vmul.f32 %v6890_v40, %v6909_v32  ;;  %v685_v21 = vmul.f32 %v6897_v29, %v6910_v47  ;;  %v6911_v17 = vld [vmem:[#allocation23_spill] sm:$0xff]  ;;  %v6914_v30 = vld [vmem:[#allocation120_spill] sm:$0xff]  ;;  %v6916_v6 = vld [vmem:[#allocation122_spill] sm:$0xff] }
  0xc7   :  { %v688_v14 = vmul.f32 %v3868_v50, %v6911_v17  ;;  %v689_v59 = vmul.f32 %v6884_v44, %v6912_v53  ;;  %v686_v22 = vmul.f32 %v3894_v51, %v6913_v16  ;;  %v690_v62 = vmul.f32 %v6892_v8, %v6914_v30  ;;  %v6917_v7 = vld [vmem:[#allocation123_spill] sm:$0xff]  ;;  %v6918_v47 = vld [vmem:[#allocation124_spill] sm:$0xff]  ;;  %v6919_v53 = vld [vmem:[#allocation78_spill] sm:$0xff] }
  0xc8   :  { %v691_v61 = vmul.f32 %v6894_v24, %v6915_v54  ;;  %v692_v40 = vmul.f32 %v3904_v19, %v6916_v6  ;;  %v693_v29 = vmul.f32 %v3910_v33, %v6917_v7  ;;  %v694_v50 = vmul.f32 %v3912_v43, %v6918_v47  ;;  %v6920_v51 = vld [vmem:[#allocation82_spill] sm:$0xff]  ;;  %v6921_v2 = vld [vmem:[#allocation83_spill] sm:$0xff]  ;;  %v6925_v43 = vld [vmem:[#allocation84_spill] sm:$0xff] }
  0xc9   :  { %v696_v17 = vadd.f32 %v688_v14, %v680_v45  ;;  %v697_v44 = vadd.f32 %v689_v59, %v681_v13  ;;  %v658_v32 = vadd.f32 %v650_v28, %v6919_v53  ;;  %v659_v16 = vadd.f32 %v651_v37, %v6920_v51  ;;  %v6922_v54 = vld [vmem:[#allocation27_spill] sm:$0xff]  ;;  %v6923_v19 = vld [vmem:[#allocation26_spill] sm:$0xff]  ;;  %v6926_v14 = vld [vmem:[#allocation89_spill] sm:$0xff] }
  0xca   :  { %v660_v8 = vadd.f32 %v652_v56, %v6921_v2  ;;  %v664_v30 = vand.u32 2147483647, %v656_v49  ;;  %v665_v27 = vand.u32 2147483647, %v657_v39  ;;  %v698_v24 = vadd.f32 %v690_v62, %v682_v34 }
  0xcb   :  { %v704_v20 = vadd.f32 %v696_v17, %v6922_v54  ;;  %v705_v6 = vadd.f32 %v697_v44, %v6923_v19  ;;  %v6924_v33 = vand.u32 2147483647, %v3986_v10  ;;  %v655_v48 = vadd.f32 %v647_v1, %v639_v4  ;;  %v6927_v17 = vld [vmem:[#allocation97_spill] sm:$0xff] }
  0xcc   :  { %v661_v45 = vadd.f32 %v653_v58, %v6925_v43  ;;  %v699_v13 = vadd.f32 %v691_v61, %v683_v26  ;;  %v662_v28 = vadd.f32 %v654_v42, %v6926_v14  ;;  %v700_v59 = vadd.f32 %v692_v40, %v684_v23  ;;  %v6929_v4 = vld [vmem:[#allocation125_spill] sm:$0xff]  ;;  %v6930_v42 = vld [vmem:[#allocation91_spill] sm:$0xff] }
  0xcd   :  { %v630_v7 = vadd.f32 %v622_v12, %v6924_v33  ;;  %v701_v37 = vadd.f32 %v693_v29, %v685_v21  ;;  %v702_v47 = vadd.f32 %v694_v50, %v686_v22  ;;  %v666_v56 = vand.u32 2147483647, %v658_v32  ;;  %v6928_v12 = vld [vmem:[#allocation113_spill] sm:$0xff]  ;;  %v6931_v21 = vld [vmem:[#allocation98_spill] sm:$0xff] }
  0xce   :  { %v667_v49 = vand.u32 2147483647, %v659_v16  ;;  %v668_v39 = vand.u32 2147483647, %v660_v8  ;;  %v672_v34 = vadd.f32 %v664_v30, %v624_v9  ;;  %v673_v62 = vadd.f32 %v665_v27, %v625_v60  ;;  %v6932_v16 = vld [vmem:[#allocation99_spill] sm:$0xff]  ;;  %v6933_v9 = vld [vmem:[#allocation93_spill] sm:$0xff] }
  0xcf   :  { %v706_v54 = vadd.f32 %v698_v24, %v6927_v17  ;;  %v712_v44 = vand.u32 2147483647, %v704_v20  ;;  %v713_v19 = vand.u32 2147483647, %v705_v6  ;;  %v669_v10 = vand.u32 2147483647, %v661_v45 }
  0xd0   :  { %v687_v1 = vmul.f32 %v3900_v55, %v6928_v12  ;;  %v695_v58 = vmul.f32 %v3914_v41, %v6929_v4  ;;  %v707_v26 = vadd.f32 %v699_v13, %v6930_v42  ;;  %v670_v23 = vand.u32 2147483647, %v662_v28  ;;  %v6934_v30 = vld [vmem:[#allocation90_spill] sm:$0xff]  ;;  %v6964_v4 = vld [vmem:[#allocation79_spill] sm:$0xff] }
  0xd1   :  { %v708_v32 = vadd.f32 %v700_v59, %v6931_v21  ;;  %v709_v22 = vadd.f32 %v701_v37, %v6932_v16  ;;  %v710_v60 = vadd.f32 %v702_v47, %v6933_v9  ;;  %v583_v27 = vand.u32 2147483647, %v3990_v35  ;;  %v6958_v9 = vld [vmem:[#allocation47_spill] sm:$0xff]  ;;  %v6959_v16 = vld [vmem:[#allocation12_spill] sm:$0xff]  ;;  %v6962_v42 = vld [vmem:[#allocation46_spill] sm:$0xff] }
  0xd2   :  { %v623_v20 = vand.u32 2147483647, %v4001_v52  ;;  %v663_v61 = vadd.f32 %v655_v48, %v6934_v30  ;;  %v674_v55 = vadd.f32 %v666_v56, %v4032_v57  ;;  %v675_v6 = vadd.f32 %v667_v49, %v4034_v31  ;;  %v6935_v52 = vld [vmem:[#allocation63_spill] sm:$0xff]  ;;  %v6937_v48 = vld [vmem:[#allocation80_spill] sm:$0xff]  ;;  %v6939_v31 = vld [vmem:[#allocation37_spill] sm:$0xff] }
  0xd3   :  { %v714_v41 = vand.u32 2147483647, %v706_v54  ;;  %v720_v40 = vadd.f32 %v712_v44, %v672_v34  ;;  %v721_v29 = vadd.f32 %v713_v19, %v673_v62  ;;  %v676_v50 = vadd.f32 %v668_v39, %v4036_v5  ;;  %v6940_v56 = vld [vmem:[#allocation45_spill] sm:$0xff]  ;;  %v6941_v39 = vld [vmem:[#allocation94_spill] sm:$0xff] }
  0xd4   :  { %v677_v8 = vadd.f32 %v669_v10, %v4038_v18  ;;  %v703_v24 = vadd.f32 %v695_v58, %v687_v1  ;;  %v715_v33 = vand.u32 2147483647, %v707_v26  ;;  %v678_v47 = vadd.f32 %v670_v23, %v630_v7  ;;  %v4106_v10 = vld [vmem:[#allocation2 + $0x80] sm:$0xff]  ;;  %v4108_v1 = vld [vmem:[#allocation2 + $0x88] sm:$0xff]  ;;  %v4110_v58 = vld [vmem:[#allocation2 + $0x90] sm:$0xff] }
  0xd5   :  { %v716_v45 = vand.u32 2147483647, %v708_v32  ;;  %v717_v35 = vand.u32 2147483647, %v709_v22  ;;  %v718_v13 = vand.u32 2147483647, %v710_v60  ;;  %v722_v37 = vadd.f32 %v714_v41, %v674_v55 }
  0xd6   :  { %v6936_v28 = vand.u32 2147483647, %v6935_v52  ;;  %v6938_v59 = vand.u32 2147483647, %v6937_v48  ;;  %v728_v54 = vmul.f32 %v6939_v31, %v720_v40  ;;  %v729_v19 = vmul.f32 %v6940_v56, %v721_v29  ;;  %v6942_v26 = vld [vmem:[#allocation56_spill] sm:$0xff]  ;;  %v4113_v60 = vld [vmem:[#allocation2 + $0xc0] sm:$0xff] }
  0xd7   :  { %v631_v49 = vadd.f32 %v623_v20, %v583_v27  ;;  %v671_v5 = vand.u32 2147483647, %v663_v61  ;;  %v711_v18 = vadd.f32 %v703_v24, %v6941_v39  ;;  %v723_v34 = vadd.f32 %v715_v33, %v675_v6  ;;  %v4115_v27 = vld [vmem:[#allocation2 + $0xc8] sm:$0xff]  ;;  %v4117_v20 = vld [vmem:[#allocation2 + $0xd0] sm:$0xff]  ;;  %v4120_v40 = vld [vmem:[#allocation2 + $0x98] sm:$0xff] }
  0xd8   :  { %v294_v57 = vadd.f32 %v6938_v59, %v6936_v28  ;;  %v724_v62 = vadd.f32 %v716_v45, %v676_v50  ;;  %v725_v7 = vadd.f32 %v717_v35, %v677_v8  ;;  %v726_v44 = vadd.f32 %v718_v13, %v678_v47  ;;  %v6943_v6 = vld [vmem:[#allocation104_spill] sm:$0xff]  ;;  %v4122_v29 = vld [vmem:[#allocation2 + $0xa0] sm:$0xff]  ;;  %v6944_v8 = vld [vmem:[#allocation85_spill] sm:$0xff] }
  0xd9   :  { %v730_v23 = vmul.f32 %v6942_v26, %v722_v37  ;;  %v2640_v32 = vadd.f32 -1.0, %v728_v54  ;;  %v2641_v22 = vadd.f32 -1.0, %v729_v19  ;;  %v679_v61 = vadd.f32 %v671_v5, %v631_v49  ;;  %v4124_v50 = vld [vmem:[#allocation2 + $0xa8] sm:$0xff]  ;;  %v6946_v45 = vld [vmem:[#allocation109_spill] sm:$0xff]  ;;  %v6947_v13 = vld [vmem:[#allocation14_spill] sm:$0xff] }
  0xda   :  { %2723 = vrcp.f32 %v294_v57  ;;  %v719_v55 = vand.u32 2147483647, %v711_v18  ;;  %v731_v41 = vmul.f32 %v6943_v6, %v723_v34  ;;  %v802_v24 = vmul.f32 %v4106_v10, %v6944_v8  ;;  %v6945_v33 = vld [vmem:[#allocation108_spill] sm:$0xff]  ;;  %v4131_v28 = vld [vmem:[#allocation2 + $0xb0] sm:$0xff]  ;;  %v4133_v48 = vld [vmem:[#allocation2 + $0xb8] sm:$0xff] }
  0xdb   :  { %v732_v47 = vmul.f32 %v6945_v33, %v724_v62  ;;  %v733_v35 = vmul.f32 %v6946_v45, %v725_v7  ;;  %v734_v52 = vmul.f32 %v6947_v13, %v726_v44  ;;  %v4135_v59 = vld [vmem:[#allocation2 + $0xd8] sm:$0xff]  ;;  %v4139_v54 = vld [vmem:[#allocation2 + $0xe0] sm:$0xff]  ;;  %v4141_v19 = vld [vmem:[#allocation2 + $0xe8] sm:$0xff]  ;;  %v4153_v45 = vadd.f32 -1.0, %v730_v23 }
  0xdc   :  { %v6948_v57 = vld [vmem:[#allocation86_spill] sm:$0xff]  ;;  %v4143_v49 = vld [vmem:[#allocation2 + $0xf0] sm:$0xff]  ;;  %v6950_v5 = vld [vmem:[#allocation68_spill] sm:$0xff]  ;;  %v745_v33 = vand.u32 2147483647, %v2641_v22  ;;  %v809_v23 = vmul.f32 %v4133_v48, %v6959_v16  ;;  %v727_v14 = vadd.f32 %v719_v55, %v679_v61  ;;  %v4177_v16 = vadd.f32 -1.0, %v731_v41 }
  0xdd   :  { %v803_v37 = vmul.f32 %v4108_v1, %v6948_v57  ;;  %6949 = vst [vmem:[#allocation101_spill] sm:$0xff] %v4143_v49  ;;  %v804_v18 = vmul.f32 %v4110_v58, %v6950_v5  ;;  %v6951_v34 = vld [vmem:[#allocation40_spill] sm:$0xff]  ;;  %v6952_v7 = vld [vmem:[#allocation41_spill] sm:$0xff]  ;;  %v6953_v8 = vld [vmem:[#allocation42_spill] sm:$0xff]  ;;  %v744_v57 = vand.u32 2147483647, %v2640_v32 }
  0xde   :  { %v810_v62 = vmul.f32 %v4113_v60, %v6951_v34  ;;  %v811_v44 = vmul.f32 %v4115_v27, %v6952_v7  ;;  %v812_v13 = vmul.f32 %v4117_v20, %v6953_v8  ;;  %6954 = vst [vmem:[#allocation102_spill] sm:$0xff] %v4153_v45  ;;  %v4155_v6 = vld [vmem:[#allocation2 + $0xf8] sm:$0xff]  ;;  %v6955_v26 = vld [vmem:[#allocation88_spill] sm:$0xff]  ;;  %v6956_v31 = vld [vmem:[#allocation17_spill] sm:$0xff]  ;;  %v808_v7 = vmul.f32 %v4131_v28, %v6958_v9 }
  0xdf   :  { %v805_v56 = vmul.f32 %v4120_v40, %v6955_v26  ;;  %v806_v5 = vmul.f32 %v4122_v29, %v6956_v31  ;;  %v6957_v39 = vld [vmem:[#allocation18_spill] sm:$0xff]  ;;  %v6960_v8 = vld [vmem:[#allocation43_spill] sm:$0xff]  ;;  %v6961_v22 = vld [vmem:[#allocation44_spill] sm:$0xff]  ;;  %v815_v26 = vmul.f32 %v4141_v19, %v6962_v42  ;;  %6965 = vst [vmem:[#allocation103_spill] sm:$0xff] %v4177_v16  ;;  %v4179_v43 = vadd.f32 -1.0, %v732_v47 }
  0xe0   :  { %v807_v34 = vmul.f32 %v4124_v50, %v6957_v39  ;;  %v813_v32 = vmul.f32 %v4135_v59, %v6960_v8  ;;  %v814_v21 = vmul.f32 %v4139_v54, %v6961_v22  ;;  %v6963_v17 = vld [vmem:[#allocation62_spill] sm:$0xff]  ;;  %v817_v39 = vmul.f32 %v4155_v6, %v6964_v4  ;;  %v6988_v45 = vld [vmem:[#allocation73_spill] sm:$0xff] }
  0xe1   :  { %v816_v31 = vmul.f32 %v4143_v49, %v6963_v17  ;;  %v818_v12 = vadd.f32 %v810_v62, %v802_v24  ;;  %v819_v9 = vadd.f32 %v811_v44, %v803_v37  ;;  %v820_v30 = vadd.f32 %v812_v13, %v804_v18  ;;  %6966 = vst [vmem:[#allocation25_spill] sm:$0xff] %v4179_v43  ;;  %v6979_v62 = vld [vmem:[#allocation30_spill] sm:$0xff] }
  0xe2   :  { %v4181_v8 = vadd.f32 -1.0, %v733_v35  ;;  %v4183_v22 = vadd.f32 -1.0, %v734_v52  ;;  %v4186_v2 = vmul.f32 2.0, %v744_v57  ;;  %v4188_v17 = vmul.f32 2.0, %v745_v33  ;;  %v6972_v52 = vld [vmem:[#allocation36_spill] sm:$0xff]  ;;  %v6980_v44 = vld [vmem:[#allocation50_spill] sm:$0xff] }
  0xe3   :  { %v821_v24 = vadd.f32 %v813_v32, %v805_v56  ;;  %v822_v37 = vadd.f32 %v814_v21, %v806_v5  ;;  %v823_v13 = vadd.f32 %v815_v26, %v807_v34  ;;  %v824_v61 = vadd.f32 %v816_v31, %v808_v7  ;;  %v6973_v57 = vld [vmem:[#allocation48_spill] sm:$0xff]  ;;  %v6974_v56 = vld [vmem:[#allocation13_spill] sm:$0xff]  ;;  %v6975_v31 = vld [vmem:[#allocation38_spill] sm:$0xff] }
  0xe4   :  { %6967 = vst [vmem:[#allocation77_spill] sm:$0xff] %v4181_v8  ;;  %6968 = vst [vmem:[#allocation34_spill] sm:$0xff] %v4183_v22  ;;  %v4190_v51 = vpop.eup %2723  ;;  %v825_v55 = vadd.f32 %v817_v39, %v809_v23  ;;  %v4193_v41 = vadd.f32 %v818_v12, %v3770_v11  ;;  %v4196_v47 = vadd.f32 %v819_v9, %v3772_v25  ;;  %v6976_v12 = vld [vmem:[#allocation39_spill] sm:$0xff]  ;;  %v6977_v9 = vld [vmem:[#allocation49_spill] sm:$0xff] }
  0xe5   :  { %6969 = vst [vmem:[#allocation95_spill] sm:$0xff] %v4186_v2  ;;  %6970 = vst [vmem:[#allocation96_spill] sm:$0xff] %v4188_v17  ;;  %v4199_v35 = vadd.f32 %v820_v30, %v3774_v3  ;;  %v842_v33 = vmul.f32 %v4106_v10, %v6972_v52  ;;  %v843_v18 = vmul.f32 %v4108_v1, %v6973_v57  ;;  %v6978_v30 = vld [vmem:[#allocation11_spill] sm:$0xff]  ;;  %v6981_v32 = vld [vmem:[#allocation114_spill] sm:$0xff] }
  0xe6   :  { %6971 = vst [vmem:[#allocation100_spill] sm:$0xff] %v4190_v51  ;;  %v844_v21 = vmul.f32 %v4110_v58, %v6974_v56  ;;  %v845_v39 = vmul.f32 %v4120_v40, %v6975_v31  ;;  %v846_v26 = vmul.f32 %v4122_v29, %v6976_v12  ;;  %v847_v5 = vmul.f32 %v4124_v50, %v6977_v9  ;;  %v6982_v3 = vld [vmem:[#allocation115_spill] sm:$0xff]  ;;  %v6983_v11 = vld [vmem:[#allocation116_spill] sm:$0xff]  ;;  %v6984_v31 = vld [vmem:[#allocation117_spill] sm:$0xff] }
  0xe7   :  { %v850_v34 = vmul.f32 %v4113_v60, %v6978_v30  ;;  %v851_v7 = vmul.f32 %v4115_v27, %v6979_v62  ;;  %v848_v23 = vmul.f32 %v4131_v28, %v6980_v44  ;;  %v852_v42 = vmul.f32 %v4117_v20, %v6981_v32  ;;  %v6985_v56 = vld [vmem:[#allocation118_spill] sm:$0xff]  ;;  %v6986_v57 = vld [vmem:[#allocation72_spill] sm:$0xff]  ;;  %v6989_v8 = vld [vmem:[#allocation75_spill] sm:$0xff] }
  0xe8   :  { %v853_v25 = vmul.f32 %v4135_v59, %v6982_v3  ;;  %v854_v12 = vmul.f32 %v4139_v54, %v6983_v11  ;;  %v849_v9 = vmul.f32 %v4133_v48, %v6878_v36  ;;  %v855_v30 = vmul.f32 %v4141_v19, %v6984_v31  ;;  %v6987_v22 = vld [vmem:[#allocation58_spill] sm:$0xff] }
  0xe9   :  { %v856_v62 = vmul.f32 %v4143_v49, %v6985_v56  ;;  %v857_v44 = vmul.f32 %v4155_v6, %v6879_v38  ;;  %v4234_v32 = vadd.f32 %v821_v24, %v6986_v57  ;;  %v858_v52 = vadd.f32 %v850_v34, %v842_v33  ;;  %v6991_v56 = vld [vmem:[#allocation76_spill] sm:$0xff] }
  0xea   :  { %v859_v3 = vadd.f32 %v851_v7, %v843_v18  ;;  %v860_v4 = vadd.f32 %v852_v42, %v844_v21  ;;  %v4237_v11 = vadd.f32 %v822_v37, %v6987_v22  ;;  %v4240_v36 = vadd.f32 %v823_v13, %v6988_v45  ;;  %v6993_v42 = vld [vmem:[#allocation64_spill] sm:$0xff]  ;;  %v6994_v37 = vld [vmem:[#allocation81_spill] sm:$0xff] }
  0xeb   :  { %v4243_v31 = vadd.f32 %v824_v61, %v6989_v8  ;;  %v861_v43 = vadd.f32 %v853_v25, %v845_v39  ;;  %v4246_v16 = vadd.f32 %v825_v55, %v6991_v56  ;;  %v834_v38 = vand.u32 2147483647, %v4193_v41  ;;  %v6995_v61 = vld [vmem:[#allocation67_spill] sm:$0xff]  ;;  %v7015_v56 = vld [vmem:[#allocation21_spill] sm:$0xff] }
  0xec   :  { %v862_v24 = vadd.f32 %v854_v12, %v846_v26  ;;  %v863_v57 = vadd.f32 %v855_v30, %v847_v5  ;;  %v864_v33 = vadd.f32 %v856_v62, %v848_v23  ;;  %v865_v18 = vadd.f32 %v857_v44, %v849_v9  ;;  %v6996_v25 = vld [vmem:[#allocation87_spill] sm:$0xff] }
  0xed   :  { %6990 = vst [vmem:[#allocation92_spill] sm:$0xff] %v4243_v31  ;;  %6992 = vst [vmem:[#allocation29_spill] sm:$0xff] %v4246_v16  ;;  %v866_v21 = vadd.f32 %v858_v52, %v6993_v42  ;;  %v867_v34 = vadd.f32 %v859_v3, %v6994_v37  ;;  %v835_v13 = vand.u32 2147483647, %v4196_v47  ;;  %v836_v7 = vand.u32 2147483647, %v4199_v35 }
  0xee   :  { %v868_v8 = vadd.f32 %v860_v4, %v6995_v61  ;;  %v869_v39 = vadd.f32 %v861_v43, %v6996_v25  ;;  %v4256_v55 = vmul.f32 %v4190_v51, %v727_v14  ;;  %v837_v41 = vand.u32 2147483647, %v4234_v32  ;;  %v6998_v47 = vld [vmem:[#allocation61_spill] sm:$0xff]  ;;  %v7000_v4 = vld [vmem:[#allocation66_spill] sm:$0xff]  ;;  %v7001_v43 = vld [vmem:[#allocation28_spill] sm:$0xff] }
  0xef   :  { %v838_v12 = vand.u32 2147483647, %v4237_v11  ;;  %v839_v26 = vand.u32 2147483647, %v4240_v36  ;;  %v870_v9 = vadd.f32 %v862_v24, %v6998_v47  ;;  %v6999_v35 = vld [vmem:[#allocation65_spill] sm:$0xff]  ;;  %v4266_v30 = vadd.f32 %v864_v33, %v7000_v4  ;;  %v7002_v32 = vld [vmem:[#allocation60_spill] sm:$0xff] }
  0xf0   :  { %6997 = vst [vmem:[#allocation74_spill] sm:$0xff] %v4256_v55  ;;  %v871_v5 = vadd.f32 %v863_v57, %v6999_v35  ;;  %v4269_v14 = vadd.f32 %v865_v18, %v7001_v43  ;;  %v874_v62 = vand.u32 2147483647, %v866_v21  ;;  %v875_v44 = vand.u32 2147483647, %v867_v34  ;;  %v7003_v52 = vld [vmem:[#allocation70_spill] sm:$0xff] }
  0xf1   :  { %v876_v23 = vand.u32 2147483647, %v868_v8  ;;  %v877_v11 = vand.u32 2147483647, %v869_v39  ;;  %v890_v36 = vmul.f32 %v4106_v10, %v7002_v32  ;;  %v891_v3 = vmul.f32 %v4108_v1, %v7003_v52  ;;  %v7004_v25 = vld [vmem:[#allocation105_spill] sm:$0xff]  ;;  %v7005_v57 = vld [vmem:[#allocation106_spill] sm:$0xff] }
  0xf2   :  { %v892_v24 = vmul.f32 %v4110_v58, %v7004_v25  ;;  %v893_v33 = vmul.f32 %v4120_v40, %v7005_v57  ;;  %v7006_v4 = vld [vmem:[#allocation107_spill] sm:$0xff]  ;;  %v7007_v43 = vld [vmem:[#allocation110_spill] sm:$0xff]  ;;  %v897_v39 = vmul.f32 %v4133_v48, %v6901_v46  ;;  %v7010_v35 = vld [vmem:[#allocation32_spill] sm:$0xff]  ;;  %v904_v46 = vmul.f32 %v4143_v49, %v7015_v56 }
  0xf3   :  { %v894_v18 = vmul.f32 %v4122_v29, %v7006_v4  ;;  %v895_v21 = vmul.f32 %v4124_v50, %v7007_v43  ;;  %v7008_v8 = vld [vmem:[#allocation111_spill] sm:$0xff]  ;;  %v899_v25 = vmul.f32 %v4115_v27, %v7010_v35  ;;  %v7011_v47 = vld [vmem:[#allocation33_spill] sm:$0xff]  ;;  %v7014_v42 = vld [vmem:[#allocation20_spill] sm:$0xff]  ;;  %v878_v55 = vand.u32 2147483647, %v870_v9 }
  0xf4   :  { %v896_v34 = vmul.f32 %v4131_v28, %v7008_v8  ;;  %v7009_v32 = vld [vmem:[#allocation31_spill] sm:$0xff]  ;;  %v900_v57 = vmul.f32 %v4117_v20, %v7011_v47  ;;  %v903_v8 = vmul.f32 %v4141_v19, %v7014_v42  ;;  %v7016_v56 = vld [vmem:[#allocation82_spill] sm:$0xff]  ;;  %v882_v9 = vadd.f32 %v874_v62, %v834_v38  ;;  %v7030_v62 = vld [vmem:[#allocation24_spill] sm:$0xff] }
  0xf5   :  { %v898_v52 = vmul.f32 %v4113_v60, %v7009_v32  ;;  %v7012_v61 = vld [vmem:[#allocation35_spill] sm:$0xff]  ;;  %v905_v32 = vmul.f32 %v4155_v6, %v6902_v63  ;;  %v907_v35 = vadd.f32 %v899_v25, %v891_v3  ;;  %v880_v63 = vand.u32 2147483647, %v4266_v30 }
  0xf6   :  { %v901_v4 = vmul.f32 %v4135_v59, %v7012_v61  ;;  %v7013_v37 = vld [vmem:[#allocation19_spill] sm:$0xff]  ;;  %v908_v22 = vadd.f32 %v900_v57, %v892_v24  ;;  %v911_v17 = vadd.f32 %v903_v8, %v895_v21  ;;  %v879_v61 = vand.u32 2147483647, %v871_v5  ;;  %v7019_v24 = vld [vmem:[#allocation89_spill] sm:$0xff]  ;;  %v7020_v57 = vld [vmem:[#allocation90_spill] sm:$0xff] }
  0xf7   :  { %v902_v43 = vmul.f32 %v4139_v54, %v7013_v37  ;;  %v906_v45 = vadd.f32 %v898_v52, %v890_v36  ;;  %v912_v2 = vadd.f32 %v904_v46, %v896_v34  ;;  %v913_v16 = vadd.f32 %v905_v32, %v897_v39  ;;  %v7017_v52 = vld [vmem:[#allocation83_spill] sm:$0xff]  ;;  %v7021_v21 = vld [vmem:[#allocation52_spill] sm:$0xff] }
  0xf8   :  { %v909_v51 = vadd.f32 %v901_v4, %v893_v33  ;;  %v915_v42 = vadd.f32 %v907_v35, %v6906_v0  ;;  %v916_v31 = vadd.f32 %v908_v22, %v6919_v53  ;;  %v881_v25 = vand.u32 2147483647, %v4269_v14  ;;  %v7018_v4 = vld [vmem:[#allocation84_spill] sm:$0xff]  ;;  %v7034_v8 = vld [vmem:[#allocation123_spill] sm:$0xff] }
  0xf9   :  { %v910_v47 = vadd.f32 %v902_v43, %v894_v18  ;;  %v914_v37 = vadd.f32 %v906_v45, %v6905_v15  ;;  %v919_v43 = vadd.f32 %v911_v17, %v7018_v4  ;;  %v883_v5 = vadd.f32 %v875_v44, %v835_v13  ;;  %v7022_v17 = vld [vmem:[#allocation54_spill] sm:$0xff]  ;;  %v7031_v44 = vld [vmem:[#allocation120_spill] sm:$0xff] }
  0xfa   :  { %v917_v49 = vadd.f32 %v909_v51, %v7016_v56  ;;  %v884_v46 = vadd.f32 %v876_v23, %v836_v7  ;;  %v885_v36 = vadd.f32 %v877_v11, %v837_v41  ;;  %v886_v45 = vadd.f32 %v878_v55, %v838_v12  ;;  %v7023_v7 = vld [vmem:[#allocation15_spill] sm:$0xff]  ;;  %v7025_v55 = vld [vmem:[#allocation16_spill] sm:$0xff]  ;;  %v7028_v12 = vld [vmem:[#allocation113_spill] sm:$0xff] }
  0xfb   :  { %v918_v3 = vadd.f32 %v910_v47, %v7017_v52  ;;  %v887_v32 = vadd.f32 %v879_v61, %v839_v26  ;;  %v4312_v35 = vadd.f32 %v912_v2, %v7019_v24  ;;  %v922_v22 = vand.u32 2147483647, %v914_v37  ;;  %v7024_v2 = vld [vmem:[#allocation55_spill] sm:$0xff]  ;;  %v7032_v23 = vld [vmem:[#allocation121_spill] sm:$0xff]  ;;  %v7033_v11 = vld [vmem:[#allocation122_spill] sm:$0xff] }
  0xfc   :  { %v4315_v51 = vadd.f32 %v913_v16, %v7020_v57  ;;  %v923_v30 = vand.u32 2147483647, %v915_v42  ;;  %v924_v33 = vand.u32 2147483647, %v916_v31  ;;  %v925_v14 = vand.u32 2147483647, %v917_v49 }
  0xfd   :  { %v926_v18 = vand.u32 2147483647, %v918_v3  ;;  %v927_v47 = vand.u32 2147483647, %v919_v43  ;;  %v938_v38 = vmul.f32 %v4106_v10, %v7021_v21  ;;  %v939_v13 = vmul.f32 %v4108_v1, %v7022_v17  ;;  %v7026_v42 = vld [vmem:[#allocation59_spill] sm:$0xff]  ;;  %v7027_v31 = vld [vmem:[#allocation69_spill] sm:$0xff] }
  0xfe   :  { %v940_v61 = vmul.f32 %v4110_v58, %v7023_v7  ;;  %v941_v37 = vmul.f32 %v4120_v40, %v7024_v2  ;;  %v942_v16 = vmul.f32 %v4122_v29, %v7025_v55  ;;  %v943_v49 = vmul.f32 %v4124_v50, %v7026_v42  ;;  %v7029_v26 = vld [vmem:[#allocation23_spill] sm:$0xff]  ;;  %v7035_v34 = vld [vmem:[#allocation124_spill] sm:$0xff]  ;;  %v7037_v3 = vld [vmem:[#allocation125_spill] sm:$0xff] }
  0xff   :  { %v944_v41 = vmul.f32 %v4131_v28, %v7027_v31  ;;  %v945_v10 = vmul.f32 %v4133_v48, %v7028_v12  ;;  %v946_v1 = vmul.f32 %v4113_v60, %v7029_v26  ;;  %v947_v58 = vmul.f32 %v4115_v27, %v7030_v62  ;;  %v7036_v48 = vld [vmem:[#allocation101_spill] sm:$0xff]  ;;  %v7041_v62 = vld [vmem:[#allocation91_spill] sm:$0xff] }
 0x100   :  { %v948_v40 = vmul.f32 %v4117_v20, %v7031_v44  ;;  %v949_v29 = vmul.f32 %v4135_v59, %v7032_v23  ;;  %v950_v50 = vmul.f32 %v4139_v54, %v7033_v11  ;;  %v951_v28 = vmul.f32 %v4141_v19, %v7034_v8  ;;  %v7038_v23 = vld [vmem:[#allocation27_spill] sm:$0xff]  ;;  %v7039_v54 = vld [vmem:[#allocation26_spill] sm:$0xff]  ;;  %v7040_v19 = vld [vmem:[#allocation97_spill] sm:$0xff] }
 0x101   :  { %v952_v39 = vmul.f32 %v7036_v48, %v7035_v34  ;;  %v953_v60 = vmul.f32 %v4155_v6, %v7037_v3  ;;  %v954_v43 = vadd.f32 %v946_v1, %v938_v38  ;;  %v955_v27 = vadd.f32 %v947_v58, %v939_v13  ;;  %v7042_v34 = vld [vmem:[#allocation98_spill] sm:$0xff]  ;;  %v7043_v38 = vld [vmem:[#allocation99_spill] sm:$0xff]  ;;  %v7122_v2 = vld [vmem:[#allocation73_spill] sm:$0xff] }
 0x102   :  { %v956_v57 = vadd.f32 %v948_v40, %v940_v61  ;;  %v957_v24 = vadd.f32 %v949_v29, %v941_v37  ;;  %v958_v20 = vadd.f32 %v950_v50, %v942_v16  ;;  %v959_v4 = vadd.f32 %v951_v28, %v943_v49  ;;  %v7123_v7 = vld [vmem:[#allocation75_spill] sm:$0xff] }
 0x103   :  { %v930_v12 = vadd.f32 %v922_v22, %v882_v9  ;;  %v931_v59 = vadd.f32 %v923_v30, %v883_v5  ;;  %v962_v44 = vadd.f32 %v954_v43, %v7038_v23  ;;  %v963_v11 = vadd.f32 %v955_v27, %v7039_v54  ;;  %v7044_v22 = vld [vmem:[#allocation92_spill] sm:$0xff]  ;;  %v7057_v43 = vld [vmem:[#allocation77_spill] sm:$0xff] }
 0x104   :  { %v960_v31 = vadd.f32 %v952_v39, %v944_v41  ;;  %v964_v8 = vadd.f32 %v956_v57, %v7040_v19  ;;  %v965_v48 = vadd.f32 %v957_v24, %v7041_v62  ;;  %v966_v26 = vadd.f32 %v958_v20, %v7042_v34  ;;  %v7046_v57 = vld [vmem:[#allocation29_spill] sm:$0xff] }
 0x105   :  { %v961_v6 = vadd.f32 %v953_v60, %v945_v10  ;;  %v967_v13 = vadd.f32 %v959_v4, %v7043_v38  ;;  %v970_v61 = vand.u32 2147483647, %v962_v44  ;;  %v971_v37 = vand.u32 2147483647, %v963_v11  ;;  %v7048_v11 = vld [vmem:[#allocation93_spill] sm:$0xff]  ;;  %v7055_v60 = vld [vmem:[#allocation103_spill] sm:$0xff] }
 0x106   :  { %v932_v16 = vadd.f32 %v924_v33, %v884_v46  ;;  %v933_v49 = vadd.f32 %v925_v14, %v885_v36  ;;  %v972_v9 = vand.u32 2147483647, %v964_v8  ;;  %v973_v5 = vand.u32 2147483647, %v965_v48  ;;  %v7049_v36 = vld [vmem:[#allocation94_spill] sm:$0xff]  ;;  %v7050_v8 = vld [vmem:[#allocation95_spill] sm:$0xff] }
 0x107   :  { %v7045_v30 = vand.u32 2147483647, %v7044_v22  ;;  %v934_v58 = vadd.f32 %v926_v18, %v886_v45  ;;  %v974_v41 = vand.u32 2147483647, %v966_v26  ;;  %v978_v40 = vadd.f32 %v970_v61, %v930_v12  ;;  %v7051_v18 = vld [vmem:[#allocation37_spill] sm:$0xff]  ;;  %v7052_v26 = vld [vmem:[#allocation74_spill] sm:$0xff] }
 0x108   :  { %v7047_v29 = vand.u32 2147483647, %v7046_v57  ;;  %v928_v50 = vand.u32 2147483647, %v4312_v35  ;;  %v929_v10 = vand.u32 2147483647, %v4315_v51  ;;  %v979_v4 = vadd.f32 %v971_v37, %v931_v59 }
 0x109   :  { %v888_v1 = vadd.f32 %v880_v63, %v7045_v30  ;;  %v935_v44 = vadd.f32 %v927_v47, %v887_v32  ;;  %v968_v46 = vadd.f32 %v960_v31, %v7048_v11  ;;  %v969_v33 = vadd.f32 %v961_v6, %v7049_v36  ;;  %v7054_v39 = vld [vmem:[#allocation45_spill] sm:$0xff]  ;;  %v7058_v61 = vld [vmem:[#allocation102_spill] sm:$0xff]  ;;  %v7092_v11 = vld [vmem:[#allocation79_spill] sm:$0xff] }
 0x10a   :  { %v889_v24 = vadd.f32 %v881_v25, %v7047_v29  ;;  %v975_v14 = vand.u32 2147483647, %v967_v13  ;;  %2725 = vtanh.f32 %v7050_v8  ;;  %v980_v63 = vadd.f32 %v972_v9, %v932_v16  ;;  %v7053_v25 = vld [vmem:[#allocation96_spill] sm:$0xff]  ;;  %v7056_v47 = vld [vmem:[#allocation25_spill] sm:$0xff]  ;;  %v7091_v36 = vld [vmem:[#allocation62_spill] sm:$0xff] }
 0x10b   :  { %v981_v45 = vadd.f32 %v973_v5, %v933_v49  ;;  %v986_v12 = vmul.f32 %v7051_v18, %v978_v40  ;;  %v2647_v28 = vadd.f32 -1.0, %v7052_v26  ;;  %2727 = vtanh.f32 %v7053_v25  ;;  %v7060_v49 = vld [vmem:[#allocation56_spill] sm:$0xff] }
 0x10c   :  { %v982_v35 = vadd.f32 %v974_v41, %v934_v58  ;;  %v987_v51 = vmul.f32 %v7054_v39, %v979_v4  ;;  %v747_v32 = vand.u32 2147483647, %v7055_v60  ;;  %v748_v31 = vand.u32 2147483647, %v7056_v47  ;;  %v7061_v5 = vld [vmem:[#allocation104_spill] sm:$0xff]  ;;  %v7062_v58 = vld [vmem:[#allocation34_spill] sm:$0xff] }
 0x10d   :  { %v749_v27 = vand.u32 2147483647, %v7057_v43  ;;  %v936_v20 = vadd.f32 %v928_v50, %v888_v1  ;;  %v937_v59 = vadd.f32 %v929_v10, %v889_v24  ;;  %v976_v48 = vand.u32 2147483647, %v968_v46  ;;  %v7063_v40 = vld [vmem:[#allocation108_spill] sm:$0xff]  ;;  %v4384_v43 = vld [vmem:[#allocation2 + $0x100] sm:$0xff] }
 0x10e   :  { %v977_v6 = vand.u32 2147483647, %v969_v33  ;;  %v983_v13 = vadd.f32 %v975_v14, %v935_v44  ;;  %v7059_v37 = vand.u32 2147483647, %v7058_v61  ;;  %v988_v9 = vmul.f32 %v7060_v49, %v980_v63  ;;  %v7064_v44 = vld [vmem:[#allocation109_spill] sm:$0xff]  ;;  %v7088_v39 = vld [vmem:[#allocation46_spill] sm:$0xff] }
 0x10f   :  { %v989_v22 = vmul.f32 %v7061_v5, %v981_v45  ;;  %v2648_v30 = vadd.f32 -1.0, %v986_v12  ;;  %v750_v41 = vand.u32 2147483647, %v7062_v58  ;;  %v990_v57 = vmul.f32 %v7063_v40, %v982_v35  ;;  %v4388_v61 = vld [vmem:[#allocation2 + $0x110] sm:$0xff]  ;;  %v7087_v5 = vld [vmem:[#allocation44_spill] sm:$0xff] }
 0x110   :  { %v754_v16 = vmul.f32 2.0, %v7059_v37  ;;  %v2649_v29 = vadd.f32 -1.0, %v987_v51  ;;  %v751_v4 = vand.u32 2147483647, %v2647_v28  ;;  %v755_v8 = vmul.f32 2.0, %v747_v32  ;;  %v7067_v28 = vld [vmem:[#allocation14_spill] sm:$0xff] }
 0x111   :  { %v756_v1 = vmul.f32 2.0, %v748_v31  ;;  %v757_v24 = vmul.f32 2.0, %v749_v27  ;;  %v984_v50 = vadd.f32 %v976_v48, %v936_v20  ;;  %v985_v10 = vadd.f32 %v977_v6, %v937_v59  ;;  %v7068_v32 = vld [vmem:[#allocation100_spill] sm:$0xff]  ;;  %v4390_v37 = vld [vmem:[#allocation2 + $0x118] sm:$0xff]  ;;  %v4398_v58 = vld [vmem:[#allocation2 + $0x130] sm:$0xff] }
 0x112   :  { %v991_v46 = vmul.f32 %v7064_v44, %v983_v13  ;;  %2729 = vtanh.f32 %v754_v16  ;;  %v2650_v33 = vadd.f32 -1.0, %v988_v9  ;;  %v2651_v14 = vadd.f32 -1.0, %v989_v22  ;;  %v4386_v48 = vld [vmem:[#allocation2 + $0x108] sm:$0xff]  ;;  %v4392_v16 = vld [vmem:[#allocation2 + $0x120] sm:$0xff]  ;;  %v4426_v22 = vld [vmem:[#allocation2 + $0x178] sm:$0xff] }
 0x113   :  { %v1002_v63 = vand.u32 2147483647, %v2648_v30  ;;  %v758_v26 = vmul.f32 2.0, %v750_v41  ;;  %v2652_v45 = vadd.f32 -1.0, %v990_v57  ;;  %v1003_v12 = vand.u32 2147483647, %v2649_v29 }
 0x114   :  { %v4378_v25 = vpop.eup %2725  ;;  %v759_v60 = vmul.f32 2.0, %v751_v4  ;;  %2731 = vtanh.f32 %v755_v8  ;;  %v992_v51 = vmul.f32 %v7067_v28, %v984_v50  ;;  %v993_v47 = vmul.f32 %v7068_v32, %v985_v10  ;;  %v4396_v30 = vld [vmem:[#allocation2 + $0x128] sm:$0xff]  ;;  %v4400_v41 = vld [vmem:[#allocation2 + $0x140] sm:$0xff]  ;;  %v7069_v57 = vld [vmem:[#allocation85_spill] sm:$0xff] }
 0x115   :  { %7065 = vst [vmem:[#allocation78_spill] sm:$0xff] %v4378_v25  ;;  %v4380_v35 = vpop.eup %2727  ;;  %2733 = vtanh.f32 %v756_v1  ;;  %v2653_v31 = vadd.f32 -1.0, %v991_v46  ;;  %v1004_v27 = vand.u32 2147483647, %v2650_v33  ;;  %v1005_v20 = vand.u32 2147483647, %v2651_v14 }
 0x116   :  { %7066 = vst [vmem:[#allocation63_spill] sm:$0xff] %v4380_v35  ;;  %2735 = vtanh.f32 %v757_v24  ;;  %v1010_v59 = vmul.f32 2.0, %v1002_v63  ;;  %v1006_v6 = vand.u32 2147483647, %v2652_v45  ;;  %v1011_v13 = vmul.f32 2.0, %v1003_v12  ;;  %v4408_v24 = vld [vmem:[#allocation2 + $0x148] sm:$0xff] }
 0x117   :  { %2737 = vtanh.f32 %v758_v26  ;;  %v1060_v29 = vmul.f32 %v4384_v43, %v7069_v57  ;;  %v4404_v4 = vadd.f32 -1.0, %v992_v51  ;;  %v4406_v8 = vadd.f32 -1.0, %v993_v47  ;;  %v4410_v50 = vld [vmem:[#allocation2 + $0x150] sm:$0xff]  ;;  %v7072_v10 = vld [vmem:[#allocation86_spill] sm:$0xff]  ;;  %v4416_v26 = vld [vmem:[#allocation2 + $0x160] sm:$0xff] }
 0x118   :  { %2739 = vtanh.f32 %v759_v60  ;;  %v1007_v1 = vand.u32 2147483647, %v2653_v31  ;;  %v1061_v46 = vmul.f32 %v4386_v48, %v7072_v10  ;;  %v1012_v33 = vmul.f32 2.0, %v1004_v27  ;;  %v4414_v63 = vld [vmem:[#allocation2 + $0x158] sm:$0xff]  ;;  %7073 = vst [vmem:[#allocation92_spill] sm:$0xff] %v4416_v26  ;;  %v4418_v45 = vld [vmem:[#allocation2 + $0x168] sm:$0xff] }
 0x119   :  { %7070 = vst [vmem:[#allocation80_spill] sm:$0xff] %v4404_v4  ;;  %7071 = vst [vmem:[#allocation101_spill] sm:$0xff] %v4406_v8  ;;  %v1013_v14 = vmul.f32 2.0, %v1005_v20  ;;  %2741 = vtanh.f32 %v1010_v59  ;;  %v7075_v12 = vld [vmem:[#allocation68_spill] sm:$0xff]  ;;  %v1014_v51 = vmul.f32 2.0, %v1006_v6  ;;  %v4422_v47 = vld [vmem:[#allocation2 + $0x138] sm:$0xff]  ;;  %v1072_v49 = vmul.f32 %v4416_v26, %v7087_v5 }
 0x11a   :  { %7074 = vst [vmem:[#allocation29_spill] sm:$0xff] %v4418_v45  ;;  %v1062_v60 = vmul.f32 %v4388_v61, %v7075_v12  ;;  %2743 = vtanh.f32 %v1011_v13  ;;  %7076 = vst [vmem:[#allocation95_spill] sm:$0xff] %v4422_v47  ;;  %v4424_v31 = vld [vmem:[#allocation2 + $0x170] sm:$0xff]  ;;  %v7078_v27 = vld [vmem:[#allocation88_spill] sm:$0xff] }
 0x11b   :  { %7077 = vst [vmem:[#allocation74_spill] sm:$0xff] %v4424_v31  ;;  %v1063_v20 = vmul.f32 %v4390_v37, %v7078_v27  ;;  %v7079_v59 = vld [vmem:[#allocation17_spill] sm:$0xff]  ;;  %v7081_v32 = vld [vmem:[#allocation18_spill] sm:$0xff]  ;;  %v7082_v12 = vld [vmem:[#allocation47_spill] sm:$0xff]  ;;  %2745 = vtanh.f32 %v1012_v33  ;;  %v1015_v33 = vmul.f32 2.0, %v1007_v1 }
 0x11c   :  { %v1064_v9 = vmul.f32 %v4392_v16, %v7079_v59  ;;  %v4432_v10 = vpop.eup %2729  ;;  %v1065_v28 = vmul.f32 %v4396_v30, %v7081_v32  ;;  %v1066_v6 = vmul.f32 %v4398_v58, %v7082_v12  ;;  %v7083_v13 = vld [vmem:[#allocation40_spill] sm:$0xff]  ;;  %v7084_v57 = vld [vmem:[#allocation41_spill] sm:$0xff]  ;;  %v7085_v35 = vld [vmem:[#allocation42_spill] sm:$0xff]  ;;  %v1073_v32 = vmul.f32 %v4418_v45, %v7088_v39 }
 0x11d   :  { %7080 = vst [vmem:[#allocation96_spill] sm:$0xff] %v4432_v10  ;;  %v1068_v44 = vmul.f32 %v4400_v41, %v7083_v13  ;;  %v1069_v40 = vmul.f32 %v4408_v24, %v7084_v57  ;;  %v1070_v27 = vmul.f32 %v4410_v50, %v7085_v35  ;;  %v7086_v25 = vld [vmem:[#allocation43_spill] sm:$0xff]  ;;  %v7090_v12 = vld [vmem:[#allocation12_spill] sm:$0xff]  ;;  %v1074_v57 = vmul.f32 %v4424_v31, %v7091_v36  ;;  %v7099_v1 = vld [vmem:[#allocation13_spill] sm:$0xff] }
 0x11e   :  { %v1071_v59 = vmul.f32 %v4414_v63, %v7086_v25  ;;  %v4450_v18 = vpop.eup %2731  ;;  %v1067_v13 = vmul.f32 %v4422_v47, %v7090_v12  ;;  %v1075_v35 = vmul.f32 %v4426_v22, %v7092_v11  ;;  %2747 = vtanh.f32 %v1013_v14  ;;  %v7097_v5 = vld [vmem:[#allocation36_spill] sm:$0xff] }
 0x11f   :  { %7089 = vst [vmem:[#allocation103_spill] sm:$0xff] %v4450_v18  ;;  %v4458_v38 = vpop.eup %2733  ;;  %2749 = vtanh.f32 %v1014_v51  ;;  %v1076_v12 = vadd.f32 %v1068_v44, %v1060_v29  ;;  %v1077_v34 = vadd.f32 %v1069_v40, %v1061_v46  ;;  %v1078_v36 = vadd.f32 %v1070_v27, %v1062_v60  ;;  %v7098_v14 = vld [vmem:[#allocation48_spill] sm:$0xff]  ;;  %v7100_v40 = vld [vmem:[#allocation11_spill] sm:$0xff]  ;;  %v7101_v46 = vld [vmem:[#allocation30_spill] sm:$0xff] }
 0x120   :  { %7093 = vst [vmem:[#allocation25_spill] sm:$0xff] %v4458_v38  ;;  %v4463_v18 = vpop.eup %2735  ;;  %v1079_v19 = vadd.f32 %v1071_v59, %v1063_v20  ;;  %v1080_v11 = vadd.f32 %v1072_v49, %v1064_v9  ;;  %v1081_v54 = vadd.f32 %v1073_v32, %v1065_v28  ;;  %v1082_v25 = vadd.f32 %v1074_v57, %v1066_v6  ;;  %v7102_v28 = vld [vmem:[#allocation114_spill] sm:$0xff]  ;;  %v7105_v60 = vld [vmem:[#allocation39_spill] sm:$0xff]  ;;  %v7107_v59 = vld [vmem:[#allocation116_spill] sm:$0xff] }
 0x121   :  { %7094 = vst [vmem:[#allocation77_spill] sm:$0xff] %v4463_v18  ;;  %v4465_v62 = vpop.eup %2737  ;;  %v1083_v10 = vadd.f32 %v1075_v35, %v1067_v13  ;;  %v1100_v39 = vmul.f32 %v4384_v43, %v7097_v5  ;;  %v1101_v18 = vmul.f32 %v4386_v48, %v7098_v14  ;;  %v1102_v44 = vmul.f32 %v4388_v61, %v7099_v1  ;;  %v7104_v35 = vld [vmem:[#allocation38_spill] sm:$0xff]  ;;  %v7106_v27 = vld [vmem:[#allocation115_spill] sm:$0xff]  ;;  %v7111_v14 = vld [vmem:[#allocation49_spill] sm:$0xff] }
 0x122   :  { %7095 = vst [vmem:[#allocation102_spill] sm:$0xff] %v4465_v62  ;;  %v4467_v38 = vpop.eup %2739  ;;  %v1108_v29 = vmul.f32 %v4400_v41, %v7100_v40  ;;  %v1109_v49 = vmul.f32 %v4408_v24, %v7101_v46  ;;  %v1110_v32 = vmul.f32 %v4410_v50, %v7102_v28  ;;  %v1103_v57 = vmul.f32 %v4390_v37, %v7104_v35  ;;  %v7109_v46 = vld [vmem:[#allocation51_spill] sm:$0xff]  ;;  %v7112_v5 = vld [vmem:[#allocation50_spill] sm:$0xff] }
 0x123   :  { %7096 = vst [vmem:[#allocation34_spill] sm:$0xff] %v4467_v38  ;;  %v4481_v9 = vpop.eup %2741  ;;  %v1104_v51 = vmul.f32 %v4392_v16, %v7105_v60  ;;  %v1111_v20 = vmul.f32 %v4414_v63, %v7106_v27  ;;  %v1112_v6 = vmul.f32 %v4416_v26, %v7107_v59  ;;  %v4494_v40 = vadd.f32 %v1076_v12, %v7109_v46  ;;  %v7110_v28 = vld [vmem:[#allocation71_spill] sm:$0xff]  ;;  %v7113_v38 = vld [vmem:[#allocation53_spill] sm:$0xff]  ;;  %v7115_v62 = vld [vmem:[#allocation118_spill] sm:$0xff] }
 0x124   :  { %7103 = vst [vmem:[#allocation126_spill] sm:$0xff] %v4481_v9  ;;  %v4491_v13 = vpop.eup %2743  ;;  %v4497_v1 = vadd.f32 %v1077_v34, %v7110_v28  ;;  %v1105_v35 = vmul.f32 %v4396_v30, %v7111_v14  ;;  %v1106_v60 = vmul.f32 %v4398_v58, %v7112_v5  ;;  %v1107_v27 = vmul.f32 %v4422_v47, %v7113_v38  ;;  %v7114_v9 = vld [vmem:[#allocation117_spill] sm:$0xff]  ;;  %v7116_v12 = vld [vmem:[#allocation119_spill] sm:$0xff]  ;;  %v7119_v5 = vld [vmem:[#allocation72_spill] sm:$0xff] }
 0x125   :  { %7108 = vst [vmem:[#allocation127_spill] sm:$0xff] %v4491_v13  ;;  %v1113_v59 = vmul.f32 %v4418_v45, %v7114_v9  ;;  %v1114_v13 = vmul.f32 %v4424_v31, %v7115_v62  ;;  %v1115_v46 = vmul.f32 %v4426_v22, %v7116_v12  ;;  %v7117_v34 = vld [vmem:[#allocation57_spill] sm:$0xff]  ;;  %v1116_v8 = vadd.f32 %v1108_v29, %v1100_v39  ;;  %v4514_v23 = vpop.eup %2745  ;;  %v7120_v38 = vld [vmem:[#allocation58_spill] sm:$0xff] }
 0x126   :  { %v4512_v28 = vadd.f32 %v1078_v36, %v7117_v34  ;;  %v1117_v14 = vadd.f32 %v1109_v49, %v1101_v18  ;;  %v1118_v4 = vadd.f32 %v1110_v32, %v1102_v44  ;;  %7118 = vst [vmem:[#allocation128_spill] sm:$0xff] %v4514_v23  ;;  %v4517_v3 = vadd.f32 %v1079_v19, %v7119_v5  ;;  %v7124_v34 = vld [vmem:[#allocation76_spill] sm:$0xff] }
 0x127   :  { %v4520_v42 = vadd.f32 %v1080_v11, %v7120_v38  ;;  %v1119_v9 = vadd.f32 %v1111_v20, %v1103_v57  ;;  %v1120_v55 = vadd.f32 %v1112_v6, %v1104_v51  ;;  %v1089_v12 = vadd.f32 %v1081_v54, %v7122_v2  ;;  %v7127_v57 = vld [vmem:[#allocation64_spill] sm:$0xff]  ;;  %v7128_v20 = vld [vmem:[#allocation81_spill] sm:$0xff]  ;;  %v7129_v6 = vld [vmem:[#allocation67_spill] sm:$0xff] }
 0x128   :  { %v4522_v62 = vpop.eup %2747  ;;  %v1090_v36 = vadd.f32 %v1082_v25, %v7123_v7  ;;  %v4527_v39 = vadd.f32 %v1083_v10, %v7124_v34  ;;  %v1092_v18 = vand.u32 2147483647, %v4494_v40  ;;  %v1093_v19 = vand.u32 2147483647, %v4497_v1  ;;  %v7130_v40 = vld [vmem:[#allocation87_spill] sm:$0xff]  ;;  %v7131_v2 = vld [vmem:[#allocation61_spill] sm:$0xff] }
 0x129   :  { %7121 = vst [vmem:[#allocation129_spill] sm:$0xff] %v4522_v62  ;;  %v4530_v44 = vpop.eup %2749  ;;  %v1121_v29 = vadd.f32 %v1113_v59, %v1105_v35  ;;  %v1122_v11 = vadd.f32 %v1114_v13, %v1106_v60  ;;  %v1123_v49 = vadd.f32 %v1115_v46, %v1107_v27  ;;  %v1094_v32 = vand.u32 2147483647, %v4512_v28  ;;  %v7132_v28 = vld [vmem:[#allocation65_spill] sm:$0xff]  ;;  %v7147_v5 = vld [vmem:[#allocation112_spill] sm:$0xff]  ;;  %v7150_v62 = vld [vmem:[#allocation22_spill] sm:$0xff] }
 0x12a   :  { %7125 = vst [vmem:[#allocation130_spill] sm:$0xff] %v4527_v39  ;;  %7126 = vst [vmem:[#allocation131_spill] sm:$0xff] %v4530_v44  ;;  %v1124_v51 = vadd.f32 %v1116_v8, %v7127_v57  ;;  %v1125_v54 = vadd.f32 %v1117_v14, %v7128_v20  ;;  %v1126_v25 = vadd.f32 %v1118_v4, %v7129_v6  ;;  %v1095_v10 = vand.u32 2147483647, %v4517_v3  ;;  %v7133_v8 = vld [vmem:[#allocation66_spill] sm:$0xff]  ;;  %v7134_v14 = vld [vmem:[#allocation28_spill] sm:$0xff] }
 0x12b   :  { %v1096_v34 = vand.u32 2147483647, %v4520_v42  ;;  %v1127_v7 = vadd.f32 %v1119_v9, %v7130_v40  ;;  %v1128_v38 = vadd.f32 %v1120_v55, %v7131_v2  ;;  %2751 = vtanh.f32 %v1015_v33  ;;  %v7135_v4 = vld [vmem:[#allocation60_spill] sm:$0xff]  ;;  %v7136_v40 = vld [vmem:[#allocation31_spill] sm:$0xff]  ;;  %v7145_v20 = vld [vmem:[#allocation110_spill] sm:$0xff] }
 0x12c   :  { %v1097_v1 = vand.u32 2147483647, %v1089_v12  ;;  %v1098_v35 = vand.u32 2147483647, %v1090_v36  ;;  %v1129_v60 = vadd.f32 %v1121_v29, %v7132_v28  ;;  %v1130_v27 = vadd.f32 %v1122_v11, %v7133_v8  ;;  %v7137_v36 = vld [vmem:[#allocation70_spill] sm:$0xff]  ;;  %v7138_v29 = vld [vmem:[#allocation32_spill] sm:$0xff] }
 0x12d   :  { %v4545_v59 = vadd.f32 %v1123_v49, %v7134_v14  ;;  %v1148_v3 = vmul.f32 %v4384_v43, %v7135_v4  ;;  %v1132_v42 = vand.u32 2147483647, %v1124_v51  ;;  %v1133_v13 = vand.u32 2147483647, %v1125_v54  ;;  %v7139_v8 = vld [vmem:[#allocation105_spill] sm:$0xff]  ;;  %v7140_v14 = vld [vmem:[#allocation106_spill] sm:$0xff] }
 0x12e   :  { %v1134_v9 = vand.u32 2147483647, %v1126_v25  ;;  %v1156_v55 = vmul.f32 %v4400_v41, %v7136_v40  ;;  %v1135_v33 = vand.u32 2147483647, %v1127_v7  ;;  %v1136_v12 = vand.u32 2147483647, %v1128_v38 }
 0x12f   :  { %v1149_v46 = vmul.f32 %v4386_v48, %v7137_v36  ;;  %v1157_v11 = vmul.f32 %v4408_v24, %v7138_v29  ;;  %v1150_v49 = vmul.f32 %v4388_v61, %v7139_v8  ;;  %v1151_v4 = vmul.f32 %v4390_v37, %v7140_v14  ;;  %v7141_v51 = vld [vmem:[#allocation33_spill] sm:$0xff]  ;;  %v7142_v25 = vld [vmem:[#allocation35_spill] sm:$0xff]  ;;  %v7148_v44 = vld [vmem:[#allocation20_spill] sm:$0xff] }
 0x130   :  { %v1158_v54 = vmul.f32 %v4410_v50, %v7141_v51  ;;  %v1159_v40 = vmul.f32 %v4414_v63, %v7142_v25  ;;  %v1137_v7 = vand.u32 2147483647, %v1129_v60  ;;  %v7143_v38 = vld [vmem:[#allocation107_spill] sm:$0xff]  ;;  %v1164_v29 = vadd.f32 %v1156_v55, %v1148_v3  ;;  %v7149_v25 = vld [vmem:[#allocation21_spill] sm:$0xff] }
 0x131   :  { %v1152_v28 = vmul.f32 %v4392_v16, %v7143_v38  ;;  %v7144_v36 = vld [vmem:[#allocation19_spill] sm:$0xff]  ;;  %v1138_v6 = vand.u32 2147483647, %v1130_v27  ;;  %v1153_v8 = vmul.f32 %v4396_v30, %v7145_v20  ;;  %v1155_v51 = vmul.f32 %v4422_v47, %v7147_v5 }
 0x132   :  { %v1160_v2 = vmul.f32 %v4416_v26, %v7144_v36  ;;  %v7146_v57 = vld [vmem:[#allocation111_spill] sm:$0xff]  ;;  %v1161_v60 = vmul.f32 %v4418_v45, %v7148_v44  ;;  %v1162_v38 = vmul.f32 %v4424_v31, %v7149_v25  ;;  %v1163_v36 = vmul.f32 %v4426_v22, %v7150_v62 }
 0x133   :  { %v1154_v14 = vmul.f32 %v4398_v58, %v7146_v57  ;;  %v1165_v3 = vadd.f32 %v1157_v11, %v1149_v46  ;;  %v1139_v27 = vand.u32 2147483647, %v4545_v59  ;;  %v1140_v55 = vadd.f32 %v1132_v42, %v1092_v18  ;;  %v7157_v42 = vld [vmem:[#allocation24_spill] sm:$0xff] }
 0x134   :  { %v1166_v20 = vadd.f32 %v1158_v54, %v1150_v49  ;;  %v1167_v23 = vadd.f32 %v1159_v40, %v1151_v4  ;;  %v1141_v39 = vadd.f32 %v1133_v13, %v1093_v19  ;;  %v1142_v57 = vadd.f32 %v1134_v9, %v1094_v32  ;;  %v7156_v4 = vld [vmem:[#allocation23_spill] sm:$0xff]  ;;  %v7159_v13 = vld [vmem:[#allocation120_spill] sm:$0xff]  ;;  %v7160_v9 = vld [vmem:[#allocation121_spill] sm:$0xff] }
 0x135   :  { %v1168_v26 = vadd.f32 %v1160_v2, %v1152_v28  ;;  %v1172_v5 = vadd.f32 %v1164_v29, %v6905_v15  ;;  %v4581_v47 = vpop.eup %2751  ;;  %v1143_v44 = vadd.f32 %v1135_v33, %v1095_v10  ;;  %v4583_v45 = vadd.f32 %v1136_v12, %v1096_v34  ;;  %v7161_v33 = vld [vmem:[#allocation122_spill] sm:$0xff]  ;;  %v7165_v49 = vld [vmem:[#allocation123_spill] sm:$0xff] }
 0x136   :  { %7151 = vst [vmem:[#allocation132_spill] sm:$0xff] %v4581_v47  ;;  %v4585_v25 = vadd.f32 %v1137_v7, %v1097_v1  ;;  %v4587_v31 = vadd.f32 %v1138_v6, %v1098_v35  ;;  %v1169_v46 = vadd.f32 %v1161_v60, %v1153_v8  ;;  %v1170_v11 = vadd.f32 %v1162_v38, %v1154_v14  ;;  %v7152_v6 = vld [vmem:[#allocation15_spill] sm:$0xff]  ;;  %v7154_v8 = vld [vmem:[#allocation16_spill] sm:$0xff]  ;;  %v7168_v38 = vld [vmem:[#allocation74_spill] sm:$0xff] }
 0x137   :  { %v1171_v59 = vadd.f32 %v1163_v36, %v1155_v51  ;;  %v1173_v18 = vadd.f32 %v1165_v3, %v6906_v0  ;;  %v1174_v19 = vadd.f32 %v1166_v20, %v6919_v53  ;;  %v1175_v2 = vadd.f32 %v1167_v23, %v7016_v56  ;;  %v7153_v35 = vld [vmem:[#allocation55_spill] sm:$0xff]  ;;  %v7163_v36 = vld [vmem:[#allocation113_spill] sm:$0xff]  ;;  %v7167_v7 = vld [vmem:[#allocation124_spill] sm:$0xff] }
 0x138   :  { %v1196_v32 = vmul.f32 %v4384_v43, %v7021_v21  ;;  %v1197_v34 = vmul.f32 %v4386_v48, %v7022_v17  ;;  %v1176_v10 = vadd.f32 %v1168_v26, %v7017_v52  ;;  %v1180_v40 = vand.u32 2147483647, %v1172_v5  ;;  %v7155_v14 = vld [vmem:[#allocation59_spill] sm:$0xff]  ;;  %v7158_v26 = vld [vmem:[#allocation69_spill] sm:$0xff] }
 0x139   :  { %v1198_v1 = vmul.f32 %v4388_v61, %v7152_v6  ;;  %v1199_v28 = vmul.f32 %v4390_v37, %v7153_v35  ;;  %v1200_v20 = vmul.f32 %v4392_v16, %v7154_v8  ;;  %v1201_v23 = vmul.f32 %v4396_v30, %v7155_v14  ;;  %v7162_v16 = vld [vmem:[#allocation92_spill] sm:$0xff]  ;;  %v7164_v30 = vld [vmem:[#allocation95_spill] sm:$0xff]  ;;  %v7169_v60 = vld [vmem:[#allocation125_spill] sm:$0xff] }
 0x13a   :  { %v1204_v43 = vmul.f32 %v4400_v41, %v7156_v4  ;;  %v1205_v48 = vmul.f32 %v4408_v24, %v7157_v42  ;;  %v1202_v5 = vmul.f32 %v4398_v58, %v7158_v26  ;;  %v1206_v61 = vmul.f32 %v4410_v50, %v7159_v13  ;;  %v7166_v41 = vld [vmem:[#allocation29_spill] sm:$0xff]  ;;  %v7267_v52 = vld [vmem:[#allocation67_spill] sm:$0xff] }
 0x13b   :  { %v1207_v37 = vmul.f32 %v4414_v63, %v7160_v9  ;;  %v1208_v12 = vmul.f32 %v7162_v16, %v7161_v33  ;;  %v1203_v29 = vmul.f32 %v7164_v30, %v7163_v36  ;;  %v1209_v51 = vmul.f32 %v7166_v41, %v7165_v49  ;;  %v7170_v63 = vld [vmem:[#allocation84_spill] sm:$0xff]  ;;  %v7171_v42 = vld [vmem:[#allocation89_spill] sm:$0xff]  ;;  %v7172_v33 = vld [vmem:[#allocation90_spill] sm:$0xff] }
 0x13c   :  { %v1212_v54 = vadd.f32 %v1204_v43, %v1196_v32  ;;  %v1213_v24 = vadd.f32 %v1205_v48, %v1197_v34  ;;  %v1210_v58 = vmul.f32 %v7168_v38, %v7167_v7  ;;  %v1211_v50 = vmul.f32 %v4426_v22, %v7169_v60  ;;  %v7173_v30 = vld [vmem:[#allocation27_spill] sm:$0xff]  ;;  %v7174_v48 = vld [vmem:[#allocation26_spill] sm:$0xff]  ;;  %v7175_v7 = vld [vmem:[#allocation97_spill] sm:$0xff] }
 0x13d   :  { %v1214_v3 = vadd.f32 %v1206_v61, %v1198_v1  ;;  %v1215_v13 = vadd.f32 %v1207_v37, %v1199_v28  ;;  %v1177_v9 = vadd.f32 %v1169_v46, %v7170_v63  ;;  %v1178_v16 = vadd.f32 %v1170_v11, %v7171_v42  ;;  %v7176_v46 = vld [vmem:[#allocation91_spill] sm:$0xff]  ;;  %v7177_v11 = vld [vmem:[#allocation130_spill] sm:$0xff]  ;;  %v4702_v47 = vld [vmem:[#allocation2 + $0x1b0] sm:$0xff] }
 0x13e   :  { %v1179_v4 = vadd.f32 %v1171_v59, %v7172_v33  ;;  %v1220_v36 = vadd.f32 %v1212_v54, %v7173_v30  ;;  %v1181_v26 = vand.u32 2147483647, %v1173_v18  ;;  %v1182_v41 = vand.u32 2147483647, %v1174_v19  ;;  %v7265_v42 = vld [vmem:[#allocation81_spill] sm:$0xff] }
 0x13f   :  { %v1188_v32 = vadd.f32 %v1180_v40, %v1140_v55  ;;  %v1216_v34 = vadd.f32 %v1208_v12, %v1200_v20  ;;  %v1217_v43 = vadd.f32 %v1209_v51, %v1201_v23  ;;  %v1221_v38 = vadd.f32 %v1213_v24, %v7174_v48  ;;  %v7179_v20 = vld [vmem:[#allocation98_spill] sm:$0xff]  ;;  %v7180_v12 = vld [vmem:[#allocation99_spill] sm:$0xff] }
 0x140   :  { %v1222_v49 = vadd.f32 %v1214_v3, %v7175_v7  ;;  %v1228_v22 = vand.u32 2147483647, %v1220_v36  ;;  %v1183_v1 = vand.u32 2147483647, %v1175_v2  ;;  %v1218_v28 = vadd.f32 %v1210_v58, %v1202_v5  ;;  %v7231_v7 = vld [vmem:[#allocation62_spill] sm:$0xff] }
 0x141   :  { %v1219_v61 = vadd.f32 %v1211_v50, %v1203_v29  ;;  %v1223_v37 = vadd.f32 %v1215_v13, %v7176_v46  ;;  %v7178_v60 = vand.u32 2147483647, %v7177_v11  ;;  %v1184_v14 = vand.u32 2147483647, %v1176_v10  ;;  %v7181_v29 = vld [vmem:[#allocation93_spill] sm:$0xff]  ;;  %v7182_v13 = vld [vmem:[#allocation94_spill] sm:$0xff] }
 0x142   :  { %v1185_v54 = vand.u32 2147483647, %v1177_v9  ;;  %v1186_v18 = vand.u32 2147483647, %v1178_v16  ;;  %v1187_v19 = vand.u32 2147483647, %v1179_v4  ;;  %v1189_v55 = vadd.f32 %v1181_v26, %v1141_v39 }
 0x143   :  { %v1147_v59 = vadd.f32 %v1139_v27, %v7178_v60  ;;  %v1190_v40 = vadd.f32 %v1182_v41, %v1142_v57  ;;  %v1224_v23 = vadd.f32 %v1216_v34, %v7179_v20  ;;  %v1225_v51 = vadd.f32 %v1217_v43, %v7180_v12  ;;  %v7185_v4 = vld [vmem:[#allocation80_spill] sm:$0xff]  ;;  %v7187_v26 = vld [vmem:[#allocation101_spill] sm:$0xff]  ;;  %v7192_v10 = vld [vmem:[#allocation126_spill] sm:$0xff] }
 0x144   :  { %v1229_v24 = vand.u32 2147483647, %v1221_v38  ;;  %v1230_v36 = vand.u32 2147483647, %v1222_v49  ;;  %v1236_v2 = vadd.f32 %v1228_v22, %v1188_v32  ;;  %v1191_v5 = vadd.f32 %v1183_v1, %v1143_v44  ;;  %v7189_v1 = vld [vmem:[#allocation37_spill] sm:$0xff]  ;;  %v7221_v9 = vld [vmem:[#allocation42_spill] sm:$0xff] }
 0x145   :  { %v1226_v58 = vadd.f32 %v1218_v28, %v7181_v29  ;;  %v1227_v50 = vadd.f32 %v1219_v61, %v7182_v13  ;;  %v1231_v3 = vand.u32 2147483647, %v1223_v37  ;;  %v7186_v39 = vand.u32 2147483647, %v7185_v4  ;;  %v7212_v60 = vld [vmem:[#allocation109_spill] sm:$0xff]  ;;  %v7224_v13 = vld [vmem:[#allocation43_spill] sm:$0xff] }
 0x146   :  { %v7188_v16 = vand.u32 2147483647, %v7187_v26  ;;  %v1192_v34 = vadd.f32 %v1184_v14, %v4583_v45  ;;  %v1193_v49 = vadd.f32 %v1185_v54, %v4585_v25  ;;  %v1194_v44 = vadd.f32 %v1186_v18, %v4587_v31  ;;  %v7193_v14 = vld [vmem:[#allocation127_spill] sm:$0xff]  ;;  %v7195_v18 = vld [vmem:[#allocation128_spill] sm:$0xff]  ;;  %v7230_v46 = vld [vmem:[#allocation46_spill] sm:$0xff] }
 0x147   :  { %v1016_v57 = vmul.f32 2.0, %v7186_v39  ;;  %v1232_v32 = vand.u32 2147483647, %v1224_v23  ;;  %v1233_v43 = vand.u32 2147483647, %v1225_v51  ;;  %v1237_v38 = vadd.f32 %v1229_v24, %v1189_v55  ;;  %v7196_v51 = vld [vmem:[#allocation45_spill] sm:$0xff] }
 0x148   :  { %v1017_v41 = vmul.f32 2.0, %v7188_v16  ;;  %v1238_v22 = vadd.f32 %v1230_v36, %v1190_v40  ;;  %v1244_v28 = vmul.f32 %v7189_v1, %v1236_v2  ;;  %v1195_v61 = vadd.f32 %v1187_v19, %v1147_v59  ;;  %v7197_v19 = vld [vmem:[#allocation56_spill] sm:$0xff]  ;;  %v4656_v2 = vld [vmem:[#allocation2 + $0x180] sm:$0xff]  ;;  %v7226_v1 = vld [vmem:[#allocation18_spill] sm:$0xff] }
 0x149   :  { %v1234_v37 = vand.u32 2147483647, %v1226_v58  ;;  %v1235_v11 = vand.u32 2147483647, %v1227_v50  ;;  %v1239_v4 = vadd.f32 %v1231_v3, %v1191_v5  ;;  %v1026_v45 = vsub.f32 1.0, %v7192_v10  ;;  %v7198_v50 = vld [vmem:[#allocation104_spill] sm:$0xff] }
 0x14a   :  { %v1027_v25 = vsub.f32 1.0, %v7193_v14  ;;  %2753 = vtanh.f32 %v1016_v57  ;;  %v1028_v55 = vsub.f32 1.0, %v7195_v18  ;;  %v1240_v40 = vadd.f32 %v1232_v32, %v1192_v34  ;;  %v4659_v10 = vld [vmem:[#allocation2 + $0x188] sm:$0xff]  ;;  %v7201_v34 = vld [vmem:[#allocation78_spill] sm:$0xff]  ;;  %v7228_v12 = vld [vmem:[#allocation47_spill] sm:$0xff] }
 0x14b   :  { %v1241_v23 = vadd.f32 %v1233_v43, %v1193_v49  ;;  %v1245_v59 = vmul.f32 %v7196_v51, %v1237_v38  ;;  %v1246_v24 = vmul.f32 %v7197_v19, %v1238_v22  ;;  %v2656_v36 = vadd.f32 -1.0, %v1244_v28  ;;  %v7204_v43 = vld [vmem:[#allocation63_spill] sm:$0xff]  ;;  %v4671_v28 = vld [vmem:[#allocation2 + $0x190] sm:$0xff]  ;;  %v7210_v16 = vld [vmem:[#allocation108_spill] sm:$0xff] }
 0x14c   :  { %2755 = vtanh.f32 %v1017_v41  ;;  %v1242_v5 = vadd.f32 %v1234_v37, %v1194_v44  ;;  %v1243_v58 = vadd.f32 %v1235_v11, %v1195_v61  ;;  %v1247_v3 = vmul.f32 %v7198_v50, %v1239_v4  ;;  %v4673_v41 = vld [vmem:[#allocation2 + $0x198] sm:$0xff]  ;;  %v4675_v44 = vld [vmem:[#allocation2 + $0x1a0] sm:$0xff]  ;;  %v7207_v37 = vld [vmem:[#allocation96_spill] sm:$0xff] }
 0x14d   :  { %v7202_v49 = vsub.f32 1.0, %v7201_v34  ;;  %v7205_v38 = vsub.f32 1.0, %v7204_v43  ;;  %v7208_v11 = vsub.f32 1.0, %v7207_v37  ;;  %v1248_v34 = vmul.f32 %v7210_v16, %v1240_v40  ;;  %v7211_v43 = vld [vmem:[#allocation85_spill] sm:$0xff]  ;;  %v7213_v37 = vld [vmem:[#allocation14_spill] sm:$0xff]  ;;  %v4700_v26 = vld [vmem:[#allocation2 + $0x1a8] sm:$0xff] }
 0x14e   :  { %v1249_v18 = vmul.f32 %v7212_v60, %v1241_v23  ;;  %v2657_v57 = vadd.f32 -1.0, %v1245_v59  ;;  %v1260_v61 = vand.u32 2147483647, %v2656_v36  ;;  %v1250_v40 = vmul.f32 %v7213_v37, %v1242_v5  ;;  %v4706_v59 = vld [vmem:[#allocation2 + $0x1b8] sm:$0xff]  ;;  %v4710_v36 = vld [vmem:[#allocation2 + $0x1f0] sm:$0xff]  ;;  %v7218_v39 = vld [vmem:[#allocation68_spill] sm:$0xff] }
 0x14f   :  { %v4665_v32 = vadd.f32 %v1026_v45, %v7202_v49  ;;  %v4669_v22 = vadd.f32 %v1027_v25, %v7205_v38  ;;  %v4680_v4 = vadd.f32 %v1028_v55, %v7208_v11  ;;  %v4683_v45 = vld [vmem:[#allocation2 + $0x1c0] sm:$0xff]  ;;  %v4685_v49 = vld [vmem:[#allocation2 + $0x1c8] sm:$0xff]  ;;  %v4687_v25 = vld [vmem:[#allocation2 + $0x1d0] sm:$0xff]  ;;  %v1318_v38 = vmul.f32 %v4656_v2, %v7211_v43  ;;  %7217 = vst [vmem:[#allocation130_spill] sm:$0xff] %v4710_v36 }
 0x150   :  { %v4694_v55 = vld [vmem:[#allocation2 + $0x1e0] sm:$0xff]  ;;  %v7214_v11 = vld [vmem:[#allocation100_spill] sm:$0xff]  ;;  %v4698_v54 = vadd.f32 -1.0, %v1247_v3  ;;  %v7216_v43 = vld [vmem:[#allocation86_spill] sm:$0xff]  ;;  %v1320_v5 = vmul.f32 %v4671_v28, %v7218_v39  ;;  %v1328_v37 = vmul.f32 %v4687_v25, %v7221_v9  ;;  %v1261_v14 = vand.u32 2147483647, %v2657_v57 }
 0x151   :  { %7203 = vst [vmem:[#allocation92_spill] sm:$0xff] %v4665_v32  ;;  %7206 = vst [vmem:[#allocation95_spill] sm:$0xff] %v4669_v22  ;;  %v2658_v22 = vadd.f32 -1.0, %v1246_v24  ;;  %v4692_v32 = vld [vmem:[#allocation2 + $0x1d8] sm:$0xff]  ;;  %v1319_v23 = vmul.f32 %v4659_v10, %v7216_v43  ;;  %v4708_v24 = vld [vmem:[#allocation2 + $0x1e8] sm:$0xff]  ;;  %v1323_v9 = vmul.f32 %v4700_v26, %v7226_v1  ;;  %v4750_v35 = vadd.f32 -1.0, %v1250_v40 }
 0x152   :  { %7209 = vst [vmem:[#allocation29_spill] sm:$0xff] %v4680_v4  ;;  %v1251_v4 = vmul.f32 %v7214_v11, %v1243_v58  ;;  %7215 = vst [vmem:[#allocation74_spill] sm:$0xff] %v4698_v54  ;;  %v7219_v31 = vld [vmem:[#allocation40_spill] sm:$0xff]  ;;  %v7220_v3 = vld [vmem:[#allocation41_spill] sm:$0xff]  ;;  %v1329_v39 = vmul.f32 %v4692_v32, %v7224_v13  ;;  %v1331_v13 = vmul.f32 %v4708_v24, %v7230_v46  ;;  %v1269_v6 = vmul.f32 2.0, %v1261_v14 }
 0x153   :  { %v1326_v58 = vmul.f32 %v4683_v45, %v7219_v31  ;;  %v1327_v11 = vmul.f32 %v4685_v49, %v7220_v3  ;;  %v4720_v60 = vld [vmem:[#allocation2 + $0x1f8] sm:$0xff]  ;;  %v7222_v43 = vld [vmem:[#allocation88_spill] sm:$0xff]  ;;  %v7223_v50 = vld [vmem:[#allocation17_spill] sm:$0xff]  ;;  %v1262_v27 = vand.u32 2147483647, %v2658_v22  ;;  %v1268_v3 = vmul.f32 2.0, %v1260_v61 }
 0x154   :  { %v1321_v16 = vmul.f32 %v4673_v41, %v7222_v43  ;;  %v1322_v19 = vmul.f32 %v4675_v44, %v7223_v50  ;;  %v7225_v51 = vld [vmem:[#allocation44_spill] sm:$0xff]  ;;  %v4732_v29 = vpop.eup %2753  ;;  %v1324_v43 = vmul.f32 %v4702_v47, %v7228_v12  ;;  %v7232_v57 = vld [vmem:[#allocation79_spill] sm:$0xff]  ;;  %v1336_v1 = vadd.f32 %v1328_v37, %v1320_v5  ;;  %7236 = vst [vmem:[#allocation128_spill] sm:$0xff] %v4750_v35 }
 0x155   :  { %v1330_v31 = vmul.f32 %v4694_v55, %v7225_v51  ;;  %7227 = vst [vmem:[#allocation80_spill] sm:$0xff] %v4732_v29  ;;  %v7229_v20 = vld [vmem:[#allocation12_spill] sm:$0xff]  ;;  %v1332_v51 = vmul.f32 %v4710_v36, %v7231_v7  ;;  %v1333_v22 = vmul.f32 %v4720_v60, %v7232_v57  ;;  %v1334_v61 = vadd.f32 %v1326_v58, %v1318_v38  ;;  %v7240_v5 = vld [vmem:[#allocation71_spill] sm:$0xff]  ;;  %v7258_v57 = vld [vmem:[#allocation73_spill] sm:$0xff] }
 0x156   :  { %v1325_v50 = vmul.f32 %v4706_v59, %v7229_v20  ;;  %v1335_v48 = vadd.f32 %v1327_v11, %v1319_v23  ;;  %v4744_v30 = vpop.eup %2755  ;;  %v4746_v29 = vadd.f32 -1.0, %v1248_v34  ;;  %v4748_v12 = vadd.f32 -1.0, %v1249_v18  ;;  %v7239_v23 = vld [vmem:[#allocation51_spill] sm:$0xff]  ;;  %v7262_v35 = vld [vmem:[#allocation76_spill] sm:$0xff] }
 0x157   :  { %7233 = vst [vmem:[#allocation101_spill] sm:$0xff] %v4744_v30  ;;  %v1337_v8 = vadd.f32 %v1329_v39, %v1321_v16  ;;  %v1338_v20 = vadd.f32 %v1330_v31, %v1322_v19  ;;  %v4752_v46 = vadd.f32 -1.0, %v1251_v4  ;;  %v4755_v17 = vmul.f32 2.0, %v1262_v27  ;;  %v7241_v39 = vld [vmem:[#allocation57_spill] sm:$0xff]  ;;  %v7242_v31 = vld [vmem:[#allocation72_spill] sm:$0xff]  ;;  %v7243_v4 = vld [vmem:[#allocation58_spill] sm:$0xff] }
 0x158   :  { %7234 = vst [vmem:[#allocation126_spill] sm:$0xff] %v4746_v29  ;;  %7235 = vst [vmem:[#allocation127_spill] sm:$0xff] %v4748_v12  ;;  %2757 = vtanh.f32 %v1268_v3  ;;  %v1339_v38 = vadd.f32 %v1331_v13, %v1323_v9  ;;  %v1340_v37 = vadd.f32 %v1332_v51, %v1324_v43  ;;  %v1341_v11 = vadd.f32 %v1333_v22, %v1325_v50  ;;  %v7244_v27 = vld [vmem:[#allocation36_spill] sm:$0xff]  ;;  %v7246_v51 = vld [vmem:[#allocation13_spill] sm:$0xff] }
 0x159   :  { %7237 = vst [vmem:[#allocation78_spill] sm:$0xff] %v4752_v46  ;;  %7238 = vst [vmem:[#allocation63_spill] sm:$0xff] %v4755_v17  ;;  %v1342_v34 = vadd.f32 %v1334_v61, %v7239_v23  ;;  %v4759_v18 = vadd.f32 %v1335_v48, %v7240_v5  ;;  %v4762_v16 = vadd.f32 %v1336_v1, %v7241_v39  ;;  %v7245_v13 = vld [vmem:[#allocation48_spill] sm:$0xff]  ;;  %v7247_v48 = vld [vmem:[#allocation38_spill] sm:$0xff]  ;;  %2759 = vtanh.f32 %v1269_v6 }
 0x15a   :  { %v4765_v19 = vadd.f32 %v1337_v8, %v7242_v31  ;;  %v4768_v40 = vadd.f32 %v1338_v20, %v7243_v4  ;;  %v1358_v14 = vmul.f32 %v4656_v2, %v7244_v27  ;;  %v1359_v9 = vmul.f32 %v4659_v10, %v7245_v13  ;;  %v7248_v1 = vld [vmem:[#allocation11_spill] sm:$0xff]  ;;  %v7249_v8 = vld [vmem:[#allocation30_spill] sm:$0xff]  ;;  %v7251_v61 = vld [vmem:[#allocation49_spill] sm:$0xff] }
 0x15b   :  { %v1360_v50 = vmul.f32 %v4671_v28, %v7246_v51  ;;  %v1361_v43 = vmul.f32 %v4673_v41, %v7247_v48  ;;  %v1366_v58 = vmul.f32 %v4683_v45, %v7248_v1  ;;  %v1367_v3 = vmul.f32 %v4685_v49, %v7249_v8  ;;  %v7250_v20 = vld [vmem:[#allocation39_spill] sm:$0xff]  ;;  %v7252_v4 = vld [vmem:[#allocation114_spill] sm:$0xff]  ;;  %v7255_v27 = vld [vmem:[#allocation53_spill] sm:$0xff] }
 0x15c   :  { %v1362_v22 = vmul.f32 %v4675_v44, %v7250_v20  ;;  %v1363_v7 = vmul.f32 %v4700_v26, %v7251_v61  ;;  %v1368_v31 = vmul.f32 %v4687_v25, %v7252_v4  ;;  %v7253_v39 = vld [vmem:[#allocation115_spill] sm:$0xff]  ;;  %v7254_v13 = vld [vmem:[#allocation50_spill] sm:$0xff]  ;;  %v1365_v1 = vmul.f32 %v4706_v59, %v7255_v27  ;;  %v7256_v5 = vld [vmem:[#allocation116_spill] sm:$0xff] }
 0x15d   :  { %v1369_v51 = vmul.f32 %v4692_v32, %v7253_v39  ;;  %v1364_v48 = vmul.f32 %v4702_v47, %v7254_v13  ;;  %v1370_v8 = vmul.f32 %v4694_v55, %v7256_v5  ;;  %v7257_v23 = vld [vmem:[#allocation117_spill] sm:$0xff]  ;;  %v4799_v61 = vadd.f32 %v1339_v38, %v7258_v57  ;;  %v7259_v30 = vld [vmem:[#allocation75_spill] sm:$0xff]  ;;  %v7260_v46 = vld [vmem:[#allocation118_spill] sm:$0xff] }
 0x15e   :  { %v1371_v20 = vmul.f32 %v4708_v24, %v7257_v23  ;;  %v4802_v4 = vadd.f32 %v1340_v37, %v7259_v30  ;;  %v1372_v39 = vmul.f32 %v4710_v36, %v7260_v46  ;;  %v7261_v54 = vld [vmem:[#allocation119_spill] sm:$0xff]  ;;  %v4809_v27 = vadd.f32 %v1341_v11, %v7262_v35  ;;  %v7264_v37 = vld [vmem:[#allocation64_spill] sm:$0xff] }
 0x15f   :  { %v1373_v13 = vmul.f32 %v4720_v60, %v7261_v54  ;;  %v1374_v12 = vadd.f32 %v1366_v58, %v1358_v14  ;;  %v1375_v5 = vadd.f32 %v1367_v3, %v1359_v9  ;;  %v1376_v17 = vadd.f32 %v1368_v31, %v1360_v50  ;;  %v7268_v35 = vld [vmem:[#allocation87_spill] sm:$0xff]  ;;  %v7269_v9 = vld [vmem:[#allocation61_spill] sm:$0xff] }
 0x160   :  { %7263 = vst [vmem:[#allocation96_spill] sm:$0xff] %v4809_v27  ;;  %v1350_v29 = vand.u32 2147483647, %v1342_v34  ;;  %v1377_v23 = vadd.f32 %v1369_v51, %v1361_v43  ;;  %v1378_v21 = vadd.f32 %v1370_v8, %v1362_v22  ;;  %v1379_v38 = vadd.f32 %v1371_v20, %v1363_v7  ;;  %v7270_v51 = vld [vmem:[#allocation65_spill] sm:$0xff]  ;;  %v7276_v22 = vld [vmem:[#allocation106_spill] sm:$0xff] }
 0x161   :  { %v1380_v57 = vadd.f32 %v1372_v39, %v1364_v48  ;;  %v1381_v33 = vadd.f32 %v1373_v13, %v1365_v1  ;;  %v1382_v30 = vadd.f32 %v1374_v12, %v7264_v37  ;;  %v1383_v63 = vadd.f32 %v1375_v5, %v7265_v42  ;;  %v7271_v39 = vld [vmem:[#allocation66_spill] sm:$0xff]  ;;  %v7272_v48 = vld [vmem:[#allocation28_spill] sm:$0xff]  ;;  %v7275_v20 = vld [vmem:[#allocation105_spill] sm:$0xff] }
 0x162   :  { %v4813_v46 = vpop.eup %2757  ;;  %v1351_v54 = vand.u32 2147483647, %v4759_v18  ;;  %v1384_v11 = vadd.f32 %v1376_v17, %v7267_v52  ;;  %v1385_v14 = vadd.f32 %v1377_v23, %v7268_v35  ;;  %v1386_v31 = vadd.f32 %v1378_v21, %v7269_v9  ;;  %v7282_v23 = vld [vmem:[#allocation32_spill] sm:$0xff] }
 0x163   :  { %7266 = vst [vmem:[#allocation133_spill] sm:$0xff] %v4813_v46  ;;  %v1352_v34 = vand.u32 2147483647, %v4762_v16  ;;  %v1387_v7 = vadd.f32 %v1379_v38, %v7270_v51  ;;  %v1388_v13 = vadd.f32 %v1380_v57, %v7271_v39  ;;  %v1390_v50 = vand.u32 2147483647, %v1382_v30  ;;  %v7273_v57 = vld [vmem:[#allocation60_spill] sm:$0xff]  ;;  %v4864_v27 = vpop.eup %2759 }
 0x164   :  { %v1353_v12 = vand.u32 2147483647, %v4765_v19  ;;  %v1354_v5 = vand.u32 2147483647, %v4768_v40  ;;  %v1355_v18 = vand.u32 2147483647, %v4799_v61  ;;  %v4828_v21 = vadd.f32 %v1381_v33, %v7272_v48 }
 0x165   :  { %v1356_v17 = vand.u32 2147483647, %v4802_v4  ;;  %v1391_v16 = vand.u32 2147483647, %v1383_v63  ;;  %v1392_v43 = vand.u32 2147483647, %v1384_v11  ;;  %v1406_v6 = vmul.f32 %v4656_v2, %v7273_v57 }
 0x166   :  { %v1393_v1 = vand.u32 2147483647, %v1385_v14  ;;  %v1394_v58 = vand.u32 2147483647, %v1386_v31  ;;  %v1395_v30 = vand.u32 2147483647, %v1387_v7  ;;  %v1398_v8 = vadd.f32 %v1390_v50, %v1350_v29 }
 0x167   :  { %v1396_v19 = vand.u32 2147483647, %v1388_v13  ;;  %v7274_v40 = vld [vmem:[#allocation70_spill] sm:$0xff]  ;;  %v1408_v4 = vmul.f32 %v4671_v28, %v7275_v20  ;;  %v1409_v33 = vmul.f32 %v4673_v41, %v7276_v22  ;;  %v7277_v61 = vld [vmem:[#allocation107_spill] sm:$0xff]  ;;  %v7280_v7 = vld [vmem:[#allocation112_spill] sm:$0xff]  ;;  %v1415_v20 = vmul.f32 %v4685_v49, %v7282_v23 }
 0x168   :  { %v1407_v3 = vmul.f32 %v4659_v10, %v7274_v40  ;;  %v1410_v63 = vmul.f32 %v4675_v44, %v7277_v61  ;;  %v7278_v38 = vld [vmem:[#allocation110_spill] sm:$0xff]  ;;  %v7279_v14 = vld [vmem:[#allocation111_spill] sm:$0xff]  ;;  %v1413_v29 = vmul.f32 %v4706_v59, %v7280_v7  ;;  %v7283_v40 = vld [vmem:[#allocation33_spill] sm:$0xff] }
 0x169   :  { %v1411_v11 = vmul.f32 %v4700_v26, %v7278_v38  ;;  %v1412_v31 = vmul.f32 %v4702_v47, %v7279_v14  ;;  %v7281_v13 = vld [vmem:[#allocation31_spill] sm:$0xff]  ;;  %v1416_v22 = vmul.f32 %v4687_v25, %v7283_v40  ;;  %v7286_v39 = vld [vmem:[#allocation20_spill] sm:$0xff]  ;;  %v7287_v51 = vld [vmem:[#allocation21_spill] sm:$0xff] }
 0x16a   :  { %v1414_v50 = vmul.f32 %v4683_v45, %v7281_v13  ;;  %v7284_v57 = vld [vmem:[#allocation35_spill] sm:$0xff]  ;;  %v1419_v14 = vmul.f32 %v4708_v24, %v7286_v39  ;;  %v1420_v7 = vmul.f32 %v4710_v36, %v7287_v51  ;;  %v1421_v13 = vmul.f32 %v4720_v60, %v7150_v62 }
 0x16b   :  { %v1417_v61 = vmul.f32 %v4692_v32, %v7284_v57  ;;  %v7285_v48 = vld [vmem:[#allocation19_spill] sm:$0xff]  ;;  %v1423_v23 = vadd.f32 %v1415_v20, %v1407_v3  ;;  %v1424_v35 = vadd.f32 %v1416_v22, %v1408_v4  ;;  %v1399_v20 = vadd.f32 %v1391_v16, %v1351_v54  ;;  %v7290_v4 = vld [vmem:[#allocation89_spill] sm:$0xff]  ;;  %v7293_v16 = vld [vmem:[#allocation54_spill] sm:$0xff] }
 0x16c   :  { %v1418_v38 = vmul.f32 %v4694_v55, %v7285_v48  ;;  %v1422_v9 = vadd.f32 %v1414_v50, %v1406_v6  ;;  %v1427_v42 = vadd.f32 %v1419_v14, %v1411_v11  ;;  %v1428_v37 = vadd.f32 %v1420_v7, %v1412_v31  ;;  %v7288_v36 = vld [vmem:[#allocation83_spill] sm:$0xff]  ;;  %v7289_v6 = vld [vmem:[#allocation84_spill] sm:$0xff]  ;;  %v7291_v31 = vld [vmem:[#allocation90_spill] sm:$0xff] }
 0x16d   :  { %v1425_v52 = vadd.f32 %v1417_v61, %v1409_v33  ;;  %v1429_v57 = vadd.f32 %v1421_v13, %v1413_v29  ;;  %v1431_v48 = vadd.f32 %v1423_v23, %v6906_v0  ;;  %v1432_v39 = vadd.f32 %v1424_v35, %v6919_v53 }
 0x16e   :  { %v1426_v40 = vadd.f32 %v1418_v38, %v1410_v63  ;;  %v1430_v46 = vadd.f32 %v1422_v9, %v6905_v15  ;;  %v1435_v3 = vadd.f32 %v1427_v42, %v7289_v6  ;;  %v1436_v22 = vadd.f32 %v1428_v37, %v7290_v4  ;;  %v7292_v42 = vld [vmem:[#allocation52_spill] sm:$0xff] }
 0x16f   :  { %v1433_v51 = vadd.f32 %v1425_v52, %v7016_v56  ;;  %v1439_v61 = vand.u32 2147483647, %v1431_v48  ;;  %v1400_v9 = vadd.f32 %v1392_v43, %v1352_v34  ;;  %v1401_v38 = vadd.f32 %v1393_v1, %v1353_v12  ;;  %v7294_v12 = vld [vmem:[#allocation15_spill] sm:$0xff]  ;;  %v7296_v43 = vld [vmem:[#allocation16_spill] sm:$0xff] }
 0x170   :  { %v1434_v62 = vadd.f32 %v1426_v40, %v7288_v36  ;;  %v1438_v33 = vand.u32 2147483647, %v1430_v46  ;;  %v1402_v23 = vadd.f32 %v1394_v58, %v1354_v5  ;;  %v1403_v11 = vadd.f32 %v1395_v30, %v1355_v18  ;;  %v7295_v18 = vld [vmem:[#allocation55_spill] sm:$0xff] }
 0x171   :  { %v1404_v14 = vadd.f32 %v1396_v19, %v1356_v17  ;;  %v4873_v35 = vadd.f32 %v1429_v57, %v7291_v31  ;;  %v1440_v52 = vand.u32 2147483647, %v1432_v39  ;;  %v1441_v7 = vand.u32 2147483647, %v1433_v51  ;;  %v7299_v57 = vld [vmem:[#allocation23_spill] sm:$0xff]  ;;  %v7308_v31 = vld [vmem:[#allocation125_spill] sm:$0xff] }
 0x172   :  { %v1442_v40 = vand.u32 2147483647, %v1434_v62  ;;  %v1443_v29 = vand.u32 2147483647, %v1435_v3  ;;  %v1454_v54 = vmul.f32 %v4656_v2, %v7292_v42  ;;  %v1444_v37 = vand.u32 2147483647, %v1436_v22 }
 0x173   :  { %v1446_v46 = vadd.f32 %v1438_v33, %v1398_v8  ;;  %v1447_v48 = vadd.f32 %v1439_v61, %v1399_v20  ;;  %v1455_v34 = vmul.f32 %v4659_v10, %v7293_v16  ;;  %v1456_v5 = vmul.f32 %v4671_v28, %v7294_v12  ;;  %v7297_v62 = vld [vmem:[#allocation59_spill] sm:$0xff]  ;;  %v7298_v2 = vld [vmem:[#allocation69_spill] sm:$0xff]  ;;  %v7300_v10 = vld [vmem:[#allocation24_spill] sm:$0xff] }
 0x174   :  { %v1457_v17 = vmul.f32 %v4673_v41, %v7295_v18  ;;  %v1458_v51 = vmul.f32 %v4675_v44, %v7296_v43  ;;  %v1459_v39 = vmul.f32 %v4700_v26, %v7297_v62  ;;  %v1448_v1 = vadd.f32 %v1440_v52, %v1400_v9  ;;  %v7301_v28 = vld [vmem:[#allocation120_spill] sm:$0xff]  ;;  %v7302_v41 = vld [vmem:[#allocation121_spill] sm:$0xff]  ;;  %v7303_v44 = vld [vmem:[#allocation122_spill] sm:$0xff] }
 0x175   :  { %v1460_v58 = vmul.f32 %v4702_v47, %v7298_v2  ;;  %v1462_v30 = vmul.f32 %v4683_v45, %v7299_v57  ;;  %v1463_v19 = vmul.f32 %v4685_v49, %v7300_v10  ;;  %v1464_v8 = vmul.f32 %v4687_v25, %v7301_v28  ;;  %v7304_v26 = vld [vmem:[#allocation123_spill] sm:$0xff]  ;;  %v7305_v20 = vld [vmem:[#allocation113_spill] sm:$0xff]  ;;  %v7306_v22 = vld [vmem:[#allocation124_spill] sm:$0xff] }
 0x176   :  { %v1465_v13 = vmul.f32 %v4692_v32, %v7302_v41  ;;  %v1466_v50 = vmul.f32 %v4694_v55, %v7303_v44  ;;  %v1467_v3 = vmul.f32 %v4708_v24, %v7304_v26  ;;  %v1461_v47 = vmul.f32 %v4706_v59, %v7305_v20  ;;  %v7307_v45 = vld [vmem:[#allocation130_spill] sm:$0xff]  ;;  %v7309_v55 = vld [vmem:[#allocation27_spill] sm:$0xff]  ;;  %v7311_v26 = vld [vmem:[#allocation97_spill] sm:$0xff] }
 0x177   :  { %v1468_v33 = vmul.f32 %v7307_v45, %v7306_v22  ;;  %v1470_v61 = vadd.f32 %v1462_v30, %v1454_v54  ;;  %v1471_v49 = vadd.f32 %v1463_v19, %v1455_v34  ;;  %v1472_v9 = vadd.f32 %v1464_v8, %v1456_v5  ;;  %v7310_v28 = vld [vmem:[#allocation26_spill] sm:$0xff]  ;;  %v7312_v59 = vld [vmem:[#allocation91_spill] sm:$0xff] }
 0x178   :  { %v1473_v52 = vadd.f32 %v1465_v13, %v1457_v17  ;;  %v1474_v25 = vadd.f32 %v1466_v50, %v1458_v51  ;;  %v1475_v63 = vadd.f32 %v1467_v3, %v1459_v39  ;;  %v1469_v32 = vmul.f32 %v4720_v60, %v7308_v31  ;;  %v7313_v57 = vld [vmem:[#allocation98_spill] sm:$0xff]  ;;  %v7314_v54 = vld [vmem:[#allocation99_spill] sm:$0xff]  ;;  %v7315_v17 = vld [vmem:[#allocation93_spill] sm:$0xff] }
 0x179   :  { %v1476_v41 = vadd.f32 %v1468_v33, %v1460_v58  ;;  %v1478_v44 = vadd.f32 %v1470_v61, %v7309_v55  ;;  %v1479_v24 = vadd.f32 %v1471_v49, %v7310_v28  ;;  %v1480_v10 = vadd.f32 %v1472_v9, %v7311_v26  ;;  %v7386_v28 = vld [vmem:[#allocation79_spill] sm:$0xff] }
 0x17a   :  { %v1481_v20 = vadd.f32 %v1473_v52, %v7312_v59  ;;  %v1482_v45 = vadd.f32 %v1474_v25, %v7313_v57  ;;  %v1483_v34 = vadd.f32 %v1475_v63, %v7314_v54  ;;  %v1449_v5 = vadd.f32 %v1441_v7, %v1401_v38  ;;  %v7316_v25 = vld [vmem:[#allocation126_spill] sm:$0xff]  ;;  %v7317_v63 = vld [vmem:[#allocation63_spill] sm:$0xff]  ;;  %v7318_v7 = vld [vmem:[#allocation37_spill] sm:$0xff] }
 0x17b   :  { %v1484_v51 = vadd.f32 %v1476_v41, %v7315_v17  ;;  %v1486_v39 = vand.u32 2147483647, %v1478_v44  ;;  %v1487_v30 = vand.u32 2147483647, %v1479_v24  ;;  %v1450_v19 = vadd.f32 %v1442_v40, %v1402_v23  ;;  %v7319_v44 = vld [vmem:[#allocation103_spill] sm:$0xff]  ;;  %v7321_v40 = vld [vmem:[#allocation129_spill] sm:$0xff] }
 0x17c   :  { %v1488_v60 = vand.u32 2147483647, %v1480_v10  ;;  %v1489_v58 = vand.u32 2147483647, %v1481_v20  ;;  %v1490_v8 = vand.u32 2147483647, %v1482_v45  ;;  %v1451_v13 = vadd.f32 %v1443_v29, %v1403_v11 }
 0x17d   :  { %v1452_v50 = vadd.f32 %v1444_v37, %v1404_v14  ;;  %v1477_v3 = vadd.f32 %v1469_v32, %v1461_v47  ;;  %v1494_v33 = vadd.f32 %v1486_v39, %v1446_v46  ;;  %v1491_v61 = vand.u32 2147483647, %v1483_v34  ;;  %v7324_v11 = vld [vmem:[#allocation127_spill] sm:$0xff]  ;;  %v7325_v37 = vld [vmem:[#allocation45_spill] sm:$0xff]  ;;  %v7329_v45 = vld [vmem:[#allocation94_spill] sm:$0xff] }
 0x17e   :  { %v1492_v49 = vand.u32 2147483647, %v1484_v51  ;;  %v1495_v9 = vadd.f32 %v1487_v30, %v1447_v48  ;;  %v1496_v52 = vadd.f32 %v1488_v60, %v1448_v1  ;;  %v1264_v57 = vand.u32 2147483647, %v7316_v25  ;;  %v7326_v48 = vld [vmem:[#allocation96_spill] sm:$0xff]  ;;  %v7332_v60 = vld [vmem:[#allocation74_spill] sm:$0xff] }
 0x17f   :  { %2761 = vtanh.f32 %v7317_v63  ;;  %v1497_v38 = vadd.f32 %v1489_v58, %v1449_v5  ;;  %v1502_v41 = vmul.f32 %v7318_v7, %v1494_v33  ;;  %v7320_v23 = vsub.f32 1.0, %v7319_v44  ;;  %v7330_v5 = vld [vmem:[#allocation56_spill] sm:$0xff]  ;;  %v7381_v17 = vld [vmem:[#allocation43_spill] sm:$0xff]  ;;  %v7383_v59 = vld [vmem:[#allocation46_spill] sm:$0xff] }
 0x180   :  { %v7322_v10 = vsub.f32 1.0, %v7321_v40  ;;  %v1265_v14 = vand.u32 2147483647, %v7324_v11  ;;  %v1498_v29 = vadd.f32 %v1490_v8, %v1450_v19  ;;  %v1503_v46 = vmul.f32 %v7325_v37, %v1495_v9  ;;  %v7331_v39 = vld [vmem:[#allocation128_spill] sm:$0xff]  ;;  %v7334_v8 = vld [vmem:[#allocation78_spill] sm:$0xff]  ;;  %v7375_v37 = vld [vmem:[#allocation17_spill] sm:$0xff] }
 0x181   :  { %v7327_v1 = vand.u32 2147483647, %v7326_v48  ;;  %v7328_v47 = vand.u32 2147483647, %v4828_v21  ;;  %v1445_v24 = vand.u32 2147483647, %v4873_v35  ;;  %v1485_v34 = vadd.f32 %v1477_v3, %v7329_v45 }
 0x182   :  { %v4921_v20 = vadd.f32 %v7322_v10, %v7320_v23  ;;  %v1504_v51 = vmul.f32 %v7330_v5, %v1496_v52  ;;  %v1266_v30 = vand.u32 2147483647, %v7331_v39  ;;  %v7333_v58 = vand.u32 2147483647, %v7332_v60  ;;  %v7335_v44 = vld [vmem:[#allocation104_spill] sm:$0xff]  ;;  %v7337_v35 = vld [vmem:[#allocation101_spill] sm:$0xff] }
 0x183   :  { %v1405_v32 = vadd.f32 %v7328_v47, %v7327_v1  ;;  %v1499_v25 = vadd.f32 %v1491_v61, %v1451_v13  ;;  %v1500_v19 = vadd.f32 %v1492_v49, %v1452_v50  ;;  %v1267_v9 = vand.u32 2147483647, %v7334_v8  ;;  %v7336_v40 = vld [vmem:[#allocation80_spill] sm:$0xff]  ;;  %v7339_v13 = vld [vmem:[#allocation109_spill] sm:$0xff]  ;;  %v7340_v61 = vld [vmem:[#allocation14_spill] sm:$0xff] }
 0x184   :  { %7323 = vst [vmem:[#allocation130_spill] sm:$0xff] %v4921_v20  ;;  %v1271_v33 = vmul.f32 2.0, %v7333_v58  ;;  %v1272_v63 = vmul.f32 2.0, %v1264_v57  ;;  %v1505_v23 = vmul.f32 %v7335_v44, %v1497_v38  ;;  %v2664_v21 = vadd.f32 -1.0, %v1502_v41  ;;  %v7338_v3 = vld [vmem:[#allocation108_spill] sm:$0xff]  ;;  %v7341_v8 = vld [vmem:[#allocation25_spill] sm:$0xff] }
 0x185   :  { %v1032_v10 = vsub.f32 1.0, %v7336_v40  ;;  %v1033_v11 = vsub.f32 1.0, %v7337_v35  ;;  %v1506_v48 = vmul.f32 %v7338_v3, %v1498_v29  ;;  %v2665_v52 = vadd.f32 -1.0, %v1503_v46  ;;  %v7343_v35 = vld [vmem:[#allocation131_spill] sm:$0xff]  ;;  %v5017_v5 = vld [vmem:[#allocation2 + $0x270] sm:$0xff]  ;;  %v7382_v54 = vld [vmem:[#allocation44_spill] sm:$0xff] }
 0x186   :  { %v1273_v1 = vmul.f32 2.0, %v1265_v14  ;;  %v1453_v47 = vadd.f32 %v1445_v24, %v1405_v32  ;;  %v1493_v39 = vand.u32 2147483647, %v1485_v34  ;;  %v2666_v60 = vadd.f32 -1.0, %v1504_v51  ;;  %v7346_v14 = vld [vmem:[#allocation77_spill] sm:$0xff]  ;;  %v7348_v32 = vld [vmem:[#allocation132_spill] sm:$0xff] }
 0x187   :  { %v1274_v58 = vmul.f32 2.0, %v1266_v30  ;;  %2763 = vtanh.f32 %v1271_v33  ;;  %v1507_v50 = vmul.f32 %v7339_v13, %v1499_v25  ;;  %v1508_v57 = vmul.f32 %v7340_v61, %v1500_v19  ;;  %v7352_v25 = vld [vmem:[#allocation133_spill] sm:$0xff]  ;;  %v5005_v61 = vld [vmem:[#allocation2 + $0x258] sm:$0xff]  ;;  %v5007_v13 = vld [vmem:[#allocation2 + $0x260] sm:$0xff] }
 0x188   :  { %v1275_v49 = vmul.f32 2.0, %v1267_v9  ;;  %2765 = vtanh.f32 %v1272_v63  ;;  %v2667_v38 = vadd.f32 -1.0, %v1505_v23  ;;  %v1518_v41 = vand.u32 2147483647, %v2664_v21  ;;  %v7353_v23 = vld [vmem:[#allocation102_spill] sm:$0xff]  ;;  %7368 = vst [vmem:[#allocation80_spill] sm:$0xff] %v5005_v61 }
 0x189   :  { %v7342_v40 = vsub.f32 1.0, %v7341_v8  ;;  %v7344_v44 = vsub.f32 1.0, %v7343_v35  ;;  %v7347_v46 = vsub.f32 1.0, %v7346_v14  ;;  %v7349_v24 = vsub.f32 1.0, %v7348_v32  ;;  %v4954_v33 = vpop.eup %2761  ;;  %v4965_v35 = vld [vmem:[#allocation2 + $0x200] sm:$0xff]  ;;  %7369 = vst [vmem:[#allocation101_spill] sm:$0xff] %v5007_v13 }
 0x18a   :  { %v2668_v51 = vadd.f32 -1.0, %v1506_v48  ;;  %v1519_v30 = vand.u32 2147483647, %v2665_v52  ;;  %7351 = vst [vmem:[#allocation103_spill] sm:$0xff] %v4954_v33  ;;  %2767 = vtanh.f32 %v1273_v1  ;;  %v1284_v19 = vsub.f32 1.0, %v7352_v25  ;;  %v4967_v48 = vld [vmem:[#allocation2 + $0x208] sm:$0xff] }
 0x18b   :  { %v4946_v29 = vadd.f32 %v7344_v44, %v7342_v40  ;;  %v4952_v34 = vadd.f32 %v7349_v24, %v7347_v46  ;;  %v1501_v9 = vadd.f32 %v1493_v39, %v1453_v47  ;;  %v1520_v63 = vand.u32 2147483647, %v2666_v60  ;;  %v7356_v52 = vld [vmem:[#allocation34_spill] sm:$0xff]  ;;  %v4973_v60 = vld [vmem:[#allocation2 + $0x210] sm:$0xff]  ;;  %v4981_v24 = vld [vmem:[#allocation2 + $0x248] sm:$0xff] }
 0x18c   :  { %v7354_v21 = vsub.f32 1.0, %v7353_v23  ;;  %2769 = vtanh.f32 %v1274_v58  ;;  %v4961_v44 = vadd.f32 -1.0, %v1507_v50  ;;  %v4963_v40 = vadd.f32 -1.0, %v1508_v57  ;;  %v4977_v58 = vld [vmem:[#allocation2 + $0x240] sm:$0xff]  ;;  %7360 = vst [vmem:[#allocation128_spill] sm:$0xff] %v4981_v24  ;;  %v7361_v25 = vld [vmem:[#allocation92_spill] sm:$0xff] }
 0x18d   :  { %7345 = vst [vmem:[#allocation126_spill] sm:$0xff] %v4946_v29  ;;  %7350 = vst [vmem:[#allocation63_spill] sm:$0xff] %v4952_v34  ;;  %v7357_v14 = vsub.f32 1.0, %v7356_v52  ;;  %2771 = vtanh.f32 %v1275_v49  ;;  %v1521_v47 = vand.u32 2147483647, %v2667_v38  ;;  %v1526_v39 = vmul.f32 2.0, %v1518_v41 }
 0x18e   :  { %v4959_v8 = vadd.f32 %v1032_v10, %v7354_v21  ;;  %v4975_v10 = vld [vmem:[#allocation2 + $0x218] sm:$0xff]  ;;  %7359 = vst [vmem:[#allocation96_spill] sm:$0xff] %v4977_v58  ;;  %v1285_v50 = vsub.f32 1.0, %v4864_v27  ;;  %v1522_v46 = vand.u32 2147483647, %v2668_v51  ;;  %v1527_v32 = vmul.f32 2.0, %v1519_v30 }
 0x18f   :  { %v4971_v1 = vadd.f32 %v1033_v11, %v7357_v14  ;;  %v4984_v11 = vadd.f32 %v1284_v19, %v7361_v25  ;;  %v7363_v49 = vld [vmem:[#allocation100_spill] sm:$0xff]  ;;  %v1528_v41 = vmul.f32 2.0, %v1520_v63  ;;  %v4987_v23 = vld [vmem:[#allocation2 + $0x220] sm:$0xff]  ;;  %v4991_v52 = vld [vmem:[#allocation2 + $0x230] sm:$0xff]  ;;  %v1523_v51 = vand.u32 2147483647, %v4961_v44 }
 0x190   :  { %7355 = vst [vmem:[#allocation129_spill] sm:$0xff] %v4959_v8  ;;  %v1509_v38 = vmul.f32 %v7363_v49, %v1501_v9  ;;  %v4989_v21 = vld [vmem:[#allocation2 + $0x228] sm:$0xff]  ;;  %v7364_v14 = vld [vmem:[#allocation85_spill] sm:$0xff]  ;;  %v1524_v30 = vand.u32 2147483647, %v4963_v40  ;;  %v4997_v57 = vld [vmem:[#allocation2 + $0x238] sm:$0xff]  ;;  %2773 = vtanh.f32 %v1526_v39  ;;  %v1580_v7 = vmul.f32 %v4987_v23, %v7375_v37 }
 0x191   :  { %7358 = vst [vmem:[#allocation127_spill] sm:$0xff] %v4971_v1  ;;  %7362 = vst [vmem:[#allocation74_spill] sm:$0xff] %v4984_v11  ;;  %v1576_v27 = vmul.f32 %v4965_v35, %v7364_v14  ;;  %v4999_v19 = vld [vmem:[#allocation2 + $0x250] sm:$0xff]  ;;  %v7366_v25 = vld [vmem:[#allocation86_spill] sm:$0xff]  ;;  %v1529_v11 = vmul.f32 2.0, %v1521_v47  ;;  %v5015_v3 = vpop.eup %2763  ;;  %2775 = vtanh.f32 %v1527_v32  ;;  %v1588_v37 = vmul.f32 %v5007_v13, %v7382_v54 }
 0x192   :  { %7365 = vst [vmem:[#allocation78_spill] sm:$0xff] %v4999_v19  ;;  %v1577_v9 = vmul.f32 %v4967_v48, %v7366_v25  ;;  %v7367_v63 = vld [vmem:[#allocation68_spill] sm:$0xff]  ;;  %v7372_v1 = vld [vmem:[#allocation41_spill] sm:$0xff]  ;;  %7373 = vst [vmem:[#allocation131_spill] sm:$0xff] %v5015_v3  ;;  %v1530_v25 = vmul.f32 2.0, %v1522_v46  ;;  %v5025_v34 = vpop.eup %2765  ;;  %2777 = vtanh.f32 %v1528_v41  ;;  %v5058_v62 = vmul.f32 2.0, %v1524_v30 }
 0x193   :  { %v1578_v49 = vmul.f32 %v4973_v60, %v7367_v63  ;;  %v5009_v14 = vld [vmem:[#allocation2 + $0x268] sm:$0xff]  ;;  %v1585_v8 = vmul.f32 %v4981_v24, %v7372_v1  ;;  %v5019_v47 = vld [vmem:[#allocation2 + $0x278] sm:$0xff]  ;;  %7376 = vst [vmem:[#allocation77_spill] sm:$0xff] %v5025_v34  ;;  %v7378_v29 = vld [vmem:[#allocation47_spill] sm:$0xff]  ;;  %2779 = vtanh.f32 %v1529_v11 }
 0x194   :  { %7370 = vst [vmem:[#allocation25_spill] sm:$0xff] %v5009_v14  ;;  %v7371_v44 = vld [vmem:[#allocation40_spill] sm:$0xff]  ;;  %v1582_v46 = vmul.f32 %v4991_v52, %v7378_v29  ;;  %v7380_v33 = vld [vmem:[#allocation42_spill] sm:$0xff]  ;;  %v1589_v41 = vmul.f32 %v5009_v14, %v7383_v59  ;;  %v5041_v26 = vpop.eup %2767  ;;  %v7388_v54 = vld [vmem:[#allocation95_spill] sm:$0xff]  ;;  %2781 = vtanh.f32 %v1530_v25 }
 0x195   :  { %v1584_v40 = vmul.f32 %v4977_v58, %v7371_v44  ;;  %v7374_v39 = vld [vmem:[#allocation88_spill] sm:$0xff]  ;;  %v7377_v44 = vld [vmem:[#allocation18_spill] sm:$0xff]  ;;  %v1586_v45 = vmul.f32 %v4999_v19, %v7380_v33  ;;  %7384 = vst [vmem:[#allocation132_spill] sm:$0xff] %v5041_v26  ;;  %v1593_v55 = vadd.f32 %v1585_v8, %v1577_v9  ;;  %v5052_v2 = vadd.f32 %v1285_v50, %v7388_v54  ;;  %v7393_v3 = vld [vmem:[#allocation51_spill] sm:$0xff] }
 0x196   :  { %v1579_v63 = vmul.f32 %v4975_v10, %v7374_v39  ;;  %v1581_v1 = vmul.f32 %v4989_v21, %v7377_v44  ;;  %v7379_v32 = vld [vmem:[#allocation12_spill] sm:$0xff]  ;;  %v1587_v39 = vmul.f32 %v5005_v61, %v7381_v17  ;;  %v7385_v44 = vld [vmem:[#allocation62_spill] sm:$0xff]  ;;  %v5047_v33 = vpop.eup %2769  ;;  %v5056_v26 = vadd.f32 -1.0, %v1509_v38  ;;  %7392 = vst [vmem:[#allocation95_spill] sm:$0xff] %v5058_v62  ;;  %v7394_v54 = vld [vmem:[#allocation71_spill] sm:$0xff] }
 0x197   :  { %v1583_v20 = vmul.f32 %v4997_v57, %v7379_v32  ;;  %v1590_v29 = vmul.f32 %v5017_v5, %v7385_v44  ;;  %v1591_v32 = vmul.f32 %v5019_v47, %v7386_v28  ;;  %v1592_v31 = vadd.f32 %v1584_v40, %v1576_v27  ;;  %7387 = vst [vmem:[#allocation133_spill] sm:$0xff] %v5047_v33  ;;  %v5054_v59 = vpop.eup %2771  ;;  %v7395_v11 = vld [vmem:[#allocation36_spill] sm:$0xff]  ;;  %v7397_v30 = vld [vmem:[#allocation13_spill] sm:$0xff]  ;;  %v7413_v34 = vld [vmem:[#allocation119_spill] sm:$0xff] }
 0x198   :  { %7389 = vst [vmem:[#allocation102_spill] sm:$0xff] %v5052_v2  ;;  %7390 = vst [vmem:[#allocation34_spill] sm:$0xff] %v5054_v59  ;;  %v1531_v44 = vmul.f32 2.0, %v1523_v51  ;;  %v1594_v27 = vadd.f32 %v1586_v45, %v1578_v49  ;;  %v1595_v8 = vadd.f32 %v1587_v39, %v1579_v63  ;;  %v1596_v9 = vadd.f32 %v1588_v37, %v1580_v7  ;;  %v7396_v2 = vld [vmem:[#allocation48_spill] sm:$0xff]  ;;  %v7398_v49 = vld [vmem:[#allocation11_spill] sm:$0xff] }
 0x199   :  { %7391 = vst [vmem:[#allocation92_spill] sm:$0xff] %v5056_v26  ;;  %v1597_v40 = vadd.f32 %v1589_v41, %v1581_v1  ;;  %v1598_v28 = vadd.f32 %v1590_v29, %v1582_v46  ;;  %v1599_v17 = vadd.f32 %v1591_v32, %v1583_v20  ;;  %v5061_v22 = vadd.f32 %v1592_v31, %v7393_v3  ;;  %v7400_v20 = vld [vmem:[#allocation38_spill] sm:$0xff]  ;;  %v7401_v29 = vld [vmem:[#allocation39_spill] sm:$0xff]  ;;  %v7402_v1 = vld [vmem:[#allocation49_spill] sm:$0xff] }
 0x19a   :  { %v5064_v50 = vadd.f32 %v1593_v55, %v7394_v54  ;;  %v1616_v38 = vmul.f32 %v4965_v35, %v7395_v11  ;;  %v1617_v51 = vmul.f32 %v4967_v48, %v7396_v2  ;;  %v1618_v45 = vmul.f32 %v4973_v60, %v7397_v30  ;;  %v5074_v37 = vpop.eup %2773  ;;  %v7403_v63 = vld [vmem:[#allocation50_spill] sm:$0xff]  ;;  %v7407_v3 = vld [vmem:[#allocation115_spill] sm:$0xff]  ;;  %v7414_v59 = vld [vmem:[#allocation57_spill] sm:$0xff] }
 0x19b   :  { %v1624_v7 = vmul.f32 %v4977_v58, %v7398_v49  ;;  %7399 = vst [vmem:[#allocation134_spill] sm:$0xff] %v5074_v37  ;;  %v1619_v31 = vmul.f32 %v4975_v10, %v7400_v20  ;;  %v1620_v55 = vmul.f32 %v4987_v23, %v7401_v29  ;;  %v1621_v25 = vmul.f32 %v4989_v21, %v7402_v1  ;;  %v5084_v46 = vpop.eup %2775  ;;  %v7405_v32 = vld [vmem:[#allocation30_spill] sm:$0xff]  ;;  %v7408_v49 = vld [vmem:[#allocation116_spill] sm:$0xff]  ;;  %v7410_v1 = vld [vmem:[#allocation53_spill] sm:$0xff] }
 0x19c   :  { %v1622_v39 = vmul.f32 %v4991_v52, %v7403_v63  ;;  %7404 = vst [vmem:[#allocation135_spill] sm:$0xff] %v5084_v46  ;;  %v1625_v41 = vmul.f32 %v4981_v24, %v7405_v32  ;;  %v7406_v30 = vld [vmem:[#allocation114_spill] sm:$0xff]  ;;  %v1627_v20 = vmul.f32 %v5005_v61, %v7407_v3  ;;  %v1628_v29 = vmul.f32 %v5007_v13, %v7408_v49  ;;  %v5094_v2 = vpop.eup %2777  ;;  %v7411_v63 = vld [vmem:[#allocation117_spill] sm:$0xff]  ;;  %v7415_v3 = vld [vmem:[#allocation72_spill] sm:$0xff] }
 0x19d   :  { %v1626_v54 = vmul.f32 %v4999_v19, %v7406_v30  ;;  %7409 = vst [vmem:[#allocation136_spill] sm:$0xff] %v5094_v2  ;;  %v1623_v11 = vmul.f32 %v4997_v57, %v7410_v1  ;;  %v1629_v46 = vmul.f32 %v5009_v14, %v7411_v63  ;;  %v7412_v37 = vld [vmem:[#allocation118_spill] sm:$0xff]  ;;  %v1631_v30 = vmul.f32 %v5019_v47, %v7413_v34  ;;  %v7417_v1 = vld [vmem:[#allocation73_spill] sm:$0xff]  ;;  %v7418_v63 = vld [vmem:[#allocation75_spill] sm:$0xff] }
 0x19e   :  { %v1630_v32 = vmul.f32 %v5017_v5, %v7412_v37  ;;  %v5105_v33 = vadd.f32 %v1594_v27, %v7414_v59  ;;  %v5108_v26 = vadd.f32 %v1595_v8, %v7415_v3  ;;  %v7416_v49 = vld [vmem:[#allocation58_spill] sm:$0xff]  ;;  %v1632_v62 = vadd.f32 %v1624_v7, %v1616_v38  ;;  %v7419_v37 = vld [vmem:[#allocation76_spill] sm:$0xff]  ;;  %v5123_v27 = vpop.eup %2779 }
 0x19f   :  { %v5111_v2 = vadd.f32 %v1596_v9, %v7416_v49  ;;  %v5114_v43 = vadd.f32 %v1597_v40, %v7417_v1  ;;  %v5117_v18 = vadd.f32 %v1598_v28, %v7418_v63  ;;  %v5120_v12 = vadd.f32 %v1599_v17, %v7419_v37  ;;  %7421 = vst [vmem:[#allocation138_spill] sm:$0xff] %v5123_v27  ;;  %v5125_v9 = vpop.eup %2781 }
 0x1a0   :  { %v1608_v34 = vand.u32 2147483647, %v5061_v22  ;;  %v1633_v59 = vadd.f32 %v1625_v41, %v1617_v51  ;;  %v1634_v8 = vadd.f32 %v1626_v54, %v1618_v45  ;;  %v1635_v3 = vadd.f32 %v1627_v20, %v1619_v31  ;;  %7422 = vst [vmem:[#allocation139_spill] sm:$0xff] %v5125_v9  ;;  %v7423_v22 = vld [vmem:[#allocation64_spill] sm:$0xff]  ;;  %v7424_v20 = vld [vmem:[#allocation81_spill] sm:$0xff]  ;;  %v7425_v31 = vld [vmem:[#allocation67_spill] sm:$0xff] }
 0x1a1   :  { %7420 = vst [vmem:[#allocation137_spill] sm:$0xff] %v5120_v12  ;;  %v1636_v16 = vadd.f32 %v1628_v29, %v1620_v55  ;;  %v1609_v38 = vand.u32 2147483647, %v5064_v50  ;;  %v1637_v40 = vadd.f32 %v1629_v46, %v1621_v25  ;;  %v1638_v7 = vadd.f32 %v1630_v32, %v1622_v39  ;;  %v7432_v32 = vld [vmem:[#allocation70_spill] sm:$0xff]  ;;  %v7433_v41 = vld [vmem:[#allocation105_spill] sm:$0xff]  ;;  %v7435_v45 = vld [vmem:[#allocation107_spill] sm:$0xff] }
 0x1a2   :  { %v1639_v1 = vadd.f32 %v1631_v30, %v1623_v11  ;;  %v1610_v28 = vand.u32 2147483647, %v5105_v33  ;;  %v1611_v17 = vand.u32 2147483647, %v5108_v26  ;;  %v1612_v37 = vand.u32 2147483647, %v5111_v2 }
 0x1a3   :  { %v1640_v63 = vadd.f32 %v1632_v62, %v7423_v22  ;;  %2783 = vtanh.f32 %v1531_v44  ;;  %v1613_v54 = vand.u32 2147483647, %v5114_v43  ;;  %v1614_v51 = vand.u32 2147483647, %v5117_v18  ;;  %v7426_v11 = vld [vmem:[#allocation87_spill] sm:$0xff]  ;;  %v7427_v33 = vld [vmem:[#allocation61_spill] sm:$0xff] }
 0x1a4   :  { %v1641_v50 = vadd.f32 %v1633_v59, %v7424_v20  ;;  %v1642_v29 = vadd.f32 %v1634_v8, %v7425_v31  ;;  %v1643_v30 = vadd.f32 %v1635_v3, %v7426_v11  ;;  %v1644_v55 = vadd.f32 %v1636_v16, %v7427_v33  ;;  %v7428_v26 = vld [vmem:[#allocation65_spill] sm:$0xff]  ;;  %v7429_v2 = vld [vmem:[#allocation66_spill] sm:$0xff]  ;;  %v7430_v62 = vld [vmem:[#allocation28_spill] sm:$0xff] }
 0x1a5   :  { %v1645_v25 = vadd.f32 %v1637_v40, %v7428_v26  ;;  %v1646_v39 = vadd.f32 %v1638_v7, %v7429_v2  ;;  %v5142_v44 = vadd.f32 %v1639_v1, %v7430_v62  ;;  %v7431_v43 = vld [vmem:[#allocation60_spill] sm:$0xff]  ;;  %v1648_v46 = vand.u32 2147483647, %v1640_v63  ;;  %v7434_v3 = vld [vmem:[#allocation106_spill] sm:$0xff]  ;;  %v7437_v62 = vld [vmem:[#allocation31_spill] sm:$0xff] }
 0x1a6   :  { %v1664_v18 = vmul.f32 %v4965_v35, %v7431_v43  ;;  %v1665_v59 = vmul.f32 %v4967_v48, %v7432_v32  ;;  %v1666_v8 = vmul.f32 %v4973_v60, %v7433_v41  ;;  %v1667_v16 = vmul.f32 %v4975_v10, %v7434_v3  ;;  %v7436_v7 = vld [vmem:[#allocation110_spill] sm:$0xff]  ;;  %v7438_v43 = vld [vmem:[#allocation32_spill] sm:$0xff]  ;;  %v7439_v26 = vld [vmem:[#allocation33_spill] sm:$0xff] }
 0x1a7   :  { %v1668_v40 = vmul.f32 %v4987_v23, %v7435_v45  ;;  %v1669_v1 = vmul.f32 %v4989_v21, %v7436_v7  ;;  %v1672_v2 = vmul.f32 %v4977_v58, %v7437_v62  ;;  %v1673_v63 = vmul.f32 %v4981_v24, %v7438_v43  ;;  %v7440_v33 = vld [vmem:[#allocation35_spill] sm:$0xff]  ;;  %v7442_v31 = vld [vmem:[#allocation20_spill] sm:$0xff]  ;;  %v7444_v62 = vld [vmem:[#allocation21_spill] sm:$0xff] }
 0x1a8   :  { %v1674_v32 = vmul.f32 %v4999_v19, %v7439_v26  ;;  %v1675_v41 = vmul.f32 %v5005_v61, %v7440_v33  ;;  %v7441_v11 = vld [vmem:[#allocation19_spill] sm:$0xff]  ;;  %v1677_v45 = vmul.f32 %v5009_v14, %v7442_v31  ;;  %v1649_v20 = vand.u32 2147483647, %v1641_v50  ;;  %v7445_v61 = vld [vmem:[#allocation112_spill] sm:$0xff] }
 0x1a9   :  { %v1676_v3 = vmul.f32 %v5007_v13, %v7441_v11  ;;  %v7443_v7 = vld [vmem:[#allocation111_spill] sm:$0xff]  ;;  %v1678_v49 = vmul.f32 %v5017_v5, %v7444_v62  ;;  %v1680_v43 = vadd.f32 %v1672_v2, %v1664_v18  ;;  %v1650_v9 = vand.u32 2147483647, %v1642_v29  ;;  %v7446_v13 = vld [vmem:[#allocation22_spill] sm:$0xff] }
 0x1aa   :  { %v1670_v22 = vmul.f32 %v4991_v52, %v7443_v7  ;;  %v1651_v27 = vand.u32 2147483647, %v1643_v30  ;;  %v1652_v26 = vand.u32 2147483647, %v1644_v55  ;;  %v1681_v12 = vadd.f32 %v1673_v63, %v1665_v59 }
 0x1ab   :  { %v1653_v19 = vand.u32 2147483647, %v1645_v25  ;;  %v1654_v33 = vand.u32 2147483647, %v1646_v39  ;;  %v1671_v11 = vmul.f32 %v4997_v57, %v7445_v61  ;;  %v1679_v31 = vmul.f32 %v5019_v47, %v7446_v13 }
 0x1ac   :  { %v1682_v50 = vadd.f32 %v1674_v32, %v1666_v8  ;;  %v1683_v14 = vadd.f32 %v1675_v41, %v1667_v16  ;;  %v1684_v24 = vadd.f32 %v1676_v3, %v1668_v40  ;;  %v1685_v7 = vadd.f32 %v1677_v45, %v1669_v1  ;;  %v7460_v16 = vld [vmem:[#allocation121_spill] sm:$0xff] }
 0x1ad   :  { %v5176_v58 = vpop.eup %2783  ;;  %v1656_v29 = vadd.f32 %v1648_v46, %v1608_v34  ;;  %v1686_v30 = vadd.f32 %v1678_v49, %v1670_v22  ;;  %v1688_v55 = vadd.f32 %v1680_v43, %v6905_v15  ;;  %v1657_v25 = vadd.f32 %v1649_v20, %v1609_v38  ;;  %v7453_v20 = vld [vmem:[#allocation69_spill] sm:$0xff]  ;;  %v7458_v46 = vld [vmem:[#allocation120_spill] sm:$0xff] }
 0x1ae   :  { %7447 = vst [vmem:[#allocation140_spill] sm:$0xff] %v5176_v58  ;;  %v1658_v39 = vadd.f32 %v1650_v9, %v1610_v28  ;;  %v1659_v18 = vadd.f32 %v1651_v27, %v1611_v17  ;;  %v1689_v59 = vadd.f32 %v1681_v12, %v6906_v0  ;;  %v1660_v63 = vadd.f32 %v1652_v26, %v1612_v37  ;;  %v7448_v9 = vld [vmem:[#allocation54_spill] sm:$0xff]  ;;  %v7449_v37 = vld [vmem:[#allocation15_spill] sm:$0xff]  ;;  %v7451_v17 = vld [vmem:[#allocation16_spill] sm:$0xff] }
 0x1af   :  { %v1661_v61 = vadd.f32 %v1653_v19, %v1613_v54  ;;  %v1662_v13 = vadd.f32 %v1654_v33, %v1614_v51  ;;  %v1687_v32 = vadd.f32 %v1679_v31, %v1671_v11  ;;  %v1690_v41 = vadd.f32 %v1682_v50, %v6919_v53  ;;  %v7450_v28 = vld [vmem:[#allocation55_spill] sm:$0xff]  ;;  %v7455_v11 = vld [vmem:[#allocation96_spill] sm:$0xff] }
 0x1b0   :  { %v1691_v45 = vadd.f32 %v1683_v14, %v7016_v56  ;;  %v1692_v8 = vadd.f32 %v1684_v24, %v7288_v36  ;;  %v1693_v34 = vadd.f32 %v1685_v7, %v7289_v6  ;;  %v1694_v49 = vadd.f32 %v1686_v30, %v7290_v4  ;;  %v7452_v54 = vld [vmem:[#allocation59_spill] sm:$0xff]  ;;  %v7457_v26 = vld [vmem:[#allocation128_spill] sm:$0xff]  ;;  %v7462_v7 = vld [vmem:[#allocation122_spill] sm:$0xff] }
 0x1b1   :  { %v1696_v22 = vand.u32 2147483647, %v1688_v55  ;;  %v1712_v27 = vmul.f32 %v4965_v35, %v7292_v42  ;;  %v1713_v12 = vmul.f32 %v4967_v48, %v7448_v9  ;;  %v1697_v19 = vand.u32 2147483647, %v1689_v59  ;;  %v7454_v35 = vld [vmem:[#allocation23_spill] sm:$0xff]  ;;  %v7456_v48 = vld [vmem:[#allocation24_spill] sm:$0xff] }
 0x1b2   :  { %v1714_v38 = vmul.f32 %v4973_v60, %v7449_v37  ;;  %v1715_v14 = vmul.f32 %v4975_v10, %v7450_v28  ;;  %v1716_v24 = vmul.f32 %v4987_v23, %v7451_v17  ;;  %v1717_v51 = vmul.f32 %v4989_v21, %v7452_v54  ;;  %v7459_v60 = vld [vmem:[#allocation78_spill] sm:$0xff]  ;;  %v7461_v10 = vld [vmem:[#allocation80_spill] sm:$0xff]  ;;  %v7463_v23 = vld [vmem:[#allocation101_spill] sm:$0xff] }
 0x1b3   :  { %v1718_v31 = vmul.f32 %v4991_v52, %v7453_v20  ;;  %v1720_v33 = vmul.f32 %v7455_v11, %v7454_v35  ;;  %v1721_v43 = vmul.f32 %v7457_v26, %v7456_v48  ;;  %v1722_v3 = vmul.f32 %v7459_v60, %v7458_v46  ;;  %v7464_v50 = vld [vmem:[#allocation123_spill] sm:$0xff]  ;;  %v7465_v21 = vld [vmem:[#allocation25_spill] sm:$0xff]  ;;  %v7466_v52 = vld [vmem:[#allocation124_spill] sm:$0xff] }
 0x1b4   :  { %v1723_v40 = vmul.f32 %v7461_v10, %v7460_v16  ;;  %v1724_v1 = vmul.f32 %v7463_v23, %v7462_v7  ;;  %v1725_v30 = vmul.f32 %v7465_v21, %v7464_v50  ;;  %v1698_v55 = vand.u32 2147483647, %v1690_v41  ;;  %v7467_v60 = vld [vmem:[#allocation113_spill] sm:$0xff]  ;;  %v7468_v54 = vld [vmem:[#allocation27_spill] sm:$0xff]  ;;  %v7470_v41 = vld [vmem:[#allocation26_spill] sm:$0xff] }
 0x1b5   :  { %v1726_v59 = vmul.f32 %v5017_v5, %v7466_v52  ;;  %v1728_v11 = vadd.f32 %v1720_v33, %v1712_v27  ;;  %v1729_v2 = vadd.f32 %v1721_v43, %v1713_v12  ;;  %v1699_v35 = vand.u32 2147483647, %v1691_v45  ;;  %v7469_v7 = vld [vmem:[#allocation125_spill] sm:$0xff]  ;;  %v7472_v27 = vld [vmem:[#allocation91_spill] sm:$0xff]  ;;  %v7473_v45 = vld [vmem:[#allocation90_spill] sm:$0xff] }
 0x1b6   :  { %v1730_v26 = vadd.f32 %v1722_v3, %v1714_v38  ;;  %v1731_v48 = vadd.f32 %v1723_v40, %v1715_v14  ;;  %v1732_v20 = vadd.f32 %v1724_v1, %v1716_v24  ;;  %v1719_v46 = vmul.f32 %v4997_v57, %v7467_v60  ;;  %v7471_v17 = vld [vmem:[#allocation97_spill] sm:$0xff]  ;;  %v7474_v33 = vld [vmem:[#allocation98_spill] sm:$0xff]  ;;  %v7475_v1 = vld [vmem:[#allocation99_spill] sm:$0xff] }
 0x1b7   :  { %v1733_v10 = vadd.f32 %v1725_v30, %v1717_v51  ;;  %v1734_v16 = vadd.f32 %v1726_v59, %v1718_v31  ;;  %v1736_v23 = vadd.f32 %v1728_v11, %v7468_v54  ;;  %v1727_v21 = vmul.f32 %v5019_v47, %v7469_v7  ;;  %v7476_v47 = vld [vmem:[#allocation93_spill] sm:$0xff]  ;;  %v7539_v58 = vld [vmem:[#allocation12_spill] sm:$0xff]  ;;  %v7573_v42 = vld [vmem:[#allocation75_spill] sm:$0xff] }
 0x1b8   :  { %v1737_v50 = vadd.f32 %v1729_v2, %v7470_v41  ;;  %v1738_v5 = vadd.f32 %v1730_v26, %v7471_v17  ;;  %v1739_v12 = vadd.f32 %v1731_v48, %v7472_v27  ;;  %v1695_v38 = vadd.f32 %v1687_v32, %v7473_v45  ;;  %v7477_v27 = vld [vmem:[#allocation132_spill] sm:$0xff]  ;;  %v7545_v45 = vld [vmem:[#allocation79_spill] sm:$0xff]  ;;  %v7572_v9 = vld [vmem:[#allocation73_spill] sm:$0xff] }
 0x1b9   :  { %v1700_v14 = vand.u32 2147483647, %v1692_v8  ;;  %v1701_v24 = vand.u32 2147483647, %v1693_v34  ;;  %v1740_v43 = vadd.f32 %v1732_v20, %v7474_v33  ;;  %v1702_v57 = vand.u32 2147483647, %v1694_v49 }
 0x1ba   :  { %v1704_v51 = vadd.f32 %v1696_v22, %v1656_v29  ;;  %v1705_v31 = vadd.f32 %v1697_v19, %v1657_v25  ;;  %v1706_v3 = vadd.f32 %v1698_v55, %v1658_v39  ;;  %v1707_v40 = vadd.f32 %v1699_v35, %v1659_v18  ;;  %v7478_v8 = vld [vmem:[#allocation95_spill] sm:$0xff]  ;;  %v7479_v49 = vld [vmem:[#allocation92_spill] sm:$0xff]  ;;  %v7480_v25 = vld [vmem:[#allocation137_spill] sm:$0xff] }
 0x1bb   :  { %v1741_v30 = vadd.f32 %v1733_v10, %v7475_v1  ;;  %v1742_v59 = vadd.f32 %v1734_v16, %v7476_v47  ;;  %v1744_v2 = vand.u32 2147483647, %v1736_v23  ;;  %v1735_v11 = vadd.f32 %v1727_v21, %v1719_v46  ;;  %v7483_v10 = vld [vmem:[#allocation94_spill] sm:$0xff]  ;;  %v7542_v47 = vld [vmem:[#allocation44_spill] sm:$0xff] }
 0x1bc   :  { %v1745_v26 = vand.u32 2147483647, %v1737_v50  ;;  %v1746_v17 = vand.u32 2147483647, %v1738_v5  ;;  %v1747_v48 = vand.u32 2147483647, %v1739_v12  ;;  %2785 = vtanh.f32 %v7478_v8 }
 0x1bd   :  { %v1289_v32 = vsub.f32 1.0, %v7477_v27  ;;  %v1708_v34 = vadd.f32 %v1700_v14, %v1660_v63  ;;  %v1748_v20 = vand.u32 2147483647, %v1740_v43  ;;  %v1525_v29 = vand.u32 2147483647, %v7479_v49  ;;  %v7484_v63 = vld [vmem:[#allocation133_spill] sm:$0xff] }
 0x1be   :  { %v7481_v39 = vand.u32 2147483647, %v7480_v25  ;;  %v7482_v18 = vand.u32 2147483647, %v5142_v44  ;;  %v1703_v19 = vand.u32 2147483647, %v1695_v38  ;;  %v1709_v35 = vadd.f32 %v1701_v24, %v1661_v61 }
 0x1bf   :  { %v1710_v16 = vadd.f32 %v1702_v57, %v1662_v13  ;;  %v1749_v46 = vand.u32 2147483647, %v1741_v30  ;;  %v1750_v50 = vand.u32 2147483647, %v1742_v59  ;;  %v1752_v55 = vadd.f32 %v1744_v2, %v1704_v51  ;;  %v7485_v14 = vld [vmem:[#allocation29_spill] sm:$0xff]  ;;  %v7486_v43 = vld [vmem:[#allocation103_spill] sm:$0xff] }
 0x1c0   :  { %v1663_v22 = vadd.f32 %v7482_v18, %v7481_v39  ;;  %v1743_v23 = vadd.f32 %v1735_v11, %v7483_v10  ;;  %v1753_v21 = vadd.f32 %v1745_v26, %v1705_v31  ;;  %v1754_v5 = vadd.f32 %v1746_v17, %v1706_v3  ;;  %v7488_v25 = vld [vmem:[#allocation130_spill] sm:$0xff]  ;;  %v7489_v44 = vld [vmem:[#allocation131_spill] sm:$0xff]  ;;  %v7493_v51 = vld [vmem:[#allocation77_spill] sm:$0xff] }
 0x1c1   :  { %v1755_v27 = vadd.f32 %v1747_v48, %v1707_v40  ;;  %v1290_v12 = vsub.f32 1.0, %v7484_v63  ;;  %v7487_v8 = vsub.f32 1.0, %v7486_v43  ;;  %v7490_v39 = vsub.f32 1.0, %v7489_v44  ;;  %v7491_v13 = vld [vmem:[#allocation34_spill] sm:$0xff]  ;;  %v7495_v31 = vld [vmem:[#allocation63_spill] sm:$0xff]  ;;  %v7497_v26 = vld [vmem:[#allocation37_spill] sm:$0xff] }
 0x1c2   :  { %v1756_v61 = vadd.f32 %v1748_v20, %v1708_v34  ;;  %v1291_v24 = vsub.f32 1.0, %v7491_v13  ;;  %v7492_v57 = vld [vmem:[#allocation126_spill] sm:$0xff]  ;;  %v7494_v30 = vsub.f32 1.0, %v7493_v51  ;;  %v5246_v17 = vadd.f32 %v1289_v32, %v7495_v31  ;;  %v7498_v63 = vld [vmem:[#allocation45_spill] sm:$0xff]  ;;  %v7499_v43 = vld [vmem:[#allocation56_spill] sm:$0xff] }
 0x1c3   :  { %v1294_v49 = vadd.f32 %v7487_v8, %v7485_v14  ;;  %v1295_v38 = vadd.f32 %v7490_v39, %v7488_v25  ;;  %v1533_v3 = vmul.f32 2.0, %v1525_v29  ;;  %v1711_v40 = vadd.f32 %v1703_v19, %v1663_v22  ;;  %v7500_v20 = vld [vmem:[#allocation104_spill] sm:$0xff]  ;;  %v7501_v25 = vld [vmem:[#allocation134_spill] sm:$0xff]  ;;  %v7502_v39 = vld [vmem:[#allocation135_spill] sm:$0xff] }
 0x1c4   :  { %v1296_v59 = vadd.f32 %v7494_v30, %v7492_v57  ;;  %7496 = vst [vmem:[#allocation96_spill] sm:$0xff] %v5246_v17  ;;  %v1757_v2 = vadd.f32 %v1749_v46, %v1709_v35  ;;  %v1758_v11 = vadd.f32 %v1750_v50, %v1710_v16  ;;  %v1760_v48 = vmul.f32 %v7497_v26, %v1752_v55  ;;  %v7503_v57 = vld [vmem:[#allocation136_spill] sm:$0xff]  ;;  %v7505_v22 = vld [vmem:[#allocation129_spill] sm:$0xff]  ;;  %v7507_v35 = vld [vmem:[#allocation127_spill] sm:$0xff] }
 0x1c5   :  { %v1751_v18 = vand.u32 2147483647, %v1743_v23  ;;  %v1761_v14 = vmul.f32 %v7498_v63, %v1753_v21  ;;  %v1762_v34 = vmul.f32 %v7499_v43, %v1754_v5  ;;  %v1763_v8 = vmul.f32 %v7500_v20, %v1755_v27  ;;  %v7504_v51 = vld [vmem:[#allocation108_spill] sm:$0xff]  ;;  %v7509_v46 = vld [vmem:[#allocation138_spill] sm:$0xff]  ;;  %v7510_v55 = vld [vmem:[#allocation139_spill] sm:$0xff] }
 0x1c6   :  { %v1542_v44 = vsub.f32 1.0, %v7501_v25  ;;  %v1543_v13 = vsub.f32 1.0, %v7502_v39  ;;  %v1544_v32 = vsub.f32 1.0, %v7503_v57  ;;  %v1764_v29 = vmul.f32 %v7504_v51, %v1756_v61  ;;  %v5264_v21 = vpop.eup %2785  ;;  %v7512_v5 = vld [vmem:[#allocation109_spill] sm:$0xff]  ;;  %v7513_v30 = vld [vmem:[#allocation14_spill] sm:$0xff]  ;;  %v7532_v43 = vld [vmem:[#allocation68_spill] sm:$0xff] }
 0x1c7   :  { %v5257_v19 = vadd.f32 %v1290_v12, %v7505_v22  ;;  %v5260_v16 = vadd.f32 %v1291_v24, %v7507_v35  ;;  %v1545_v50 = vsub.f32 1.0, %v7509_v46  ;;  %v1546_v23 = vsub.f32 1.0, %v7510_v55  ;;  %7511 = vst [vmem:[#allocation80_spill] sm:$0xff] %v5264_v21  ;;  %v5268_v22 = vld [vmem:[#allocation2 + $0x280] sm:$0xff]  ;;  %v5270_v24 = vld [vmem:[#allocation2 + $0x288] sm:$0xff]  ;;  %v5272_v35 = vld [vmem:[#allocation2 + $0x290] sm:$0xff] }
 0x1c8   :  { %2787 = vtanh.f32 %v1533_v3  ;;  %v1765_v27 = vmul.f32 %v7512_v5, %v1757_v2  ;;  %v1766_v31 = vmul.f32 %v7513_v30, %v1758_v11  ;;  %v2672_v25 = vadd.f32 -1.0, %v1760_v48  ;;  %v7514_v46 = vld [vmem:[#allocation74_spill] sm:$0xff]  ;;  %v5315_v5 = vld [vmem:[#allocation2 + $0x2e8] sm:$0xff]  ;;  %v7538_v26 = vld [vmem:[#allocation47_spill] sm:$0xff] }
 0x1c9   :  { %7506 = vst [vmem:[#allocation128_spill] sm:$0xff] %v5257_v19  ;;  %7508 = vst [vmem:[#allocation78_spill] sm:$0xff] %v5260_v16  ;;  %v1759_v39 = vadd.f32 %v1751_v18, %v1711_v40  ;;  %v2673_v61 = vadd.f32 -1.0, %v1761_v14  ;;  %v2674_v57 = vadd.f32 -1.0, %v1762_v34  ;;  %v2675_v12 = vadd.f32 -1.0, %v1763_v8  ;;  %v7516_v51 = vld [vmem:[#allocation102_spill] sm:$0xff] }
 0x1ca   :  { %v5275_v55 = vadd.f32 %v1542_v44, %v7514_v46  ;;  %v5278_v3 = vadd.f32 %v1543_v13, %v7516_v51  ;;  %v5280_v2 = vadd.f32 %v1544_v32, %v1294_v49  ;;  %v2676_v11 = vadd.f32 -1.0, %v1764_v29  ;;  %v5282_v48 = vld [vmem:[#allocation2 + $0x298] sm:$0xff]  ;;  %v5284_v40 = vld [vmem:[#allocation2 + $0x2a0] sm:$0xff]  ;;  %v5286_v18 = vld [vmem:[#allocation2 + $0x2a8] sm:$0xff]  ;;  %7529 = vst [vmem:[#allocation34_spill] sm:$0xff] %v5315_v5 }
 0x1cb   :  { %v5290_v8 = vadd.f32 %v1545_v50, %v1295_v38  ;;  %v5292_v44 = vadd.f32 %v1546_v23, %v1296_v59  ;;  %v5294_v46 = vld [vmem:[#allocation2 + $0x2b0] sm:$0xff]  ;;  %v5296_v13 = vld [vmem:[#allocation2 + $0x2b8] sm:$0xff]  ;;  %v5298_v49 = vld [vmem:[#allocation2 + $0x2c0] sm:$0xff]  ;;  %v5304_v29 = vadd.f32 -1.0, %v1765_v27  ;;  %v1776_v14 = vand.u32 2147483647, %v2672_v25 }
 0x1cc   :  { %7515 = vst [vmem:[#allocation101_spill] sm:$0xff] %v5275_v55  ;;  %7517 = vst [vmem:[#allocation25_spill] sm:$0xff] %v5278_v3  ;;  %v5300_v32 = vld [vmem:[#allocation2 + $0x2c8] sm:$0xff]  ;;  %v5302_v51 = vld [vmem:[#allocation2 + $0x2d0] sm:$0xff]  ;;  %v1778_v3 = vand.u32 2147483647, %v2674_v57  ;;  %v1836_v16 = vmul.f32 %v5272_v35, %v7532_v43  ;;  %v1841_v43 = vmul.f32 %v5296_v13, %v7539_v58 }
 0x1cd   :  { %7518 = vst [vmem:[#allocation132_spill] sm:$0xff] %v5280_v2  ;;  %7519 = vst [vmem:[#allocation95_spill] sm:$0xff] %v5290_v8  ;;  %v5306_v2 = vadd.f32 -1.0, %v1766_v31  ;;  %v5308_v34 = vld [vmem:[#allocation2 + $0x2d8] sm:$0xff]  ;;  %v5310_v38 = vld [vmem:[#allocation2 + $0x2e0] sm:$0xff]  ;;  %v1784_v54 = vmul.f32 2.0, %v1776_v14 }
 0x1ce   :  { %7520 = vst [vmem:[#allocation92_spill] sm:$0xff] %v5292_v44  ;;  %7521 = vst [vmem:[#allocation137_spill] sm:$0xff] %v5300_v32  ;;  %v7527_v59 = vld [vmem:[#allocation85_spill] sm:$0xff]  ;;  %v7528_v23 = vld [vmem:[#allocation100_spill] sm:$0xff]  ;;  %v1777_v8 = vand.u32 2147483647, %v2673_v61 }
 0x1cf   :  { %7522 = vst [vmem:[#allocation133_spill] sm:$0xff] %v5302_v51  ;;  %7523 = vst [vmem:[#allocation29_spill] sm:$0xff] %v5304_v29  ;;  %v1834_v50 = vmul.f32 %v5268_v22, %v7527_v59  ;;  %v1767_v44 = vmul.f32 %v7528_v23, %v1759_v39  ;;  %v1779_v55 = vand.u32 2147483647, %v2675_v12  ;;  %v1780_v30 = vand.u32 2147483647, %v2676_v11 }
 0x1d0   :  { %7524 = vst [vmem:[#allocation103_spill] sm:$0xff] %v5306_v2  ;;  %7525 = vst [vmem:[#allocation130_spill] sm:$0xff] %v5308_v34  ;;  %v5317_v27 = vld [vmem:[#allocation2 + $0x2f0] sm:$0xff]  ;;  %v5319_v31 = vld [vmem:[#allocation2 + $0x2f8] sm:$0xff]  ;;  %v5357_v7 = vmul.f32 2.0, %v1777_v8  ;;  %2789 = vtanh.f32 %v1784_v54 }
 0x1d1   :  { %7526 = vst [vmem:[#allocation131_spill] sm:$0xff] %v5310_v38  ;;  %7530 = vst [vmem:[#allocation126_spill] sm:$0xff] %v5317_v27  ;;  %v7531_v25 = vld [vmem:[#allocation86_spill] sm:$0xff]  ;;  %v7533_v21 = vld [vmem:[#allocation88_spill] sm:$0xff]  ;;  %v5353_v58 = vadd.f32 -1.0, %v1767_v44  ;;  %v5361_v60 = vmul.f32 2.0, %v1779_v55 }
 0x1d2   :  { %v1835_v20 = vmul.f32 %v5270_v24, %v7531_v25  ;;  %v1837_v59 = vmul.f32 %v5282_v48, %v7533_v21  ;;  %v7534_v39 = vld [vmem:[#allocation17_spill] sm:$0xff]  ;;  %v7535_v57 = vld [vmem:[#allocation18_spill] sm:$0xff]  ;;  %v7536_v11 = vld [vmem:[#allocation40_spill] sm:$0xff]  ;;  %v1840_v25 = vmul.f32 %v5294_v46, %v7538_v26  ;;  %v1849_v26 = vmul.f32 %v5319_v31, %v7545_v45  ;;  %v5351_v41 = vpop.eup %2787 }
 0x1d3   :  { %v1838_v61 = vmul.f32 %v5284_v40, %v7534_v39  ;;  %v1839_v12 = vmul.f32 %v5286_v18, %v7535_v57  ;;  %v1842_v23 = vmul.f32 %v5298_v49, %v7536_v11  ;;  %v7537_v19 = vld [vmem:[#allocation41_spill] sm:$0xff]  ;;  %v7540_v17 = vld [vmem:[#allocation42_spill] sm:$0xff]  ;;  %v7541_v10 = vld [vmem:[#allocation43_spill] sm:$0xff]  ;;  %v1846_v57 = vmul.f32 %v5310_v38, %v7542_v47  ;;  %7546 = vst [vmem:[#allocation77_spill] sm:$0xff] %v5351_v41 }
 0x1d4   :  { %v1843_v63 = vmul.f32 %v5300_v32, %v7537_v19  ;;  %v1844_v21 = vmul.f32 %v5302_v51, %v7540_v17  ;;  %v1845_v39 = vmul.f32 %v5308_v34, %v7541_v10  ;;  %v7543_v1 = vld [vmem:[#allocation46_spill] sm:$0xff]  ;;  %7547 = vst [vmem:[#allocation63_spill] sm:$0xff] %v5353_v58  ;;  %v5359_v47 = vmul.f32 2.0, %v1778_v3  ;;  %7549 = vst [vmem:[#allocation135_spill] sm:$0xff] %v5361_v60  ;;  %v7551_v17 = vld [vmem:[#allocation36_spill] sm:$0xff] }
 0x1d5   :  { %v1847_v11 = vmul.f32 %v5315_v5, %v7543_v1  ;;  %v7544_v33 = vld [vmem:[#allocation62_spill] sm:$0xff]  ;;  %v1850_v1 = vadd.f32 %v1842_v23, %v1834_v50  ;;  %v1854_v41 = vadd.f32 %v1846_v57, %v1838_v61  ;;  %v1857_v37 = vadd.f32 %v1849_v26, %v1841_v43  ;;  %v7552_v14 = vld [vmem:[#allocation48_spill] sm:$0xff]  ;;  %v7553_v3 = vld [vmem:[#allocation11_spill] sm:$0xff] }
 0x1d6   :  { %v1848_v19 = vmul.f32 %v5317_v27, %v7544_v33  ;;  %7548 = vst [vmem:[#allocation134_spill] sm:$0xff] %v5359_v47  ;;  %v1851_v52 = vadd.f32 %v1843_v63, %v1835_v20  ;;  %v5363_v33 = vmul.f32 2.0, %v1780_v30  ;;  %v1852_v45 = vadd.f32 %v1844_v21, %v1836_v16  ;;  %v7554_v63 = vld [vmem:[#allocation30_spill] sm:$0xff]  ;;  %v7555_v30 = vld [vmem:[#allocation51_spill] sm:$0xff]  ;;  %v7561_v57 = vld [vmem:[#allocation49_spill] sm:$0xff] }
 0x1d7   :  { %v1853_v28 = vadd.f32 %v1845_v39, %v1837_v59  ;;  %v1855_v44 = vadd.f32 %v1847_v11, %v1839_v12  ;;  %v1874_v10 = vmul.f32 %v5268_v22, %v7551_v17  ;;  %v1875_v8 = vmul.f32 %v5270_v24, %v7552_v14  ;;  %v7556_v16 = vld [vmem:[#allocation71_spill] sm:$0xff]  ;;  %v7558_v43 = vld [vmem:[#allocation114_spill] sm:$0xff]  ;;  %v7565_v14 = vld [vmem:[#allocation117_spill] sm:$0xff] }
 0x1d8   :  { %7550 = vst [vmem:[#allocation136_spill] sm:$0xff] %v5363_v33  ;;  %v1856_v58 = vadd.f32 %v1848_v19, %v1840_v25  ;;  %v1882_v50 = vmul.f32 %v5298_v49, %v7553_v3  ;;  %v1883_v20 = vmul.f32 %v5300_v32, %v7554_v63  ;;  %v5374_v55 = vadd.f32 %v1850_v1, %v7555_v30  ;;  %v7557_v19 = vld [vmem:[#allocation13_spill] sm:$0xff]  ;;  %v7559_v23 = vld [vmem:[#allocation38_spill] sm:$0xff]  ;;  %v7560_v39 = vld [vmem:[#allocation39_spill] sm:$0xff] }
 0x1d9   :  { %v5377_v21 = vadd.f32 %v1851_v52, %v7556_v16  ;;  %v1876_v26 = vmul.f32 %v5272_v35, %v7557_v19  ;;  %v1884_v59 = vmul.f32 %v5302_v51, %v7558_v43  ;;  %v1877_v25 = vmul.f32 %v5282_v48, %v7559_v23  ;;  %v7562_v1 = vld [vmem:[#allocation50_spill] sm:$0xff]  ;;  %v7563_v52 = vld [vmem:[#allocation115_spill] sm:$0xff]  ;;  %v7564_v3 = vld [vmem:[#allocation116_spill] sm:$0xff] }
 0x1da   :  { %v1878_v61 = vmul.f32 %v5284_v40, %v7560_v39  ;;  %v1879_v12 = vmul.f32 %v5286_v18, %v7561_v57  ;;  %v1880_v11 = vmul.f32 %v5294_v46, %v7562_v1  ;;  %v1885_v63 = vmul.f32 %v5308_v34, %v7563_v52  ;;  %v7566_v17 = vld [vmem:[#allocation118_spill] sm:$0xff]  ;;  %v7567_v16 = vld [vmem:[#allocation53_spill] sm:$0xff]  ;;  %v7568_v30 = vld [vmem:[#allocation119_spill] sm:$0xff] }
 0x1db   :  { %v1886_v19 = vmul.f32 %v5310_v38, %v7564_v3  ;;  %v1887_v43 = vmul.f32 %v5315_v5, %v7565_v14  ;;  %v1888_v23 = vmul.f32 %v5317_v27, %v7566_v17  ;;  %v1881_v39 = vmul.f32 %v5296_v13, %v7567_v16  ;;  %v7569_v60 = vld [vmem:[#allocation57_spill] sm:$0xff]  ;;  %v7570_v52 = vld [vmem:[#allocation72_spill] sm:$0xff]  ;;  %v7571_v3 = vld [vmem:[#allocation58_spill] sm:$0xff] }
 0x1dc   :  { %v1889_v57 = vmul.f32 %v5319_v31, %v7568_v30  ;;  %v1890_v33 = vadd.f32 %v1882_v50, %v1874_v10  ;;  %v1891_v1 = vadd.f32 %v1883_v20, %v1875_v8  ;;  %v5404_v2 = vadd.f32 %v1852_v45, %v7569_v60  ;;  %v7574_v4 = vld [vmem:[#allocation76_spill] sm:$0xff] }
 0x1dd   :  { %v5407_v47 = vadd.f32 %v1853_v28, %v7570_v52  ;;  %v5410_v29 = vadd.f32 %v1854_v41, %v7571_v3  ;;  %v1892_v14 = vadd.f32 %v1884_v59, %v1876_v26  ;;  %v5413_v17 = vadd.f32 %v1855_v44, %v7572_v9  ;;  %v7575_v3 = vld [vmem:[#allocation64_spill] sm:$0xff]  ;;  %v7576_v59 = vld [vmem:[#allocation81_spill] sm:$0xff] }
 0x1de   :  { %v5416_v16 = vadd.f32 %v1856_v58, %v7573_v42  ;;  %v5419_v30 = vadd.f32 %v1857_v37, %v7574_v4  ;;  %v1866_v10 = vand.u32 2147483647, %v5374_v55  ;;  %v1893_v45 = vadd.f32 %v1885_v63, %v1877_v25  ;;  %v7577_v4 = vld [vmem:[#allocation67_spill] sm:$0xff]  ;;  %v7580_v25 = vld [vmem:[#allocation65_spill] sm:$0xff]  ;;  %v7596_v60 = vld [vmem:[#allocation112_spill] sm:$0xff] }
 0x1df   :  { %v1894_v8 = vadd.f32 %v1886_v19, %v1878_v61  ;;  %v1895_v50 = vadd.f32 %v1887_v43, %v1879_v12  ;;  %v1896_v28 = vadd.f32 %v1888_v23, %v1880_v11  ;;  %v1867_v20 = vand.u32 2147483647, %v5377_v21  ;;  %v7578_v19 = vld [vmem:[#allocation87_spill] sm:$0xff] }
 0x1e0   :  { %v1897_v41 = vadd.f32 %v1889_v57, %v1881_v39  ;;  %v1898_v26 = vadd.f32 %v1890_v33, %v7575_v3  ;;  %v1899_v44 = vadd.f32 %v1891_v1, %v7576_v59  ;;  %v1868_v9 = vand.u32 2147483647, %v5404_v2  ;;  %v7579_v33 = vld [vmem:[#allocation61_spill] sm:$0xff]  ;;  %v7581_v2 = vld [vmem:[#allocation66_spill] sm:$0xff] }
 0x1e1   :  { %v1869_v58 = vand.u32 2147483647, %v5407_v47  ;;  %v1870_v37 = vand.u32 2147483647, %v5410_v29  ;;  %v1900_v42 = vadd.f32 %v1892_v14, %v7577_v4  ;;  %v1871_v63 = vand.u32 2147483647, %v5413_v17 }
 0x1e2   :  { %v1872_v55 = vand.u32 2147483647, %v5416_v16  ;;  %v1873_v21 = vand.u32 2147483647, %v5419_v30  ;;  %v1901_v43 = vadd.f32 %v1893_v45, %v7578_v19  ;;  %v1902_v23 = vadd.f32 %v1894_v8, %v7579_v33  ;;  %v7582_v47 = vld [vmem:[#allocation28_spill] sm:$0xff]  ;;  %v7584_v1 = vld [vmem:[#allocation70_spill] sm:$0xff] }
 0x1e3   :  { %v1903_v39 = vadd.f32 %v1895_v50, %v7580_v25  ;;  %v1904_v61 = vadd.f32 %v1896_v28, %v7581_v2  ;;  %v1905_v57 = vadd.f32 %v1897_v41, %v7582_v47  ;;  %v1906_v29 = vand.u32 2147483647, %v1898_v26  ;;  %v7583_v14 = vld [vmem:[#allocation60_spill] sm:$0xff]  ;;  %v7585_v30 = vld [vmem:[#allocation105_spill] sm:$0xff]  ;;  %v7586_v45 = vld [vmem:[#allocation106_spill] sm:$0xff] }
 0x1e4   :  { %v1907_v12 = vand.u32 2147483647, %v1899_v44  ;;  %v1922_v54 = vmul.f32 %v5268_v22, %v7583_v14  ;;  %v1908_v17 = vand.u32 2147483647, %v1900_v42  ;;  %v1923_v16 = vmul.f32 %v5270_v24, %v7584_v1  ;;  %v7587_v50 = vld [vmem:[#allocation107_spill] sm:$0xff]  ;;  %v7588_v2 = vld [vmem:[#allocation110_spill] sm:$0xff] }
 0x1e5   :  { %v1924_v11 = vmul.f32 %v5272_v35, %v7585_v30  ;;  %v1925_v8 = vmul.f32 %v5282_v48, %v7586_v45  ;;  %v1926_v28 = vmul.f32 %v5284_v40, %v7587_v50  ;;  %v1927_v41 = vmul.f32 %v5286_v18, %v7588_v2  ;;  %v7589_v26 = vld [vmem:[#allocation31_spill] sm:$0xff]  ;;  %v7590_v14 = vld [vmem:[#allocation32_spill] sm:$0xff]  ;;  %v7591_v47 = vld [vmem:[#allocation33_spill] sm:$0xff] }
 0x1e6   :  { %v1930_v44 = vmul.f32 %v5298_v49, %v7589_v26  ;;  %v1931_v42 = vmul.f32 %v5300_v32, %v7590_v14  ;;  %v1932_v1 = vmul.f32 %v5302_v51, %v7591_v47  ;;  %v7592_v25 = vld [vmem:[#allocation35_spill] sm:$0xff]  ;;  %v7594_v19 = vld [vmem:[#allocation20_spill] sm:$0xff]  ;;  %v1909_v4 = vand.u32 2147483647, %v1901_v43  ;;  %v5470_v32 = vpop.eup %2789 }
 0x1e7   :  { %v1933_v30 = vmul.f32 %v5308_v34, %v7592_v25  ;;  %v7593_v33 = vld [vmem:[#allocation19_spill] sm:$0xff]  ;;  %v1935_v50 = vmul.f32 %v5315_v5, %v7594_v19  ;;  %v1936_v26 = vmul.f32 %v5317_v27, %v7444_v62  ;;  %2791 = vtanh.f32 %v5357_v7  ;;  %7598 = vst [vmem:[#allocation129_spill] sm:$0xff] %v5470_v32  ;;  %v7664_v32 = vld [vmem:[#allocation42_spill] sm:$0xff] }
 0x1e8   :  { %v1934_v45 = vmul.f32 %v5310_v38, %v7593_v33  ;;  %v7595_v2 = vld [vmem:[#allocation111_spill] sm:$0xff]  ;;  %v1938_v14 = vadd.f32 %v1930_v44, %v1922_v54  ;;  %v1910_v47 = vand.u32 2147483647, %v1902_v23  ;;  %v1911_v3 = vand.u32 2147483647, %v1903_v39  ;;  %v7597_v38 = vld [vmem:[#allocation22_spill] sm:$0xff] }
 0x1e9   :  { %v1928_v59 = vmul.f32 %v5294_v46, %v7595_v2  ;;  %v1912_v52 = vand.u32 2147483647, %v1904_v61  ;;  %v1913_v25 = vand.u32 2147483647, %v1905_v57  ;;  %v1929_v33 = vmul.f32 %v5296_v13, %v7596_v60 }
 0x1ea   :  { %v1937_v19 = vmul.f32 %v5319_v31, %v7597_v38  ;;  %v1939_v43 = vadd.f32 %v1931_v42, %v1923_v16  ;;  %v1940_v5 = vadd.f32 %v1932_v1, %v1924_v11  ;;  %v1941_v34 = vadd.f32 %v1933_v30, %v1925_v8  ;;  %v7613_v11 = vld [vmem:[#allocation133_spill] sm:$0xff]  ;;  %v7615_v8 = vld [vmem:[#allocation130_spill] sm:$0xff]  ;;  %v7620_v42 = vld [vmem:[#allocation124_spill] sm:$0xff] }
 0x1eb   :  { %v1942_v2 = vadd.f32 %v1934_v45, %v1926_v28  ;;  %v1943_v51 = vadd.f32 %v1935_v50, %v1927_v41  ;;  %v1914_v54 = vadd.f32 %v1906_v29, %v1866_v10  ;;  %v1915_v44 = vadd.f32 %v1907_v12, %v1867_v20  ;;  %v7609_v12 = vld [vmem:[#allocation24_spill] sm:$0xff]  ;;  %v7614_v45 = vld [vmem:[#allocation121_spill] sm:$0xff]  ;;  %v7616_v50 = vld [vmem:[#allocation122_spill] sm:$0xff] }
 0x1ec   :  { %v1944_v7 = vadd.f32 %v1936_v26, %v1928_v59  ;;  %v1946_v23 = vadd.f32 %v1938_v14, %v6905_v15  ;;  %v1916_v39 = vadd.f32 %v1908_v17, %v1868_v9  ;;  %v1917_v61 = vadd.f32 %v1909_v4, %v1869_v58  ;;  %v7599_v59 = vld [vmem:[#allocation89_spill] sm:$0xff]  ;;  %v7600_v4 = vld [vmem:[#allocation52_spill] sm:$0xff]  ;;  %v7617_v28 = vld [vmem:[#allocation131_spill] sm:$0xff] }
 0x1ed   :  { %v1918_v57 = vadd.f32 %v1910_v47, %v1870_v37  ;;  %v1919_v62 = vadd.f32 %v1911_v3, %v1871_v63  ;;  %v1920_v60 = vadd.f32 %v1912_v52, %v1872_v55  ;;  %v5473_v27 = vadd.f32 %v1913_v25, %v1873_v21  ;;  %v7601_v52 = vld [vmem:[#allocation54_spill] sm:$0xff]  ;;  %v7602_v37 = vld [vmem:[#allocation15_spill] sm:$0xff] }
 0x1ee   :  { %v1945_v38 = vadd.f32 %v1937_v19, %v1929_v33  ;;  %v1947_v1 = vadd.f32 %v1939_v43, %v6906_v0  ;;  %v1948_v16 = vadd.f32 %v1940_v5, %v6919_v53  ;;  %v1949_v30 = vadd.f32 %v1941_v34, %v7016_v56  ;;  %v7603_v55 = vld [vmem:[#allocation55_spill] sm:$0xff]  ;;  %v7604_v34 = vld [vmem:[#allocation16_spill] sm:$0xff]  ;;  %v7606_v33 = vld [vmem:[#allocation69_spill] sm:$0xff] }
 0x1ef   :  { %v1950_v10 = vadd.f32 %v1942_v2, %v7288_v36  ;;  %v1951_v20 = vadd.f32 %v1943_v51, %v7289_v6  ;;  %v1952_v29 = vadd.f32 %v1944_v7, %v7599_v59  ;;  %v1954_v9 = vand.u32 2147483647, %v1946_v23  ;;  %v7605_v19 = vld [vmem:[#allocation59_spill] sm:$0xff]  ;;  %v7607_v2 = vld [vmem:[#allocation113_spill] sm:$0xff]  ;;  %v7619_v26 = vld [vmem:[#allocation34_spill] sm:$0xff] }
 0x1f0   :  { %v1970_v3 = vmul.f32 %v5268_v22, %v7600_v4  ;;  %v1971_v58 = vmul.f32 %v5270_v24, %v7601_v52  ;;  %v1972_v63 = vmul.f32 %v5272_v35, %v7602_v37  ;;  %v1973_v5 = vmul.f32 %v5282_v48, %v7603_v55  ;;  %v7608_v47 = vld [vmem:[#allocation23_spill] sm:$0xff]  ;;  %v7610_v35 = vld [vmem:[#allocation137_spill] sm:$0xff]  ;;  %v7612_v48 = vld [vmem:[#allocation120_spill] sm:$0xff] }
 0x1f1   :  { %v1974_v21 = vmul.f32 %v5284_v40, %v7604_v34  ;;  %v1975_v51 = vmul.f32 %v5286_v18, %v7605_v19  ;;  %v1976_v25 = vmul.f32 %v5294_v46, %v7606_v33  ;;  %v1977_v22 = vmul.f32 %v5296_v13, %v7607_v2  ;;  %v5501_v17 = vpop.eup %2791  ;;  %v7618_v41 = vld [vmem:[#allocation123_spill] sm:$0xff]  ;;  %v7621_v43 = vld [vmem:[#allocation126_spill] sm:$0xff]  ;;  %v7622_v7 = vld [vmem:[#allocation125_spill] sm:$0xff] }
 0x1f2   :  { %v1978_v24 = vmul.f32 %v5298_v49, %v7608_v47  ;;  %v1979_v14 = vmul.f32 %v7610_v35, %v7609_v12  ;;  %7611 = vst [vmem:[#allocation127_spill] sm:$0xff] %v5501_v17  ;;  %v1980_v40 = vmul.f32 %v7613_v11, %v7612_v48  ;;  %v1981_v18 = vmul.f32 %v7615_v8, %v7614_v45  ;;  %v7623_v45 = vld [vmem:[#allocation27_spill] sm:$0xff]  ;;  %v7625_v19 = vld [vmem:[#allocation90_spill] sm:$0xff] }
 0x1f3   :  { %v1982_v46 = vmul.f32 %v7617_v28, %v7616_v50  ;;  %v1983_v13 = vmul.f32 %v7619_v26, %v7618_v41  ;;  %v1984_v49 = vmul.f32 %v7621_v43, %v7620_v42  ;;  %v1985_v23 = vmul.f32 %v5319_v31, %v7622_v7  ;;  %v7624_v28 = vld [vmem:[#allocation26_spill] sm:$0xff]  ;;  %v7626_v31 = vld [vmem:[#allocation97_spill] sm:$0xff]  ;;  %v7680_v7 = vld [vmem:[#allocation100_spill] sm:$0xff] }
 0x1f4   :  { %v1986_v35 = vadd.f32 %v1978_v24, %v1970_v3  ;;  %v1987_v17 = vadd.f32 %v1979_v14, %v1971_v58  ;;  %v1988_v12 = vadd.f32 %v1980_v40, %v1972_v63  ;;  %v1989_v47 = vadd.f32 %v1981_v18, %v1973_v5  ;;  %v7627_v58 = vld [vmem:[#allocation91_spill] sm:$0xff]  ;;  %v7630_v24 = vld [vmem:[#allocation93_spill] sm:$0xff] }
 0x1f5   :  { %v1990_v11 = vadd.f32 %v1982_v46, %v1974_v21  ;;  %v1991_v48 = vadd.f32 %v1983_v13, %v1975_v51  ;;  %v1955_v2 = vand.u32 2147483647, %v1947_v1  ;;  %v1992_v8 = vadd.f32 %v1984_v49, %v1976_v25  ;;  %v7628_v21 = vld [vmem:[#allocation98_spill] sm:$0xff]  ;;  %v7629_v1 = vld [vmem:[#allocation99_spill] sm:$0xff] }
 0x1f6   :  { %v1994_v33 = vadd.f32 %v1986_v35, %v7623_v45  ;;  %v1995_v50 = vadd.f32 %v1987_v17, %v7624_v28  ;;  %v1953_v26 = vadd.f32 %v1945_v38, %v7625_v19  ;;  %v1956_v41 = vand.u32 2147483647, %v1948_v16  ;;  %v7631_v46 = vld [vmem:[#allocation94_spill] sm:$0xff]  ;;  %v7714_v59 = vld [vmem:[#allocation67_spill] sm:$0xff] }
 0x1f7   :  { %v1957_v34 = vand.u32 2147483647, %v1949_v30  ;;  %v1958_v43 = vand.u32 2147483647, %v1950_v10  ;;  %v1959_v42 = vand.u32 2147483647, %v1951_v20  ;;  %v1993_v55 = vadd.f32 %v1985_v23, %v1977_v22 }
 0x1f8   :  { %v1996_v3 = vadd.f32 %v1988_v12, %v7626_v31  ;;  %v1997_v63 = vadd.f32 %v1989_v47, %v7627_v58  ;;  %v1960_v5 = vand.u32 2147483647, %v1952_v29  ;;  %v1998_v51 = vadd.f32 %v1990_v11, %v7628_v21  ;;  %v7715_v6 = vld [vmem:[#allocation87_spill] sm:$0xff] }
 0x1f9   :  { %v1999_v25 = vadd.f32 %v1991_v48, %v7629_v1  ;;  %v2000_v14 = vadd.f32 %v1992_v8, %v7630_v24  ;;  %v1962_v40 = vadd.f32 %v1954_v9, %v1914_v54  ;;  %v1963_v17 = vadd.f32 %v1955_v2, %v1915_v44  ;;  %v7632_v48 = vld [vmem:[#allocation29_spill] sm:$0xff]  ;;  %v7634_v54 = vld [vmem:[#allocation134_spill] sm:$0xff]  ;;  %v7639_v2 = vld [vmem:[#allocation135_spill] sm:$0xff] }
 0x1fa   :  { %v2002_v18 = vand.u32 2147483647, %v1994_v33  ;;  %v2003_v38 = vand.u32 2147483647, %v1995_v50  ;;  %v1961_v16 = vand.u32 2147483647, %v1953_v26  ;;  %v1964_v30 = vadd.f32 %v1956_v41, %v1916_v39 }
 0x1fb   :  { %v1965_v10 = vadd.f32 %v1957_v34, %v1917_v61  ;;  %v1966_v20 = vadd.f32 %v1958_v43, %v1918_v57  ;;  %v1967_v22 = vadd.f32 %v1959_v42, %v1919_v62  ;;  %v2001_v12 = vadd.f32 %v1993_v55, %v7631_v46  ;;  %v7635_v33 = vld [vmem:[#allocation77_spill] sm:$0xff]  ;;  %v7636_v61 = vld [vmem:[#allocation63_spill] sm:$0xff]  ;;  %v7671_v46 = vld [vmem:[#allocation12_spill] sm:$0xff] }
 0x1fc   :  { %v2004_v13 = vand.u32 2147483647, %v1996_v3  ;;  %v2005_v47 = vand.u32 2147483647, %v1997_v63  ;;  %v1968_v29 = vadd.f32 %v1960_v5, %v1920_v60  ;;  %v2006_v49 = vand.u32 2147483647, %v1998_v51 }
 0x1fd   :  { %v2007_v23 = vand.u32 2147483647, %v1999_v25  ;;  %v2008_v35 = vand.u32 2147483647, %v2000_v14  ;;  %v7633_v11 = vand.u32 2147483647, %v7632_v48  ;;  %2793 = vtanh.f32 %v7634_v54 }
 0x1fe   :  { %v2010_v44 = vadd.f32 %v2002_v18, %v1962_v40  ;;  %v2011_v9 = vadd.f32 %v2003_v38, %v1963_v17  ;;  %v1549_v39 = vsub.f32 1.0, %v7635_v33  ;;  %v1783_v57 = vand.u32 2147483647, %v7636_v61  ;;  %v7637_v62 = vld [vmem:[#allocation103_spill] sm:$0xff]  ;;  %v7640_v60 = vld [vmem:[#allocation136_spill] sm:$0xff]  ;;  %v7645_v17 = vld [vmem:[#allocation37_spill] sm:$0xff] }
 0x1ff   :  { %v1789_v8 = vmul.f32 2.0, %v7633_v11  ;;  %v7638_v34 = vand.u32 2147483647, %v7637_v62  ;;  %2795 = vtanh.f32 %v7639_v2  ;;  %v1969_v50 = vadd.f32 %v1961_v16, %v5473_v27  ;;  %v5534_v5 = vld [vmem:[#allocation2 + $0x300] sm:$0xff]  ;;  %v7641_v51 = vld [vmem:[#allocation96_spill] sm:$0xff]  ;;  %v7646_v38 = vld [vmem:[#allocation45_spill] sm:$0xff] }
 0x200   :  { %2797 = vtanh.f32 %v7640_v60  ;;  %v2009_v41 = vand.u32 2147483647, %v2001_v12  ;;  %v2012_v42 = vadd.f32 %v2004_v13, %v1964_v30  ;;  %v2013_v26 = vadd.f32 %v2005_v47, %v1965_v10  ;;  %v7642_v25 = vld [vmem:[#allocation140_spill] sm:$0xff]  ;;  %v5555_v13 = vld [vmem:[#allocation2 + $0x310] sm:$0xff]  ;;  %v5557_v47 = vld [vmem:[#allocation2 + $0x318] sm:$0xff] }
 0x201   :  { %v1790_v55 = vmul.f32 2.0, %v7638_v34  ;;  %v2014_v43 = vadd.f32 %v2006_v49, %v1966_v20  ;;  %v2015_v3 = vadd.f32 %v2007_v23, %v1967_v22  ;;  %v2016_v63 = vadd.f32 %v2008_v35, %v1968_v29  ;;  %v5543_v11 = vld [vmem:[#allocation2 + $0x308] sm:$0xff]  ;;  %v7651_v20 = vld [vmem:[#allocation78_spill] sm:$0xff]  ;;  %v5559_v29 = vld [vmem:[#allocation2 + $0x320] sm:$0xff] }
 0x202   :  { %v7643_v14 = vsub.f32 1.0, %v7642_v25  ;;  %2799 = vtanh.f32 %v1789_v8  ;;  %v2018_v18 = vmul.f32 %v7645_v17, %v2010_v44  ;;  %v2019_v48 = vmul.f32 %v7646_v38, %v2011_v9  ;;  %v7647_v27 = vld [vmem:[#allocation128_spill] sm:$0xff]  ;;  %v5563_v54 = vld [vmem:[#allocation2 + $0x340] sm:$0xff]  ;;  %v5567_v9 = vld [vmem:[#allocation2 + $0x350] sm:$0xff] }
 0x203   :  { %v7648_v16 = vld [vmem:[#allocation80_spill] sm:$0xff]  ;;  %v5551_v22 = vadd.f32 %v1549_v39, %v7651_v20  ;;  %v5553_v12 = vmul.f32 2.0, %v1783_v57  ;;  %2801 = vtanh.f32 %v1790_v55  ;;  %v2017_v23 = vadd.f32 %v2009_v41, %v1969_v50  ;;  %v7654_v33 = vld [vmem:[#allocation85_spill] sm:$0xff]  ;;  %v7658_v60 = vld [vmem:[#allocation14_spill] sm:$0xff] }
 0x204   :  { %v5539_v40 = vadd.f32 %v7643_v14, %v7641_v51  ;;  %v7649_v30 = vsub.f32 1.0, %v7648_v16  ;;  %v7653_v35 = vld [vmem:[#allocation56_spill] sm:$0xff]  ;;  %v2092_v39 = vmul.f32 %v5534_v5, %v7654_v33  ;;  %v7657_v55 = vld [vmem:[#allocation109_spill] sm:$0xff]  ;;  %v2024_v51 = vmul.f32 %v7658_v60, %v2016_v63  ;;  %v5583_v16 = vld [vmem:[#allocation2 + $0x360] sm:$0xff] }
 0x205   :  { %7652 = vst [vmem:[#allocation74_spill] sm:$0xff] %v5551_v22  ;;  %v2020_v8 = vmul.f32 %v7653_v35, %v2012_v42  ;;  %v5565_v44 = vld [vmem:[#allocation2 + $0x348] sm:$0xff]  ;;  %v2023_v2 = vmul.f32 %v7657_v55, %v2015_v3  ;;  %v5577_v41 = vld [vmem:[#allocation2 + $0x330] sm:$0xff]  ;;  %v5579_v42 = vld [vmem:[#allocation2 + $0x358] sm:$0xff]  ;;  %v2680_v25 = vadd.f32 -1.0, %v2018_v18  ;;  %v2681_v14 = vadd.f32 -1.0, %v2019_v48 }
 0x206   :  { %7644 = vst [vmem:[#allocation138_spill] sm:$0xff] %v5539_v40  ;;  %v5548_v10 = vadd.f32 %v7649_v30, %v7647_v27  ;;  %v7655_v61 = vld [vmem:[#allocation104_spill] sm:$0xff]  ;;  %v5581_v27 = vld [vmem:[#allocation2 + $0x338] sm:$0xff]  ;;  %v5591_v20 = vld [vmem:[#allocation2 + $0x370] sm:$0xff]  ;;  %v2102_v60 = vmul.f32 %v5567_v9, %v7664_v32  ;;  %2803 = vtanh.f32 %v5553_v12 }
 0x207   :  { %v2021_v57 = vmul.f32 %v7655_v61, %v2013_v26  ;;  %v7656_v62 = vld [vmem:[#allocation108_spill] sm:$0xff]  ;;  %v7659_v26 = vld [vmem:[#allocation86_spill] sm:$0xff]  ;;  %v7663_v40 = vld [vmem:[#allocation41_spill] sm:$0xff]  ;;  %v2682_v55 = vadd.f32 -1.0, %v2020_v8  ;;  %v2099_v32 = vmul.f32 %v5581_v27, %v7671_v46  ;;  %v5634_v37 = vadd.f32 -1.0, %v2023_v2 }
 0x208   :  { %7650 = vst [vmem:[#allocation139_spill] sm:$0xff] %v5548_v10  ;;  %v2022_v34 = vmul.f32 %v7656_v62, %v2014_v43  ;;  %v5575_v50 = vld [vmem:[#allocation2 + $0x328] sm:$0xff]  ;;  %v2093_v43 = vmul.f32 %v5543_v11, %v7659_v26  ;;  %v5593_v49 = vld [vmem:[#allocation2 + $0x378] sm:$0xff]  ;;  %v2101_v33 = vmul.f32 %v5565_v44, %v7663_v40  ;;  %v5603_v26 = vpop.eup %2793  ;;  %v7668_v38 = vld [vmem:[#allocation43_spill] sm:$0xff] }
 0x209   :  { %v5585_v30 = vld [vmem:[#allocation2 + $0x368] sm:$0xff]  ;;  %7665 = vst [vmem:[#allocation102_spill] sm:$0xff] %v5603_v26  ;;  %v7667_v61 = vld [vmem:[#allocation18_spill] sm:$0xff]  ;;  %v5611_v17 = vpop.eup %2795  ;;  %7681 = vst [vmem:[#allocation126_spill] sm:$0xff] %v5634_v37 }
 0x20a   :  { %v7660_v3 = vld [vmem:[#allocation68_spill] sm:$0xff]  ;;  %v2097_v35 = vmul.f32 %v5575_v50, %v7667_v61  ;;  %7669 = vst [vmem:[#allocation137_spill] sm:$0xff] %v5611_v17  ;;  %v7673_v26 = vld [vmem:[#allocation46_spill] sm:$0xff]  ;;  %v5621_v1 = vpop.eup %2797  ;;  %v2109_v31 = vadd.f32 %v2101_v33, %v2093_v43  ;;  %v5629_v28 = vadd.f32 -1.0, %v2022_v34  ;;  %v7684_v43 = vld [vmem:[#allocation51_spill] sm:$0xff] }
 0x20b   :  { %v2094_v63 = vmul.f32 %v5555_v13, %v7660_v3  ;;  %v7661_v22 = vld [vmem:[#allocation88_spill] sm:$0xff]  ;;  %v7666_v3 = vld [vmem:[#allocation17_spill] sm:$0xff]  ;;  %7674 = vst [vmem:[#allocation133_spill] sm:$0xff] %v5621_v1  ;;  %v7675_v61 = vld [vmem:[#allocation62_spill] sm:$0xff]  ;;  %v5636_v1 = vadd.f32 -1.0, %v2024_v51 }
 0x20c   :  { %v2095_v18 = vmul.f32 %v5557_v47, %v7661_v22  ;;  %v7662_v48 = vld [vmem:[#allocation40_spill] sm:$0xff]  ;;  %v2096_v62 = vmul.f32 %v5559_v29, %v7666_v3  ;;  %v2103_v22 = vmul.f32 %v5579_v42, %v7668_v38  ;;  %v2105_v3 = vmul.f32 %v5585_v30, %v7673_v26  ;;  %v7676_v38 = vld [vmem:[#allocation79_spill] sm:$0xff]  ;;  %7678 = vst [vmem:[#allocation131_spill] sm:$0xff] %v5629_v28  ;;  %v7686_v51 = vld [vmem:[#allocation57_spill] sm:$0xff] }
 0x20d   :  { %v2100_v10 = vmul.f32 %v5563_v54, %v7662_v48  ;;  %v7670_v48 = vld [vmem:[#allocation47_spill] sm:$0xff]  ;;  %v7672_v24 = vld [vmem:[#allocation44_spill] sm:$0xff]  ;;  %v2106_v21 = vmul.f32 %v5591_v20, %v7675_v61  ;;  %v2107_v17 = vmul.f32 %v5593_v49, %v7676_v38  ;;  %v2110_v46 = vadd.f32 %v2102_v60, %v2094_v63  ;;  %7682 = vst [vmem:[#allocation29_spill] sm:$0xff] %v5636_v1  ;;  %v7710_v1 = vld [vmem:[#allocation118_spill] sm:$0xff] }
 0x20e   :  { %v2098_v40 = vmul.f32 %v5577_v41, %v7670_v48  ;;  %v2104_v8 = vmul.f32 %v5583_v16, %v7672_v24  ;;  %v5627_v48 = vadd.f32 -1.0, %v2021_v57  ;;  %v2111_v45 = vadd.f32 %v2103_v22, %v2095_v18  ;;  %v5631_v24 = vpop.eup %2799  ;;  %v7685_v22 = vld [vmem:[#allocation71_spill] sm:$0xff]  ;;  %v7687_v18 = vld [vmem:[#allocation72_spill] sm:$0xff]  ;;  %v7722_v12 = vld [vmem:[#allocation105_spill] sm:$0xff] }
 0x20f   :  { %v2108_v58 = vadd.f32 %v2100_v10, %v2092_v39  ;;  %7679 = vst [vmem:[#allocation34_spill] sm:$0xff] %v5631_v24  ;;  %v2025_v26 = vmul.f32 %v7680_v7, %v2017_v23  ;;  %v2034_v61 = vand.u32 2147483647, %v2680_v25  ;;  %v5638_v52 = vpop.eup %2801  ;;  %v2035_v38 = vand.u32 2147483647, %v2681_v14  ;;  %v7697_v23 = vld [vmem:[#allocation48_spill] sm:$0xff] }
 0x210   :  { %7677 = vst [vmem:[#allocation130_spill] sm:$0xff] %v5627_v48  ;;  %7683 = vst [vmem:[#allocation134_spill] sm:$0xff] %v5638_v52  ;;  %v2036_v10 = vand.u32 2147483647, %v2682_v55  ;;  %v2112_v33 = vadd.f32 %v2104_v8, %v2096_v62  ;;  %v2113_v39 = vadd.f32 %v2105_v3, %v2097_v35  ;;  %v2114_v57 = vadd.f32 %v2106_v21, %v2098_v40  ;;  %v7693_v55 = vld [vmem:[#allocation73_spill] sm:$0xff]  ;;  %v7694_v3 = vld [vmem:[#allocation75_spill] sm:$0xff] }
 0x211   :  { %v2115_v34 = vadd.f32 %v2107_v17, %v2099_v32  ;;  %v5641_v60 = vadd.f32 %v2108_v58, %v7684_v43  ;;  %v5644_v63 = vadd.f32 %v2109_v31, %v7685_v22  ;;  %v5649_v25 = vadd.f32 %v2110_v46, %v7686_v51  ;;  %v7692_v17 = vld [vmem:[#allocation58_spill] sm:$0xff]  ;;  %v7696_v58 = vld [vmem:[#allocation36_spill] sm:$0xff]  ;;  %v7700_v24 = vld [vmem:[#allocation11_spill] sm:$0xff] }
 0x212   :  { %v5652_v14 = vadd.f32 %v2111_v45, %v7687_v18  ;;  %v5654_v62 = vadd.f32 -1.0, %v2025_v26  ;;  %v5658_v21 = vmul.f32 2.0, %v2034_v61  ;;  %v5660_v31 = vmul.f32 2.0, %v2035_v38  ;;  %v7695_v45 = vld [vmem:[#allocation76_spill] sm:$0xff]  ;;  %v7699_v52 = vld [vmem:[#allocation38_spill] sm:$0xff]  ;;  %v7707_v51 = vld [vmem:[#allocation53_spill] sm:$0xff] }
 0x213   :  { %v5662_v40 = vmul.f32 2.0, %v2036_v10  ;;  %v2120_v35 = vadd.f32 %v2112_v33, %v7692_v17  ;;  %v2121_v46 = vadd.f32 %v2113_v39, %v7693_v55  ;;  %v2122_v8 = vadd.f32 %v2114_v57, %v7694_v3  ;;  %v7698_v39 = vld [vmem:[#allocation13_spill] sm:$0xff]  ;;  %v7704_v55 = vld [vmem:[#allocation114_spill] sm:$0xff]  ;;  %v7705_v17 = vld [vmem:[#allocation115_spill] sm:$0xff] }
 0x214   :  { %7688 = vst [vmem:[#allocation77_spill] sm:$0xff] %v5654_v62  ;;  %7689 = vst [vmem:[#allocation63_spill] sm:$0xff] %v5658_v21  ;;  %v5668_v2 = vadd.f32 %v2115_v34, %v7695_v45  ;;  %v2124_v26 = vand.u32 2147483647, %v5641_v60  ;;  %v2125_v32 = vand.u32 2147483647, %v5644_v63  ;;  %v2132_v10 = vmul.f32 %v5534_v5, %v7696_v58 }
 0x215   :  { %7690 = vst [vmem:[#allocation103_spill] sm:$0xff] %v5660_v31  ;;  %7691 = vst [vmem:[#allocation135_spill] sm:$0xff] %v5662_v40  ;;  %v2126_v61 = vand.u32 2147483647, %v5649_v25  ;;  %v2127_v38 = vand.u32 2147483647, %v5652_v14  ;;  %v2133_v33 = vmul.f32 %v5543_v11, %v7697_v23  ;;  %v2134_v57 = vmul.f32 %v5555_v13, %v7698_v39 }
 0x216   :  { %v2135_v34 = vmul.f32 %v5557_v47, %v7699_v52  ;;  %v2140_v60 = vmul.f32 %v5563_v54, %v7700_v24  ;;  %v7701_v63 = vld [vmem:[#allocation30_spill] sm:$0xff]  ;;  %v7702_v45 = vld [vmem:[#allocation39_spill] sm:$0xff]  ;;  %v7703_v3 = vld [vmem:[#allocation49_spill] sm:$0xff]  ;;  %v2142_v23 = vmul.f32 %v5567_v9, %v7704_v55  ;;  %v2143_v39 = vmul.f32 %v5579_v42, %v7705_v17 }
 0x217   :  { %v2141_v25 = vmul.f32 %v5565_v44, %v7701_v63  ;;  %v2136_v14 = vmul.f32 %v5559_v29, %v7702_v45  ;;  %v2137_v58 = vmul.f32 %v5575_v50, %v7703_v3  ;;  %v7706_v18 = vld [vmem:[#allocation50_spill] sm:$0xff]  ;;  %v2139_v24 = vmul.f32 %v5581_v27, %v7707_v51  ;;  %v7708_v22 = vld [vmem:[#allocation116_spill] sm:$0xff]  ;;  %v7709_v43 = vld [vmem:[#allocation117_spill] sm:$0xff] }
 0x218   :  { %v2138_v52 = vmul.f32 %v5577_v41, %v7706_v18  ;;  %v2144_v63 = vmul.f32 %v5583_v16, %v7708_v22  ;;  %v2145_v45 = vmul.f32 %v5585_v30, %v7709_v43  ;;  %v2128_v7 = vand.u32 2147483647, %v2120_v35  ;;  %v7711_v40 = vld [vmem:[#allocation119_spill] sm:$0xff]  ;;  %v7712_v43 = vld [vmem:[#allocation64_spill] sm:$0xff] }
 0x219   :  { %v2129_v3 = vand.u32 2147483647, %v2121_v46  ;;  %v2146_v55 = vmul.f32 %v5591_v20, %v7710_v1  ;;  %v2147_v17 = vmul.f32 %v5593_v49, %v7711_v40  ;;  %v2130_v37 = vand.u32 2147483647, %v2122_v8  ;;  %v7713_v46 = vld [vmem:[#allocation81_spill] sm:$0xff]  ;;  %v7733_v51 = vld [vmem:[#allocation20_spill] sm:$0xff] }
 0x21a   :  { %v2148_v62 = vadd.f32 %v2140_v60, %v2132_v10  ;;  %v2149_v18 = vadd.f32 %v2141_v25, %v2133_v33  ;;  %v2150_v31 = vadd.f32 %v2142_v23, %v2134_v57  ;;  %v2151_v28 = vadd.f32 %v2143_v39, %v2135_v34  ;;  %v7716_v40 = vld [vmem:[#allocation61_spill] sm:$0xff]  ;;  %v7718_v23 = vld [vmem:[#allocation66_spill] sm:$0xff]  ;;  %v7719_v60 = vld [vmem:[#allocation28_spill] sm:$0xff] }
 0x21b   :  { %v2152_v21 = vadd.f32 %v2144_v63, %v2136_v14  ;;  %v2153_v22 = vadd.f32 %v2145_v45, %v2137_v58  ;;  %v2154_v48 = vadd.f32 %v2146_v55, %v2138_v52  ;;  %v2155_v4 = vadd.f32 %v2147_v17, %v2139_v24  ;;  %v7717_v10 = vld [vmem:[#allocation65_spill] sm:$0xff]  ;;  %v7720_v55 = vld [vmem:[#allocation60_spill] sm:$0xff]  ;;  %v7721_v14 = vld [vmem:[#allocation70_spill] sm:$0xff] }
 0x21c   :  { %v2156_v35 = vadd.f32 %v2148_v62, %v7712_v43  ;;  %v2157_v19 = vadd.f32 %v2149_v18, %v7713_v46  ;;  %v2158_v1 = vadd.f32 %v2150_v31, %v7714_v59  ;;  %v2159_v36 = vadd.f32 %v2151_v28, %v7715_v6 }
 0x21d   :  { %v2160_v8 = vadd.f32 %v2152_v21, %v7716_v40  ;;  %v2161_v33 = vadd.f32 %v2153_v22, %v7717_v10  ;;  %v2162_v57 = vadd.f32 %v2154_v48, %v7718_v23  ;;  %v2163_v39 = vadd.f32 %v2155_v4, %v7719_v60  ;;  %v5750_v10 = vpop.eup %2803  ;;  %v7737_v40 = vld [vmem:[#allocation83_spill] sm:$0xff] }
 0x21e   :  { %v2164_v34 = vand.u32 2147483647, %v2156_v35  ;;  %v2165_v58 = vand.u32 2147483647, %v2157_v19  ;;  %v2166_v52 = vand.u32 2147483647, %v2158_v1  ;;  %v2180_v28 = vmul.f32 %v5534_v5, %v7720_v55 }
 0x21f   :  { %v2167_v24 = vand.u32 2147483647, %v2159_v36  ;;  %v2168_v62 = vand.u32 2147483647, %v2160_v8  ;;  %v2169_v18 = vand.u32 2147483647, %v2161_v33  ;;  %v2181_v19 = vmul.f32 %v5543_v11, %v7721_v14 }
 0x220   :  { %v2170_v17 = vand.u32 2147483647, %v2162_v57  ;;  %v2171_v31 = vand.u32 2147483647, %v2163_v39  ;;  %v2172_v21 = vadd.f32 %v2164_v34, %v2124_v26  ;;  %v2173_v45 = vadd.f32 %v2165_v58, %v2125_v32  ;;  %v7723_v1 = vld [vmem:[#allocation106_spill] sm:$0xff]  ;;  %v7724_v8 = vld [vmem:[#allocation107_spill] sm:$0xff] }
 0x221   :  { %v2174_v22 = vadd.f32 %v2166_v52, %v2126_v61  ;;  %v2175_v63 = vadd.f32 %v2167_v24, %v2127_v38  ;;  %v2176_v48 = vadd.f32 %v2168_v62, %v2128_v7  ;;  %v2177_v25 = vadd.f32 %v2169_v18, %v2129_v3  ;;  %v7725_v57 = vld [vmem:[#allocation110_spill] sm:$0xff]  ;;  %v7726_v26 = vld [vmem:[#allocation111_spill] sm:$0xff]  ;;  %v7727_v3 = vld [vmem:[#allocation112_spill] sm:$0xff]  ;;  %7736 = vst [vmem:[#allocation136_spill] sm:$0xff] %v5750_v10 }
 0x222   :  { %v2178_v4 = vadd.f32 %v2170_v17, %v2130_v37  ;;  %v2182_v36 = vmul.f32 %v5555_v13, %v7722_v12  ;;  %v2183_v35 = vmul.f32 %v5557_v47, %v7723_v1  ;;  %v2184_v33 = vmul.f32 %v5559_v29, %v7724_v8  ;;  %v7728_v61 = vld [vmem:[#allocation31_spill] sm:$0xff]  ;;  %v7729_v39 = vld [vmem:[#allocation32_spill] sm:$0xff]  ;;  %v7730_v58 = vld [vmem:[#allocation33_spill] sm:$0xff] }
 0x223   :  { %v2185_v32 = vmul.f32 %v5575_v50, %v7725_v57  ;;  %v2186_v7 = vmul.f32 %v5577_v41, %v7726_v26  ;;  %v2187_v37 = vmul.f32 %v5581_v27, %v7727_v3  ;;  %v2188_v38 = vmul.f32 %v5563_v54, %v7728_v61  ;;  %v7731_v24 = vld [vmem:[#allocation35_spill] sm:$0xff]  ;;  %v7734_v57 = vld [vmem:[#allocation21_spill] sm:$0xff]  ;;  %v7735_v8 = vld [vmem:[#allocation22_spill] sm:$0xff] }
 0x224   :  { %v2189_v34 = vmul.f32 %v5565_v44, %v7729_v39  ;;  %v2190_v52 = vmul.f32 %v5567_v9, %v7730_v58  ;;  %v2191_v62 = vmul.f32 %v5579_v42, %v7731_v24  ;;  %v7732_v18 = vld [vmem:[#allocation19_spill] sm:$0xff]  ;;  %v2193_v26 = vmul.f32 %v5585_v30, %v7733_v51 }
 0x225   :  { %v2192_v17 = vmul.f32 %v5583_v16, %v7732_v18  ;;  %v2194_v3 = vmul.f32 %v5591_v20, %v7734_v57  ;;  %v2195_v61 = vmul.f32 %v5593_v49, %v7735_v8  ;;  %v2196_v1 = vadd.f32 %v2188_v38, %v2180_v28  ;;  %v7738_v28 = vld [vmem:[#allocation84_spill] sm:$0xff] }
 0x226   :  { %v2197_v39 = vadd.f32 %v2189_v34, %v2181_v19  ;;  %v2198_v12 = vadd.f32 %v2190_v52, %v2182_v36  ;;  %v2199_v14 = vadd.f32 %v2191_v62, %v2183_v35  ;;  %v2201_v55 = vadd.f32 %v2193_v26, %v2185_v32  ;;  %v7739_v36 = vld [vmem:[#allocation89_spill] sm:$0xff] }
 0x227   :  { %v2200_v58 = vadd.f32 %v2192_v17, %v2184_v33  ;;  %v2202_v60 = vadd.f32 %v2194_v3, %v2186_v7  ;;  %v2203_v24 = vadd.f32 %v2195_v61, %v2187_v37  ;;  %v2204_v23 = vadd.f32 %v2196_v1, %v6905_v15  ;;  %v7740_v33 = vld [vmem:[#allocation90_spill] sm:$0xff] }
 0x228   :  { %v2205_v18 = vadd.f32 %v2197_v39, %v6906_v0  ;;  %v2206_v51 = vadd.f32 %v2198_v12, %v6919_v53  ;;  %v2207_v57 = vadd.f32 %v2199_v14, %v7016_v56  ;;  %v2209_v19 = vadd.f32 %v2201_v55, %v7738_v28  ;;  %v7742_v14 = vld [vmem:[#allocation52_spill] sm:$0xff] }
 0x229   :  { %v2208_v8 = vadd.f32 %v2200_v58, %v7737_v40  ;;  %v2210_v35 = vadd.f32 %v2202_v60, %v7739_v36  ;;  %v2211_v32 = vadd.f32 %v2203_v24, %v7740_v33  ;;  %v2212_v26 = vand.u32 2147483647, %v2204_v23 }
 0x22a   :  { %v2213_v7 = vand.u32 2147483647, %v2205_v18  ;;  %v7741_v1 = vand.u32 2147483647, %v5668_v2  ;;  %v2214_v37 = vand.u32 2147483647, %v2206_v51  ;;  %v2228_v58 = vmul.f32 %v5534_v5, %v7742_v14 }
 0x22b   :  { %v2215_v61 = vand.u32 2147483647, %v2207_v57  ;;  %v2216_v38 = vand.u32 2147483647, %v2208_v8  ;;  %v2217_v39 = vand.u32 2147483647, %v2209_v19  ;;  %v2220_v52 = vadd.f32 %v2212_v26, %v2172_v21 }
 0x22c   :  { %v2179_v3 = vadd.f32 %v2171_v31, %v7741_v1  ;;  %v2218_v12 = vand.u32 2147483647, %v2210_v35  ;;  %v2219_v34 = vand.u32 2147483647, %v2211_v32  ;;  %v2221_v55 = vadd.f32 %v2213_v7, %v2173_v45  ;;  %v7743_v18 = vld [vmem:[#allocation54_spill] sm:$0xff]  ;;  %v7744_v31 = vld [vmem:[#allocation15_spill] sm:$0xff] }
 0x22d   :  { %v2222_v62 = vadd.f32 %v2214_v37, %v2174_v22  ;;  %v2223_v60 = vadd.f32 %v2215_v61, %v2175_v63  ;;  %v2224_v17 = vadd.f32 %v2216_v38, %v2176_v48  ;;  %v2225_v24 = vadd.f32 %v2217_v39, %v2177_v25  ;;  %v7745_v8 = vld [vmem:[#allocation55_spill] sm:$0xff]  ;;  %v7746_v19 = vld [vmem:[#allocation16_spill] sm:$0xff]  ;;  %v7748_v45 = vld [vmem:[#allocation69_spill] sm:$0xff] }
 0x22e   :  { %v2226_v23 = vadd.f32 %v2218_v12, %v2178_v4  ;;  %v2229_v2 = vmul.f32 %v5543_v11, %v7743_v18  ;;  %v2230_v51 = vmul.f32 %v5555_v13, %v7744_v31  ;;  %v2231_v57 = vmul.f32 %v5557_v47, %v7745_v8  ;;  %v7747_v5 = vld [vmem:[#allocation59_spill] sm:$0xff]  ;;  %v7749_v63 = vld [vmem:[#allocation113_spill] sm:$0xff]  ;;  %v7751_v4 = vld [vmem:[#allocation24_spill] sm:$0xff] }
 0x22f   :  { %v2232_v35 = vmul.f32 %v5559_v29, %v7746_v19  ;;  %v2233_v21 = vmul.f32 %v5575_v50, %v7747_v5  ;;  %v2234_v22 = vmul.f32 %v5577_v41, %v7748_v45  ;;  %v2235_v48 = vmul.f32 %v5581_v27, %v7749_v63  ;;  %v7750_v25 = vld [vmem:[#allocation23_spill] sm:$0xff]  ;;  %v7752_v32 = vld [vmem:[#allocation120_spill] sm:$0xff]  ;;  %v7753_v26 = vld [vmem:[#allocation121_spill] sm:$0xff] }
 0x230   :  { %v2236_v11 = vmul.f32 %v5563_v54, %v7750_v25  ;;  %v2237_v13 = vmul.f32 %v5565_v44, %v7751_v4  ;;  %v2238_v47 = vmul.f32 %v5567_v9, %v7752_v32  ;;  %v2239_v29 = vmul.f32 %v5579_v42, %v7753_v26  ;;  %v7754_v7 = vld [vmem:[#allocation122_spill] sm:$0xff]  ;;  %v7755_v1 = vld [vmem:[#allocation123_spill] sm:$0xff]  ;;  %v7756_v37 = vld [vmem:[#allocation124_spill] sm:$0xff] }
 0x231   :  { %v2240_v50 = vmul.f32 %v5583_v16, %v7754_v7  ;;  %v2241_v41 = vmul.f32 %v5585_v30, %v7755_v1  ;;  %v2242_v27 = vmul.f32 %v5591_v20, %v7756_v37  ;;  %v7757_v61 = vld [vmem:[#allocation125_spill] sm:$0xff]  ;;  %v7758_v26 = vld [vmem:[#allocation27_spill] sm:$0xff]  ;;  %v7759_v16 = vld [vmem:[#allocation26_spill] sm:$0xff] }
 0x232   :  { %v2243_v54 = vmul.f32 %v5593_v49, %v7757_v61  ;;  %v2244_v38 = vadd.f32 %v2236_v11, %v2228_v58  ;;  %v2245_v44 = vadd.f32 %v2237_v13, %v2229_v2  ;;  %v2246_v39 = vadd.f32 %v2238_v47, %v2230_v51  ;;  %v7760_v25 = vld [vmem:[#allocation97_spill] sm:$0xff]  ;;  %v7761_v1 = vld [vmem:[#allocation91_spill] sm:$0xff]  ;;  %v7762_v20 = vld [vmem:[#allocation98_spill] sm:$0xff] }
 0x233   :  { %v2247_v12 = vadd.f32 %v2239_v29, %v2231_v57  ;;  %v2248_v9 = vadd.f32 %v2240_v50, %v2232_v35  ;;  %v2249_v10 = vadd.f32 %v2241_v41, %v2233_v21  ;;  %v2250_v32 = vadd.f32 %v2242_v27, %v2234_v22  ;;  %v7763_v45 = vld [vmem:[#allocation99_spill] sm:$0xff]  ;;  %v7764_v58 = vld [vmem:[#allocation93_spill] sm:$0xff]  ;;  %v7765_v51 = vld [vmem:[#allocation94_spill] sm:$0xff] }
 0x234   :  { %v2251_v42 = vadd.f32 %v2243_v54, %v2235_v48  ;;  %v2252_v4 = vadd.f32 %v2244_v38, %v7758_v26  ;;  %v2253_v7 = vadd.f32 %v2245_v44, %v7759_v16  ;;  %v2254_v30 = vadd.f32 %v2246_v39, %v7760_v25  ;;  %v7766_v39 = vld [vmem:[#allocation130_spill] sm:$0xff]  ;;  %v7804_v16 = vld [vmem:[#allocation43_spill] sm:$0xff]  ;;  %v7807_v61 = vld [vmem:[#allocation12_spill] sm:$0xff] }
 0x235   :  { %v2255_v63 = vadd.f32 %v2247_v12, %v7761_v1  ;;  %v2256_v37 = vadd.f32 %v2248_v9, %v7762_v20  ;;  %v2257_v49 = vadd.f32 %v2249_v10, %v7763_v45  ;;  %v2258_v2 = vadd.f32 %v2250_v32, %v7764_v58  ;;  %v7768_v32 = vld [vmem:[#allocation63_spill] sm:$0xff]  ;;  %v7803_v1 = vld [vmem:[#allocation18_spill] sm:$0xff]  ;;  %v7808_v5 = vld [vmem:[#allocation44_spill] sm:$0xff] }
 0x236   :  { %v2259_v57 = vadd.f32 %v2251_v42, %v7765_v51  ;;  %v2260_v35 = vand.u32 2147483647, %v2252_v4  ;;  %v2261_v21 = vand.u32 2147483647, %v2253_v7  ;;  %v2227_v22 = vadd.f32 %v2219_v34, %v2179_v3  ;;  %v7769_v4 = vld [vmem:[#allocation37_spill] sm:$0xff]  ;;  %v7771_v42 = vld [vmem:[#allocation56_spill] sm:$0xff] }
 0x237   :  { %v2262_v48 = vand.u32 2147483647, %v2254_v30  ;;  %v2263_v11 = vand.u32 2147483647, %v2255_v63  ;;  %v2264_v13 = vand.u32 2147483647, %v2256_v37  ;;  %2805 = vtanh.f32 %v7768_v32 }
 0x238   :  { %v2265_v47 = vand.u32 2147483647, %v2257_v49  ;;  %v2266_v29 = vand.u32 2147483647, %v2258_v2  ;;  %v2267_v50 = vand.u32 2147483647, %v2259_v57  ;;  %v2268_v41 = vadd.f32 %v2260_v35, %v2220_v52 }
 0x239   :  { %v2269_v27 = vadd.f32 %v2261_v21, %v2221_v55  ;;  %v2270_v54 = vadd.f32 %v2262_v48, %v2222_v62  ;;  %v2271_v38 = vadd.f32 %v2263_v11, %v2223_v60  ;;  %v2272_v44 = vadd.f32 %v2264_v13, %v2224_v17  ;;  %v7770_v63 = vld [vmem:[#allocation45_spill] sm:$0xff]  ;;  %v7772_v49 = vld [vmem:[#allocation131_spill] sm:$0xff]  ;;  %v7775_v60 = vld [vmem:[#allocation104_spill] sm:$0xff] }
 0x23a   :  { %v7767_v10 = vand.u32 2147483647, %v7766_v39  ;;  %v2273_v9 = vadd.f32 %v2265_v47, %v2225_v24  ;;  %v2276_v7 = vmul.f32 %v7769_v4, %v2268_v41  ;;  %v2274_v3 = vadd.f32 %v2266_v29, %v2226_v23  ;;  %v7774_v62 = vld [vmem:[#allocation103_spill] sm:$0xff]  ;;  %v7776_v2 = vld [vmem:[#allocation108_spill] sm:$0xff]  ;;  %v7778_v24 = vld [vmem:[#allocation77_spill] sm:$0xff] }
 0x23b   :  { %v2275_v34 = vadd.f32 %v2267_v50, %v2227_v22  ;;  %v2277_v37 = vmul.f32 %v7770_v63, %v2269_v27  ;;  %v2278_v30 = vmul.f32 %v7771_v42, %v2270_v54  ;;  %v7773_v52 = vand.u32 2147483647, %v7772_v49  ;;  %v7777_v35 = vld [vmem:[#allocation127_spill] sm:$0xff]  ;;  %v7779_v11 = vld [vmem:[#allocation126_spill] sm:$0xff]  ;;  %v7782_v47 = vld [vmem:[#allocation29_spill] sm:$0xff] }
 0x23c   :  { %v2045_v12 = vmul.f32 2.0, %v7767_v10  ;;  %2807 = vtanh.f32 %v7774_v62  ;;  %v2279_v17 = vmul.f32 %v7775_v60, %v2271_v38  ;;  %v2280_v57 = vmul.f32 %v7776_v2, %v2272_v44  ;;  %v7781_v13 = vld [vmem:[#allocation135_spill] sm:$0xff]  ;;  %v7784_v41 = vld [vmem:[#allocation109_spill] sm:$0xff]  ;;  %v7785_v39 = vld [vmem:[#allocation14_spill] sm:$0xff] }
 0x23d   :  { %v2046_v55 = vmul.f32 2.0, %v7773_v52  ;;  %v2041_v48 = vand.u32 2147483647, %v7778_v24  ;;  %v7780_v23 = vand.u32 2147483647, %v7779_v11  ;;  %2809 = vtanh.f32 %v7781_v13  ;;  %v7786_v10 = vld [vmem:[#allocation100_spill] sm:$0xff] }
 0x23e   :  { %v7783_v29 = vand.u32 2147483647, %v7782_v47  ;;  %2811 = vtanh.f32 %v2045_v12  ;;  %v2281_v27 = vmul.f32 %v7784_v41, %v2273_v9  ;;  %v2688_v54 = vadd.f32 -1.0, %v2276_v7  ;;  %v5823_v52 = vld [vmem:[#allocation2 + $0x380] sm:$0xff]  ;;  %v5830_v12 = vld [vmem:[#allocation2 + $0x388] sm:$0xff]  ;;  %v5832_v9 = vld [vmem:[#allocation2 + $0x390] sm:$0xff] }
 0x23f   :  { %v2047_v22 = vmul.f32 2.0, %v7780_v23  ;;  %v2282_v38 = vmul.f32 %v7785_v39, %v2274_v3  ;;  %v2283_v44 = vmul.f32 %v7786_v10, %v2275_v34  ;;  %v2689_v32 = vadd.f32 -1.0, %v2277_v37  ;;  %v5834_v7 = vld [vmem:[#allocation2 + $0x398] sm:$0xff]  ;;  %v7789_v37 = vld [vmem:[#allocation101_spill] sm:$0xff]  ;;  %v5854_v3 = vld [vmem:[#allocation2 + $0x3c8] sm:$0xff] }
 0x240   :  { %v2048_v50 = vmul.f32 2.0, %v7783_v29  ;;  %v5821_v49 = vadd.f32 -1.0, %v2278_v30  ;;  %2813 = vtanh.f32 %v2046_v55  ;;  %v5826_v11 = vadd.f32 -1.0, %v2279_v17  ;;  %v7790_v30 = vld [vmem:[#allocation129_spill] sm:$0xff]  ;;  %v5842_v55 = vld [vmem:[#allocation2 + $0x3a0] sm:$0xff]  ;;  %v5844_v17 = vld [vmem:[#allocation2 + $0x3a8] sm:$0xff] }
 0x241   :  { %v5828_v23 = vadd.f32 -1.0, %v2280_v57  ;;  %v7791_v13 = vsub.f32 1.0, %v7790_v30  ;;  %v2049_v29 = vmul.f32 2.0, %v2041_v48  ;;  %2815 = vtanh.f32 %v2047_v22  ;;  %v5846_v57 = vld [vmem:[#allocation2 + $0x3c0] sm:$0xff]  ;;  %v5850_v62 = vld [vmem:[#allocation2 + $0x3b0] sm:$0xff]  ;;  %v5852_v34 = vld [vmem:[#allocation2 + $0x3b8] sm:$0xff] }
 0x242   :  { %2817 = vtanh.f32 %v2048_v50  ;;  %v5848_v24 = vadd.f32 -1.0, %v2281_v27  ;;  %v2292_v21 = vand.u32 2147483647, %v2688_v54  ;;  %v5858_v48 = vld [vmem:[#allocation2 + $0x3d8] sm:$0xff]  ;;  %v7793_v22 = vld [vmem:[#allocation85_spill] sm:$0xff]  ;;  %v5863_v27 = vpop.eup %2805  ;;  %v5867_v41 = vld [vmem:[#allocation2 + $0x3e0] sm:$0xff]  ;;  %v2355_v25 = vmul.f32 %v5844_v17, %v7803_v1 }
 0x243   :  { %v5840_v47 = vadd.f32 %v7791_v13, %v7789_v37  ;;  %v5856_v37 = vld [vmem:[#allocation2 + $0x3d0] sm:$0xff]  ;;  %v2350_v30 = vmul.f32 %v5823_v52, %v7793_v22  ;;  %v2694_v13 = vadd.f32 -1.0, %v2282_v38  ;;  %v2293_v10 = vand.u32 2147483647, %v2689_v32  ;;  %7794 = vst [vmem:[#allocation140_spill] sm:$0xff] %v5863_v27  ;;  %v5869_v2 = vld [vmem:[#allocation2 + $0x3e8] sm:$0xff] }
 0x244   :  { %v2294_v50 = vand.u32 2147483647, %v5821_v49  ;;  %v2295_v54 = vand.u32 2147483647, %v5826_v11  ;;  %v2296_v39 = vand.u32 2147483647, %v5828_v23  ;;  %2819 = vtanh.f32 %v2049_v29 }
 0x245   :  { %7792 = vst [vmem:[#allocation96_spill] sm:$0xff] %v5840_v47  ;;  %v2695_v47 = vadd.f32 -1.0, %v2283_v44  ;;  %v7795_v60 = vld [vmem:[#allocation86_spill] sm:$0xff]  ;;  %v7796_v63 = vld [vmem:[#allocation68_spill] sm:$0xff]  ;;  %v5875_v44 = vld [vmem:[#allocation2 + $0x3f0] sm:$0xff]  ;;  %v2300_v45 = vmul.f32 2.0, %v2292_v21  ;;  %v2362_v21 = vmul.f32 %v5867_v41, %v7808_v5 }
 0x246   :  { %v2351_v42 = vmul.f32 %v5830_v12, %v7795_v60  ;;  %v2352_v38 = vmul.f32 %v5832_v9, %v7796_v63  ;;  %v5877_v32 = vld [vmem:[#allocation2 + $0x3f8] sm:$0xff]  ;;  %v7797_v49 = vld [vmem:[#allocation88_spill] sm:$0xff]  ;;  %v7799_v27 = vld [vmem:[#allocation41_spill] sm:$0xff]  ;;  %v5887_v60 = vpop.eup %2807  ;;  %v2301_v14 = vmul.f32 2.0, %v2293_v10  ;;  %v2298_v5 = vand.u32 2147483647, %v2694_v13 }
 0x247   :  { %v2353_v22 = vmul.f32 %v5834_v7, %v7797_v49  ;;  %v7798_v11 = vld [vmem:[#allocation40_spill] sm:$0xff]  ;;  %v2359_v4 = vmul.f32 %v5854_v3, %v7799_v27  ;;  %v7800_v51 = vld [vmem:[#allocation42_spill] sm:$0xff]  ;;  %7801 = vst [vmem:[#allocation128_spill] sm:$0xff] %v5887_v60  ;;  %v7802_v63 = vld [vmem:[#allocation17_spill] sm:$0xff]  ;;  %v2361_v49 = vmul.f32 %v5858_v48, %v7804_v16  ;;  %v5895_v26 = vpop.eup %2809  ;;  %v2302_v28 = vmul.f32 2.0, %v2294_v50 }
 0x248   :  { %v2358_v23 = vmul.f32 %v5846_v57, %v7798_v11  ;;  %v2360_v58 = vmul.f32 %v5856_v37, %v7800_v51  ;;  %v2354_v20 = vmul.f32 %v5842_v55, %v7802_v63  ;;  %7805 = vst [vmem:[#allocation80_spill] sm:$0xff] %v5895_v26  ;;  %v7806_v11 = vld [vmem:[#allocation47_spill] sm:$0xff]  ;;  %v2357_v51 = vmul.f32 %v5852_v34, %v7807_v61  ;;  %v7809_v60 = vld [vmem:[#allocation46_spill] sm:$0xff]  ;;  %v5905_v19 = vpop.eup %2811  ;;  %v7818_v29 = vld [vmem:[#allocation25_spill] sm:$0xff] }
 0x249   :  { %v2356_v27 = vmul.f32 %v5850_v62, %v7806_v11  ;;  %v2363_v63 = vmul.f32 %v5869_v2, %v7809_v60  ;;  %7810 = vst [vmem:[#allocation78_spill] sm:$0xff] %v5905_v19  ;;  %v7811_v1 = vld [vmem:[#allocation62_spill] sm:$0xff]  ;;  %v7812_v16 = vld [vmem:[#allocation79_spill] sm:$0xff]  ;;  %v2367_v18 = vadd.f32 %v2359_v4, %v2351_v42  ;;  %v2297_v11 = vand.u32 2147483647, %v5848_v24  ;;  %v7821_v50 = vld [vmem:[#allocation57_spill] sm:$0xff] }
 0x24a   :  { %v2364_v8 = vmul.f32 %v5875_v44, %v7811_v1  ;;  %v2365_v26 = vmul.f32 %v5877_v32, %v7812_v16  ;;  %v2366_v31 = vadd.f32 %v2358_v23, %v2350_v30  ;;  %v2368_v61 = vadd.f32 %v2360_v58, %v2352_v38  ;;  %v5912_v36 = vpop.eup %2813  ;;  %v7816_v24 = vld [vmem:[#allocation51_spill] sm:$0xff] }
 0x24b   :  { %v2369_v33 = vadd.f32 %v2361_v49, %v2353_v22  ;;  %7813 = vst [vmem:[#allocation64_spill] sm:$0xff] %v5912_v36  ;;  %v2299_v60 = vand.u32 2147483647, %v2695_v47  ;;  %v5914_v19 = vpop.eup %2815  ;;  %v2303_v40 = vmul.f32 2.0, %v2295_v54  ;;  %2821 = vtanh.f32 %v2300_v45  ;;  %v7817_v58 = vld [vmem:[#allocation71_spill] sm:$0xff] }
 0x24c   :  { %7814 = vst [vmem:[#allocation81_spill] sm:$0xff] %v5914_v19  ;;  %v2370_v1 = vadd.f32 %v2362_v21, %v2354_v20  ;;  %v2371_v56 = vadd.f32 %v2363_v63, %v2355_v25  ;;  %v5916_v16 = vpop.eup %2817  ;;  %v2372_v4 = vadd.f32 %v2364_v8, %v2356_v27  ;;  %v2373_v42 = vadd.f32 %v2365_v26, %v2357_v51  ;;  %v7822_v25 = vld [vmem:[#allocation72_spill] sm:$0xff]  ;;  %v7827_v22 = vld [vmem:[#allocation75_spill] sm:$0xff] }
 0x24d   :  { %7815 = vst [vmem:[#allocation67_spill] sm:$0xff] %v5916_v16  ;;  %v5919_v10 = vadd.f32 %v2366_v31, %v7816_v24  ;;  %v5922_v30 = vadd.f32 %v2367_v18, %v7817_v58  ;;  %v7819_v47 = vsub.f32 1.0, %v7777_v35  ;;  %2823 = vtanh.f32 %v2301_v14  ;;  %v7825_v35 = vld [vmem:[#allocation58_spill] sm:$0xff]  ;;  %v7826_v14 = vld [vmem:[#allocation73_spill] sm:$0xff]  ;;  %v7829_v51 = vld [vmem:[#allocation36_spill] sm:$0xff] }
 0x24e   :  { %v5930_v45 = vadd.f32 %v2368_v61, %v7821_v50  ;;  %v5933_v20 = vadd.f32 %v2369_v33, %v7822_v25  ;;  %v5935_v8 = vmul.f32 2.0, %v2296_v39  ;;  %v5937_v26 = vmul.f32 2.0, %v2297_v11  ;;  %v7828_v33 = vld [vmem:[#allocation76_spill] sm:$0xff]  ;;  %v7831_v11 = vld [vmem:[#allocation13_spill] sm:$0xff] }
 0x24f   :  { %v5927_v13 = vadd.f32 %v7819_v47, %v7818_v29  ;;  %v5939_v31 = vmul.f32 2.0, %v2298_v5  ;;  %2825 = vtanh.f32 %v2302_v28  ;;  %v5941_v18 = vmul.f32 2.0, %v2299_v60  ;;  %v7830_v63 = vld [vmem:[#allocation48_spill] sm:$0xff]  ;;  %v7832_v5 = vld [vmem:[#allocation38_spill] sm:$0xff] }
 0x250   :  { %2827 = vtanh.f32 %v2303_v40  ;;  %v5944_v54 = vadd.f32 %v2370_v1, %v7825_v35  ;;  %v5947_v38 = vadd.f32 %v2371_v56, %v7826_v14  ;;  %v5950_v23 = vadd.f32 %v2372_v4, %v7827_v22  ;;  %v7833_v1 = vld [vmem:[#allocation11_spill] sm:$0xff]  ;;  %v7837_v47 = vld [vmem:[#allocation114_spill] sm:$0xff]  ;;  %v7841_v22 = vld [vmem:[#allocation53_spill] sm:$0xff] }
 0x251   :  { %7820 = vst [vmem:[#allocation87_spill] sm:$0xff] %v5927_v13  ;;  %7823 = vst [vmem:[#allocation130_spill] sm:$0xff] %v5939_v31  ;;  %v5953_v39 = vadd.f32 %v2373_v42, %v7828_v33  ;;  %v2382_v49 = vand.u32 2147483647, %v5919_v10  ;;  %v2383_v27 = vand.u32 2147483647, %v5922_v30  ;;  %v2390_v21 = vmul.f32 %v5823_v52, %v7829_v51 }
 0x252   :  { %7824 = vst [vmem:[#allocation63_spill] sm:$0xff] %v5941_v18  ;;  %v2384_v28 = vand.u32 2147483647, %v5930_v45  ;;  %v2385_v40 = vand.u32 2147483647, %v5933_v20  ;;  %v2391_v56 = vmul.f32 %v5830_v12, %v7830_v63  ;;  %v2392_v61 = vmul.f32 %v5832_v9, %v7831_v11  ;;  %v7834_v42 = vld [vmem:[#allocation30_spill] sm:$0xff]  ;;  %v5979_v20 = vpop.eup %2819 }
 0x253   :  { %v2393_v60 = vmul.f32 %v5834_v7, %v7832_v5  ;;  %v2398_v4 = vmul.f32 %v5846_v57, %v7833_v1  ;;  %v2399_v24 = vmul.f32 %v5854_v3, %v7834_v42  ;;  %v7835_v10 = vld [vmem:[#allocation39_spill] sm:$0xff]  ;;  %v7836_v30 = vld [vmem:[#allocation49_spill] sm:$0xff]  ;;  %v2400_v50 = vmul.f32 %v5856_v37, %v7837_v47  ;;  %7839 = vst [vmem:[#allocation131_spill] sm:$0xff] %v5979_v20  ;;  %v7840_v35 = vld [vmem:[#allocation50_spill] sm:$0xff] }
 0x254   :  { %v2394_v58 = vmul.f32 %v5842_v55, %v7835_v10  ;;  %v2395_v29 = vmul.f32 %v5844_v17, %v7836_v30  ;;  %v7838_v45 = vld [vmem:[#allocation115_spill] sm:$0xff]  ;;  %v2396_v14 = vmul.f32 %v5850_v62, %v7840_v35  ;;  %v2397_v33 = vmul.f32 %v5852_v34, %v7841_v22  ;;  %v7842_v51 = vld [vmem:[#allocation116_spill] sm:$0xff]  ;;  %v7843_v11 = vld [vmem:[#allocation117_spill] sm:$0xff] }
 0x255   :  { %v2401_v25 = vmul.f32 %v5858_v48, %v7838_v45  ;;  %v2402_v63 = vmul.f32 %v5867_v41, %v7842_v51  ;;  %v2403_v5 = vmul.f32 %v5869_v2, %v7843_v11  ;;  %v5989_v1 = vpop.eup %2821  ;;  %v2386_v42 = vand.u32 2147483647, %v5944_v54  ;;  %v7845_v30 = vld [vmem:[#allocation118_spill] sm:$0xff]  ;;  %v7846_v45 = vld [vmem:[#allocation119_spill] sm:$0xff] }
 0x256   :  { %7844 = vst [vmem:[#allocation103_spill] sm:$0xff] %v5989_v1  ;;  %v2387_v10 = vand.u32 2147483647, %v5947_v38  ;;  %v2404_v47 = vmul.f32 %v5875_v44, %v7845_v30  ;;  %v2405_v35 = vmul.f32 %v5877_v32, %v7846_v45  ;;  %v2388_v22 = vand.u32 2147483647, %v5950_v23 }
 0x257   :  { %v2406_v20 = vadd.f32 %v2398_v4, %v2390_v21  ;;  %v2407_v16 = vadd.f32 %v2399_v24, %v2391_v56  ;;  %v2408_v51 = vadd.f32 %v2400_v50, %v2392_v61  ;;  %v5998_v13 = vpop.eup %2823  ;;  %v2389_v11 = vand.u32 2147483647, %v5953_v39  ;;  %v7848_v56 = vld [vmem:[#allocation61_spill] sm:$0xff]  ;;  %v7850_v4 = vld [vmem:[#allocation66_spill] sm:$0xff] }
 0x258   :  { %v2409_v19 = vadd.f32 %v2401_v25, %v2393_v60  ;;  %v2410_v1 = vadd.f32 %v2402_v63, %v2394_v58  ;;  %v2411_v54 = vadd.f32 %v2403_v5, %v2395_v29  ;;  %v2412_v38 = vadd.f32 %v2404_v47, %v2396_v14  ;;  %v7849_v39 = vld [vmem:[#allocation65_spill] sm:$0xff]  ;;  %v7851_v58 = vld [vmem:[#allocation28_spill] sm:$0xff] }
 0x259   :  { %v6001_v36 = vpop.eup %2825  ;;  %v2413_v18 = vadd.f32 %v2405_v35, %v2397_v33  ;;  %v2414_v30 = vadd.f32 %v2406_v20, %v7712_v43  ;;  %v2415_v45 = vadd.f32 %v2407_v16, %v7713_v46  ;;  %v2416_v23 = vadd.f32 %v2408_v51, %v7714_v59  ;;  %v7852_v46 = vld [vmem:[#allocation60_spill] sm:$0xff] }
 0x25a   :  { %v6005_v31 = vpop.eup %2827  ;;  %v2417_v21 = vadd.f32 %v2409_v19, %v7715_v6  ;;  %v2418_v61 = vadd.f32 %v2410_v1, %v7848_v56  ;;  %v2419_v60 = vadd.f32 %v2411_v54, %v7849_v39  ;;  %v2420_v24 = vadd.f32 %v2412_v38, %v7850_v4  ;;  %v7856_v56 = vld [vmem:[#allocation107_spill] sm:$0xff]  ;;  %v7861_v39 = vld [vmem:[#allocation32_spill] sm:$0xff]  ;;  %v7862_v4 = vld [vmem:[#allocation33_spill] sm:$0xff] }
 0x25b   :  { %7847 = vst [vmem:[#allocation127_spill] sm:$0xff] %v6005_v31  ;;  %v2421_v29 = vadd.f32 %v2413_v18, %v7851_v58  ;;  %v2422_v50 = vand.u32 2147483647, %v2414_v30  ;;  %v2423_v25 = vand.u32 2147483647, %v2415_v45  ;;  %v2438_v16 = vmul.f32 %v5823_v52, %v7852_v46  ;;  %v7853_v18 = vld [vmem:[#allocation70_spill] sm:$0xff] }
 0x25c   :  { %v2424_v14 = vand.u32 2147483647, %v2416_v23  ;;  %v2425_v43 = vand.u32 2147483647, %v2417_v21  ;;  %v2426_v20 = vand.u32 2147483647, %v2418_v61  ;;  %v2439_v38 = vmul.f32 %v5830_v12, %v7853_v18 }
 0x25d   :  { %v2427_v33 = vand.u32 2147483647, %v2419_v60  ;;  %v2428_v59 = vand.u32 2147483647, %v2420_v24  ;;  %v2429_v63 = vand.u32 2147483647, %v2421_v29  ;;  %v2430_v6 = vadd.f32 %v2422_v50, %v2382_v49 }
 0x25e   :  { %v2431_v19 = vadd.f32 %v2423_v25, %v2383_v27  ;;  %v2432_v5 = vadd.f32 %v2424_v14, %v2384_v28  ;;  %v2433_v1 = vadd.f32 %v2425_v43, %v2385_v40  ;;  %v2434_v47 = vadd.f32 %v2426_v20, %v2386_v42  ;;  %v7854_v30 = vld [vmem:[#allocation105_spill] sm:$0xff]  ;;  %v7855_v23 = vld [vmem:[#allocation106_spill] sm:$0xff]  ;;  %v7858_v28 = vld [vmem:[#allocation111_spill] sm:$0xff] }
 0x25f   :  { %v2435_v35 = vadd.f32 %v2427_v33, %v2387_v10  ;;  %v2436_v51 = vadd.f32 %v2428_v59, %v2388_v22  ;;  %v2437_v54 = vadd.f32 %v2429_v63, %v2389_v11  ;;  %v2440_v45 = vmul.f32 %v5832_v9, %v7854_v30  ;;  %v7857_v49 = vld [vmem:[#allocation110_spill] sm:$0xff]  ;;  %v7859_v42 = vld [vmem:[#allocation112_spill] sm:$0xff]  ;;  %v7860_v22 = vld [vmem:[#allocation31_spill] sm:$0xff] }
 0x260   :  { %v2441_v21 = vmul.f32 %v5834_v7, %v7855_v23  ;;  %v2442_v61 = vmul.f32 %v5842_v55, %v7856_v56  ;;  %v2443_v27 = vmul.f32 %v5844_v17, %v7857_v49  ;;  %v2444_v40 = vmul.f32 %v5850_v62, %v7858_v28  ;;  %v7863_v58 = vld [vmem:[#allocation35_spill] sm:$0xff]  ;;  %v7865_v14 = vld [vmem:[#allocation20_spill] sm:$0xff]  ;;  %v7866_v20 = vld [vmem:[#allocation21_spill] sm:$0xff] }
 0x261   :  { %v2445_v10 = vmul.f32 %v5852_v34, %v7859_v42  ;;  %v2446_v11 = vmul.f32 %v5846_v57, %v7860_v22  ;;  %v2447_v60 = vmul.f32 %v5854_v3, %v7861_v39  ;;  %v2448_v24 = vmul.f32 %v5856_v37, %v7862_v4  ;;  %v7864_v50 = vld [vmem:[#allocation19_spill] sm:$0xff]  ;;  %v7867_v33 = vld [vmem:[#allocation22_spill] sm:$0xff]  ;;  %v7870_v31 = vld [vmem:[#allocation84_spill] sm:$0xff] }
 0x262   :  { %v2449_v29 = vmul.f32 %v5858_v48, %v7863_v58  ;;  %v2450_v25 = vmul.f32 %v5867_v41, %v7864_v50  ;;  %v2451_v43 = vmul.f32 %v5869_v2, %v7865_v14  ;;  %v2452_v46 = vmul.f32 %v5875_v44, %v7866_v20  ;;  %v7868_v58 = vld [vmem:[#allocation82_spill] sm:$0xff]  ;;  %v7869_v14 = vld [vmem:[#allocation83_spill] sm:$0xff] }
 0x263   :  { %v2453_v59 = vmul.f32 %v5877_v32, %v7867_v33  ;;  %v2454_v63 = vadd.f32 %v2446_v11, %v2438_v16  ;;  %v2455_v18 = vadd.f32 %v2447_v60, %v2439_v38  ;;  %v2456_v30 = vadd.f32 %v2448_v24, %v2440_v45  ;;  %v7871_v16 = vld [vmem:[#allocation89_spill] sm:$0xff]  ;;  %v7872_v45 = vld [vmem:[#allocation90_spill] sm:$0xff] }
 0x264   :  { %v2457_v23 = vadd.f32 %v2449_v29, %v2441_v21  ;;  %v2458_v56 = vadd.f32 %v2450_v25, %v2442_v61  ;;  %v2459_v49 = vadd.f32 %v2451_v43, %v2443_v27  ;;  %v2460_v28 = vadd.f32 %v2452_v46, %v2444_v40 }
 0x265   :  { %v2461_v42 = vadd.f32 %v2453_v59, %v2445_v10  ;;  %v2462_v22 = vadd.f32 %v2454_v63, %v6905_v15  ;;  %v2463_v39 = vadd.f32 %v2455_v18, %v6906_v0  ;;  %v2464_v4 = vadd.f32 %v2456_v30, %v6919_v53  ;;  %v7873_v15 = vld [vmem:[#allocation52_spill] sm:$0xff]  ;;  %v7874_v30 = vld [vmem:[#allocation54_spill] sm:$0xff] }
 0x266   :  { %v2465_v50 = vadd.f32 %v2457_v23, %v7868_v58  ;;  %v2466_v20 = vadd.f32 %v2458_v56, %v7869_v14  ;;  %v2467_v33 = vadd.f32 %v2459_v49, %v7870_v31  ;;  %v2468_v38 = vadd.f32 %v2460_v28, %v7871_v16  ;;  %v7875_v56 = vld [vmem:[#allocation15_spill] sm:$0xff]  ;;  %v7885_v58 = vld [vmem:[#allocation122_spill] sm:$0xff]  ;;  %v7887_v14 = vld [vmem:[#allocation124_spill] sm:$0xff] }
 0x267   :  { %v2469_v21 = vadd.f32 %v2461_v42, %v7872_v45  ;;  %v2470_v61 = vand.u32 2147483647, %v2462_v22  ;;  %v2471_v27 = vand.u32 2147483647, %v2463_v39  ;;  %v2472_v40 = vand.u32 2147483647, %v2464_v4 }
 0x268   :  { %v2473_v10 = vand.u32 2147483647, %v2465_v50  ;;  %v2474_v11 = vand.u32 2147483647, %v2466_v20  ;;  %v2486_v0 = vmul.f32 %v5823_v52, %v7873_v15  ;;  %v2475_v60 = vand.u32 2147483647, %v2467_v33 }
 0x269   :  { %v2476_v53 = vand.u32 2147483647, %v2468_v38  ;;  %v2477_v24 = vand.u32 2147483647, %v2469_v21  ;;  %v2478_v29 = vadd.f32 %v2470_v61, %v2430_v6  ;;  %v2479_v25 = vadd.f32 %v2471_v27, %v2431_v19  ;;  %v7876_v28 = vld [vmem:[#allocation55_spill] sm:$0xff]  ;;  %v7877_v42 = vld [vmem:[#allocation16_spill] sm:$0xff] }
 0x26a   :  { %v2480_v43 = vadd.f32 %v2472_v40, %v2432_v5  ;;  %v2481_v46 = vadd.f32 %v2473_v10, %v2433_v1  ;;  %v2482_v31 = vadd.f32 %v2474_v11, %v2434_v47  ;;  %v2483_v59 = vadd.f32 %v2475_v60, %v2435_v35  ;;  %v7878_v6 = vld [vmem:[#allocation59_spill] sm:$0xff]  ;;  %v7879_v5 = vld [vmem:[#allocation69_spill] sm:$0xff]  ;;  %v7883_v39 = vld [vmem:[#allocation120_spill] sm:$0xff] }
 0x26b   :  { %v2484_v63 = vadd.f32 %v2476_v53, %v2436_v51  ;;  %v2485_v18 = vadd.f32 %v2477_v24, %v2437_v54  ;;  %v2487_v23 = vmul.f32 %v5830_v12, %v7874_v30  ;;  %v2488_v49 = vmul.f32 %v5832_v9, %v7875_v56  ;;  %v7880_v47 = vld [vmem:[#allocation113_spill] sm:$0xff]  ;;  %v7881_v51 = vld [vmem:[#allocation23_spill] sm:$0xff]  ;;  %v7882_v54 = vld [vmem:[#allocation24_spill] sm:$0xff] }
 0x26c   :  { %v2489_v52 = vmul.f32 %v5834_v7, %v7876_v28  ;;  %v2490_v22 = vmul.f32 %v5842_v55, %v7877_v42  ;;  %v2491_v19 = vmul.f32 %v5844_v17, %v7878_v6  ;;  %v2492_v1 = vmul.f32 %v5850_v62, %v7879_v5  ;;  %v7884_v4 = vld [vmem:[#allocation121_spill] sm:$0xff]  ;;  %v7886_v50 = vld [vmem:[#allocation123_spill] sm:$0xff]  ;;  %v7896_v30 = vld [vmem:[#allocation94_spill] sm:$0xff] }
 0x26d   :  { %v2493_v35 = vmul.f32 %v5852_v34, %v7880_v47  ;;  %v2494_v12 = vmul.f32 %v5846_v57, %v7881_v51  ;;  %v2495_v9 = vmul.f32 %v5854_v3, %v7882_v54  ;;  %v2496_v7 = vmul.f32 %v5856_v37, %v7883_v39  ;;  %v7888_v20 = vld [vmem:[#allocation125_spill] sm:$0xff]  ;;  %v7889_v61 = vld [vmem:[#allocation27_spill] sm:$0xff] }
 0x26e   :  { %v2497_v55 = vmul.f32 %v5858_v48, %v7884_v4  ;;  %v2498_v17 = vmul.f32 %v5867_v41, %v7885_v58  ;;  %v2499_v62 = vmul.f32 %v5869_v2, %v7886_v50  ;;  %v2500_v34 = vmul.f32 %v5875_v44, %v7887_v14  ;;  %v7890_v41 = vld [vmem:[#allocation26_spill] sm:$0xff]  ;;  %v7891_v10 = vld [vmem:[#allocation97_spill] sm:$0xff]  ;;  %v7892_v11 = vld [vmem:[#allocation91_spill] sm:$0xff] }
 0x26f   :  { %v2501_v57 = vmul.f32 %v5877_v32, %v7888_v20  ;;  %v2502_v33 = vadd.f32 %v2494_v12, %v2486_v0  ;;  %v2503_v3 = vadd.f32 %v2495_v9, %v2487_v23  ;;  %v2504_v16 = vadd.f32 %v2496_v7, %v2488_v49  ;;  %v7893_v44 = vld [vmem:[#allocation98_spill] sm:$0xff]  ;;  %v7894_v53 = vld [vmem:[#allocation99_spill] sm:$0xff]  ;;  %v7895_v0 = vld [vmem:[#allocation93_spill] sm:$0xff] }
 0x270   :  { %v2505_v38 = vadd.f32 %v2497_v55, %v2489_v52  ;;  %v2506_v37 = vadd.f32 %v2498_v17, %v2490_v22  ;;  %v2507_v45 = vadd.f32 %v2499_v62, %v2491_v19  ;;  %v2508_v21 = vadd.f32 %v2500_v34, %v2492_v1  ;;  %v7897_v39 = vld [vmem:[#allocation37_spill] sm:$0xff]  ;;  %v7899_v58 = vld [vmem:[#allocation56_spill] sm:$0xff] }
 0x271   :  { %v2509_v48 = vadd.f32 %v2501_v57, %v2493_v35  ;;  %v2510_v27 = vadd.f32 %v2502_v33, %v7889_v61  ;;  %v2511_v40 = vadd.f32 %v2503_v3, %v7890_v41  ;;  %v2512_v2 = vadd.f32 %v2504_v16, %v7891_v10  ;;  %v7898_v4 = vld [vmem:[#allocation45_spill] sm:$0xff]  ;;  %v7900_v17 = vld [vmem:[#allocation104_spill] sm:$0xff] }
 0x272   :  { %v2513_v15 = vadd.f32 %v2505_v38, %v7892_v11  ;;  %v2514_v60 = vadd.f32 %v2506_v37, %v7893_v44  ;;  %v2515_v32 = vadd.f32 %v2507_v45, %v7894_v53  ;;  %v2516_v24 = vadd.f32 %v2508_v21, %v7895_v0  ;;  %v7901_v62 = vld [vmem:[#allocation108_spill] sm:$0xff]  ;;  %v7902_v34 = vld [vmem:[#allocation109_spill] sm:$0xff]  ;;  %v7908_v53 = vld [vmem:[#allocation102_spill] sm:$0xff] }
 0x273   :  { %v2517_v23 = vadd.f32 %v2509_v48, %v7896_v30  ;;  %v2518_v56 = vand.u32 2147483647, %v2510_v27  ;;  %v2519_v49 = vand.u32 2147483647, %v2511_v40  ;;  %2829 = vtanh.f32 %v5935_v8  ;;  %v7905_v48 = vld [vmem:[#allocation133_spill] sm:$0xff]  ;;  %v7906_v27 = vld [vmem:[#allocation130_spill] sm:$0xff] }
 0x274   :  { %v2520_v28 = vand.u32 2147483647, %v2512_v2  ;;  %v2521_v52 = vand.u32 2147483647, %v2513_v15  ;;  %v2522_v42 = vand.u32 2147483647, %v2514_v60  ;;  %2831 = vtanh.f32 %v5937_v26 }
 0x275   :  { %v2523_v22 = vand.u32 2147483647, %v2515_v32  ;;  %v2524_v6 = vand.u32 2147483647, %v2516_v24  ;;  %v2525_v19 = vand.u32 2147483647, %v2517_v23  ;;  %v2526_v5 = vadd.f32 %v2518_v56, %v2478_v29 }
 0x276   :  { %v2527_v1 = vadd.f32 %v2519_v49, %v2479_v25  ;;  %v2528_v47 = vadd.f32 %v2520_v28, %v2480_v43  ;;  %v2529_v35 = vadd.f32 %v2521_v52, %v2481_v46  ;;  %v2530_v51 = vadd.f32 %v2522_v42, %v2482_v31  ;;  %v7903_v29 = vld [vmem:[#allocation14_spill] sm:$0xff]  ;;  %v7904_v43 = vld [vmem:[#allocation100_spill] sm:$0xff]  ;;  %v7910_v26 = vld [vmem:[#allocation63_spill] sm:$0xff] }
 0x277   :  { %v2531_v12 = vadd.f32 %v2523_v22, %v2483_v59  ;;  %v2532_v54 = vadd.f32 %v2524_v6, %v2484_v63  ;;  %v2533_v9 = vadd.f32 %v2525_v19, %v2485_v18  ;;  %v2534_v7 = vmul.f32 %v7897_v39, %v2526_v5  ;;  %v7907_v60 = vld [vmem:[#allocation132_spill] sm:$0xff]  ;;  %v7911_v23 = vld [vmem:[#allocation34_spill] sm:$0xff]  ;;  %v7913_v42 = vld [vmem:[#allocation95_spill] sm:$0xff] }
 0x278   :  { %v2535_v55 = vmul.f32 %v7898_v4, %v2527_v1  ;;  %v2536_v8 = vmul.f32 %v7899_v58, %v2528_v47  ;;  %v2537_v50 = vmul.f32 %v7900_v17, %v2529_v35  ;;  %v2538_v14 = vmul.f32 %v7901_v62, %v2530_v51  ;;  %v7912_v49 = vld [vmem:[#allocation134_spill] sm:$0xff]  ;;  %v7914_v22 = vld [vmem:[#allocation137_spill] sm:$0xff]  ;;  %v7916_v5 = vld [vmem:[#allocation140_spill] sm:$0xff] }
 0x279   :  { %v2539_v20 = vmul.f32 %v7902_v34, %v2531_v12  ;;  %v2540_v25 = vmul.f32 %v7903_v29, %v2532_v54  ;;  %v2541_v46 = vmul.f32 %v7904_v43, %v2533_v9  ;;  %v2696_v31 = vadd.f32 -1.0, %v2534_v7  ;;  %v7917_v35 = vld [vmem:[#allocation92_spill] sm:$0xff] }
 0x27a   :  { %v2697_v59 = vadd.f32 -1.0, %v2535_v55  ;;  %v2698_v63 = vadd.f32 -1.0, %v2536_v8  ;;  %v2699_v18 = vadd.f32 -1.0, %v2537_v50  ;;  %v2700_v57 = vadd.f32 -1.0, %v2538_v14  ;;  %v7918_v12 = vld [vmem:[#allocation128_spill] sm:$0xff]  ;;  %v7921_v8 = vld [vmem:[#allocation138_spill] sm:$0xff] }
 0x27b   :  { %v2701_v33 = vadd.f32 -1.0, %v2539_v20  ;;  %v2702_v3 = vadd.f32 -1.0, %v2540_v25  ;;  %v2703_v16 = vadd.f32 -1.0, %v2541_v46  ;;  %v2550_v38 = vand.u32 2147483647, %v2696_v31  ;;  %v7919_v39 = vld [vmem:[#allocation136_spill] sm:$0xff] }
 0x27c   :  { %v2551_v37 = vand.u32 2147483647, %v2697_v59  ;;  %v2552_v45 = vand.u32 2147483647, %v2698_v63  ;;  %v2553_v21 = vand.u32 2147483647, %v2699_v18  ;;  %2833 = vtanh.f32 %v7906_v27 }
 0x27d   :  { %v1804_v61 = vsub.f32 1.0, %v7905_v48  ;;  %v2554_v41 = vand.u32 2147483647, %v2700_v57  ;;  %v2555_v40 = vand.u32 2147483647, %v2701_v33  ;;  %v6105_v10 = vpop.eup %2829  ;;  %v2558_v11 = vmul.f32 2.0, %v2550_v38 }
 0x27e   :  { %v2556_v2 = vand.u32 2147483647, %v2702_v3  ;;  %v2559_v15 = vmul.f32 2.0, %v2551_v37  ;;  %v2560_v44 = vmul.f32 2.0, %v2552_v45  ;;  %v7909_v32 = vsub.f32 1.0, %v7908_v53  ;;  %v7920_v4 = vld [vmem:[#allocation80_spill] sm:$0xff]  ;;  %v2832_v59 = vpop.eup %2831 }
 0x27f   :  { %2835 = vtanh.f32 %v7910_v26  ;;  %v2557_v24 = vand.u32 2147483647, %v2703_v16  ;;  %v2561_v30 = vmul.f32 2.0, %v2553_v21  ;;  %v1805_v56 = vsub.f32 1.0, %v7911_v23  ;;  %v7922_v50 = vld [vmem:[#allocation139_spill] sm:$0xff]  ;;  %v7923_v14 = vld [vmem:[#allocation78_spill] sm:$0xff] }
 0x280   :  { %v1810_v0 = vadd.f32 %v7909_v32, %v7907_v60  ;;  %v1806_v28 = vsub.f32 1.0, %v7912_v49  ;;  %v2562_v52 = vmul.f32 2.0, %v2554_v41  ;;  %2837 = vtanh.f32 %v2558_v11  ;;  %v7924_v20 = vld [vmem:[#allocation64_spill] sm:$0xff]  ;;  %v7926_v46 = vld [vmem:[#allocation103_spill] sm:$0xff]  ;;  %v7927_v63 = vld [vmem:[#allocation81_spill] sm:$0xff] }
 0x281   :  { %v7915_v6 = vsub.f32 1.0, %v7914_v22  ;;  %v2058_v1 = vsub.f32 1.0, %v7916_v5  ;;  %v2563_v47 = vmul.f32 2.0, %v2555_v40  ;;  %2839 = vtanh.f32 %v2559_v15  ;;  %v7925_v25 = vld [vmem:[#allocation96_spill] sm:$0xff]  ;;  %v7928_v57 = vld [vmem:[#allocation87_spill] sm:$0xff]  ;;  %v7930_v48 = vld [vmem:[#allocation74_spill] sm:$0xff] }
 0x282   :  { %v1812_v51 = vadd.f32 %v1804_v61, %v7917_v35  ;;  %v2059_v54 = vsub.f32 1.0, %v7918_v12  ;;  %v2564_v9 = vmul.f32 2.0, %v2556_v2  ;;  %2841 = vtanh.f32 %v2560_v44  ;;  %v7929_v38 = vld [vmem:[#allocation67_spill] sm:$0xff] }
 0x283   :  { %v1811_v19 = vadd.f32 %v7915_v6, %v7913_v42  ;;  %v1807_v7 = vsub.f32 1.0, %v7919_v39  ;;  %v2060_v55 = vsub.f32 1.0, %v7920_v4  ;;  %v2565_v58 = vmul.f32 2.0, %v2557_v24  ;;  %v7931_v27 = vld [vmem:[#allocation131_spill] sm:$0xff] }
 0x284   :  { %2843 = vtanh.f32 %v2561_v30  ;;  %v1813_v17 = vadd.f32 %v1805_v56, %v7921_v8  ;;  %v1814_v62 = vadd.f32 %v1806_v28, %v7922_v50  ;;  %v2061_v34 = vsub.f32 1.0, %v7923_v14  ;;  %v7932_v2 = vld [vmem:[#allocation127_spill] sm:$0xff] }
 0x285   :  { %2845 = vtanh.f32 %v2562_v52  ;;  %v2062_v29 = vsub.f32 1.0, %v7924_v20  ;;  %v2066_v43 = vadd.f32 %v2058_v1, %v7925_v25  ;;  %v2316_v31 = vsub.f32 1.0, %v7926_v46 }
 0x286   :  { %2847 = vtanh.f32 %v2563_v47  ;;  %v2063_v18 = vsub.f32 1.0, %v7927_v63  ;;  %v2067_v33 = vadd.f32 %v2059_v54, %v7928_v57  ;;  %v2317_v3 = vsub.f32 1.0, %v5998_v13  ;;  %v2834_v16 = vpop.eup %2833 }
 0x287   :  { %2849 = vtanh.f32 %v2564_v9  ;;  %v2064_v37 = vsub.f32 1.0, %v7929_v38  ;;  %v2068_v45 = vadd.f32 %v2060_v55, %v1810_v0  ;;  %v2318_v21 = vsub.f32 1.0, %v6001_v36 }
 0x288   :  { %2851 = vtanh.f32 %v2565_v58  ;;  %v1815_v61 = vadd.f32 %v1807_v7, %v7930_v48  ;;  %v2065_v41 = vsub.f32 1.0, %v7931_v27  ;;  %v2069_v40 = vadd.f32 %v2061_v34, %v1811_v19 }
 0x289   :  { %v2319_v11 = vsub.f32 1.0, %v7932_v2  ;;  %v2836_v15 = vpop.eup %2835  ;;  %v2070_v44 = vadd.f32 %v2062_v29, %v1812_v51  ;;  %v2320_v60 = vsub.f32 1.0, %v6105_v10  ;;  %v2324_v13 = vadd.f32 %v2316_v31, %v2066_v43 }
 0x28a   :  { %v2838_v53 = vpop.eup %2837  ;;  %v2071_v32 = vadd.f32 %v2063_v18, %v1813_v17  ;;  %v2321_v26 = vsub.f32 1.0, %v2832_v59  ;;  %v2325_v24 = vadd.f32 %v2317_v3, %v2067_v33  ;;  %v2072_v30 = vadd.f32 %v2064_v37, %v1814_v62 }
 0x28b   :  { %v2840_v0 = vpop.eup %2839  ;;  %v2322_v36 = vsub.f32 1.0, %v2834_v16  ;;  %v2326_v23 = vadd.f32 %v2318_v21, %v2068_v45  ;;  %v2574_v56 = vsub.f32 1.0, %v2838_v53  ;;  %v2073_v28 = vadd.f32 %v2065_v41, %v1815_v61 }
 0x28c   :  { %v2842_v49 = vpop.eup %2841  ;;  %v2323_v52 = vsub.f32 1.0, %v2836_v15  ;;  %v2327_v42 = vadd.f32 %v2319_v11, %v2069_v40  ;;  %v2575_v22 = vsub.f32 1.0, %v2840_v0  ;;  %v2328_v19 = vadd.f32 %v2320_v60, %v2070_v44 }
 0x28d   :  { %v2576_v5 = vsub.f32 1.0, %v2842_v49  ;;  %v2582_v1 = vadd.f32 %v2574_v56, %v2324_v13  ;;  %v2329_v47 = vadd.f32 %v2321_v26, %v2071_v32  ;;  %v2330_v54 = vadd.f32 %v2322_v36, %v2072_v30 }
 0x28e   :  { %v2844_v6 = vpop.eup %2843  ;;  %v2583_v51 = vadd.f32 %v2575_v22, %v2325_v24  ;;  %v2331_v55 = vadd.f32 %v2323_v52, %v2073_v28 }
 0x28f   :  { %v2846_v10 = vpop.eup %2845  ;;  %v2577_v35 = vsub.f32 1.0, %v2844_v6  ;;  %v2584_v39 = vadd.f32 %v2576_v5, %v2326_v23  ;;  %v2590_v7 = vmul.f32 0.125, %v2582_v1 }
 0x290   :  { %v2848_v12 = vpop.eup %2847  ;;  %v2578_v9 = vsub.f32 1.0, %v2846_v10  ;;  %v2591_v17 = vmul.f32 0.125, %v2583_v51 }
 0x291   :  { %v2850_v4 = vpop.eup %2849  ;;  %v2579_v58 = vsub.f32 1.0, %v2848_v12  ;;  %v2585_v8 = vadd.f32 %v2577_v35, %v2327_v42  ;;  %v2592_v34 = vmul.f32 0.125, %v2584_v39  ;;  %v2598_v20 = vand.u32 2147483647, %v2590_v7 }
 0x292   :  { %v2852_v50 = vpop.eup %2851  ;;  %v2580_v62 = vsub.f32 1.0, %v2850_v4  ;;  %v2586_v14 = vadd.f32 %v2578_v9, %v2328_v19  ;;  %v2599_v46 = vand.u32 2147483647, %v2591_v17 }
 0x293   :  { %v2581_v29 = vsub.f32 1.0, %v2852_v50  ;;  %v2587_v25 = vadd.f32 %v2579_v58, %v2329_v47  ;;  %v2593_v43 = vmul.f32 0.125, %v2585_v8  ;;  %v2600_v63 = vand.u32 2147483647, %v2592_v34 }
 0x294   :  { %v2588_v31 = vadd.f32 %v2580_v62, %v2330_v54  ;;  %v2594_v59 = vmul.f32 0.125, %v2586_v14  ;;  %v2606_v18 = vsub.f32 1.0, %v2598_v20  ;;  %v2607_v16 = vsub.f32 1.0, %v2599_v46 }
 0x295   :  { %v2589_v57 = vadd.f32 %v2581_v29, %v2331_v55  ;;  %v2595_v33 = vmul.f32 0.125, %v2587_v25  ;;  %v2601_v3 = vand.u32 2147483647, %v2593_v43  ;;  %v2608_v45 = vsub.f32 1.0, %v2600_v63 }
 0x296   :  { %v2596_v38 = vmul.f32 0.125, %v2588_v31  ;;  %v2602_v37 = vand.u32 2147483647, %v2594_v59  ;;  %2614 = vst [vmem:[#allocation7] sm:$0xff] %v2606_v18  ;;  %2615 = vst [vmem:[#allocation7 + $0x8] sm:$0xff] %v2607_v16 }
 0x297   :  { %v2597_v21 = vmul.f32 0.125, %v2589_v57  ;;  %v2603_v48 = vand.u32 2147483647, %v2595_v33  ;;  %v2609_v61 = vsub.f32 1.0, %v2601_v3  ;;  %2616 = vst [vmem:[#allocation7 + $0x10] sm:$0xff] %v2608_v45 }
 0x298   :  { %v2604_v27 = vand.u32 2147483647, %v2596_v38  ;;  %v2610_v41 = vsub.f32 1.0, %v2602_v37 }
 0x299   :  { %v2605_v40 = vand.u32 2147483647, %v2597_v21  ;;  %v2611_v2 = vsub.f32 1.0, %v2603_v48  ;;  %2617 = vst [vmem:[#allocation7 + $0x18] sm:$0xff] %v2609_v61 }
 0x29a   :  { %v2612_v11 = vsub.f32 1.0, %v2604_v27  ;;  %2618 = vst [vmem:[#allocation7 + $0x20] sm:$0xff] %v2610_v41 }
 0x29b   :  { %v2613_v15 = vsub.f32 1.0, %v2605_v40  ;;  %2619 = vst [vmem:[#allocation7 + $0x28] sm:$0xff] %v2611_v2 }
 0x29c   :  { %2620 = vst [vmem:[#allocation7 + $0x30] sm:$0xff] %v2612_v11 }
 0x29d   :  { %2621 = vst [vmem:[#allocation7 + $0x38] sm:$0xff] %v2613_v15 }
 0x29e   :  { %2908 = shalt.err (!%p2905_p6)
}
 0x29f   :  { %s2909_s10 = scalar_lea.hbm %s6153_s2, 1024 }
 0x2a0   :  { %p2910_p7 = scmp.ne.s32.totalorder %s6153_s2, %s2909_s10  ;;  %p2913_p8 = scmp.lt.u32.totalorder %s2909_s10, %s6153_s2 }
 0x2a2   :  { %p2915_p9 = pnand %p2913_p8, %p2910_p7 }
 0x2a4   :  { %2918 = shalt.err (!%p2915_p9)
}
 0x2a5   :  { %2633 = dma.vmem_to_hbm [thread:$0]  %s2628_s6, 1024, %s6153_s2, [#allocation4], %s2926_s19, %s2926_s19, %s2927_s20  }
 0x2a6   :  { %2923 = dma.done.wait [#allocation4], 1024  }
 0x2a7   :  { %2924 = vsyncadd [#allocation4], 4294966272 }
 0x2a8   :  { %2637 = vsyncpa [#allocation3], 1 }
 0x2a9   :  { %2638 = vsyncpa [#allocation6], 1 }
 0x2aa   :  { %2639 = vsyncpa [#allocation4], 1 }

</bundles_post_ra>
